<compile_context>
chip_gen: v6e
topology: v6e:2x2x1
jax: 0.10.0
libtpu: 0.0.40
codegen_flags: <defaults>
</compile_context>

<pallas_src>
import functools
import math

import jax
import jax.numpy as jnp
from jax import lax
from jax.experimental import pallas as pl
from jax.experimental.pallas import tpu as pltpu

_MB = 1024 * 1024


def _round_up(x, m):
    return (x + m - 1) // m * m


# ----------------------------------------------------------------------------
# Generation-aware VMEM / tile planning
# ----------------------------------------------------------------------------
def _vmem_plan():
    cap = None
    try:
        cap = getattr(pltpu.get_tpu_info(), "vmem_capacity_bytes", None)
    except Exception:
        cap = None
    if cap is not None and cap >= 100 * _MB:
        # v5e / v6e: 128 MiB VMEM -> bigger tiles, raised scoped budget.
        return {"vmem_limit": 64 * _MB, "tm_cap": 512, "tk_cap": 4096}
    if cap is not None:
        # v7x: 64 MiB VMEM -> capped tiles, 48 MiB scoped budget.
        return {"vmem_limit": 48 * _MB, "tm_cap": 256, "tk_cap": 1024}
    # Unknown backend (e.g. interpret mode): conservative settings, safe everywhere.
    return {"vmem_limit": 32 * _MB, "tm_cap": 256, "tk_cap": 1024}


_PLAN = _vmem_plan()


def _tile_bytes(tm, tk, tn):
    # double-buffered bf16 LHS/RHS/out + f32 accumulator + bias
    return (2 * (tm * tk * 2) + 2 * (tk * tn * 2) + 2 * (tm * tn * 2)
            + tm * tn * 4 + 2 * tn * 4)


def _choose_tiles(M, Kp, Np):
    """Pick (TM, TK, TN). Kp, Np are multiples of 128; TM is a multiple of 16."""
    budget = int(_PLAN["vmem_limit"] * 0.75)
    tm = min(_PLAN["tm_cap"], _round_up(M, 16))
    tn = 256 if Np % 256 == 0 else 128
    tk_cands = [d for d in range(min(_PLAN["tk_cap"], Kp), 0, -128) if Kp % d == 0]
    if not tk_cands:
        tk_cands = [128]
    ci = 0
    tk = tk_cands[ci]
    while _tile_bytes(tm, tk, tn) > budget:
        if ci + 1 < len(tk_cands):
            ci += 1
            tk = tk_cands[ci]
        elif tm > 16:
            tm = max(16, (tm // 2) // 16 * 16)
        elif tn > 128:
            tn = 128
        else:
            break

    # Megacore (v7x has 2 TensorCores): make sure at least one "parallel" axis has >=2
    # blocks whenever the problem size allows it.
    mp = _round_up(M, tm)
    if (mp // tm) * (Np // tn) < 2:
        if Np // tn == 1 and Np >= 256:
            tn = 128
        elif M > 16:
            tm = max(16, _round_up((M + 1) // 2, 16))
    return tm, tk, tn


# ----------------------------------------------------------------------------
# Pallas kernel: tiled matmul + bias + ReLU (the conv hot path after im2col)
# ----------------------------------------------------------------------------
def _matmul_bias_relu_kernel(x_ref, w_ref, b_ref, o_ref, acc_ref):
    # x_ref: (TM, TK) bf16, w_ref: (TK, TN) bf16, b_ref: (1, TN) f32,
    # o_ref: (TM, TN) bf16, acc_ref: (TM, TN) f32 scratch accumulator.
    @pl.when(pl.program_id(2) == 0)
    def _():
        acc_ref[...] = jnp.zeros_like(acc_ref)

    acc_ref[...] += jnp.dot(x_ref[...], w_ref[...],
                            preferred_element_type=jnp.float32)

    @pl.when(pl.program_id(2) == pl.num_programs(2) - 1)
    def _():
        o_ref[...] = jnp.maximum(acc_ref[...] + b_ref[...], 0.0).astype(o_ref.dtype)


def _matmul_bias_relu(patches, wmat, bias, *, tm, tk, tn, out_dtype=jnp.bfloat16):
    """patches: (Mp, Kp) bf16; wmat: (Kp, Coutp) bf16; bias: (1, Coutp) f32."""
    Mp, Kp = patches.shape
    Kp2, Np = wmat.shape
    assert Kp == Kp2 and Mp % tm == 0 and Kp % tk == 0 and Np % tn == 0
    grid = (Mp // tm, Np // tn, Kp // tk)

    cost = pl.CostEstimate(
        flops=2 * Mp * Kp * Np,
        transcendentals=0,
        bytes_accessed=Mp * Kp * 2 + Kp * Np * 2 + Mp * Np * 2 + Np * 4,
    )

    return pl.pallas_call(
        _matmul_bias_relu_kernel,
        out_shape=jax.ShapeDtypeStruct((Mp, Np), out_dtype),
        grid_spec=pltpu.PrefetchScalarGridSpec(
            num_scalar_prefetch=0,
            grid=grid,
            in_specs=[
                pl.BlockSpec((tm, tk), lambda i, j, k: (i, k)),
                pl.BlockSpec((tk, tn), lambda i, j, k: (k, j)),
                pl.BlockSpec((1, tn), lambda i, j, k: (0, j)),
            ],
            out_specs=pl.BlockSpec((tm, tn), lambda i, j, k: (i, j)),
            scratch_shapes=[pltpu.VMEM((tm, tn), jnp.float32)],
        ),
        compiler_params=pltpu.CompilerParams(
            dimension_semantics=("parallel", "parallel", "arbitrary"),
            vmem_limit_bytes=_PLAN["vmem_limit"],
        ),
        cost_estimate=cost,
    )(patches, wmat, bias)


# ----------------------------------------------------------------------------
# Conv2d + ReLU layer (im2col glue in XLA, tiled matmul+bias+ReLU in Pallas)
# ----------------------------------------------------------------------------
def conv2d_relu(x_nhwc, wmat, bias, *, cin, cout, k, stride, padding):
    """x_nhwc: (N, H, W, Cpad) bf16 activation (Cpad >= cin; padded lanes are zero).

    wmat: (Kp, Coutp) bf16 with Kp = round_up(k*k*cin, 128); bias: (1, Coutp) f32.
    Returns a channel-padded (N, Ho, Wo, Coutp) bf16 activation (lane-dense writeback).
    """
    del cout  # shape comes from the padded weight; real cout is sliced at the taps
    N, H, W, _ = x_nhwc.shape
    Ho = (H + 2 * padding - k) // stride + 1
    Wo = (W + 2 * padding - k) // stride + 1
    K = k * k * cin
    Kp, Coutp = wmat.shape

    xp = jnp.pad(x_nhwc, ((0, 0), (padding, padding), (padding, padding), (0, 0)))

    # im2col: gather k*k shifted (strided) windows; (kh, kw, cin) ordering matches the
    # OIHW -> (KH, KW, Cin, Cout) weight reshape done at init.  Only the valid :cin
    # channels of the (possibly channel-padded) activation are read.
    # TODO(synk): fuse this gather into the Pallas kernel with manual DMA of shifted
    # windows so the k^2-inflated patches stream never round-trips HBM.
    cols = []
    for kh in range(k):
        for kw in range(k):
            cols.append(
                lax.slice(
                    xp,
                    (0, kh, kw, 0),
                    (N, kh + (Ho - 1) * stride + 1, kw + (Wo - 1) * stride + 1, cin),
                    (1, stride, stride, 1),
                )
            )
    patches = jnp.stack(cols, axis=3).reshape(N * Ho * Wo, K)

    M = N * Ho * Wo
    tm, tk, tn = _choose_tiles(M, Kp, Coutp)
    Mp = _round_up(M, tm)
    patches = jnp.pad(patches, ((0, Mp - M), (0, Kp - K))).astype(jnp.bfloat16)

    out = _matmul_bias_relu(patches, wmat, bias, tm=tm, tk=tk, tn=tn)
    # Keep the lane-dense channel padding (padded lanes are exactly zero after ReLU);
    # only drop the padded rows.
    return out[:M].reshape(N, Ho, Wo, Coutp)


# ----------------------------------------------------------------------------
# Static layer configuration + parameter construction (mimics nn.Conv2d init)
# ----------------------------------------------------------------------------
LAYER_CFG = (
    # (name, Cin, Cout, K, stride, padding, is_feature_tap)
    ("conv0_1", 3, 16, 3, 1, 1, False),
    ("conv0_2", 16, 16, 3, 1, 1, True),
    ("conv1_1", 16, 32, 3, 2, 1, False),
    ("conv1_2", 32, 32, 3, 1, 1, False),
    ("conv1_3", 32, 32, 3, 1, 1, True),
    ("conv2_1", 32, 64, 3, 2, 1, False),
    ("conv2_2", 64, 64, 3, 1, 1, False),
    ("conv2_3", 64, 64, 3, 1, 1, True),
    ("conv3_1", 64, 128, 3, 2, 1, False),
    ("conv3_2", 128, 128, 3, 1, 1, False),
    ("conv3_3", 128, 128, 3, 1, 1, True),
    ("conv4_1", 128, 256, 5, 2, 2, False),
    ("conv4_2", 256, 256, 3, 1, 1, False),
    ("conv4_3", 256, 256, 3, 1, 1, True),
    ("conv5_1", 256, 512, 5, 2, 2, False),
    ("conv5_2", 512, 512, 3, 1, 1, False),
    ("conv5_3", 512, 512, 3, 1, 1, False),
    ("conv5_4", 512, 512, 3, 1, 1, True),
)


def build_layer_cfg(input_size=3):
    cfg = []
    for i, (name, cin, cout, k, s, p, tap) in enumerate(LAYER_CFG):
        if i == 0:
            cin = input_size
        cfg.append((name, cin, cout, k, s, p, tap))
    return tuple(cfg)


def init_params(key, cfg):
    """Only arrays live in `params`; every hyper-parameter stays in the static cfg."""
    params = {}
    for i, (name, cin, cout, k, _s, _p, _tap) in enumerate(cfg):
        kw_key, kb_key = jax.random.split(jax.random.fold_in(key, i))
        fan_in = cin * k * k
        bound = 1.0 / math.sqrt(fan_in)
        w = jax.random.uniform(kw_key, (cout, cin, k, k), jnp.float32, -bound, bound)
        b = jax.random.uniform(kb_key, (cout,), jnp.float32, -bound, bound)

        # OIHW -> (KH, KW, Cin, Cout) -> (K, Cout); zero-pad K and Cout to lane-dense
        # multiples of 128; cast to bf16 ONCE at init (not per forward call).
        K = k * k * cin
        Kp = _round_up(K, 128)
        Coutp = _round_up(cout, 128)
        wmat = jnp.transpose(w, (2, 3, 1, 0)).reshape(K, cout)
        wmat = jnp.pad(wmat, ((0, Kp - K), (0, Coutp - cout))).astype(jnp.bfloat16)
        bias = jnp.pad(b, (0, Coutp - cout)).reshape(1, Coutp).astype(jnp.float32)
        params[name] = {"wmat": wmat, "bias": bias}
    return params


# ----------------------------------------------------------------------------
# Forward pass (mirrors PerceptualNetwork.forward)
# ----------------------------------------------------------------------------
def perceptual_forward(cfg, params, x_nchw):
    # NCHW -> NHWC; bf16 activations emulate torch.cuda.amp.autocast mixed precision.
    x = jnp.transpose(x_nchw, (0, 2, 3, 1)).astype(jnp.bfloat16)

    taps = []
    for name, cin, cout, k, s, p, is_tap in cfg:
        x = conv2d_relu(x, params[name]["wmat"], params[name]["bias"],
                        cin=cin, cout=cout, k=k, stride=s, padding=p)
        if is_tap:
            taps.append((x, cout))

    # Drop the channel padding only at the feature taps; back to PyTorch NCHW, f32.
    def to_nchw(t, c):
        return jnp.transpose(t[..., :c], (0, 3, 1, 2)).astype(jnp.float32)

    x0, x1, x2, x3, x4, x5 = [to_nchw(t, c) for t, c in taps]
    return {
        "geometry_feature": [x0, x1, x2],
        "semantic_feature": [x2, x3, x4, x5],
    }


if __name__ == "__main__":
    key = jax.random.PRNGKey(0)
    pkey, xkey = jax.random.split(key)

    cfg = build_layer_cfg(input_size=3)
    params = init_params(pkey, cfg)

    # Small NCHW input consistent with the module (batch=2, C=3, 16x16).
    x = jax.random.normal(xkey, (2, 3, 16, 16), jnp.float32)

    fwd = jax.jit(functools.partial(perceptual_forward, cfg))
    out = jax.block_until_ready(fwd(params, x))

    # Shape sanity (NCHW, matching PyTorch conv arithmetic).
    assert out["geometry_feature"][0].shape == (2, 16, 16, 16)
    assert out["geometry_feature"][1].shape == (2, 32, 8, 8)
    assert out["geometry_feature"][2].shape == (2, 64, 4, 4)
    assert out["semantic_feature"][1].shape == (2, 128, 2, 2)
    assert out["semantic_feature"][2].shape == (2, 256, 1, 1)
    assert out["semantic_feature"][3].shape == (2, 512, 1, 1)
    feats = out["geometry_feature"] + out["semantic_feature"]
    assert all(bool(jnp.all(jnp.isfinite(f))) for f in feats)

    print("KERNEL_OK")
</pallas_src>

<mosaic_0001>
module attributes {stable_mosaic.version = 11 : i64} {
  func.func @_matmul_bias_relu_kernel(%arg0: i32, %arg1: i32, %arg2: i32, %arg3: memref<256x128xbf16, #tpu.memory_space<vmem>>, %arg4: memref<128x128xbf16, #tpu.memory_space<vmem>>, %arg5: memref<1x128xf32, #tpu.memory_space<vmem>>, %arg6: memref<256x128xbf16, #tpu.memory_space<vmem>>, %arg7: memref<256x128xf32, #tpu.memory_space<vmem>>) attributes {dimension_semantics = [#tpu.dimension_semantics<parallel>, #tpu.dimension_semantics<parallel>, #tpu.dimension_semantics<arbitrary>], iteration_bounds = array<i64: 2, 1, 1>, scalar_prefetch = 0 : i64, scratch_operands = 1 : i64, tpu.core_type = #tpu.core_type<tc>, window_params = [{transform_indices = @transform_0, window_bounds = array<i64: 256, 128>}, {transform_indices = @transform_1, window_bounds = array<i64: 128, 128>}, {transform_indices = @transform_2, window_bounds = array<i64: 1, 128>}, {transform_indices = @transform_3, window_bounds = array<i64: 256, 128>}]} {
    %c0_i32 = arith.constant 0 : i32
    %0 = arith.cmpi eq, %arg2, %c0_i32 : i32
    %1 = arith.extui %0 : i1 to i32
    %c0_i32_0 = arith.constant 0 : i32
    %2 = arith.cmpi ne, %1, %c0_i32_0 : i32
    scf.if %2 {
      %cst_10 = arith.constant 0.000000e+00 : f32
      %12 = vector.broadcast %cst_10 : f32 to vector<256x128xf32>
      %c0_11 = arith.constant 0 : index
      %c0_12 = arith.constant 0 : index
      %13 = vector.load %arg7[%c0_11, %c0_12] : memref<256x128xf32, #tpu.memory_space<vmem>>, vector<256x128xf32>
      tpu.vector_store %arg7[%c0_11, %c0_12], %12 {strides = array<i32>} : memref<256x128xf32, #tpu.memory_space<vmem>>, vector<256x128xf32>,
    } else {
    }
    %c0 = arith.constant 0 : index
    %c0_1 = arith.constant 0 : index
    %3 = vector.load %arg7[%c0, %c0_1] : memref<256x128xf32, #tpu.memory_space<vmem>>, vector<256x128xf32>
    %c0_2 = arith.constant 0 : index
    %c0_3 = arith.constant 0 : index
    %4 = vector.load %arg3[%c0_2, %c0_3] : memref<256x128xbf16, #tpu.memory_space<vmem>>, vector<256x128xbf16>
    %c0_4 = arith.constant 0 : index
    %c0_5 = arith.constant 0 : index
    %5 = vector.load %arg4[%c0_4, %c0_5] : memref<128x128xbf16, #tpu.memory_space<vmem>>, vector<128x128xbf16>
    %cst = arith.constant dense<0.000000e+00> : vector<256x128xf32>
    %6 = tpu.matmul %4, %5, %cst {dimension_numbers = #tpu.dot_dimension_numbers<[1], [0], [0], [1], [0, 0, 1, 1], [], []>} : vector<256x128xbf16>, vector<128x128xbf16>, vector<256x128xf32> -> vector<256x128xf32>
    %7 = arith.addf %3, %6 : vector<256x128xf32>
    %c0_6 = arith.constant 0 : index
    %c0_7 = arith.constant 0 : index
    %8 = vector.load %arg7[%c0_6, %c0_7] : memref<256x128xf32, #tpu.memory_space<vmem>>, vector<256x128xf32>
    tpu.vector_store %arg7[%c0_6, %c0_7], %7 {strides = array<i32>} : memref<256x128xf32, #tpu.memory_space<vmem>>, vector<256x128xf32>,
    %c0_i32_8 = arith.constant 0 : i32
    %9 = arith.cmpi eq, %arg2, %c0_i32_8 : i32
    %10 = arith.extui %9 : i1 to i32
    %c0_i32_9 = arith.constant 0 : i32
    %11 = arith.cmpi ne, %10, %c0_i32_9 : i32
    scf.if %11 {
      %c0_10 = arith.constant 0 : index
      %c0_11 = arith.constant 0 : index
      %12 = vector.load %arg7[%c0_10, %c0_11] : memref<256x128xf32, #tpu.memory_space<vmem>>, vector<256x128xf32>
      %c0_12 = arith.constant 0 : index
      %c0_13 = arith.constant 0 : index
      %13 = vector.load %arg5[%c0_12, %c0_13] : memref<1x128xf32, #tpu.memory_space<vmem>>, vector<1x128xf32>
      %14 = vector.broadcast %13 : vector<1x128xf32> to vector<256x128xf32>
      %15 = arith.addf %12, %14 : vector<256x128xf32>
      %cst_14 = arith.constant 0.000000e+00 : f32
      %16 = vector.broadcast %cst_14 : f32 to vector<256x128xf32>
      %17 = arith.maximumf %15, %16 : vector<256x128xf32>
      %18 = arith.truncf %17 : vector<256x128xf32> to vector<256x128xbf16>
      %c0_15 = arith.constant 0 : index
      %c0_16 = arith.constant 0 : index
      %19 = vector.load %arg6[%c0_15, %c0_16] : memref<256x128xbf16, #tpu.memory_space<vmem>>, vector<256x128xbf16>
      tpu.vector_store %arg6[%c0_15, %c0_16], %18 {strides = array<i32>} : memref<256x128xbf16, #tpu.memory_space<vmem>>, vector<256x128xbf16>,
    } else {
    }
    return
  }
  func.func @transform_0(%arg0: i32, %arg1: i32, %arg2: i32) -> (i32, i32) {
    %c0_i32 = arith.constant 0 : i32
    return %arg0, %arg2 : i32, i32
  }
  func.func @transform_1(%arg0: i32, %arg1: i32, %arg2: i32) -> (i32, i32) {
    %c0_i32 = arith.constant 0 : i32
    return %arg2, %arg1 : i32, i32
  }
  func.func @transform_2(%arg0: i32, %arg1: i32, %arg2: i32) -> (i32, i32) {
    %c0_i32 = arith.constant 0 : i32
    %c0_i32_0 = arith.constant 0 : i32
    return %c0_i32, %arg1 : i32, i32
  }
  func.func @transform_3(%arg0: i32, %arg1: i32, %arg2: i32) -> (i32, i32) {
    %c0_i32 = arith.constant 0 : i32
    return %arg0, %arg1 : i32, i32
  }
}

module attributes {stable_mosaic.version = 11 : i64} {
  func.func @_matmul_bias_relu_kernel(%arg0: i32, %arg1: i32, %arg2: i32, %arg3: memref<256x256xbf16, #tpu.memory_space<vmem>>, %arg4: memref<256x128xbf16, #tpu.memory_space<vmem>>, %arg5: memref<1x128xf32, #tpu.memory_space<vmem>>, %arg6: memref<256x128xbf16, #tpu.memory_space<vmem>>, %arg7: memref<256x128xf32, #tpu.memory_space<vmem>>) attributes {dimension_semantics = [#tpu.dimension_semantics<parallel>, #tpu.dimension_semantics<parallel>, #tpu.dimension_semantics<arbitrary>], iteration_bounds = array<i64: 2, 1, 1>, scalar_prefetch = 0 : i64, scratch_operands = 1 : i64, tpu.core_type = #tpu.core_type<tc>, window_params = [{transform_indices = @transform_0, window_bounds = array<i64: 256, 256>}, {transform_indices = @transform_1, window_bounds = array<i64: 256, 128>}, {transform_indices = @transform_2, window_bounds = array<i64: 1, 128>}, {transform_indices = @transform_3, window_bounds = array<i64: 256, 128>}]} {
    %c0_i32 = arith.constant 0 : i32
    %0 = arith.cmpi eq, %arg2, %c0_i32 : i32
    %1 = arith.extui %0 : i1 to i32
    %c0_i32_0 = arith.constant 0 : i32
    %2 = arith.cmpi ne, %1, %c0_i32_0 : i32
    scf.if %2 {
      %cst_10 = arith.constant 0.000000e+00 : f32
      %12 = vector.broadcast %cst_10 : f32 to vector<256x128xf32>
      %c0_11 = arith.constant 0 : index
      %c0_12 = arith.constant 0 : index
      %13 = vector.load %arg7[%c0_11, %c0_12] : memref<256x128xf32, #tpu.memory_space<vmem>>, vector<256x128xf32>
      tpu.vector_store %arg7[%c0_11, %c0_12], %12 {strides = array<i32>} : memref<256x128xf32, #tpu.memory_space<vmem>>, vector<256x128xf32>,
    } else {
    }
    %c0 = arith.constant 0 : index
    %c0_1 = arith.constant 0 : index
    %3 = vector.load %arg7[%c0, %c0_1] : memref<256x128xf32, #tpu.memory_space<vmem>>, vector<256x128xf32>
    %c0_2 = arith.constant 0 : index
    %c0_3 = arith.constant 0 : index
    %4 = vector.load %arg3[%c0_2, %c0_3] : memref<256x256xbf16, #tpu.memory_space<vmem>>, vector<256x256xbf16>
    %c0_4 = arith.constant 0 : index
    %c0_5 = arith.constant 0 : index
    %5 = vector.load %arg4[%c0_4, %c0_5] : memref<256x128xbf16, #tpu.memory_space<vmem>>, vector<256x128xbf16>
    %cst = arith.constant dense<0.000000e+00> : vector<256x128xf32>
    %6 = tpu.matmul %4, %5, %cst {dimension_numbers = #tpu.dot_dimension_numbers<[1], [0], [0], [1], [0, 0, 1, 1], [], []>} : vector<256x256xbf16>, vector<256x128xbf16>, vector<256x128xf32> -> vector<256x128xf32>
    %7 = arith.addf %3, %6 : vector<256x128xf32>
    %c0_6 = arith.constant 0 : index
    %c0_7 = arith.constant 0 : index
    %8 = vector.load %arg7[%c0_6, %c0_7] : memref<256x128xf32, #tpu.memory_space<vmem>>, vector<256x128xf32>
    tpu.vector_store %arg7[%c0_6, %c0_7], %7 {strides = array<i32>} : memref<256x128xf32, #tpu.memory_space<vmem>>, vector<256x128xf32>,
    %c0_i32_8 = arith.constant 0 : i32
    %9 = arith.cmpi eq, %arg2, %c0_i32_8 : i32
    %10 = arith.extui %9 : i1 to i32
    %c0_i32_9 = arith.constant 0 : i32
    %11 = arith.cmpi ne, %10, %c0_i32_9 : i32
    scf.if %11 {
      %c0_10 = arith.constant 0 : index
      %c0_11 = arith.constant 0 : index
      %12 = vector.load %arg7[%c0_10, %c0_11] : memref<256x128xf32, #tpu.memory_space<vmem>>, vector<256x128xf32>
      %c0_12 = arith.constant 0 : index
      %c0_13 = arith.constant 0 : index
      %13 = vector.load %arg5[%c0_12, %c0_13] : memref<1x128xf32, #tpu.memory_space<vmem>>, vector<1x128xf32>
      %14 = vector.broadcast %13 : vector<1x128xf32> to vector<256x128xf32>
      %15 = arith.addf %12, %14 : vector<256x128xf32>
      %cst_14 = arith.constant 0.000000e+00 : f32
      %16 = vector.broadcast %cst_14 : f32 to vector<256x128xf32>
      %17 = arith.maximumf %15, %16 : vector<256x128xf32>
      %18 = arith.truncf %17 : vector<256x128xf32> to vector<256x128xbf16>
      %c0_15 = arith.constant 0 : index
      %c0_16 = arith.constant 0 : index
      %19 = vector.load %arg6[%c0_15, %c0_16] : memref<256x128xbf16, #tpu.memory_space<vmem>>, vector<256x128xbf16>
      tpu.vector_store %arg6[%c0_15, %c0_16], %18 {strides = array<i32>} : memref<256x128xbf16, #tpu.memory_space<vmem>>, vector<256x128xbf16>,
    } else {
    }
    return
  }
  func.func @transform_0(%arg0: i32, %arg1: i32, %arg2: i32) -> (i32, i32) {
    %c0_i32 = arith.constant 0 : i32
    return %arg0, %arg2 : i32, i32
  }
  func.func @transform_1(%arg0: i32, %arg1: i32, %arg2: i32) -> (i32, i32) {
    %c0_i32 = arith.constant 0 : i32
    return %arg2, %arg1 : i32, i32
  }
  func.func @transform_2(%arg0: i32, %arg1: i32, %arg2: i32) -> (i32, i32) {
    %c0_i32 = arith.constant 0 : i32
    %c0_i32_0 = arith.constant 0 : i32
    return %c0_i32, %arg1 : i32, i32
  }
  func.func @transform_3(%arg0: i32, %arg1: i32, %arg2: i32) -> (i32, i32) {
    %c0_i32 = arith.constant 0 : i32
    return %arg0, %arg1 : i32, i32
  }
}

module attributes {stable_mosaic.version = 11 : i64} {
  func.func @_matmul_bias_relu_kernel(%arg0: i32, %arg1: i32, %arg2: i32, %arg3: memref<64x256xbf16, #tpu.memory_space<vmem>>, %arg4: memref<256x128xbf16, #tpu.memory_space<vmem>>, %arg5: memref<1x128xf32, #tpu.memory_space<vmem>>, %arg6: memref<64x128xbf16, #tpu.memory_space<vmem>>, %arg7: memref<64x128xf32, #tpu.memory_space<vmem>>) attributes {dimension_semantics = [#tpu.dimension_semantics<parallel>, #tpu.dimension_semantics<parallel>, #tpu.dimension_semantics<arbitrary>], iteration_bounds = array<i64: 2, 1, 1>, scalar_prefetch = 0 : i64, scratch_operands = 1 : i64, tpu.core_type = #tpu.core_type<tc>, window_params = [{transform_indices = @transform_0, window_bounds = array<i64: 64, 256>}, {transform_indices = @transform_1, window_bounds = array<i64: 256, 128>}, {transform_indices = @transform_2, window_bounds = array<i64: 1, 128>}, {transform_indices = @transform_3, window_bounds = array<i64: 64, 128>}]} {
    %c0_i32 = arith.constant 0 : i32
    %0 = arith.cmpi eq, %arg2, %c0_i32 : i32
    %1 = arith.extui %0 : i1 to i32
    %c0_i32_0 = arith.constant 0 : i32
    %2 = arith.cmpi ne, %1, %c0_i32_0 : i32
    scf.if %2 {
      %cst_10 = arith.constant 0.000000e+00 : f32
      %12 = vector.broadcast %cst_10 : f32 to vector<64x128xf32>
      %c0_11 = arith.constant 0 : index
      %c0_12 = arith.constant 0 : index
      %13 = vector.load %arg7[%c0_11, %c0_12] : memref<64x128xf32, #tpu.memory_space<vmem>>, vector<64x128xf32>
      tpu.vector_store %arg7[%c0_11, %c0_12], %12 {strides = array<i32>} : memref<64x128xf32, #tpu.memory_space<vmem>>, vector<64x128xf32>,
    } else {
    }
    %c0 = arith.constant 0 : index
    %c0_1 = arith.constant 0 : index
    %3 = vector.load %arg7[%c0, %c0_1] : memref<64x128xf32, #tpu.memory_space<vmem>>, vector<64x128xf32>
    %c0_2 = arith.constant 0 : index
    %c0_3 = arith.constant 0 : index
    %4 = vector.load %arg3[%c0_2, %c0_3] : memref<64x256xbf16, #tpu.memory_space<vmem>>, vector<64x256xbf16>
    %c0_4 = arith.constant 0 : index
    %c0_5 = arith.constant 0 : index
    %5 = vector.load %arg4[%c0_4, %c0_5] : memref<256x128xbf16, #tpu.memory_space<vmem>>, vector<256x128xbf16>
    %cst = arith.constant dense<0.000000e+00> : vector<64x128xf32>
    %6 = tpu.matmul %4, %5, %cst {dimension_numbers = #tpu.dot_dimension_numbers<[1], [0], [0], [1], [0, 0, 1, 1], [], []>} : vector<64x256xbf16>, vector<256x128xbf16>, vector<64x128xf32> -> vector<64x128xf32>
    %7 = arith.addf %3, %6 : vector<64x128xf32>
    %c0_6 = arith.constant 0 : index
    %c0_7 = arith.constant 0 : index
    %8 = vector.load %arg7[%c0_6, %c0_7] : memref<64x128xf32, #tpu.memory_space<vmem>>, vector<64x128xf32>
    tpu.vector_store %arg7[%c0_6, %c0_7], %7 {strides = array<i32>} : memref<64x128xf32, #tpu.memory_space<vmem>>, vector<64x128xf32>,
    %c0_i32_8 = arith.constant 0 : i32
    %9 = arith.cmpi eq, %arg2, %c0_i32_8 : i32
    %10 = arith.extui %9 : i1 to i32
    %c0_i32_9 = arith.constant 0 : i32
    %11 = arith.cmpi ne, %10, %c0_i32_9 : i32
    scf.if %11 {
      %c0_10 = arith.constant 0 : index
      %c0_11 = arith.constant 0 : index
      %12 = vector.load %arg7[%c0_10, %c0_11] : memref<64x128xf32, #tpu.memory_space<vmem>>, vector<64x128xf32>
      %c0_12 = arith.constant 0 : index
      %c0_13 = arith.constant 0 : index
      %13 = vector.load %arg5[%c0_12, %c0_13] : memref<1x128xf32, #tpu.memory_space<vmem>>, vector<1x128xf32>
      %14 = vector.broadcast %13 : vector<1x128xf32> to vector<64x128xf32>
      %15 = arith.addf %12, %14 : vector<64x128xf32>
      %cst_14 = arith.constant 0.000000e+00 : f32
      %16 = vector.broadcast %cst_14 : f32 to vector<64x128xf32>
      %17 = arith.maximumf %15, %16 : vector<64x128xf32>
      %18 = arith.truncf %17 : vector<64x128xf32> to vector<64x128xbf16>
      %c0_15 = arith.constant 0 : index
      %c0_16 = arith.constant 0 : index
      %19 = vector.load %arg6[%c0_15, %c0_16] : memref<64x128xbf16, #tpu.memory_space<vmem>>, vector<64x128xbf16>
      tpu.vector_store %arg6[%c0_15, %c0_16], %18 {strides = array<i32>} : memref<64x128xbf16, #tpu.memory_space<vmem>>, vector<64x128xbf16>,
    } else {
    }
    return
  }
  func.func @transform_0(%arg0: i32, %arg1: i32, %arg2: i32) -> (i32, i32) {
    %c0_i32 = arith.constant 0 : i32
    return %arg0, %arg2 : i32, i32
  }
  func.func @transform_1(%arg0: i32, %arg1: i32, %arg2: i32) -> (i32, i32) {
    %c0_i32 = arith.constant 0 : i32
    return %arg2, %arg1 : i32, i32
  }
  func.func @transform_2(%arg0: i32, %arg1: i32, %arg2: i32) -> (i32, i32) {
    %c0_i32 = arith.constant 0 : i32
    %c0_i32_0 = arith.constant 0 : i32
    return %c0_i32, %arg1 : i32, i32
  }
  func.func @transform_3(%arg0: i32, %arg1: i32, %arg2: i32) -> (i32, i32) {
    %c0_i32 = arith.constant 0 : i32
    return %arg0, %arg1 : i32, i32
  }
}

module attributes {stable_mosaic.version = 11 : i64} {
  func.func @_matmul_bias_relu_kernel(%arg0: i32, %arg1: i32, %arg2: i32, %arg3: memref<64x384xbf16, #tpu.memory_space<vmem>>, %arg4: memref<384x128xbf16, #tpu.memory_space<vmem>>, %arg5: memref<1x128xf32, #tpu.memory_space<vmem>>, %arg6: memref<64x128xbf16, #tpu.memory_space<vmem>>, %arg7: memref<64x128xf32, #tpu.memory_space<vmem>>) attributes {dimension_semantics = [#tpu.dimension_semantics<parallel>, #tpu.dimension_semantics<parallel>, #tpu.dimension_semantics<arbitrary>], iteration_bounds = array<i64: 2, 1, 1>, scalar_prefetch = 0 : i64, scratch_operands = 1 : i64, tpu.core_type = #tpu.core_type<tc>, window_params = [{transform_indices = @transform_0, window_bounds = array<i64: 64, 384>}, {transform_indices = @transform_1, window_bounds = array<i64: 384, 128>}, {transform_indices = @transform_2, window_bounds = array<i64: 1, 128>}, {transform_indices = @transform_3, window_bounds = array<i64: 64, 128>}]} {
    %c0_i32 = arith.constant 0 : i32
    %0 = arith.cmpi eq, %arg2, %c0_i32 : i32
    %1 = arith.extui %0 : i1 to i32
    %c0_i32_0 = arith.constant 0 : i32
    %2 = arith.cmpi ne, %1, %c0_i32_0 : i32
    scf.if %2 {
      %cst_10 = arith.constant 0.000000e+00 : f32
      %12 = vector.broadcast %cst_10 : f32 to vector<64x128xf32>
      %c0_11 = arith.constant 0 : index
      %c0_12 = arith.constant 0 : index
      %13 = vector.load %arg7[%c0_11, %c0_12] : memref<64x128xf32, #tpu.memory_space<vmem>>, vector<64x128xf32>
      tpu.vector_store %arg7[%c0_11, %c0_12], %12 {strides = array<i32>} : memref<64x128xf32, #tpu.memory_space<vmem>>, vector<64x128xf32>,
    } else {
    }
    %c0 = arith.constant 0 : index
    %c0_1 = arith.constant 0 : index
    %3 = vector.load %arg7[%c0, %c0_1] : memref<64x128xf32, #tpu.memory_space<vmem>>, vector<64x128xf32>
    %c0_2 = arith.constant 0 : index
    %c0_3 = arith.constant 0 : index
    %4 = vector.load %arg3[%c0_2, %c0_3] : memref<64x384xbf16, #tpu.memory_space<vmem>>, vector<64x384xbf16>
    %c0_4 = arith.constant 0 : index
    %c0_5 = arith.constant 0 : index
    %5 = vector.load %arg4[%c0_4, %c0_5] : memref<384x128xbf16, #tpu.memory_space<vmem>>, vector<384x128xbf16>
    %cst = arith.constant dense<0.000000e+00> : vector<64x128xf32>
    %6 = tpu.matmul %4, %5, %cst {dimension_numbers = #tpu.dot_dimension_numbers<[1], [0], [0], [1], [0, 0, 1, 1], [], []>} : vector<64x384xbf16>, vector<384x128xbf16>, vector<64x128xf32> -> vector<64x128xf32>
    %7 = arith.addf %3, %6 : vector<64x128xf32>
    %c0_6 = arith.constant 0 : index
    %c0_7 = arith.constant 0 : index
    %8 = vector.load %arg7[%c0_6, %c0_7] : memref<64x128xf32, #tpu.memory_space<vmem>>, vector<64x128xf32>
    tpu.vector_store %arg7[%c0_6, %c0_7], %7 {strides = array<i32>} : memref<64x128xf32, #tpu.memory_space<vmem>>, vector<64x128xf32>,
    %c0_i32_8 = arith.constant 0 : i32
    %9 = arith.cmpi eq, %arg2, %c0_i32_8 : i32
    %10 = arith.extui %9 : i1 to i32
    %c0_i32_9 = arith.constant 0 : i32
    %11 = arith.cmpi ne, %10, %c0_i32_9 : i32
    scf.if %11 {
      %c0_10 = arith.constant 0 : index
      %c0_11 = arith.constant 0 : index
      %12 = vector.load %arg7[%c0_10, %c0_11] : memref<64x128xf32, #tpu.memory_space<vmem>>, vector<64x128xf32>
      %c0_12 = arith.constant 0 : index
      %c0_13 = arith.constant 0 : index
      %13 = vector.load %arg5[%c0_12, %c0_13] : memref<1x128xf32, #tpu.memory_space<vmem>>, vector<1x128xf32>
      %14 = vector.broadcast %13 : vector<1x128xf32> to vector<64x128xf32>
      %15 = arith.addf %12, %14 : vector<64x128xf32>
      %cst_14 = arith.constant 0.000000e+00 : f32
      %16 = vector.broadcast %cst_14 : f32 to vector<64x128xf32>
      %17 = arith.maximumf %15, %16 : vector<64x128xf32>
      %18 = arith.truncf %17 : vector<64x128xf32> to vector<64x128xbf16>
      %c0_15 = arith.constant 0 : index
      %c0_16 = arith.constant 0 : index
      %19 = vector.load %arg6[%c0_15, %c0_16] : memref<64x128xbf16, #tpu.memory_space<vmem>>, vector<64x128xbf16>
      tpu.vector_store %arg6[%c0_15, %c0_16], %18 {strides = array<i32>} : memref<64x128xbf16, #tpu.memory_space<vmem>>, vector<64x128xbf16>,
    } else {
    }
    return
  }
  func.func @transform_0(%arg0: i32, %arg1: i32, %arg2: i32) -> (i32, i32) {
    %c0_i32 = arith.constant 0 : i32
    return %arg0, %arg2 : i32, i32
  }
  func.func @transform_1(%arg0: i32, %arg1: i32, %arg2: i32) -> (i32, i32) {
    %c0_i32 = arith.constant 0 : i32
    return %arg2, %arg1 : i32, i32
  }
  func.func @transform_2(%arg0: i32, %arg1: i32, %arg2: i32) -> (i32, i32) {
    %c0_i32 = arith.constant 0 : i32
    %c0_i32_0 = arith.constant 0 : i32
    return %c0_i32, %arg1 : i32, i32
  }
  func.func @transform_3(%arg0: i32, %arg1: i32, %arg2: i32) -> (i32, i32) {
    %c0_i32 = arith.constant 0 : i32
    return %arg0, %arg1 : i32, i32
  }
}

module attributes {stable_mosaic.version = 11 : i64} {
  func.func @_matmul_bias_relu_kernel(%arg0: i32, %arg1: i32, %arg2: i32, %arg3: memref<16x384xbf16, #tpu.memory_space<vmem>>, %arg4: memref<384x128xbf16, #tpu.memory_space<vmem>>, %arg5: memref<1x128xf32, #tpu.memory_space<vmem>>, %arg6: memref<16x128xbf16, #tpu.memory_space<vmem>>, %arg7: memref<16x128xf32, #tpu.memory_space<vmem>>) attributes {dimension_semantics = [#tpu.dimension_semantics<parallel>, #tpu.dimension_semantics<parallel>, #tpu.dimension_semantics<arbitrary>], iteration_bounds = array<i64: 2, 1, 1>, scalar_prefetch = 0 : i64, scratch_operands = 1 : i64, tpu.core_type = #tpu.core_type<tc>, window_params = [{transform_indices = @transform_0, window_bounds = array<i64: 16, 384>}, {transform_indices = @transform_1, window_bounds = array<i64: 384, 128>}, {transform_indices = @transform_2, window_bounds = array<i64: 1, 128>}, {transform_indices = @transform_3, window_bounds = array<i64: 16, 128>}]} {
    %c0_i32 = arith.constant 0 : i32
    %0 = arith.cmpi eq, %arg2, %c0_i32 : i32
    %1 = arith.extui %0 : i1 to i32
    %c0_i32_0 = arith.constant 0 : i32
    %2 = arith.cmpi ne, %1, %c0_i32_0 : i32
    scf.if %2 {
      %cst_10 = arith.constant 0.000000e+00 : f32
      %12 = vector.broadcast %cst_10 : f32 to vector<16x128xf32>
      %c0_11 = arith.constant 0 : index
      %c0_12 = arith.constant 0 : index
      %13 = vector.load %arg7[%c0_11, %c0_12] : memref<16x128xf32, #tpu.memory_space<vmem>>, vector<16x128xf32>
      tpu.vector_store %arg7[%c0_11, %c0_12], %12 {strides = array<i32>} : memref<16x128xf32, #tpu.memory_space<vmem>>, vector<16x128xf32>,
    } else {
    }
    %c0 = arith.constant 0 : index
    %c0_1 = arith.constant 0 : index
    %3 = vector.load %arg7[%c0, %c0_1] : memref<16x128xf32, #tpu.memory_space<vmem>>, vector<16x128xf32>
    %c0_2 = arith.constant 0 : index
    %c0_3 = arith.constant 0 : index
    %4 = vector.load %arg3[%c0_2, %c0_3] : memref<16x384xbf16, #tpu.memory_space<vmem>>, vector<16x384xbf16>
    %c0_4 = arith.constant 0 : index
    %c0_5 = arith.constant 0 : index
    %5 = vector.load %arg4[%c0_4, %c0_5] : memref<384x128xbf16, #tpu.memory_space<vmem>>, vector<384x128xbf16>
    %cst = arith.constant dense<0.000000e+00> : vector<16x128xf32>
    %6 = tpu.matmul %4, %5, %cst {dimension_numbers = #tpu.dot_dimension_numbers<[1], [0], [0], [1], [0, 0, 1, 1], [], []>} : vector<16x384xbf16>, vector<384x128xbf16>, vector<16x128xf32> -> vector<16x128xf32>
    %7 = arith.addf %3, %6 : vector<16x128xf32>
    %c0_6 = arith.constant 0 : index
    %c0_7 = arith.constant 0 : index
    %8 = vector.load %arg7[%c0_6, %c0_7] : memref<16x128xf32, #tpu.memory_space<vmem>>, vector<16x128xf32>
    tpu.vector_store %arg7[%c0_6, %c0_7], %7 {strides = array<i32>} : memref<16x128xf32, #tpu.memory_space<vmem>>, vector<16x128xf32>,
    %c0_i32_8 = arith.constant 0 : i32
    %9 = arith.cmpi eq, %arg2, %c0_i32_8 : i32
    %10 = arith.extui %9 : i1 to i32
    %c0_i32_9 = arith.constant 0 : i32
    %11 = arith.cmpi ne, %10, %c0_i32_9 : i32
    scf.if %11 {
      %c0_10 = arith.constant 0 : index
      %c0_11 = arith.constant 0 : index
      %12 = vector.load %arg7[%c0_10, %c0_11] : memref<16x128xf32, #tpu.memory_space<vmem>>, vector<16x128xf32>
      %c0_12 = arith.constant 0 : index
      %c0_13 = arith.constant 0 : index
      %13 = vector.load %arg5[%c0_12, %c0_13] : memref<1x128xf32, #tpu.memory_space<vmem>>, vector<1x128xf32>
      %14 = vector.broadcast %13 : vector<1x128xf32> to vector<16x128xf32>
      %15 = arith.addf %12, %14 : vector<16x128xf32>
      %cst_14 = arith.constant 0.000000e+00 : f32
      %16 = vector.broadcast %cst_14 : f32 to vector<16x128xf32>
      %17 = arith.maximumf %15, %16 : vector<16x128xf32>
      %18 = arith.truncf %17 : vector<16x128xf32> to vector<16x128xbf16>
      %c0_15 = arith.constant 0 : index
      %c0_16 = arith.constant 0 : index
      %19 = vector.load %arg6[%c0_15, %c0_16] : memref<16x128xbf16, #tpu.memory_space<vmem>>, vector<16x128xbf16>
      tpu.vector_store %arg6[%c0_15, %c0_16], %18 {strides = array<i32>} : memref<16x128xbf16, #tpu.memory_space<vmem>>, vector<16x128xbf16>,
    } else {
    }
    return
  }
  func.func @transform_0(%arg0: i32, %arg1: i32, %arg2: i32) -> (i32, i32) {
    %c0_i32 = arith.constant 0 : i32
    return %arg0, %arg2 : i32, i32
  }
  func.func @transform_1(%arg0: i32, %arg1: i32, %arg2: i32) -> (i32, i32) {
    %c0_i32 = arith.constant 0 : i32
    return %arg2, %arg1 : i32, i32
  }
  func.func @transform_2(%arg0: i32, %arg1: i32, %arg2: i32) -> (i32, i32) {
    %c0_i32 = arith.constant 0 : i32
    %c0_i32_0 = arith.constant 0 : i32
    return %c0_i32, %arg1 : i32, i32
  }
  func.func @transform_3(%arg0: i32, %arg1: i32, %arg2: i32) -> (i32, i32) {
    %c0_i32 = arith.constant 0 : i32
    return %arg0, %arg1 : i32, i32
  }
}

module attributes {stable_mosaic.version = 11 : i64} {
  func.func @_matmul_bias_relu_kernel(%arg0: i32, %arg1: i32, %arg2: i32, %arg3: memref<16x640xbf16, #tpu.memory_space<vmem>>, %arg4: memref<640x128xbf16, #tpu.memory_space<vmem>>, %arg5: memref<1x128xf32, #tpu.memory_space<vmem>>, %arg6: memref<16x128xbf16, #tpu.memory_space<vmem>>, %arg7: memref<16x128xf32, #tpu.memory_space<vmem>>) attributes {dimension_semantics = [#tpu.dimension_semantics<parallel>, #tpu.dimension_semantics<parallel>, #tpu.dimension_semantics<arbitrary>], iteration_bounds = array<i64: 2, 1, 1>, scalar_prefetch = 0 : i64, scratch_operands = 1 : i64, tpu.core_type = #tpu.core_type<tc>, window_params = [{transform_indices = @transform_0, window_bounds = array<i64: 16, 640>}, {transform_indices = @transform_1, window_bounds = array<i64: 640, 128>}, {transform_indices = @transform_2, window_bounds = array<i64: 1, 128>}, {transform_indices = @transform_3, window_bounds = array<i64: 16, 128>}]} {
    %c0_i32 = arith.constant 0 : i32
    %0 = arith.cmpi eq, %arg2, %c0_i32 : i32
    %1 = arith.extui %0 : i1 to i32
    %c0_i32_0 = arith.constant 0 : i32
    %2 = arith.cmpi ne, %1, %c0_i32_0 : i32
    scf.if %2 {
      %cst_10 = arith.constant 0.000000e+00 : f32
      %12 = vector.broadcast %cst_10 : f32 to vector<16x128xf32>
      %c0_11 = arith.constant 0 : index
      %c0_12 = arith.constant 0 : index
      %13 = vector.load %arg7[%c0_11, %c0_12] : memref<16x128xf32, #tpu.memory_space<vmem>>, vector<16x128xf32>
      tpu.vector_store %arg7[%c0_11, %c0_12], %12 {strides = array<i32>} : memref<16x128xf32, #tpu.memory_space<vmem>>, vector<16x128xf32>,
    } else {
    }
    %c0 = arith.constant 0 : index
    %c0_1 = arith.constant 0 : index
    %3 = vector.load %arg7[%c0, %c0_1] : memref<16x128xf32, #tpu.memory_space<vmem>>, vector<16x128xf32>
    %c0_2 = arith.constant 0 : index
    %c0_3 = arith.constant 0 : index
    %4 = vector.load %arg3[%c0_2, %c0_3] : memref<16x640xbf16, #tpu.memory_space<vmem>>, vector<16x640xbf16>
    %c0_4 = arith.constant 0 : index
    %c0_5 = arith.constant 0 : index
    %5 = vector.load %arg4[%c0_4, %c0_5] : memref<640x128xbf16, #tpu.memory_space<vmem>>, vector<640x128xbf16>
    %cst = arith.constant dense<0.000000e+00> : vector<16x128xf32>
    %6 = tpu.matmul %4, %5, %cst {dimension_numbers = #tpu.dot_dimension_numbers<[1], [0], [0], [1], [0, 0, 1, 1], [], []>} : vector<16x640xbf16>, vector<640x128xbf16>, vector<16x128xf32> -> vector<16x128xf32>
    %7 = arith.addf %3, %6 : vector<16x128xf32>
    %c0_6 = arith.constant 0 : index
    %c0_7 = arith.constant 0 : index
    %8 = vector.load %arg7[%c0_6, %c0_7] : memref<16x128xf32, #tpu.memory_space<vmem>>, vector<16x128xf32>
    tpu.vector_store %arg7[%c0_6, %c0_7], %7 {strides = array<i32>} : memref<16x128xf32, #tpu.memory_space<vmem>>, vector<16x128xf32>,
    %c0_i32_8 = arith.constant 0 : i32
    %9 = arith.cmpi eq, %arg2, %c0_i32_8 : i32
    %10 = arith.extui %9 : i1 to i32
    %c0_i32_9 = arith.constant 0 : i32
    %11 = arith.cmpi ne, %10, %c0_i32_9 : i32
    scf.if %11 {
      %c0_10 = arith.constant 0 : index
      %c0_11 = arith.constant 0 : index
      %12 = vector.load %arg7[%c0_10, %c0_11] : memref<16x128xf32, #tpu.memory_space<vmem>>, vector<16x128xf32>
      %c0_12 = arith.constant 0 : index
      %c0_13 = arith.constant 0 : index
      %13 = vector.load %arg5[%c0_12, %c0_13] : memref<1x128xf32, #tpu.memory_space<vmem>>, vector<1x128xf32>
      %14 = vector.broadcast %13 : vector<1x128xf32> to vector<16x128xf32>
      %15 = arith.addf %12, %14 : vector<16x128xf32>
      %cst_14 = arith.constant 0.000000e+00 : f32
      %16 = vector.broadcast %cst_14 : f32 to vector<16x128xf32>
      %17 = arith.maximumf %15, %16 : vector<16x128xf32>
      %18 = arith.truncf %17 : vector<16x128xf32> to vector<16x128xbf16>
      %c0_15 = arith.constant 0 : index
      %c0_16 = arith.constant 0 : index
      %19 = vector.load %arg6[%c0_15, %c0_16] : memref<16x128xbf16, #tpu.memory_space<vmem>>, vector<16x128xbf16>
      tpu.vector_store %arg6[%c0_15, %c0_16], %18 {strides = array<i32>} : memref<16x128xbf16, #tpu.memory_space<vmem>>, vector<16x128xbf16>,
    } else {
    }
    return
  }
  func.func @transform_0(%arg0: i32, %arg1: i32, %arg2: i32) -> (i32, i32) {
    %c0_i32 = arith.constant 0 : i32
    return %arg0, %arg2 : i32, i32
  }
  func.func @transform_1(%arg0: i32, %arg1: i32, %arg2: i32) -> (i32, i32) {
    %c0_i32 = arith.constant 0 : i32
    return %arg2, %arg1 : i32, i32
  }
  func.func @transform_2(%arg0: i32, %arg1: i32, %arg2: i32) -> (i32, i32) {
    %c0_i32 = arith.constant 0 : i32
    %c0_i32_0 = arith.constant 0 : i32
    return %c0_i32, %arg1 : i32, i32
  }
  func.func @transform_3(%arg0: i32, %arg1: i32, %arg2: i32) -> (i32, i32) {
    %c0_i32 = arith.constant 0 : i32
    return %arg0, %arg1 : i32, i32
  }
}

module attributes {stable_mosaic.version = 11 : i64} {
  func.func @_matmul_bias_relu_kernel(%arg0: i32, %arg1: i32, %arg2: i32, %arg3: memref<16x640xbf16, #tpu.memory_space<vmem>>, %arg4: memref<640x128xbf16, #tpu.memory_space<vmem>>, %arg5: memref<1x128xf32, #tpu.memory_space<vmem>>, %arg6: memref<16x128xbf16, #tpu.memory_space<vmem>>, %arg7: memref<16x128xf32, #tpu.memory_space<vmem>>) attributes {dimension_semantics = [#tpu.dimension_semantics<parallel>, #tpu.dimension_semantics<parallel>, #tpu.dimension_semantics<arbitrary>], iteration_bounds = array<i64: 1, 1, 1>, scalar_prefetch = 0 : i64, scratch_operands = 1 : i64, tpu.core_type = #tpu.core_type<tc>, window_params = [{transform_indices = @transform_0, window_bounds = array<i64: 16, 640>}, {transform_indices = @transform_1, window_bounds = array<i64: 640, 128>}, {transform_indices = @transform_2, window_bounds = array<i64: 1, 128>}, {transform_indices = @transform_3, window_bounds = array<i64: 16, 128>}]} {
    %c0_i32 = arith.constant 0 : i32
    %0 = arith.cmpi eq, %arg2, %c0_i32 : i32
    %1 = arith.extui %0 : i1 to i32
    %c0_i32_0 = arith.constant 0 : i32
    %2 = arith.cmpi ne, %1, %c0_i32_0 : i32
    scf.if %2 {
      %cst_10 = arith.constant 0.000000e+00 : f32
      %12 = vector.broadcast %cst_10 : f32 to vector<16x128xf32>
      %c0_11 = arith.constant 0 : index
      %c0_12 = arith.constant 0 : index
      %13 = vector.load %arg7[%c0_11, %c0_12] : memref<16x128xf32, #tpu.memory_space<vmem>>, vector<16x128xf32>
      tpu.vector_store %arg7[%c0_11, %c0_12], %12 {strides = array<i32>} : memref<16x128xf32, #tpu.memory_space<vmem>>, vector<16x128xf32>,
    } else {
    }
    %c0 = arith.constant 0 : index
    %c0_1 = arith.constant 0 : index
    %3 = vector.load %arg7[%c0, %c0_1] : memref<16x128xf32, #tpu.memory_space<vmem>>, vector<16x128xf32>
    %c0_2 = arith.constant 0 : index
    %c0_3 = arith.constant 0 : index
    %4 = vector.load %arg3[%c0_2, %c0_3] : memref<16x640xbf16, #tpu.memory_space<vmem>>, vector<16x640xbf16>
    %c0_4 = arith.constant 0 : index
    %c0_5 = arith.constant 0 : index
    %5 = vector.load %arg4[%c0_4, %c0_5] : memref<640x128xbf16, #tpu.memory_space<vmem>>, vector<640x128xbf16>
    %cst = arith.constant dense<0.000000e+00> : vector<16x128xf32>
    %6 = tpu.matmul %4, %5, %cst {dimension_numbers = #tpu.dot_dimension_numbers<[1], [0], [0], [1], [0, 0, 1, 1], [], []>} : vector<16x640xbf16>, vector<640x128xbf16>, vector<16x128xf32> -> vector<16x128xf32>
    %7 = arith.addf %3, %6 : vector<16x128xf32>
    %c0_6 = arith.constant 0 : index
    %c0_7 = arith.constant 0 : index
    %8 = vector.load %arg7[%c0_6, %c0_7] : memref<16x128xf32, #tpu.memory_space<vmem>>, vector<16x128xf32>
    tpu.vector_store %arg7[%c0_6, %c0_7], %7 {strides = array<i32>} : memref<16x128xf32, #tpu.memory_space<vmem>>, vector<16x128xf32>,
    %c0_i32_8 = arith.constant 0 : i32
    %9 = arith.cmpi eq, %arg2, %c0_i32_8 : i32
    %10 = arith.extui %9 : i1 to i32
    %c0_i32_9 = arith.constant 0 : i32
    %11 = arith.cmpi ne, %10, %c0_i32_9 : i32
    scf.if %11 {
      %c0_10 = arith.constant 0 : index
      %c0_11 = arith.constant 0 : index
      %12 = vector.load %arg7[%c0_10, %c0_11] : memref<16x128xf32, #tpu.memory_space<vmem>>, vector<16x128xf32>
      %c0_12 = arith.constant 0 : index
      %c0_13 = arith.constant 0 : index
      %13 = vector.load %arg5[%c0_12, %c0_13] : memref<1x128xf32, #tpu.memory_space<vmem>>, vector<1x128xf32>
      %14 = vector.broadcast %13 : vector<1x128xf32> to vector<16x128xf32>
      %15 = arith.addf %12, %14 : vector<16x128xf32>
      %cst_14 = arith.constant 0.000000e+00 : f32
      %16 = vector.broadcast %cst_14 : f32 to vector<16x128xf32>
      %17 = arith.maximumf %15, %16 : vector<16x128xf32>
      %18 = arith.truncf %17 : vector<16x128xf32> to vector<16x128xbf16>
      %c0_15 = arith.constant 0 : index
      %c0_16 = arith.constant 0 : index
      %19 = vector.load %arg6[%c0_15, %c0_16] : memref<16x128xbf16, #tpu.memory_space<vmem>>, vector<16x128xbf16>
      tpu.vector_store %arg6[%c0_15, %c0_16], %18 {strides = array<i32>} : memref<16x128xbf16, #tpu.memory_space<vmem>>, vector<16x128xbf16>,
    } else {
    }
    return
  }
  func.func @transform_0(%arg0: i32, %arg1: i32, %arg2: i32) -> (i32, i32) {
    %c0_i32 = arith.constant 0 : i32
    return %arg0, %arg2 : i32, i32
  }
  func.func @transform_1(%arg0: i32, %arg1: i32, %arg2: i32) -> (i32, i32) {
    %c0_i32 = arith.constant 0 : i32
    return %arg2, %arg1 : i32, i32
  }
  func.func @transform_2(%arg0: i32, %arg1: i32, %arg2: i32) -> (i32, i32) {
    %c0_i32 = arith.constant 0 : i32
    %c0_i32_0 = arith.constant 0 : i32
    return %c0_i32, %arg1 : i32, i32
  }
  func.func @transform_3(%arg0: i32, %arg1: i32, %arg2: i32) -> (i32, i32) {
    %c0_i32 = arith.constant 0 : i32
    return %arg0, %arg1 : i32, i32
  }
}

module attributes {stable_mosaic.version = 11 : i64} {
  func.func @_matmul_bias_relu_kernel(%arg0: i32, %arg1: i32, %arg2: i32, %arg3: memref<16x384xbf16, #tpu.memory_space<vmem>>, %arg4: memref<384x128xbf16, #tpu.memory_space<vmem>>, %arg5: memref<1x128xf32, #tpu.memory_space<vmem>>, %arg6: memref<16x128xbf16, #tpu.memory_space<vmem>>, %arg7: memref<16x128xf32, #tpu.memory_space<vmem>>) attributes {dimension_semantics = [#tpu.dimension_semantics<parallel>, #tpu.dimension_semantics<parallel>, #tpu.dimension_semantics<arbitrary>], iteration_bounds = array<i64: 1, 1, 3>, scalar_prefetch = 0 : i64, scratch_operands = 1 : i64, tpu.core_type = #tpu.core_type<tc>, window_params = [{transform_indices = @transform_0, window_bounds = array<i64: 16, 384>}, {transform_indices = @transform_1, window_bounds = array<i64: 384, 128>}, {transform_indices = @transform_2, window_bounds = array<i64: 1, 128>}, {transform_indices = @transform_3, window_bounds = array<i64: 16, 128>}]} {
    %c0_i32 = arith.constant 0 : i32
    %0 = arith.cmpi eq, %arg2, %c0_i32 : i32
    %1 = arith.extui %0 : i1 to i32
    %c0_i32_0 = arith.constant 0 : i32
    %2 = arith.cmpi ne, %1, %c0_i32_0 : i32
    scf.if %2 {
      %cst_9 = arith.constant 0.000000e+00 : f32
      %12 = vector.broadcast %cst_9 : f32 to vector<16x128xf32>
      %c0_10 = arith.constant 0 : index
      %c0_11 = arith.constant 0 : index
      %13 = vector.load %arg7[%c0_10, %c0_11] : memref<16x128xf32, #tpu.memory_space<vmem>>, vector<16x128xf32>
      tpu.vector_store %arg7[%c0_10, %c0_11], %12 {strides = array<i32>} : memref<16x128xf32, #tpu.memory_space<vmem>>, vector<16x128xf32>,
    } else {
    }
    %c0 = arith.constant 0 : index
    %c0_1 = arith.constant 0 : index
    %3 = vector.load %arg7[%c0, %c0_1] : memref<16x128xf32, #tpu.memory_space<vmem>>, vector<16x128xf32>
    %c0_2 = arith.constant 0 : index
    %c0_3 = arith.constant 0 : index
    %4 = vector.load %arg3[%c0_2, %c0_3] : memref<16x384xbf16, #tpu.memory_space<vmem>>, vector<16x384xbf16>
    %c0_4 = arith.constant 0 : index
    %c0_5 = arith.constant 0 : index
    %5 = vector.load %arg4[%c0_4, %c0_5] : memref<384x128xbf16, #tpu.memory_space<vmem>>, vector<384x128xbf16>
    %cst = arith.constant dense<0.000000e+00> : vector<16x128xf32>
    %6 = tpu.matmul %4, %5, %cst {dimension_numbers = #tpu.dot_dimension_numbers<[1], [0], [0], [1], [0, 0, 1, 1], [], []>} : vector<16x384xbf16>, vector<384x128xbf16>, vector<16x128xf32> -> vector<16x128xf32>
    %7 = arith.addf %3, %6 : vector<16x128xf32>
    %c0_6 = arith.constant 0 : index
    %c0_7 = arith.constant 0 : index
    %8 = vector.load %arg7[%c0_6, %c0_7] : memref<16x128xf32, #tpu.memory_space<vmem>>, vector<16x128xf32>
    tpu.vector_store %arg7[%c0_6, %c0_7], %7 {strides = array<i32>} : memref<16x128xf32, #tpu.memory_space<vmem>>, vector<16x128xf32>,
    %c2_i32 = arith.constant 2 : i32
    %9 = arith.cmpi eq, %arg2, %c2_i32 : i32
    %10 = arith.extui %9 : i1 to i32
    %c0_i32_8 = arith.constant 0 : i32
    %11 = arith.cmpi ne, %10, %c0_i32_8 : i32
    scf.if %11 {
      %c0_9 = arith.constant 0 : index
      %c0_10 = arith.constant 0 : index
      %12 = vector.load %arg7[%c0_9, %c0_10] : memref<16x128xf32, #tpu.memory_space<vmem>>, vector<16x128xf32>
      %c0_11 = arith.constant 0 : index
      %c0_12 = arith.constant 0 : index
      %13 = vector.load %arg5[%c0_11, %c0_12] : memref<1x128xf32, #tpu.memory_space<vmem>>, vector<1x128xf32>
      %14 = vector.broadcast %13 : vector<1x128xf32> to vector<16x128xf32>
      %15 = arith.addf %12, %14 : vector<16x128xf32>
      %cst_13 = arith.constant 0.000000e+00 : f32
      %16 = vector.broadcast %cst_13 : f32 to vector<16x128xf32>
      %17 = arith.maximumf %15, %16 : vector<16x128xf32>
      %18 = arith.truncf %17 : vector<16x128xf32> to vector<16x128xbf16>
      %c0_14 = arith.constant 0 : index
      %c0_15 = arith.constant 0 : index
      %19 = vector.load %arg6[%c0_14, %c0_15] : memref<16x128xbf16, #tpu.memory_space<vmem>>, vector<16x128xbf16>
      tpu.vector_store %arg6[%c0_14, %c0_15], %18 {strides = array<i32>} : memref<16x128xbf16, #tpu.memory_space<vmem>>, vector<16x128xbf16>,
    } else {
    }
    return
  }
  func.func @transform_0(%arg0: i32, %arg1: i32, %arg2: i32) -> (i32, i32) {
    %c0_i32 = arith.constant 0 : i32
    return %arg0, %arg2 : i32, i32
  }
  func.func @transform_1(%arg0: i32, %arg1: i32, %arg2: i32) -> (i32, i32) {
    %c0_i32 = arith.constant 0 : i32
    return %arg2, %arg1 : i32, i32
  }
  func.func @transform_2(%arg0: i32, %arg1: i32, %arg2: i32) -> (i32, i32) {
    %c0_i32 = arith.constant 0 : i32
    %c0_i32_0 = arith.constant 0 : i32
    return %c0_i32, %arg1 : i32, i32
  }
  func.func @transform_3(%arg0: i32, %arg1: i32, %arg2: i32) -> (i32, i32) {
    %c0_i32 = arith.constant 0 : i32
    return %arg0, %arg1 : i32, i32
  }
}

module attributes {stable_mosaic.version = 11 : i64} {
  func.func @_matmul_bias_relu_kernel(%arg0: i32, %arg1: i32, %arg2: i32, %arg3: memref<16x640xbf16, #tpu.memory_space<vmem>>, %arg4: memref<640x128xbf16, #tpu.memory_space<vmem>>, %arg5: memref<1x128xf32, #tpu.memory_space<vmem>>, %arg6: memref<16x128xbf16, #tpu.memory_space<vmem>>, %arg7: memref<16x128xf32, #tpu.memory_space<vmem>>) attributes {dimension_semantics = [#tpu.dimension_semantics<parallel>, #tpu.dimension_semantics<parallel>, #tpu.dimension_semantics<arbitrary>], iteration_bounds = array<i64: 1, 2, 5>, scalar_prefetch = 0 : i64, scratch_operands = 1 : i64, tpu.core_type = #tpu.core_type<tc>, window_params = [{transform_indices = @transform_0, window_bounds = array<i64: 16, 640>}, {transform_indices = @transform_1, window_bounds = array<i64: 640, 128>}, {transform_indices = @transform_2, window_bounds = array<i64: 1, 128>}, {transform_indices = @transform_3, window_bounds = array<i64: 16, 128>}]} {
    %c0_i32 = arith.constant 0 : i32
    %0 = arith.cmpi eq, %arg2, %c0_i32 : i32
    %1 = arith.extui %0 : i1 to i32
    %c0_i32_0 = arith.constant 0 : i32
    %2 = arith.cmpi ne, %1, %c0_i32_0 : i32
    scf.if %2 {
      %cst_9 = arith.constant 0.000000e+00 : f32
      %12 = vector.broadcast %cst_9 : f32 to vector<16x128xf32>
      %c0_10 = arith.constant 0 : index
      %c0_11 = arith.constant 0 : index
      %13 = vector.load %arg7[%c0_10, %c0_11] : memref<16x128xf32, #tpu.memory_space<vmem>>, vector<16x128xf32>
      tpu.vector_store %arg7[%c0_10, %c0_11], %12 {strides = array<i32>} : memref<16x128xf32, #tpu.memory_space<vmem>>, vector<16x128xf32>,
    } else {
    }
    %c0 = arith.constant 0 : index
    %c0_1 = arith.constant 0 : index
    %3 = vector.load %arg7[%c0, %c0_1] : memref<16x128xf32, #tpu.memory_space<vmem>>, vector<16x128xf32>
    %c0_2 = arith.constant 0 : index
    %c0_3 = arith.constant 0 : index
    %4 = vector.load %arg3[%c0_2, %c0_3] : memref<16x640xbf16, #tpu.memory_space<vmem>>, vector<16x640xbf16>
    %c0_4 = arith.constant 0 : index
    %c0_5 = arith.constant 0 : index
    %5 = vector.load %arg4[%c0_4, %c0_5] : memref<640x128xbf16, #tpu.memory_space<vmem>>, vector<640x128xbf16>
    %cst = arith.constant dense<0.000000e+00> : vector<16x128xf32>
    %6 = tpu.matmul %4, %5, %cst {dimension_numbers = #tpu.dot_dimension_numbers<[1], [0], [0], [1], [0, 0, 1, 1], [], []>} : vector<16x640xbf16>, vector<640x128xbf16>, vector<16x128xf32> -> vector<16x128xf32>
    %7 = arith.addf %3, %6 : vector<16x128xf32>
    %c0_6 = arith.constant 0 : index
    %c0_7 = arith.constant 0 : index
    %8 = vector.load %arg7[%c0_6, %c0_7] : memref<16x128xf32, #tpu.memory_space<vmem>>, vector<16x128xf32>
    tpu.vector_store %arg7[%c0_6, %c0_7], %7 {strides = array<i32>} : memref<16x128xf32, #tpu.memory_space<vmem>>, vector<16x128xf32>,
    %c4_i32 = arith.constant 4 : i32
    %9 = arith.cmpi eq, %arg2, %c4_i32 : i32
    %10 = arith.extui %9 : i1 to i32
    %c0_i32_8 = arith.constant 0 : i32
    %11 = arith.cmpi ne, %10, %c0_i32_8 : i32
    scf.if %11 {
      %c0_9 = arith.constant 0 : index
      %c0_10 = arith.constant 0 : index
      %12 = vector.load %arg7[%c0_9, %c0_10] : memref<16x128xf32, #tpu.memory_space<vmem>>, vector<16x128xf32>
      %c0_11 = arith.constant 0 : index
      %c0_12 = arith.constant 0 : index
      %13 = vector.load %arg5[%c0_11, %c0_12] : memref<1x128xf32, #tpu.memory_space<vmem>>, vector<1x128xf32>
      %14 = vector.broadcast %13 : vector<1x128xf32> to vector<16x128xf32>
      %15 = arith.addf %12, %14 : vector<16x128xf32>
      %cst_13 = arith.constant 0.000000e+00 : f32
      %16 = vector.broadcast %cst_13 : f32 to vector<16x128xf32>
      %17 = arith.maximumf %15, %16 : vector<16x128xf32>
      %18 = arith.truncf %17 : vector<16x128xf32> to vector<16x128xbf16>
      %c0_14 = arith.constant 0 : index
      %c0_15 = arith.constant 0 : index
      %19 = vector.load %arg6[%c0_14, %c0_15] : memref<16x128xbf16, #tpu.memory_space<vmem>>, vector<16x128xbf16>
      tpu.vector_store %arg6[%c0_14, %c0_15], %18 {strides = array<i32>} : memref<16x128xbf16, #tpu.memory_space<vmem>>, vector<16x128xbf16>,
    } else {
    }
    return
  }
  func.func @transform_0(%arg0: i32, %arg1: i32, %arg2: i32) -> (i32, i32) {
    %c0_i32 = arith.constant 0 : i32
    return %arg0, %arg2 : i32, i32
  }
  func.func @transform_1(%arg0: i32, %arg1: i32, %arg2: i32) -> (i32, i32) {
    %c0_i32 = arith.constant 0 : i32
    return %arg2, %arg1 : i32, i32
  }
  func.func @transform_2(%arg0: i32, %arg1: i32, %arg2: i32) -> (i32, i32) {
    %c0_i32 = arith.constant 0 : i32
    %c0_i32_0 = arith.constant 0 : i32
    return %c0_i32, %arg1 : i32, i32
  }
  func.func @transform_3(%arg0: i32, %arg1: i32, %arg2: i32) -> (i32, i32) {
    %c0_i32 = arith.constant 0 : i32
    return %arg0, %arg1 : i32, i32
  }
}

module attributes {stable_mosaic.version = 11 : i64} {
  func.func @_matmul_bias_relu_kernel(%arg0: i32, %arg1: i32, %arg2: i32, %arg3: memref<16x768xbf16, #tpu.memory_space<vmem>>, %arg4: memref<768x128xbf16, #tpu.memory_space<vmem>>, %arg5: memref<1x128xf32, #tpu.memory_space<vmem>>, %arg6: memref<16x128xbf16, #tpu.memory_space<vmem>>, %arg7: memref<16x128xf32, #tpu.memory_space<vmem>>) attributes {dimension_semantics = [#tpu.dimension_semantics<parallel>, #tpu.dimension_semantics<parallel>, #tpu.dimension_semantics<arbitrary>], iteration_bounds = array<i64: 1, 2, 3>, scalar_prefetch = 0 : i64, scratch_operands = 1 : i64, tpu.core_type = #tpu.core_type<tc>, window_params = [{transform_indices = @transform_0, window_bounds = array<i64: 16, 768>}, {transform_indices = @transform_1, window_bounds = array<i64: 768, 128>}, {transform_indices = @transform_2, window_bounds = array<i64: 1, 128>}, {transform_indices = @transform_3, window_bounds = array<i64: 16, 128>}]} {
    %c0_i32 = arith.constant 0 : i32
    %0 = arith.cmpi eq, %arg2, %c0_i32 : i32
    %1 = arith.extui %0 : i1 to i32
    %c0_i32_0 = arith.constant 0 : i32
    %2 = arith.cmpi ne, %1, %c0_i32_0 : i32
    scf.if %2 {
      %cst_9 = arith.constant 0.000000e+00 : f32
      %12 = vector.broadcast %cst_9 : f32 to vector<16x128xf32>
      %c0_10 = arith.constant 0 : index
      %c0_11 = arith.constant 0 : index
      %13 = vector.load %arg7[%c0_10, %c0_11] : memref<16x128xf32, #tpu.memory_space<vmem>>, vector<16x128xf32>
      tpu.vector_store %arg7[%c0_10, %c0_11], %12 {strides = array<i32>} : memref<16x128xf32, #tpu.memory_space<vmem>>, vector<16x128xf32>,
    } else {
    }
    %c0 = arith.constant 0 : index
    %c0_1 = arith.constant 0 : index
    %3 = vector.load %arg7[%c0, %c0_1] : memref<16x128xf32, #tpu.memory_space<vmem>>, vector<16x128xf32>
    %c0_2 = arith.constant 0 : index
    %c0_3 = arith.constant 0 : index
    %4 = vector.load %arg3[%c0_2, %c0_3] : memref<16x768xbf16, #tpu.memory_space<vmem>>, vector<16x768xbf16>
    %c0_4 = arith.constant 0 : index
    %c0_5 = arith.constant 0 : index
    %5 = vector.load %arg4[%c0_4, %c0_5] : memref<768x128xbf16, #tpu.memory_space<vmem>>, vector<768x128xbf16>
    %cst = arith.constant dense<0.000000e+00> : vector<16x128xf32>
    %6 = tpu.matmul %4, %5, %cst {dimension_numbers = #tpu.dot_dimension_numbers<[1], [0], [0], [1], [0, 0, 1, 1], [], []>} : vector<16x768xbf16>, vector<768x128xbf16>, vector<16x128xf32> -> vector<16x128xf32>
    %7 = arith.addf %3, %6 : vector<16x128xf32>
    %c0_6 = arith.constant 0 : index
    %c0_7 = arith.constant 0 : index
    %8 = vector.load %arg7[%c0_6, %c0_7] : memref<16x128xf32, #tpu.memory_space<vmem>>, vector<16x128xf32>
    tpu.vector_store %arg7[%c0_6, %c0_7], %7 {strides = array<i32>} : memref<16x128xf32, #tpu.memory_space<vmem>>, vector<16x128xf32>,
    %c2_i32 = arith.constant 2 : i32
    %9 = arith.cmpi eq, %arg2, %c2_i32 : i32
    %10 = arith.extui %9 : i1 to i32
    %c0_i32_8 = arith.constant 0 : i32
    %11 = arith.cmpi ne, %10, %c0_i32_8 : i32
    scf.if %11 {
      %c0_9 = arith.constant 0 : index
      %c0_10 = arith.constant 0 : index
      %12 = vector.load %arg7[%c0_9, %c0_10] : memref<16x128xf32, #tpu.memory_space<vmem>>, vector<16x128xf32>
      %c0_11 = arith.constant 0 : index
      %c0_12 = arith.constant 0 : index
      %13 = vector.load %arg5[%c0_11, %c0_12] : memref<1x128xf32, #tpu.memory_space<vmem>>, vector<1x128xf32>
      %14 = vector.broadcast %13 : vector<1x128xf32> to vector<16x128xf32>
      %15 = arith.addf %12, %14 : vector<16x128xf32>
      %cst_13 = arith.constant 0.000000e+00 : f32
      %16 = vector.broadcast %cst_13 : f32 to vector<16x128xf32>
      %17 = arith.maximumf %15, %16 : vector<16x128xf32>
      %18 = arith.truncf %17 : vector<16x128xf32> to vector<16x128xbf16>
      %c0_14 = arith.constant 0 : index
      %c0_15 = arith.constant 0 : index
      %19 = vector.load %arg6[%c0_14, %c0_15] : memref<16x128xbf16, #tpu.memory_space<vmem>>, vector<16x128xbf16>
      tpu.vector_store %arg6[%c0_14, %c0_15], %18 {strides = array<i32>} : memref<16x128xbf16, #tpu.memory_space<vmem>>, vector<16x128xbf16>,
    } else {
    }
    return
  }
  func.func @transform_0(%arg0: i32, %arg1: i32, %arg2: i32) -> (i32, i32) {
    %c0_i32 = arith.constant 0 : i32
    return %arg0, %arg2 : i32, i32
  }
  func.func @transform_1(%arg0: i32, %arg1: i32, %arg2: i32) -> (i32, i32) {
    %c0_i32 = arith.constant 0 : i32
    return %arg2, %arg1 : i32, i32
  }
  func.func @transform_2(%arg0: i32, %arg1: i32, %arg2: i32) -> (i32, i32) {
    %c0_i32 = arith.constant 0 : i32
    %c0_i32_0 = arith.constant 0 : i32
    return %c0_i32, %arg1 : i32, i32
  }
  func.func @transform_3(%arg0: i32, %arg1: i32, %arg2: i32) -> (i32, i32) {
    %c0_i32 = arith.constant 0 : i32
    return %arg0, %arg1 : i32, i32
  }
}

module attributes {stable_mosaic.version = 11 : i64} {
  func.func @_matmul_bias_relu_kernel(%arg0: i32, %arg1: i32, %arg2: i32, %arg3: memref<16x640xbf16, #tpu.memory_space<vmem>>, %arg4: memref<640x256xbf16, #tpu.memory_space<vmem>>, %arg5: memref<1x256xf32, #tpu.memory_space<vmem>>, %arg6: memref<16x256xbf16, #tpu.memory_space<vmem>>, %arg7: memref<16x256xf32, #tpu.memory_space<vmem>>) attributes {dimension_semantics = [#tpu.dimension_semantics<parallel>, #tpu.dimension_semantics<parallel>, #tpu.dimension_semantics<arbitrary>], iteration_bounds = array<i64: 1, 2, 10>, scalar_prefetch = 0 : i64, scratch_operands = 1 : i64, tpu.core_type = #tpu.core_type<tc>, window_params = [{transform_indices = @transform_0, window_bounds = array<i64: 16, 640>}, {transform_indices = @transform_1, window_bounds = array<i64: 640, 256>}, {transform_indices = @transform_2, window_bounds = array<i64: 1, 256>}, {transform_indices = @transform_3, window_bounds = array<i64: 16, 256>}]} {
    %c0_i32 = arith.constant 0 : i32
    %0 = arith.cmpi eq, %arg2, %c0_i32 : i32
    %1 = arith.extui %0 : i1 to i32
    %c0_i32_0 = arith.constant 0 : i32
    %2 = arith.cmpi ne, %1, %c0_i32_0 : i32
    scf.if %2 {
      %cst_9 = arith.constant 0.000000e+00 : f32
      %12 = vector.broadcast %cst_9 : f32 to vector<16x256xf32>
      %c0_10 = arith.constant 0 : index
      %c0_11 = arith.constant 0 : index
      %13 = vector.load %arg7[%c0_10, %c0_11] : memref<16x256xf32, #tpu.memory_space<vmem>>, vector<16x256xf32>
      tpu.vector_store %arg7[%c0_10, %c0_11], %12 {strides = array<i32>} : memref<16x256xf32, #tpu.memory_space<vmem>>, vector<16x256xf32>,
    } else {
    }
    %c0 = arith.constant 0 : index
    %c0_1 = arith.constant 0 : index
    %3 = vector.load %arg7[%c0, %c0_1] : memref<16x256xf32, #tpu.memory_space<vmem>>, vector<16x256xf32>
    %c0_2 = arith.constant 0 : index
    %c0_3 = arith.constant 0 : index
    %4 = vector.load %arg3[%c0_2, %c0_3] : memref<16x640xbf16, #tpu.memory_space<vmem>>, vector<16x640xbf16>
    %c0_4 = arith.constant 0 : index
    %c0_5 = arith.constant 0 : index
    %5 = vector.load %arg4[%c0_4, %c0_5] : memref<640x256xbf16, #tpu.memory_space<vmem>>, vector<640x256xbf16>
    %cst = arith.constant dense<0.000000e+00> : vector<16x256xf32>
    %6 = tpu.matmul %4, %5, %cst {dimension_numbers = #tpu.dot_dimension_numbers<[1], [0], [0], [1], [0, 0, 1, 1], [], []>} : vector<16x640xbf16>, vector<640x256xbf16>, vector<16x256xf32> -> vector<16x256xf32>
    %7 = arith.addf %3, %6 : vector<16x256xf32>
    %c0_6 = arith.constant 0 : index
    %c0_7 = arith.constant 0 : index
    %8 = vector.load %arg7[%c0_6, %c0_7] : memref<16x256xf32, #tpu.memory_space<vmem>>, vector<16x256xf32>
    tpu.vector_store %arg7[%c0_6, %c0_7], %7 {strides = array<i32>} : memref<16x256xf32, #tpu.memory_space<vmem>>, vector<16x256xf32>,
    %c9_i32 = arith.constant 9 : i32
    %9 = arith.cmpi eq, %arg2, %c9_i32 : i32
    %10 = arith.extui %9 : i1 to i32
    %c0_i32_8 = arith.constant 0 : i32
    %11 = arith.cmpi ne, %10, %c0_i32_8 : i32
    scf.if %11 {
      %c0_9 = arith.constant 0 : index
      %c0_10 = arith.constant 0 : index
      %12 = vector.load %arg7[%c0_9, %c0_10] : memref<16x256xf32, #tpu.memory_space<vmem>>, vector<16x256xf32>
      %c0_11 = arith.constant 0 : index
      %c0_12 = arith.constant 0 : index
      %13 = vector.load %arg5[%c0_11, %c0_12] : memref<1x256xf32, #tpu.memory_space<vmem>>, vector<1x256xf32>
      %14 = vector.broadcast %13 : vector<1x256xf32> to vector<16x256xf32>
      %15 = arith.addf %12, %14 : vector<16x256xf32>
      %cst_13 = arith.constant 0.000000e+00 : f32
      %16 = vector.broadcast %cst_13 : f32 to vector<16x256xf32>
      %17 = arith.maximumf %15, %16 : vector<16x256xf32>
      %18 = arith.truncf %17 : vector<16x256xf32> to vector<16x256xbf16>
      %c0_14 = arith.constant 0 : index
      %c0_15 = arith.constant 0 : index
      %19 = vector.load %arg6[%c0_14, %c0_15] : memref<16x256xbf16, #tpu.memory_space<vmem>>, vector<16x256xbf16>
      tpu.vector_store %arg6[%c0_14, %c0_15], %18 {strides = array<i32>} : memref<16x256xbf16, #tpu.memory_space<vmem>>, vector<16x256xbf16>,
    } else {
    }
    return
  }
  func.func @transform_0(%arg0: i32, %arg1: i32, %arg2: i32) -> (i32, i32) {
    %c0_i32 = arith.constant 0 : i32
    return %arg0, %arg2 : i32, i32
  }
  func.func @transform_1(%arg0: i32, %arg1: i32, %arg2: i32) -> (i32, i32) {
    %c0_i32 = arith.constant 0 : i32
    return %arg2, %arg1 : i32, i32
  }
  func.func @transform_2(%arg0: i32, %arg1: i32, %arg2: i32) -> (i32, i32) {
    %c0_i32 = arith.constant 0 : i32
    %c0_i32_0 = arith.constant 0 : i32
    return %c0_i32, %arg1 : i32, i32
  }
  func.func @transform_3(%arg0: i32, %arg1: i32, %arg2: i32) -> (i32, i32) {
    %c0_i32 = arith.constant 0 : i32
    return %arg0, %arg1 : i32, i32
  }
}

module attributes {stable_mosaic.version = 11 : i64} {
  func.func @_matmul_bias_relu_kernel(%arg0: i32, %arg1: i32, %arg2: i32, %arg3: memref<16x768xbf16, #tpu.memory_space<vmem>>, %arg4: memref<768x256xbf16, #tpu.memory_space<vmem>>, %arg5: memref<1x256xf32, #tpu.memory_space<vmem>>, %arg6: memref<16x256xbf16, #tpu.memory_space<vmem>>, %arg7: memref<16x256xf32, #tpu.memory_space<vmem>>) attributes {dimension_semantics = [#tpu.dimension_semantics<parallel>, #tpu.dimension_semantics<parallel>, #tpu.dimension_semantics<arbitrary>], iteration_bounds = array<i64: 1, 2, 6>, scalar_prefetch = 0 : i64, scratch_operands = 1 : i64, tpu.core_type = #tpu.core_type<tc>, window_params = [{transform_indices = @transform_0, window_bounds = array<i64: 16, 768>}, {transform_indices = @transform_1, window_bounds = array<i64: 768, 256>}, {transform_indices = @transform_2, window_bounds = array<i64: 1, 256>}, {transform_indices = @transform_3, window_bounds = array<i64: 16, 256>}]} {
    %c0_i32 = arith.constant 0 : i32
    %0 = arith.cmpi eq, %arg2, %c0_i32 : i32
    %1 = arith.extui %0 : i1 to i32
    %c0_i32_0 = arith.constant 0 : i32
    %2 = arith.cmpi ne, %1, %c0_i32_0 : i32
    scf.if %2 {
      %cst_9 = arith.constant 0.000000e+00 : f32
      %12 = vector.broadcast %cst_9 : f32 to vector<16x256xf32>
      %c0_10 = arith.constant 0 : index
      %c0_11 = arith.constant 0 : index
      %13 = vector.load %arg7[%c0_10, %c0_11] : memref<16x256xf32, #tpu.memory_space<vmem>>, vector<16x256xf32>
      tpu.vector_store %arg7[%c0_10, %c0_11], %12 {strides = array<i32>} : memref<16x256xf32, #tpu.memory_space<vmem>>, vector<16x256xf32>,
    } else {
    }
    %c0 = arith.constant 0 : index
    %c0_1 = arith.constant 0 : index
    %3 = vector.load %arg7[%c0, %c0_1] : memref<16x256xf32, #tpu.memory_space<vmem>>, vector<16x256xf32>
    %c0_2 = arith.constant 0 : index
    %c0_3 = arith.constant 0 : index
    %4 = vector.load %arg3[%c0_2, %c0_3] : memref<16x768xbf16, #tpu.memory_space<vmem>>, vector<16x768xbf16>
    %c0_4 = arith.constant 0 : index
    %c0_5 = arith.constant 0 : index
    %5 = vector.load %arg4[%c0_4, %c0_5] : memref<768x256xbf16, #tpu.memory_space<vmem>>, vector<768x256xbf16>
    %cst = arith.constant dense<0.000000e+00> : vector<16x256xf32>
    %6 = tpu.matmul %4, %5, %cst {dimension_numbers = #tpu.dot_dimension_numbers<[1], [0], [0], [1], [0, 0, 1, 1], [], []>} : vector<16x768xbf16>, vector<768x256xbf16>, vector<16x256xf32> -> vector<16x256xf32>
    %7 = arith.addf %3, %6 : vector<16x256xf32>
    %c0_6 = arith.constant 0 : index
    %c0_7 = arith.constant 0 : index
    %8 = vector.load %arg7[%c0_6, %c0_7] : memref<16x256xf32, #tpu.memory_space<vmem>>, vector<16x256xf32>
    tpu.vector_store %arg7[%c0_6, %c0_7], %7 {strides = array<i32>} : memref<16x256xf32, #tpu.memory_space<vmem>>, vector<16x256xf32>,
    %c5_i32 = arith.constant 5 : i32
    %9 = arith.cmpi eq, %arg2, %c5_i32 : i32
    %10 = arith.extui %9 : i1 to i32
    %c0_i32_8 = arith.constant 0 : i32
    %11 = arith.cmpi ne, %10, %c0_i32_8 : i32
    scf.if %11 {
      %c0_9 = arith.constant 0 : index
      %c0_10 = arith.constant 0 : index
      %12 = vector.load %arg7[%c0_9, %c0_10] : memref<16x256xf32, #tpu.memory_space<vmem>>, vector<16x256xf32>
      %c0_11 = arith.constant 0 : index
      %c0_12 = arith.constant 0 : index
      %13 = vector.load %arg5[%c0_11, %c0_12] : memref<1x256xf32, #tpu.memory_space<vmem>>, vector<1x256xf32>
      %14 = vector.broadcast %13 : vector<1x256xf32> to vector<16x256xf32>
      %15 = arith.addf %12, %14 : vector<16x256xf32>
      %cst_13 = arith.constant 0.000000e+00 : f32
      %16 = vector.broadcast %cst_13 : f32 to vector<16x256xf32>
      %17 = arith.maximumf %15, %16 : vector<16x256xf32>
      %18 = arith.truncf %17 : vector<16x256xf32> to vector<16x256xbf16>
      %c0_14 = arith.constant 0 : index
      %c0_15 = arith.constant 0 : index
      %19 = vector.load %arg6[%c0_14, %c0_15] : memref<16x256xbf16, #tpu.memory_space<vmem>>, vector<16x256xbf16>
      tpu.vector_store %arg6[%c0_14, %c0_15], %18 {strides = array<i32>} : memref<16x256xbf16, #tpu.memory_space<vmem>>, vector<16x256xbf16>,
    } else {
    }
    return
  }
  func.func @transform_0(%arg0: i32, %arg1: i32, %arg2: i32) -> (i32, i32) {
    %c0_i32 = arith.constant 0 : i32
    return %arg0, %arg2 : i32, i32
  }
  func.func @transform_1(%arg0: i32, %arg1: i32, %arg2: i32) -> (i32, i32) {
    %c0_i32 = arith.constant 0 : i32
    return %arg2, %arg1 : i32, i32
  }
  func.func @transform_2(%arg0: i32, %arg1: i32, %arg2: i32) -> (i32, i32) {
    %c0_i32 = arith.constant 0 : i32
    %c0_i32_0 = arith.constant 0 : i32
    return %c0_i32, %arg1 : i32, i32
  }
  func.func @transform_3(%arg0: i32, %arg1: i32, %arg2: i32) -> (i32, i32) {
    %c0_i32 = arith.constant 0 : i32
    return %arg0, %arg1 : i32, i32
  }
}

</mosaic_0001>

<bundles_post_ra>
// kernel: perceptual_forward.18
= control target key start
LH: loop header
LB: loop body
LE: loop exit
PB: predicated region body
PF: predicated region fallthrough
CT: control target
= control target key end

     0   :  { %s1499_s12 = smov 0   ;;  %s1501_s13 = smov 0   ;;  %s1636_s0 = inlined_call_operand.vmem [shape: bf16[512,128], index: 0, kind: input, shape index: {}]   ;;  %s1637_s1 = inlined_call_operand.vmem [shape: bf16[128,128], index: 1, kind: input, shape index: {}]   ;;  %s1638_s2 = inlined_call_operand.vmem [shape: f32[1,128], index: 2, kind: input, shape index: {}]   ;;  %s1639_s3 = inlined_call_operand.vmem [shape: bf16[512,128], index: 3, kind: output, shape index: {}]  }
   0x1   :  { %s1503_s14 = smov 0  }
   0x2 LB: > { %s32_s15 = sadd.s32 1, %s1473_s13  ;;  %p1128_p0 = scmp.ge.s32.totalorder %s1477_s14, 1  ;;  %s1477_s14 = sphi %s1503_s14, %s13_s14   ;;  %s1473_s13 = sphi %s1501_s13, %s1641_s13   ;;  %s1469_s12 = sphi %s1499_s12, %s1640_s12  }
   0x3   : > { %p34_p1 = scmp.ge.s32.totalorder %s32_s15, 2  ;;  %p188_p2 = scmp.lt.s32.totalorder %s1477_s14, 3 }
   0x5   : > { %s1643_s15 = smov (%p34_p1, %s32_s15), 0  ;;  %p189_p3 = pnand %p1128_p0, %p188_p2 }
   0x6   : > { %s1129_s18 = sshll.u32 (!%p189_p3), %s1469_s12, 5 }
   0x7   : > { %192 = sbr.rel (%p189_p3) target bundleno = 275 (0x113), region = 32  ;;  %p230_p4 = scmp.lt.s32.totalorder (!%p189_p3), %s1129_s18, 63 }
   0xc   : > { %v1431_v0 = vld [vmem:[%s1637_s1 + $0x38] sm:$0xff]   ;;  %v1432_v1 = vld [vmem:[%s1637_s1 + $0x30] sm:$0xff]   ;;  %s1645_s18 = smov (!%p230_p4, %s1129_s18), 63  ;;  %v1433_v2 = vld [vmem:[%s1637_s1 + $0x28] sm:$0xff]  }
   0xd   : > { %1343 = vmatprep.subr.bf16.mxu0 %v1431_v0  ;;  %1391 = vmatprep.subr.bf16.mxu1 %v1431_v0  ;;  %s1130_s23 = sshll.u32 %s1645_s18, 2  ;;  %v1434_v3 = vld [vmem:[%s1637_s1 + $0x20] sm:$0xff]   ;;  %v1435_v6 = vld [vmem:[%s1637_s1 + $0x18] sm:$0xff]   ;;  %v1436_v7 = vld [vmem:[%s1637_s1 + $0x10] sm:$0xff]  }
   0xe   : > { %1344 = vmatpush3.bf16.msra.mxu0 %v1431_v0  ;;  %1399 = vmatpush3.bf16.msra.mxu1 %v1431_v0  ;;  %s1534_s26 = scalar_lea.vmem %s1636_s0, %s1130_s23  ;;  %v1437_v8 = vld [vmem:[%s1637_s1 + $0x8] sm:$0xff]   ;;  %v1438_v9 = vld [vmem:[%s1637_s1] sm:$0xff]   ;;  %s1585_s17 = scalar_lea.vmem %s1639_s3, %s1130_s23 }
   0xf   : > { %1345 = vmatprep.subr.bf16.mxu0 %v1432_v1  ;;  %1392 = vmatprep.subr.bf16.mxu1 %v1432_v1  ;;  %v1439_v4 = vld [vmem:[%s1534_s26] sm:$0xff]   ;;  %v1441_v10 = vld [vmem:[%s1534_s26 + $0x8] sm:$0xff]   ;;  %v1443_v12 = vld [vmem:[%s1534_s26 + $0x10] sm:$0xff]  }
  0x10   : > { %v1440_v5 = vld [vmem:[%s1534_s26 + $0x40] sm:$0xff]   ;;  %1359 = vmatprep.mubr.bf16.mxu0 %v1439_v4  ;;  %v1442_v11 = vld [vmem:[%s1534_s26 + $0x48] sm:$0xff]   ;;  %v1444_v13 = vld [vmem:[%s1534_s26 + $0x50] sm:$0xff]  }
  0x11   : > { %1375 = vmatprep.mubr.bf16.mxu1 %v1440_v5  ;;  %v1445_v14 = vld [vmem:[%s1534_s26 + $0x18] sm:$0xff]   ;;  %v1447_v16 = vld [vmem:[%s1534_s26 + $0x20] sm:$0xff]   ;;  %v1449_v18 = vld [vmem:[%s1534_s26 + $0x28] sm:$0xff]  }
  0x12   : > { %1346 = vmatpush3.bf16.msra.mxu0 %v1432_v1  ;;  %1400 = vmatpush3.bf16.msra.mxu1 %v1432_v1  ;;  %v1446_v15 = vld [vmem:[%s1534_s26 + $0x58] sm:$0xff]   ;;  %v1448_v17 = vld [vmem:[%s1534_s26 + $0x60] sm:$0xff]   ;;  %v1450_v19 = vld [vmem:[%s1534_s26 + $0x68] sm:$0xff]  }
  0x13   : > { %1347 = vmatprep.subr.bf16.mxu0 %v1433_v2  ;;  %1393 = vmatprep.subr.bf16.mxu1 %v1433_v2  ;;  %v1451_v20 = vld [vmem:[%s1534_s26 + $0x30] sm:$0xff]   ;;  %v1453_v22 = vld [vmem:[%s1534_s26 + $0x38] sm:$0xff]   ;;  %v1570_v24 = vld [vmem:[%s1638_s2] ss:$0 sm:$0xff] }
  0x14   : > { %v1452_v21 = vld [vmem:[%s1534_s26 + $0x70] sm:$0xff]   ;;  %v1454_v23 = vld [vmem:[%s1534_s26 + $0x78] sm:$0xff]  }
  0x16   : > { %1348 = vmatpush3.bf16.msra.mxu0 %v1433_v2  ;;  %1401 = vmatpush3.bf16.msra.mxu1 %v1433_v2 }
  0x17   : > { %1349 = vmatprep.subr.bf16.mxu0 %v1434_v3  ;;  %1394 = vmatprep.subr.bf16.mxu1 %v1434_v3 }
  0x1a   : > { %1350 = vmatpush3.bf16.msra.mxu0 %v1434_v3  ;;  %1402 = vmatpush3.bf16.msra.mxu1 %v1434_v3 }
  0x1b   : > { %1351 = vmatprep.subr.bf16.mxu0 %v1435_v6  ;;  %1395 = vmatprep.subr.bf16.mxu1 %v1435_v6 }
  0x1e   : > { %1352 = vmatpush3.bf16.msra.mxu0 %v1435_v6  ;;  %1403 = vmatpush3.bf16.msra.mxu1 %v1435_v6 }
  0x1f   : > { %1353 = vmatprep.subr.bf16.mxu0 %v1436_v7  ;;  %1396 = vmatprep.subr.bf16.mxu1 %v1436_v7 }
  0x22   : > { %1354 = vmatpush3.bf16.msra.mxu0 %v1436_v7  ;;  %1404 = vmatpush3.bf16.msra.mxu1 %v1436_v7 }
  0x23   : > { %1355 = vmatprep.subr.bf16.mxu0 %v1437_v8  ;;  %1397 = vmatprep.subr.bf16.mxu1 %v1437_v8 }
  0x26   : > { %1356 = vmatpush3.bf16.msra.mxu0 %v1437_v8  ;;  %1405 = vmatpush3.bf16.msra.mxu1 %v1437_v8 }
  0x27   : > { %1357 = vmatprep.subr.bf16.mxu0 %v1438_v9  ;;  %1398 = vmatprep.subr.bf16.mxu1 %v1438_v9 }
  0x2a   : > { %1358 = vmatpush3.bf16.msra.mxu0 %v1438_v9  ;;  %1406 = vmatpush3.bf16.msra.mxu1 %v1438_v9 }
  0x2d   : > { %1360 = vmatmul.mubr.bf16.vlgmr.msra.gmra.mxu0 %v1441_v10  ;;  %1376 = vmatmul.mubr.bf16.vlgmr.msra.gmra.mxu1 %v1442_v11 }
  0x2e   : > { %1363 = vmatprep.mubr.bf16.mxu0 %v1443_v12  ;;  %1379 = vmatprep.mubr.bf16.mxu1 %v1444_v13 }
  0x35   : > { %1364 = vmatmul.mubr.bf16.gmra.mxu0 %v1445_v14  ;;  %1380 = vmatmul.mubr.bf16.gmra.mxu1 %v1446_v15 }
  0x36   : > { %1367 = vmatprep.mubr.bf16.mxu0 %v1447_v16  ;;  %1383 = vmatprep.mubr.bf16.mxu1 %v1448_v17 }
  0x3d   : > { %1368 = vmatmul.mubr.bf16.gmra.mxu0 %v1449_v18  ;;  %1384 = vmatmul.mubr.bf16.gmra.mxu1 %v1450_v19 }
  0x3e   : > { %1371 = vmatprep.mubr.bf16.mxu0 %v1451_v20  ;;  %1387 = vmatprep.mubr.bf16.mxu1 %v1452_v21 }
  0x45   : > { %1372 = vmatmul.mubr.bf16.gmra.mxu0 %v1453_v22  ;;  %1388 = vmatmul.mubr.bf16.gmra.mxu1 %v1454_v23 }
  0xed   : > { %v1361_v25 = vpop.f32.mrf.mxu0  ;;  %v1377_v26 = vpop.f32.mrf.mxu1 }
  0xee   : > { %v789_v27 = vadd.f32 %v1361_v25, %v1570_v24  ;;  %v805_v28 = vadd.f32 %v1377_v26, %v1570_v24 }
  0xef   : > { %v554_v29 = vpop.f32.mrf.mxu0  ;;  %v618_v30 = vpop.f32.mrf.mxu1 }
  0xf0   : > { %v787_v31 = vadd.f32 %v1570_v24, %v554_v29  ;;  %v803_v32 = vadd.f32 %v1570_v24, %v618_v30  ;;  %v821_v37 = vmax.f32 %v789_v27, 0.0  ;;  %v837_v38 = vmax.f32 %v805_v28, 0.0 }
  0xf1   : > { %v1362_v33 = vpop.f32.mrf.mxu0  ;;  %v1378_v34 = vpop.f32.mrf.mxu1 }
  0xf2   : > { %v790_v35 = vadd.f32 %v1362_v33, %v1570_v24  ;;  %v806_v36 = vadd.f32 %v1378_v34, %v1570_v24  ;;  %v819_v45 = vmax.f32 %v787_v31, 0.0  ;;  %v835_v46 = vmax.f32 %v803_v32, 0.0 }
  0xf3   : > { %v557_v39 = vpop.f32.mrf.mxu0  ;;  %v621_v40 = vpop.f32.mrf.mxu1 }
  0xf4   : > { %v822_v41 = vmax.f32 %v790_v35, 0.0  ;;  %v838_v42 = vmax.f32 %v806_v36, 0.0  ;;  %v788_v43 = vadd.f32 %v1570_v24, %v557_v39  ;;  %v804_v44 = vadd.f32 %v1570_v24, %v621_v40 }
  0xf5   : > { %v1365_v47 = vpop.f32.mrf.mxu0  ;;  %v1381_v48 = vpop.f32.mrf.mxu1 }
  0xf6   : > { %v1232_v49 = vpack.c.bf16 %v822_v41, %v821_v37  ;;  %v1272_v50 = vpack.c.bf16 %v838_v42, %v837_v38  ;;  %v820_v51 = vmax.f32 %v788_v43, 0.0  ;;  %v836_v52 = vmax.f32 %v804_v44, 0.0 }
  0xf7   : > { %v793_v53 = vadd.f32 %v1365_v47, %v1570_v24  ;;  %v809_v54 = vadd.f32 %v1381_v48, %v1570_v24  ;;  %v570_v55 = vpop.f32.mrf.mxu0  ;;  %v634_v56 = vpop.f32.mrf.mxu1 }
  0xf8   : > { %1304 = vst [vmem:[%s1585_s17 + $0x8] sm:$0xff] %v1232_v49   ;;  %1312 = vst [vmem:[%s1585_s17 + $0x48] sm:$0xff] %v1272_v50   ;;  %v1227_v57 = vpack.c.bf16 %v820_v51, %v819_v45  ;;  %v1267_v58 = vpack.c.bf16 %v836_v52, %v835_v46  ;;  %v791_v59 = vadd.f32 %v1570_v24, %v570_v55 }
  0xf9   : > { %v807_v60 = vadd.f32 %v1570_v24, %v634_v56  ;;  %v1366_v61 = vpop.f32.mrf.mxu0  ;;  %v1382_v62 = vpop.f32.mrf.mxu1  ;;  %v825_v1 = vmax.f32 %v793_v53, 0.0  ;;  %v841_v2 = vmax.f32 %v809_v54, 0.0 }
  0xfa   : > { %1228 = vst [vmem:[%s1585_s17] sm:$0xff] %v1227_v57   ;;  %1311 = vst [vmem:[%s1585_s17 + $0x40] sm:$0xff] %v1267_v58   ;;  %v794_v63 = vadd.f32 %v1366_v61, %v1570_v24  ;;  %v810_v0 = vadd.f32 %v1382_v62, %v1570_v24  ;;  %v823_v9 = vmax.f32 %v791_v59, 0.0 }
  0xfb   : > { %v573_v3 = vpop.f32.mrf.mxu0  ;;  %v637_v4 = vpop.f32.mrf.mxu1  ;;  %v839_v10 = vmax.f32 %v807_v60, 0.0 }
  0xfc   : > { %v826_v5 = vmax.f32 %v794_v63, 0.0  ;;  %v842_v6 = vmax.f32 %v810_v0, 0.0  ;;  %v792_v7 = vadd.f32 %v1570_v24, %v573_v3  ;;  %v808_v8 = vadd.f32 %v1570_v24, %v637_v4 }
  0xfd   : > { %v1369_v11 = vpop.f32.mrf.mxu0  ;;  %v1385_v12 = vpop.f32.mrf.mxu1 }
  0xfe   : > { %v1242_v13 = vpack.c.bf16 %v826_v5, %v825_v1  ;;  %v1282_v14 = vpack.c.bf16 %v842_v6, %v841_v2  ;;  %v824_v15 = vmax.f32 %v792_v7, 0.0  ;;  %v840_v16 = vmax.f32 %v808_v8, 0.0 }
  0xff   : > { %v797_v17 = vadd.f32 %v1369_v11, %v1570_v24  ;;  %v813_v18 = vadd.f32 %v1385_v12, %v1570_v24  ;;  %v586_v19 = vpop.f32.mrf.mxu0  ;;  %v650_v20 = vpop.f32.mrf.mxu1 }
 0x100   : > { %1306 = vst [vmem:[%s1585_s17 + $0x18] sm:$0xff] %v1242_v13   ;;  %1314 = vst [vmem:[%s1585_s17 + $0x58] sm:$0xff] %v1282_v14   ;;  %v1237_v21 = vpack.c.bf16 %v824_v15, %v823_v9  ;;  %v1277_v22 = vpack.c.bf16 %v840_v16, %v839_v10  ;;  %v795_v23 = vadd.f32 %v1570_v24, %v586_v19 }
 0x101   : > { %v811_v25 = vadd.f32 %v1570_v24, %v650_v20  ;;  %v1370_v26 = vpop.f32.mrf.mxu0  ;;  %v1386_v27 = vpop.f32.mrf.mxu1  ;;  %v829_v30 = vmax.f32 %v797_v17, 0.0  ;;  %v845_v31 = vmax.f32 %v813_v18, 0.0 }
 0x102   : > { %1305 = vst [vmem:[%s1585_s17 + $0x10] sm:$0xff] %v1237_v21   ;;  %1313 = vst [vmem:[%s1585_s17 + $0x50] sm:$0xff] %v1277_v22   ;;  %v798_v28 = vadd.f32 %v1370_v26, %v1570_v24  ;;  %v814_v29 = vadd.f32 %v1386_v27, %v1570_v24  ;;  %v827_v38 = vmax.f32 %v795_v23, 0.0 }
 0x103   : > { %v589_v32 = vpop.f32.mrf.mxu0  ;;  %v653_v33 = vpop.f32.mrf.mxu1  ;;  %v843_v39 = vmax.f32 %v811_v25, 0.0 }
 0x104   : > { %v830_v34 = vmax.f32 %v798_v28, 0.0  ;;  %v846_v35 = vmax.f32 %v814_v29, 0.0  ;;  %v796_v36 = vadd.f32 %v1570_v24, %v589_v32  ;;  %v812_v37 = vadd.f32 %v1570_v24, %v653_v33 }
 0x105   : > { %v1373_v40 = vpop.f32.mrf.mxu0  ;;  %v1389_v41 = vpop.f32.mrf.mxu1 }
 0x106   : > { %v1252_v42 = vpack.c.bf16 %v830_v34, %v829_v30  ;;  %v1292_v43 = vpack.c.bf16 %v846_v35, %v845_v31  ;;  %v828_v44 = vmax.f32 %v796_v36, 0.0  ;;  %v844_v45 = vmax.f32 %v812_v37, 0.0 }
 0x107   : > { %v801_v46 = vadd.f32 %v1373_v40, %v1570_v24  ;;  %v817_v47 = vadd.f32 %v1389_v41, %v1570_v24  ;;  %v602_v48 = vpop.f32.mrf.mxu0  ;;  %v666_v49 = vpop.f32.mrf.mxu1 }
 0x108   : > { %1308 = vst [vmem:[%s1585_s17 + $0x28] sm:$0xff] %v1252_v42   ;;  %1316 = vst [vmem:[%s1585_s17 + $0x68] sm:$0xff] %v1292_v43   ;;  %v1247_v50 = vpack.c.bf16 %v828_v44, %v827_v38  ;;  %v1287_v51 = vpack.c.bf16 %v844_v45, %v843_v39  ;;  %v799_v52 = vadd.f32 %v1570_v24, %v602_v48 }
 0x109   : > { %v815_v53 = vadd.f32 %v1570_v24, %v666_v49  ;;  %v1374_v54 = vpop.f32.mrf.mxu0  ;;  %v1390_v55 = vpop.f32.mrf.mxu1  ;;  %v833_v58 = vmax.f32 %v801_v46, 0.0  ;;  %v849_v59 = vmax.f32 %v817_v47, 0.0 }
 0x10a   : > { %1307 = vst [vmem:[%s1585_s17 + $0x20] sm:$0xff] %v1247_v50   ;;  %1315 = vst [vmem:[%s1585_s17 + $0x60] sm:$0xff] %v1287_v51   ;;  %v802_v56 = vadd.f32 %v1374_v54, %v1570_v24  ;;  %v818_v57 = vadd.f32 %v1390_v55, %v1570_v24  ;;  %v831_v2 = vmax.f32 %v799_v52, 0.0 }
 0x10b   : > { %v605_v60 = vpop.f32.mrf.mxu0  ;;  %v669_v61 = vpop.f32.mrf.mxu1  ;;  %v847_v3 = vmax.f32 %v815_v53, 0.0 }
 0x10c   : > { %v834_v62 = vmax.f32 %v802_v56, 0.0  ;;  %v850_v63 = vmax.f32 %v818_v57, 0.0  ;;  %v800_v0 = vadd.f32 %v1570_v24, %v605_v60  ;;  %v816_v1 = vadd.f32 %v1570_v24, %v669_v61 }
 0x10e   : > { %v1262_v4 = vpack.c.bf16 %v834_v62, %v833_v58  ;;  %v1302_v5 = vpack.c.bf16 %v850_v63, %v849_v59  ;;  %v832_v6 = vmax.f32 %v800_v0, 0.0  ;;  %v848_v7 = vmax.f32 %v816_v1, 0.0 }
 0x110   : > { %1310 = vst [vmem:[%s1585_s17 + $0x38] sm:$0xff] %v1262_v4   ;;  %1318 = vst [vmem:[%s1585_s17 + $0x78] sm:$0xff] %v1302_v5   ;;  %v1257_v8 = vpack.c.bf16 %v832_v6, %v831_v2  ;;  %v1297_v9 = vpack.c.bf16 %v848_v7, %v847_v3 }
 0x112   : > { %1309 = vst [vmem:[%s1585_s17 + $0x30] sm:$0xff] %v1257_v8   ;;  %1317 = vst [vmem:[%s1585_s17 + $0x70] sm:$0xff] %v1297_v9  }
 0x113 PF: > { %s13_s14 = sadd.s32 1, %s1477_s14   ;;  %s1640_s12 = smov %s1473_s13 }
 0x114   : > { %p10_p5 = scmp.ge.s32.totalorder %s13_s14, 4   ;;  %s1641_s13 = smov %s1643_s15 }
 0x116   :  { %12 = sbr.rel (!%p10_p5) target bundleno = 2 (0x2), region = 76 }

// kernel: perceptual_forward.19
= control target key start
LH: loop header
LB: loop body
LE: loop exit
PB: predicated region body
PF: predicated region fallthrough
CT: control target
= control target key end

     0   :  { %s1744_s12 = smov 0   ;;  %s1746_s13 = smov 0   ;;  %s1918_s0 = inlined_call_operand.vmem [shape: bf16[512,256], index: 0, kind: input, shape index: {}]   ;;  %s1919_s1 = inlined_call_operand.vmem [shape: bf16[256,128], index: 1, kind: input, shape index: {}]   ;;  %s1920_s2 = inlined_call_operand.vmem [shape: f32[1,128], index: 2, kind: input, shape index: {}]   ;;  %s1921_s3 = inlined_call_operand.vmem [shape: bf16[512,128], index: 3, kind: output, shape index: {}]  }
   0x1   :  { %s1748_s14 = smov 0  }
   0x2 LB: > { %s32_s15 = sadd.s32 1, %s1718_s13  ;;  %p1267_p0 = scmp.ge.s32.totalorder %s1722_s14, 1  ;;  %s1722_s14 = sphi %s1748_s14, %s13_s14   ;;  %s1718_s13 = sphi %s1746_s13, %s1923_s13   ;;  %s1714_s12 = sphi %s1744_s12, %s1922_s12  }
   0x3   : > { %p34_p1 = scmp.ge.s32.totalorder %s32_s15, 2  ;;  %p191_p2 = scmp.lt.s32.totalorder %s1722_s14, 3 }
   0x5   : > { %s1925_s15 = smov (%p34_p1, %s32_s15), 0  ;;  %p192_p3 = pnand %p1267_p0, %p191_p2 }
   0x6   : > { %s1268_s18 = sshll.u32 (!%p192_p3), %s1714_s12, 5 }
   0x7   : > { %195 = sbr.rel (%p192_p3) target bundleno = 309 (0x135), region = 32  ;;  %p236_p4 = scmp.lt.s32.totalorder (!%p192_p3), %s1268_s18, 63 }
   0xc   : > { %v1636_v0 = vld [vmem:[%s1919_s1 + $0x78] sm:$0xff]   ;;  %v1638_v2 = vld [vmem:[%s1919_s1 + $0x70] sm:$0xff]   ;;  %v1640_v4 = vld [vmem:[%s1919_s1 + $0x68] sm:$0xff]   ;;  %s1927_s18 = smov (!%p236_p4, %s1268_s18), 63 }
   0xd   : > { %v1637_v1 = vld [vmem:[%s1919_s1 + $0x38] sm:$0xff]   ;;  %1484 = vmatprep.subr.bf16.mxu0 %v1636_v0  ;;  %1596 = vmatprep.subr.bf16.mxu1 %v1636_v0  ;;  %v1639_v3 = vld [vmem:[%s1919_s1 + $0x30] sm:$0xff]   ;;  %v1641_v5 = vld [vmem:[%s1919_s1 + $0x28] sm:$0xff]   ;;  %s1356_s6 = sshll.u32 %s1927_s18, 3  ;;  %s1272_s5 = sshll.u32 %s1927_s18, 2 }
   0xe   : > { %1485 = vmatpush3.bf16.msra.mxu0 %v1637_v1  ;;  %1604 = vmatpush3.bf16.msra.mxu1 %v1637_v1  ;;  %v1642_v6 = vld [vmem:[%s1919_s1 + $0x60] sm:$0xff]   ;;  %v1644_v8 = vld [vmem:[%s1919_s1 + $0x58] sm:$0xff]   ;;  %s1795_s11 = scalar_lea.vmem %s1918_s0, %s1356_s6  ;;  %v1646_v10 = vld [vmem:[%s1919_s1 + $0x50] sm:$0xff]   ;;  %s1863_s8 = scalar_lea.vmem %s1921_s3, %s1272_s5 }
   0xf   : > { %1486 = vmatprep.subr.bf16.mxu0 %v1638_v2  ;;  %1597 = vmatprep.subr.bf16.mxu1 %v1638_v2  ;;  %v1643_v7 = vld [vmem:[%s1919_s1 + $0x20] sm:$0xff]   ;;  %v1645_v9 = vld [vmem:[%s1919_s1 + $0x18] sm:$0xff]   ;;  %v1647_v13 = vld [vmem:[%s1919_s1 + $0x10] sm:$0xff]  }
  0x10   : > { %v1654_v11 = vld [vmem:[%s1795_s11 + $0x4] ss:$8 sps:$4 sm:$0xff]   ;;  %v1652_v18 = vld [vmem:[%s1795_s11] ss:$8 sps:$4 sm:$0xff]   ;;  %v1658_v20 = vld [vmem:[%s1795_s11 + $0x14] ss:$8 sps:$4 sm:$0xff]  }
  0x11   : > { %v1657_v12 = vld [vmem:[%s1795_s11 + $0x84] ss:$8 sps:$4 sm:$0xff]   ;;  %688 = vmatprep.mubr.bf16.mxu0 %v1654_v11  ;;  %v1655_v19 = vld [vmem:[%s1795_s11 + $0x80] ss:$8 sps:$4 sm:$0xff]   ;;  %v1660_v21 = vld [vmem:[%s1795_s11 + $0x94] ss:$8 sps:$4 sm:$0xff]  }
  0x12   : > { %1487 = vmatpush3.bf16.msra.mxu0 %v1639_v3  ;;  %1605 = vmatpush3.bf16.msra.mxu1 %v1639_v3  ;;  %v1648_v14 = vld [vmem:[%s1919_s1 + $0x48] sm:$0xff]   ;;  %v1650_v16 = vld [vmem:[%s1919_s1 + $0x40] sm:$0xff]   ;;  %v1662_v22 = vld [vmem:[%s1795_s11 + $0x10] ss:$8 sps:$4 sm:$0xff]  }
  0x13   : > { %1488 = vmatprep.subr.bf16.mxu0 %v1640_v4  ;;  %1598 = vmatprep.subr.bf16.mxu1 %v1640_v4  ;;  %v1649_v15 = vld [vmem:[%s1919_s1 + $0x8] sm:$0xff]   ;;  %v1651_v17 = vld [vmem:[%s1919_s1] sm:$0xff]   ;;  %v1663_v23 = vld [vmem:[%s1795_s11 + $0x90] ss:$8 sps:$4 sm:$0xff]  }
  0x14   : > { %752 = vmatprep.mubr.bf16.mxu1 %v1657_v12  ;;  %v1664_v24 = vld [vmem:[%s1795_s11 + $0x24] ss:$8 sps:$4 sm:$0xff]   ;;  %v1668_v26 = vld [vmem:[%s1795_s11 + $0x20] ss:$8 sps:$4 sm:$0xff]   ;;  %v1670_v28 = vld [vmem:[%s1795_s11 + $0x34] ss:$8 sps:$4 sm:$0xff]  }
  0x15   : > { %v1666_v25 = vld [vmem:[%s1795_s11 + $0xa4] ss:$8 sps:$4 sm:$0xff]   ;;  %v1669_v27 = vld [vmem:[%s1795_s11 + $0xa0] ss:$8 sps:$4 sm:$0xff]   ;;  %v1672_v29 = vld [vmem:[%s1795_s11 + $0xb4] ss:$8 sps:$4 sm:$0xff]  }
  0x16   : > { %1489 = vmatpush3.bf16.msra.mxu0 %v1641_v5  ;;  %1606 = vmatpush3.bf16.msra.mxu1 %v1641_v5  ;;  %v1674_v30 = vld [vmem:[%s1795_s11 + $0x30] ss:$8 sps:$4 sm:$0xff]   ;;  %v1676_v32 = vld [vmem:[%s1795_s11 + $0x44] ss:$8 sps:$4 sm:$0xff]   ;;  %v1680_v34 = vld [vmem:[%s1795_s11 + $0x40] ss:$8 sps:$4 sm:$0xff]  }
  0x17   : > { %1490 = vmatprep.subr.bf16.mxu0 %v1642_v6  ;;  %1599 = vmatprep.subr.bf16.mxu1 %v1642_v6  ;;  %v1675_v31 = vld [vmem:[%s1795_s11 + $0xb0] ss:$8 sps:$4 sm:$0xff]   ;;  %v1678_v33 = vld [vmem:[%s1795_s11 + $0xc4] ss:$8 sps:$4 sm:$0xff]   ;;  %v1681_v35 = vld [vmem:[%s1795_s11 + $0xc0] ss:$8 sps:$4 sm:$0xff]  }
  0x18   : > { %v1682_v36 = vld [vmem:[%s1795_s11 + $0x54] ss:$8 sps:$4 sm:$0xff]   ;;  %v1686_v38 = vld [vmem:[%s1795_s11 + $0x50] ss:$8 sps:$4 sm:$0xff]   ;;  %v1688_v40 = vld [vmem:[%s1795_s11 + $0x64] ss:$8 sps:$4 sm:$0xff]  }
  0x19   : > { %v1684_v37 = vld [vmem:[%s1795_s11 + $0xd4] ss:$8 sps:$4 sm:$0xff]   ;;  %v1687_v39 = vld [vmem:[%s1795_s11 + $0xd0] ss:$8 sps:$4 sm:$0xff]   ;;  %v1690_v41 = vld [vmem:[%s1795_s11 + $0xe4] ss:$8 sps:$4 sm:$0xff]  }
  0x1a   : > { %1491 = vmatpush3.bf16.msra.mxu0 %v1643_v7  ;;  %1607 = vmatpush3.bf16.msra.mxu1 %v1643_v7  ;;  %v1692_v42 = vld [vmem:[%s1795_s11 + $0x60] ss:$8 sps:$4 sm:$0xff]   ;;  %v1694_v44 = vld [vmem:[%s1795_s11 + $0x74] ss:$8 sps:$4 sm:$0xff]   ;;  %v1698_v46 = vld [vmem:[%s1795_s11 + $0x70] ss:$8 sps:$4 sm:$0xff]  }
  0x1b   : > { %1492 = vmatprep.subr.bf16.mxu0 %v1644_v8  ;;  %1600 = vmatprep.subr.bf16.mxu1 %v1644_v8  ;;  %v1693_v43 = vld [vmem:[%s1795_s11 + $0xe0] ss:$8 sps:$4 sm:$0xff]   ;;  %v1696_v45 = vld [vmem:[%s1795_s11 + $0xf4] ss:$8 sps:$4 sm:$0xff]   ;;  %v1699_v47 = vld [vmem:[%s1795_s11 + $0xf0] ss:$8 sps:$4 sm:$0xff]  }
  0x1c   : > { %v1853_v53 = vld [vmem:[%s1920_s2] ss:$0 sm:$0xff] }
  0x1e   : > { %1493 = vmatpush3.bf16.msra.mxu0 %v1645_v9  ;;  %1608 = vmatpush3.bf16.msra.mxu1 %v1645_v9 }
  0x1f   : > { %1494 = vmatprep.subr.bf16.mxu0 %v1646_v10  ;;  %1601 = vmatprep.subr.bf16.mxu1 %v1646_v10 }
  0x22   : > { %1495 = vmatpush3.bf16.msra.mxu0 %v1647_v13  ;;  %1609 = vmatpush3.bf16.msra.mxu1 %v1647_v13 }
  0x23   : > { %1496 = vmatprep.subr.bf16.mxu0 %v1648_v14  ;;  %1602 = vmatprep.subr.bf16.mxu1 %v1648_v14 }
  0x26   : > { %1497 = vmatpush3.bf16.msra.mxu0 %v1649_v15  ;;  %1610 = vmatpush3.bf16.msra.mxu1 %v1649_v15 }
  0x27   : > { %1498 = vmatprep.subr.bf16.mxu0 %v1650_v16  ;;  %1603 = vmatprep.subr.bf16.mxu1 %v1650_v16 }
  0x2a   : > { %1499 = vmatpush3.bf16.msra.mxu0 %v1651_v17  ;;  %1611 = vmatpush3.bf16.msra.mxu1 %v1651_v17 }
  0x2d   : > { %689 = vmatmul.mubr.bf16.vlgmr.msra.gmra.mxu0 %v1652_v18  ;;  %753 = vmatmul.mubr.bf16.vlgmr.msra.gmra.mxu1 %v1655_v19 }
  0x2e   : > { %696 = vmatprep.mubr.bf16.mxu0 %v1658_v20  ;;  %760 = vmatprep.mubr.bf16.mxu1 %v1660_v21 }
  0x35   : > { %697 = vmatmul.mubr.bf16.gmra.mxu0 %v1662_v22  ;;  %761 = vmatmul.mubr.bf16.gmra.mxu1 %v1663_v23 }
  0x36   : > { %704 = vmatprep.mubr.bf16.mxu0 %v1664_v24  ;;  %768 = vmatprep.mubr.bf16.mxu1 %v1666_v25 }
  0x3d   : > { %705 = vmatmul.mubr.bf16.gmra.mxu0 %v1668_v26  ;;  %769 = vmatmul.mubr.bf16.gmra.mxu1 %v1669_v27 }
  0x3e   : > { %712 = vmatprep.mubr.bf16.mxu0 %v1670_v28  ;;  %776 = vmatprep.mubr.bf16.mxu1 %v1672_v29 }
  0x45   : > { %713 = vmatmul.mubr.bf16.gmra.mxu0 %v1674_v30  ;;  %777 = vmatmul.mubr.bf16.gmra.mxu1 %v1675_v31 }
  0x46   : > { %720 = vmatprep.mubr.bf16.mxu0 %v1676_v32  ;;  %784 = vmatprep.mubr.bf16.mxu1 %v1678_v33 }
  0x4d   : > { %721 = vmatmul.mubr.bf16.gmra.mxu0 %v1680_v34  ;;  %785 = vmatmul.mubr.bf16.gmra.mxu1 %v1681_v35 }
  0x4e   : > { %728 = vmatprep.mubr.bf16.mxu0 %v1682_v36  ;;  %792 = vmatprep.mubr.bf16.mxu1 %v1684_v37 }
  0x55   : > { %729 = vmatmul.mubr.bf16.gmra.mxu0 %v1686_v38  ;;  %793 = vmatmul.mubr.bf16.gmra.mxu1 %v1687_v39 }
  0x56   : > { %736 = vmatprep.mubr.bf16.mxu0 %v1688_v40  ;;  %800 = vmatprep.mubr.bf16.mxu1 %v1690_v41 }
  0x5d   : > { %737 = vmatmul.mubr.bf16.gmra.mxu0 %v1692_v42  ;;  %801 = vmatmul.mubr.bf16.gmra.mxu1 %v1693_v43 }
  0x5e   : > { %744 = vmatprep.mubr.bf16.mxu0 %v1694_v44  ;;  %808 = vmatprep.mubr.bf16.mxu1 %v1696_v45 }
  0x65   : > { %745 = vmatmul.mubr.bf16.gmra.mxu0 %v1698_v46  ;;  %809 = vmatmul.mubr.bf16.gmra.mxu1 %v1699_v47 }
  0xed   : > { %v1500_v48 = vpop.f32.mrf.mxu0  ;;  %v1548_v49 = vpop.f32.mrf.mxu1 }
  0xef   : > { %v1501_v50 = vpop.f32.mrf.mxu0  ;;  %v1549_v51 = vpop.f32.mrf.mxu1 }
  0xf0   : > { %v1502_v52 = vadd.f32 %v1501_v50, %v1500_v48  ;;  %v1550_v54 = vadd.f32 %v1549_v51, %v1548_v49 }
  0xf1   : > { %v1503_v55 = vpop.f32.mrf.mxu0  ;;  %v1551_v56 = vpop.f32.mrf.mxu1 }
  0xf2   : > { %v923_v57 = vadd.f32 %v1502_v52, %v1853_v53  ;;  %v939_v58 = vadd.f32 %v1550_v54, %v1853_v53 }
  0xf3   : > { %v1504_v59 = vpop.f32.mrf.mxu0  ;;  %v1552_v60 = vpop.f32.mrf.mxu1 }
  0xf4   : > { %v1505_v61 = vadd.f32 %v1504_v59, %v1503_v55  ;;  %v1553_v62 = vadd.f32 %v1552_v60, %v1551_v56  ;;  %v955_v3 = vmax.f32 %v923_v57, 0.0  ;;  %v971_v4 = vmax.f32 %v939_v58, 0.0 }
  0xf5   : > { %v1506_v63 = vpop.f32.mrf.mxu0  ;;  %v1554_v0 = vpop.f32.mrf.mxu1 }
  0xf6   : > { %v924_v1 = vadd.f32 %v1505_v61, %v1853_v53  ;;  %v940_v2 = vadd.f32 %v1553_v62, %v1853_v53 }
  0xf7   : > { %v1507_v5 = vpop.f32.mrf.mxu0  ;;  %v1555_v6 = vpop.f32.mrf.mxu1 }
  0xf8   : > { %v956_v7 = vmax.f32 %v924_v1, 0.0  ;;  %v972_v8 = vmax.f32 %v940_v2, 0.0  ;;  %v1508_v9 = vadd.f32 %v1507_v5, %v1506_v63  ;;  %v1556_v10 = vadd.f32 %v1555_v6, %v1554_v0 }
  0xf9   : > { %v1509_v11 = vpop.f32.mrf.mxu0  ;;  %v1557_v12 = vpop.f32.mrf.mxu1 }
  0xfa   : > { %v1392_v13 = vpack.c.bf16 %v956_v7, %v955_v3  ;;  %v1432_v14 = vpack.c.bf16 %v972_v8, %v971_v4  ;;  %v925_v15 = vadd.f32 %v1508_v9, %v1853_v53  ;;  %v941_v16 = vadd.f32 %v1556_v10, %v1853_v53 }
  0xfb   : > { %v1510_v17 = vpop.f32.mrf.mxu0  ;;  %v1558_v18 = vpop.f32.mrf.mxu1 }
  0xfc   : > { %1393 = vst [vmem:[%s1863_s8] sm:$0xff] %v1392_v13   ;;  %1476 = vst [vmem:[%s1863_s8 + $0x40] sm:$0xff] %v1432_v14   ;;  %v1511_v19 = vadd.f32 %v1510_v17, %v1509_v11  ;;  %v1559_v20 = vadd.f32 %v1558_v18, %v1557_v12  ;;  %v957_v25 = vmax.f32 %v925_v15, 0.0  ;;  %v973_v26 = vmax.f32 %v941_v16, 0.0 }
  0xfd   : > { %v1512_v21 = vpop.f32.mrf.mxu0  ;;  %v1560_v22 = vpop.f32.mrf.mxu1 }
  0xfe   : > { %v926_v23 = vadd.f32 %v1511_v19, %v1853_v53  ;;  %v942_v24 = vadd.f32 %v1559_v20, %v1853_v53 }
  0xff   : > { %v1513_v27 = vpop.f32.mrf.mxu0  ;;  %v1561_v28 = vpop.f32.mrf.mxu1 }
 0x100   : > { %v958_v29 = vmax.f32 %v926_v23, 0.0  ;;  %v974_v30 = vmax.f32 %v942_v24, 0.0  ;;  %v1514_v31 = vadd.f32 %v1513_v27, %v1512_v21  ;;  %v1562_v32 = vadd.f32 %v1561_v28, %v1560_v22 }
 0x101   : > { %v1515_v33 = vpop.f32.mrf.mxu0  ;;  %v1563_v34 = vpop.f32.mrf.mxu1 }
 0x102   : > { %v1397_v35 = vpack.c.bf16 %v958_v29, %v957_v25  ;;  %v1437_v36 = vpack.c.bf16 %v974_v30, %v973_v26  ;;  %v927_v37 = vadd.f32 %v1514_v31, %v1853_v53  ;;  %v943_v38 = vadd.f32 %v1562_v32, %v1853_v53 }
 0x103   : > { %v1516_v39 = vpop.f32.mrf.mxu0  ;;  %v1564_v40 = vpop.f32.mrf.mxu1 }
 0x104   : > { %1469 = vst [vmem:[%s1863_s8 + $0x8] sm:$0xff] %v1397_v35   ;;  %1477 = vst [vmem:[%s1863_s8 + $0x48] sm:$0xff] %v1437_v36   ;;  %v1517_v41 = vadd.f32 %v1516_v39, %v1515_v33  ;;  %v1565_v42 = vadd.f32 %v1564_v40, %v1563_v34  ;;  %v959_v47 = vmax.f32 %v927_v37, 0.0  ;;  %v975_v48 = vmax.f32 %v943_v38, 0.0 }
 0x105   : > { %v1518_v43 = vpop.f32.mrf.mxu0  ;;  %v1566_v44 = vpop.f32.mrf.mxu1 }
 0x106   : > { %v928_v45 = vadd.f32 %v1517_v41, %v1853_v53  ;;  %v944_v46 = vadd.f32 %v1565_v42, %v1853_v53 }
 0x107   : > { %v1519_v49 = vpop.f32.mrf.mxu0  ;;  %v1567_v50 = vpop.f32.mrf.mxu1 }
 0x108   : > { %v960_v51 = vmax.f32 %v928_v45, 0.0  ;;  %v976_v52 = vmax.f32 %v944_v46, 0.0  ;;  %v1520_v54 = vadd.f32 %v1519_v49, %v1518_v43  ;;  %v1568_v55 = vadd.f32 %v1567_v50, %v1566_v44 }
 0x109   : > { %v1521_v56 = vpop.f32.mrf.mxu0  ;;  %v1569_v57 = vpop.f32.mrf.mxu1 }
 0x10a   : > { %v1402_v58 = vpack.c.bf16 %v960_v51, %v959_v47  ;;  %v1442_v59 = vpack.c.bf16 %v976_v52, %v975_v48  ;;  %v929_v60 = vadd.f32 %v1520_v54, %v1853_v53  ;;  %v945_v61 = vadd.f32 %v1568_v55, %v1853_v53 }
 0x10b   : > { %v1522_v62 = vpop.f32.mrf.mxu0  ;;  %v1570_v63 = vpop.f32.mrf.mxu1 }
 0x10c   : > { %1470 = vst [vmem:[%s1863_s8 + $0x10] sm:$0xff] %v1402_v58   ;;  %1478 = vst [vmem:[%s1863_s8 + $0x50] sm:$0xff] %v1442_v59   ;;  %v1523_v0 = vadd.f32 %v1522_v62, %v1521_v56  ;;  %v1571_v1 = vadd.f32 %v1570_v63, %v1569_v57  ;;  %v961_v6 = vmax.f32 %v929_v60, 0.0  ;;  %v977_v7 = vmax.f32 %v945_v61, 0.0 }
 0x10d   : > { %v1524_v2 = vpop.f32.mrf.mxu0  ;;  %v1572_v3 = vpop.f32.mrf.mxu1 }
 0x10e   : > { %v930_v4 = vadd.f32 %v1523_v0, %v1853_v53  ;;  %v946_v5 = vadd.f32 %v1571_v1, %v1853_v53 }
 0x10f   : > { %v1525_v8 = vpop.f32.mrf.mxu0  ;;  %v1573_v9 = vpop.f32.mrf.mxu1 }
 0x110   : > { %v962_v10 = vmax.f32 %v930_v4, 0.0  ;;  %v978_v11 = vmax.f32 %v946_v5, 0.0  ;;  %v1526_v12 = vadd.f32 %v1525_v8, %v1524_v2  ;;  %v1574_v13 = vadd.f32 %v1573_v9, %v1572_v3 }
 0x111   : > { %v1527_v14 = vpop.f32.mrf.mxu0  ;;  %v1575_v15 = vpop.f32.mrf.mxu1 }
 0x112   : > { %v1407_v16 = vpack.c.bf16 %v962_v10, %v961_v6  ;;  %v1447_v17 = vpack.c.bf16 %v978_v11, %v977_v7  ;;  %v931_v18 = vadd.f32 %v1526_v12, %v1853_v53  ;;  %v947_v19 = vadd.f32 %v1574_v13, %v1853_v53 }
 0x113   : > { %v1528_v20 = vpop.f32.mrf.mxu0  ;;  %v1576_v21 = vpop.f32.mrf.mxu1 }
 0x114   : > { %1471 = vst [vmem:[%s1863_s8 + $0x18] sm:$0xff] %v1407_v16   ;;  %1479 = vst [vmem:[%s1863_s8 + $0x58] sm:$0xff] %v1447_v17   ;;  %v1529_v22 = vadd.f32 %v1528_v20, %v1527_v14  ;;  %v1577_v23 = vadd.f32 %v1576_v21, %v1575_v15  ;;  %v963_v28 = vmax.f32 %v931_v18, 0.0  ;;  %v979_v29 = vmax.f32 %v947_v19, 0.0 }
 0x115   : > { %v1530_v24 = vpop.f32.mrf.mxu0  ;;  %v1578_v25 = vpop.f32.mrf.mxu1 }
 0x116   : > { %v932_v26 = vadd.f32 %v1529_v22, %v1853_v53  ;;  %v948_v27 = vadd.f32 %v1577_v23, %v1853_v53 }
 0x117   : > { %v1531_v30 = vpop.f32.mrf.mxu0  ;;  %v1579_v31 = vpop.f32.mrf.mxu1 }
 0x118   : > { %v964_v32 = vmax.f32 %v932_v26, 0.0  ;;  %v980_v33 = vmax.f32 %v948_v27, 0.0  ;;  %v1532_v34 = vadd.f32 %v1531_v30, %v1530_v24  ;;  %v1580_v35 = vadd.f32 %v1579_v31, %v1578_v25 }
 0x119   : > { %v1533_v36 = vpop.f32.mrf.mxu0  ;;  %v1581_v37 = vpop.f32.mrf.mxu1 }
 0x11a   : > { %v1412_v38 = vpack.c.bf16 %v964_v32, %v963_v28  ;;  %v1452_v39 = vpack.c.bf16 %v980_v33, %v979_v29  ;;  %v933_v40 = vadd.f32 %v1532_v34, %v1853_v53  ;;  %v949_v41 = vadd.f32 %v1580_v35, %v1853_v53 }
 0x11b   : > { %v1534_v42 = vpop.f32.mrf.mxu0  ;;  %v1582_v43 = vpop.f32.mrf.mxu1 }
 0x11c   : > { %1472 = vst [vmem:[%s1863_s8 + $0x20] sm:$0xff] %v1412_v38   ;;  %1480 = vst [vmem:[%s1863_s8 + $0x60] sm:$0xff] %v1452_v39   ;;  %v1535_v44 = vadd.f32 %v1534_v42, %v1533_v36  ;;  %v1583_v45 = vadd.f32 %v1582_v43, %v1581_v37  ;;  %v965_v50 = vmax.f32 %v933_v40, 0.0  ;;  %v981_v51 = vmax.f32 %v949_v41, 0.0 }
 0x11d   : > { %v1536_v46 = vpop.f32.mrf.mxu0  ;;  %v1584_v47 = vpop.f32.mrf.mxu1 }
 0x11e   : > { %v934_v48 = vadd.f32 %v1535_v44, %v1853_v53  ;;  %v950_v49 = vadd.f32 %v1583_v45, %v1853_v53 }
 0x11f   : > { %v1537_v52 = vpop.f32.mrf.mxu0  ;;  %v1585_v54 = vpop.f32.mrf.mxu1 }
 0x120   : > { %v966_v55 = vmax.f32 %v934_v48, 0.0  ;;  %v982_v56 = vmax.f32 %v950_v49, 0.0  ;;  %v1538_v57 = vadd.f32 %v1537_v52, %v1536_v46  ;;  %v1586_v58 = vadd.f32 %v1585_v54, %v1584_v47 }
 0x121   : > { %v1539_v59 = vpop.f32.mrf.mxu0  ;;  %v1587_v60 = vpop.f32.mrf.mxu1 }
 0x122   : > { %v1417_v61 = vpack.c.bf16 %v966_v55, %v965_v50  ;;  %v1457_v62 = vpack.c.bf16 %v982_v56, %v981_v51  ;;  %v935_v63 = vadd.f32 %v1538_v57, %v1853_v53  ;;  %v951_v0 = vadd.f32 %v1586_v58, %v1853_v53 }
 0x123   : > { %v1540_v1 = vpop.f32.mrf.mxu0  ;;  %v1588_v2 = vpop.f32.mrf.mxu1 }
 0x124   : > { %1473 = vst [vmem:[%s1863_s8 + $0x28] sm:$0xff] %v1417_v61   ;;  %1481 = vst [vmem:[%s1863_s8 + $0x68] sm:$0xff] %v1457_v62   ;;  %v1541_v3 = vadd.f32 %v1540_v1, %v1539_v59  ;;  %v1589_v4 = vadd.f32 %v1588_v2, %v1587_v60  ;;  %v967_v9 = vmax.f32 %v935_v63, 0.0  ;;  %v983_v10 = vmax.f32 %v951_v0, 0.0 }
 0x125   : > { %v1542_v5 = vpop.f32.mrf.mxu0  ;;  %v1590_v6 = vpop.f32.mrf.mxu1 }
 0x126   : > { %v936_v7 = vadd.f32 %v1541_v3, %v1853_v53  ;;  %v952_v8 = vadd.f32 %v1589_v4, %v1853_v53 }
 0x127   : > { %v1543_v11 = vpop.f32.mrf.mxu0  ;;  %v1591_v12 = vpop.f32.mrf.mxu1 }
 0x128   : > { %v968_v13 = vmax.f32 %v936_v7, 0.0  ;;  %v984_v14 = vmax.f32 %v952_v8, 0.0  ;;  %v1544_v15 = vadd.f32 %v1543_v11, %v1542_v5  ;;  %v1592_v16 = vadd.f32 %v1591_v12, %v1590_v6 }
 0x129   : > { %v1545_v17 = vpop.f32.mrf.mxu0  ;;  %v1593_v18 = vpop.f32.mrf.mxu1 }
 0x12a   : > { %v1422_v19 = vpack.c.bf16 %v968_v13, %v967_v9  ;;  %v1462_v20 = vpack.c.bf16 %v984_v14, %v983_v10  ;;  %v937_v23 = vadd.f32 %v1544_v15, %v1853_v53  ;;  %v953_v24 = vadd.f32 %v1592_v16, %v1853_v53 }
 0x12b   : > { %v1546_v21 = vpop.f32.mrf.mxu0  ;;  %v1594_v22 = vpop.f32.mrf.mxu1 }
 0x12c   : > { %1474 = vst [vmem:[%s1863_s8 + $0x30] sm:$0xff] %v1422_v19   ;;  %1482 = vst [vmem:[%s1863_s8 + $0x70] sm:$0xff] %v1462_v20   ;;  %v1547_v25 = vadd.f32 %v1546_v21, %v1545_v17  ;;  %v1595_v26 = vadd.f32 %v1594_v22, %v1593_v18  ;;  %v969_v29 = vmax.f32 %v937_v23, 0.0  ;;  %v985_v30 = vmax.f32 %v953_v24, 0.0 }
 0x12e   : > { %v938_v27 = vadd.f32 %v1547_v25, %v1853_v53  ;;  %v954_v28 = vadd.f32 %v1595_v26, %v1853_v53 }
 0x130   : > { %v970_v31 = vmax.f32 %v938_v27, 0.0  ;;  %v986_v32 = vmax.f32 %v954_v28, 0.0 }
 0x132   : > { %v1427_v33 = vpack.c.bf16 %v970_v31, %v969_v29  ;;  %v1467_v34 = vpack.c.bf16 %v986_v32, %v985_v30 }
 0x134   : > { %1475 = vst [vmem:[%s1863_s8 + $0x38] sm:$0xff] %v1427_v33   ;;  %1483 = vst [vmem:[%s1863_s8 + $0x78] sm:$0xff] %v1467_v34  }
 0x135 PF: > { %s13_s14 = sadd.s32 1, %s1722_s14   ;;  %s1922_s12 = smov %s1718_s13 }
 0x136   : > { %p10_p5 = scmp.ge.s32.totalorder %s13_s14, 4   ;;  %s1923_s13 = smov %s1925_s15 }
 0x138   :  { %12 = sbr.rel (!%p10_p5) target bundleno = 2 (0x2), region = 76 }

// kernel: perceptual_forward.20
= control target key start
LH: loop header
LB: loop body
LE: loop exit
PB: predicated region body
PF: predicated region fallthrough
CT: control target
= control target key end

     0   :  { %s964_s12 = smov 0   ;;  %s966_s13 = smov 0   ;;  %s1062_s0 = inlined_call_operand.vmem [shape: bf16[128,256], index: 0, kind: input, shape index: {}]   ;;  %s1063_s1 = inlined_call_operand.vmem [shape: bf16[256,128], index: 1, kind: input, shape index: {}]   ;;  %s1064_s2 = inlined_call_operand.vmem [shape: f32[1,128], index: 2, kind: input, shape index: {}]   ;;  %s1065_s3 = inlined_call_operand.vmem [shape: bf16[128,128], index: 3, kind: output, shape index: {}]  }
   0x1   :  { %s968_s14 = smov 0  }
   0x2 LB: > { %s32_s15 = sadd.s32 1, %s938_s13  ;;  %p739_p0 = scmp.ge.s32.totalorder %s942_s14, 1  ;;  %s942_s14 = sphi %s968_s14, %s13_s14   ;;  %s938_s13 = sphi %s966_s13, %s1067_s13   ;;  %s934_s12 = sphi %s964_s12, %s1066_s12  }
   0x3   : > { %p34_p1 = scmp.ge.s32.totalorder %s32_s15, 2  ;;  %p191_p2 = scmp.lt.s32.totalorder %s942_s14, 3 }
   0x5   : > { %s1069_s15 = smov (%p34_p1, %s32_s15), 0  ;;  %p192_p3 = pnand %p739_p0, %p191_p2 }
   0x6   : > { %s740_s18 = sshll.u32 (!%p192_p3), %s934_s12, 3 }
   0x7   : > { %195 = sbr.rel (%p192_p3) target bundleno = 261 (0x105), region = 32  ;;  %p236_p4 = scmp.lt.s32.totalorder (!%p192_p3), %s740_s18, 15 }
   0xc   : > { %v892_v0 = vld [vmem:[%s1063_s1 + $0x78] sm:$0xff]   ;;  %v894_v2 = vld [vmem:[%s1063_s1 + $0x70] sm:$0xff]   ;;  %v896_v4 = vld [vmem:[%s1063_s1 + $0x68] sm:$0xff]   ;;  %s1071_s18 = smov (!%p236_p4, %s740_s18), 15 }
   0xd   : > { %v893_v1 = vld [vmem:[%s1063_s1 + $0x38] sm:$0xff]   ;;  %812 = vmatprep.subr.bf16.mxu0 %v892_v0  ;;  %852 = vmatprep.subr.bf16.mxu1 %v892_v0  ;;  %v895_v3 = vld [vmem:[%s1063_s1 + $0x30] sm:$0xff]   ;;  %v897_v5 = vld [vmem:[%s1063_s1 + $0x28] sm:$0xff]   ;;  %s780_s6 = sshll.u32 %s1071_s18, 3  ;;  %s744_s5 = sshll.u32 %s1071_s18, 2 }
   0xe   : > { %813 = vmatpush3.bf16.msra.mxu0 %v893_v1  ;;  %860 = vmatpush3.bf16.msra.mxu1 %v893_v1  ;;  %v898_v6 = vld [vmem:[%s1063_s1 + $0x60] sm:$0xff]   ;;  %v900_v8 = vld [vmem:[%s1063_s1 + $0x58] sm:$0xff]   ;;  %s1015_s11 = scalar_lea.vmem %s1062_s0, %s780_s6  ;;  %v902_v10 = vld [vmem:[%s1063_s1 + $0x50] sm:$0xff]   ;;  %s265_s8 = scalar_lea.vmem %s1065_s3, %s744_s5 }
   0xf   : > { %814 = vmatprep.subr.bf16.mxu0 %v894_v2  ;;  %853 = vmatprep.subr.bf16.mxu1 %v894_v2  ;;  %v899_v7 = vld [vmem:[%s1063_s1 + $0x20] sm:$0xff]   ;;  %v901_v9 = vld [vmem:[%s1063_s1 + $0x18] sm:$0xff]   ;;  %v903_v13 = vld [vmem:[%s1063_s1 + $0x10] sm:$0xff]  }
  0x10   : > { %v910_v11 = vld [vmem:[%s1015_s11 + $0x4] ss:$8 sps:$4 sm:$0xff]   ;;  %v908_v18 = vld [vmem:[%s1015_s11] ss:$8 sps:$4 sm:$0xff]   ;;  %v914_v20 = vld [vmem:[%s1015_s11 + $0x14] ss:$8 sps:$4 sm:$0xff]  }
  0x11   : > { %v913_v12 = vld [vmem:[%s1015_s11 + $0x24] ss:$8 sps:$4 sm:$0xff]   ;;  %496 = vmatprep.mubr.bf16.mxu0 %v910_v11  ;;  %v911_v19 = vld [vmem:[%s1015_s11 + $0x20] ss:$8 sps:$4 sm:$0xff]   ;;  %v916_v21 = vld [vmem:[%s1015_s11 + $0x34] ss:$8 sps:$4 sm:$0xff]  }
  0x12   : > { %815 = vmatpush3.bf16.msra.mxu0 %v895_v3  ;;  %861 = vmatpush3.bf16.msra.mxu1 %v895_v3  ;;  %v904_v14 = vld [vmem:[%s1063_s1 + $0x48] sm:$0xff]   ;;  %v906_v16 = vld [vmem:[%s1063_s1 + $0x40] sm:$0xff]   ;;  %v918_v22 = vld [vmem:[%s1015_s11 + $0x10] ss:$8 sps:$4 sm:$0xff]  }
  0x13   : > { %816 = vmatprep.subr.bf16.mxu0 %v896_v4  ;;  %854 = vmatprep.subr.bf16.mxu1 %v896_v4  ;;  %v905_v15 = vld [vmem:[%s1063_s1 + $0x8] sm:$0xff]   ;;  %v907_v17 = vld [vmem:[%s1063_s1] sm:$0xff]   ;;  %v919_v23 = vld [vmem:[%s1015_s11 + $0x30] ss:$8 sps:$4 sm:$0xff]  }
  0x14   : > { %512 = vmatprep.mubr.bf16.mxu1 %v913_v12  ;;  %v769_v29 = vld [vmem:[%s1064_s2] ss:$0 sm:$0xff] }
  0x16   : > { %817 = vmatpush3.bf16.msra.mxu0 %v897_v5  ;;  %862 = vmatpush3.bf16.msra.mxu1 %v897_v5 }
  0x17   : > { %818 = vmatprep.subr.bf16.mxu0 %v898_v6  ;;  %855 = vmatprep.subr.bf16.mxu1 %v898_v6 }
  0x1a   : > { %819 = vmatpush3.bf16.msra.mxu0 %v899_v7  ;;  %863 = vmatpush3.bf16.msra.mxu1 %v899_v7 }
  0x1b   : > { %820 = vmatprep.subr.bf16.mxu0 %v900_v8  ;;  %856 = vmatprep.subr.bf16.mxu1 %v900_v8 }
  0x1e   : > { %821 = vmatpush3.bf16.msra.mxu0 %v901_v9  ;;  %864 = vmatpush3.bf16.msra.mxu1 %v901_v9 }
  0x1f   : > { %822 = vmatprep.subr.bf16.mxu0 %v902_v10  ;;  %857 = vmatprep.subr.bf16.mxu1 %v902_v10 }
  0x22   : > { %823 = vmatpush3.bf16.msra.mxu0 %v903_v13  ;;  %865 = vmatpush3.bf16.msra.mxu1 %v903_v13 }
  0x23   : > { %824 = vmatprep.subr.bf16.mxu0 %v904_v14  ;;  %858 = vmatprep.subr.bf16.mxu1 %v904_v14 }
  0x26   : > { %825 = vmatpush3.bf16.msra.mxu0 %v905_v15  ;;  %866 = vmatpush3.bf16.msra.mxu1 %v905_v15 }
  0x27   : > { %826 = vmatprep.subr.bf16.mxu0 %v906_v16  ;;  %859 = vmatprep.subr.bf16.mxu1 %v906_v16 }
  0x2a   : > { %827 = vmatpush3.bf16.msra.mxu0 %v907_v17  ;;  %867 = vmatpush3.bf16.msra.mxu1 %v907_v17 }
  0x2d   : > { %497 = vmatmul.mubr.bf16.vlgmr.msra.gmra.mxu0 %v908_v18  ;;  %513 = vmatmul.mubr.bf16.vlgmr.msra.gmra.mxu1 %v911_v19 }
  0x2e   : > { %504 = vmatprep.mubr.bf16.mxu0 %v914_v20  ;;  %520 = vmatprep.mubr.bf16.mxu1 %v916_v21 }
  0x35   : > { %505 = vmatmul.mubr.bf16.gmra.mxu0 %v918_v22  ;;  %521 = vmatmul.mubr.bf16.gmra.mxu1 %v919_v23 }
  0xed   : > { %v828_v24 = vpop.f32.mrf.mxu0  ;;  %v840_v25 = vpop.f32.mrf.mxu1 }
  0xef   : > { %v829_v26 = vpop.f32.mrf.mxu0  ;;  %v841_v27 = vpop.f32.mrf.mxu1 }
  0xf0   : > { %v830_v28 = vadd.f32 %v829_v26, %v828_v24  ;;  %v842_v30 = vadd.f32 %v841_v27, %v840_v25 }
  0xf1   : > { %v831_v31 = vpop.f32.mrf.mxu0  ;;  %v843_v32 = vpop.f32.mrf.mxu1 }
  0xf2   : > { %v563_v33 = vadd.f32 %v830_v28, %v769_v29  ;;  %v567_v34 = vadd.f32 %v842_v30, %v769_v29 }
  0xf3   : > { %v832_v35 = vpop.f32.mrf.mxu0  ;;  %v844_v36 = vpop.f32.mrf.mxu1 }
  0xf4   : > { %v833_v37 = vadd.f32 %v832_v35, %v831_v31  ;;  %v845_v38 = vadd.f32 %v844_v36, %v843_v32  ;;  %v571_v43 = vmax.f32 %v563_v33, 0.0  ;;  %v575_v44 = vmax.f32 %v567_v34, 0.0 }
  0xf5   : > { %v834_v39 = vpop.f32.mrf.mxu0  ;;  %v846_v40 = vpop.f32.mrf.mxu1 }
  0xf6   : > { %v564_v41 = vadd.f32 %v833_v37, %v769_v29  ;;  %v568_v42 = vadd.f32 %v845_v38, %v769_v29 }
  0xf7   : > { %v835_v45 = vpop.f32.mrf.mxu0  ;;  %v847_v46 = vpop.f32.mrf.mxu1 }
  0xf8   : > { %v572_v47 = vmax.f32 %v564_v41, 0.0  ;;  %v576_v48 = vmax.f32 %v568_v42, 0.0  ;;  %v836_v49 = vadd.f32 %v835_v45, %v834_v39  ;;  %v848_v50 = vadd.f32 %v847_v46, %v846_v40 }
  0xf9   : > { %v837_v51 = vpop.f32.mrf.mxu0  ;;  %v849_v52 = vpop.f32.mrf.mxu1 }
  0xfa   : > { %v792_v53 = vpack.c.bf16 %v572_v47, %v571_v43  ;;  %v802_v54 = vpack.c.bf16 %v576_v48, %v575_v44  ;;  %v565_v57 = vadd.f32 %v836_v49, %v769_v29  ;;  %v569_v58 = vadd.f32 %v848_v50, %v769_v29 }
  0xfb   : > { %v838_v55 = vpop.f32.mrf.mxu0  ;;  %v850_v56 = vpop.f32.mrf.mxu1 }
  0xfc   : > { %793 = vst [vmem:[%s265_s8] sm:$0xff] %v792_v53   ;;  %810 = vst [vmem:[%s265_s8 + $0x10] sm:$0xff] %v802_v54   ;;  %v839_v59 = vadd.f32 %v838_v55, %v837_v51  ;;  %v851_v60 = vadd.f32 %v850_v56, %v849_v52  ;;  %v573_v63 = vmax.f32 %v565_v57, 0.0  ;;  %v577_v0 = vmax.f32 %v569_v58, 0.0 }
  0xfe   : > { %v566_v61 = vadd.f32 %v839_v59, %v769_v29  ;;  %v570_v62 = vadd.f32 %v851_v60, %v769_v29 }
 0x100   : > { %v574_v1 = vmax.f32 %v566_v61, 0.0  ;;  %v578_v2 = vmax.f32 %v570_v62, 0.0 }
 0x102   : > { %v797_v3 = vpack.c.bf16 %v574_v1, %v573_v63  ;;  %v807_v4 = vpack.c.bf16 %v578_v2, %v577_v0 }
 0x104   : > { %809 = vst [vmem:[%s265_s8 + $0x8] sm:$0xff] %v797_v3   ;;  %811 = vst [vmem:[%s265_s8 + $0x18] sm:$0xff] %v807_v4  }
 0x105 PF: > { %s13_s14 = sadd.s32 1, %s942_s14   ;;  %s1066_s12 = smov %s938_s13 }
 0x106   : > { %p10_p5 = scmp.ge.s32.totalorder %s13_s14, 4   ;;  %s1067_s13 = smov %s1069_s15 }
 0x108   :  { %12 = sbr.rel (!%p10_p5) target bundleno = 2 (0x2), region = 76 }

// kernel: perceptual_forward.21
= control target key start
LH: loop header
LB: loop body
LE: loop exit
PB: predicated region body
PF: predicated region fallthrough
CT: control target
= control target key end

     0   :  { %s1168_s12 = smov 0   ;;  %s1170_s13 = smov 0   ;;  %s1303_s0 = inlined_call_operand.vmem [shape: bf16[128,384], index: 0, kind: input, shape index: {}]   ;;  %s1304_s1 = inlined_call_operand.vmem [shape: bf16[384,128], index: 1, kind: input, shape index: {}]   ;;  %s1305_s2 = inlined_call_operand.vmem [shape: f32[1,128], index: 2, kind: input, shape index: {}]   ;;  %s1306_s3 = inlined_call_operand.vmem [shape: bf16[128,128], index: 3, kind: output, shape index: {}]  }
   0x1   :  { %s1172_s14 = smov 0  }
   0x2 LB: > { %s32_s15 = sadd.s32 1, %s1142_s13  ;;  %p900_p0 = scmp.ge.s32.totalorder %s1146_s14, 1  ;;  %s1146_s14 = sphi %s1172_s14, %s13_s14   ;;  %s1142_s13 = sphi %s1170_s13, %s1308_s13   ;;  %s1138_s12 = sphi %s1168_s12, %s1307_s12  }
   0x3   : > { %p34_p1 = scmp.ge.s32.totalorder %s32_s15, 2  ;;  %p191_p2 = scmp.lt.s32.totalorder %s1146_s14, 3 }
   0x5   : > { %s1310_s15 = smov (%p34_p1, %s32_s15), 0  ;;  %p192_p3 = pnand %p900_p0, %p191_p2 }
   0x6   : > { %s901_s5 = sshll.u32 (!%p192_p3), %s1138_s12, 3 }
   0x7   : > { %195 = sbr.rel (%p192_p3) target bundleno = 279 (0x117), region = 32  ;;  %p236_p4 = scmp.lt.s32.totalorder (!%p192_p3), %s901_s5, 15 }
   0xc   : > { %v1084_v0 = vld [vmem:[%s1304_s1 + $0x78] sm:$0xff]   ;;  %v1087_v3 = vld [vmem:[%s1304_s1 + $0x70] sm:$0xff]   ;;  %v1090_v6 = vld [vmem:[%s1304_s1 + $0x68] sm:$0xff]   ;;  %s1312_s5 = smov (!%p236_p4, %s901_s5), 15 }
   0xd   : > { %v1085_v1 = vld [vmem:[%s1304_s1 + $0x38] sm:$0xff]   ;;  %983 = vmatprep.subr.bf16.mxu0 %v1084_v0  ;;  %v1088_v4 = vld [vmem:[%s1304_s1 + $0x30] sm:$0xff]   ;;  %v1091_v7 = vld [vmem:[%s1304_s1 + $0x28] sm:$0xff]   ;;  %s1059_s27 = smul.u32 12, %s1312_s5  ;;  %s904_s24 = sshll.u32 %s1312_s5, 2 }
   0xe   : > { %v1086_v2 = vld [vmem:[%s1304_s1 + $0xb8] sm:$0xff]   ;;  %984 = vmatpush3.bf16.msra.mxu0 %v1085_v1  ;;  %v1089_v5 = vld [vmem:[%s1304_s1 + $0xb0] sm:$0xff]   ;;  %v1092_v8 = vld [vmem:[%s1304_s1 + $0xa8] sm:$0xff]  }
   0xf   : > { %1035 = vmatprep.subr.bf16.mxu1 %v1086_v2  ;;  %985 = vmatprep.subr.bf16.mxu0 %v1087_v3  ;;  %v1093_v9 = vld [vmem:[%s1304_s1 + $0x60] sm:$0xff]   ;;  %v1096_v12 = vld [vmem:[%s1304_s1 + $0x58] sm:$0xff]   ;;  %v1099_v15 = vld [vmem:[%s1304_s1 + $0x50] sm:$0xff]   ;;  %s1258_s16 = scalar_lea.vmem %s1303_s0, %s1059_s27  ;;  %s1288_s27 = scalar_lea.vmem %s1306_s3, %s904_s24 }
  0x10   : > { %1036 = vmatpush3.bf16.msra.mxu1 %v1086_v2  ;;  %v1094_v10 = vld [vmem:[%s1304_s1 + $0x20] sm:$0xff]   ;;  %v1098_v13 = vld [vmem:[%s1304_s1 + $0x98] sm:$0xff]   ;;  %v1101_v16 = vld [vmem:[%s1304_s1 + $0x90] sm:$0xff]  }
  0x11   : > { %1037 = vmatprep.subr.bf16.mxu1 %v1089_v5  ;;  %v1095_v11 = vld [vmem:[%s1304_s1 + $0xa0] sm:$0xff]   ;;  %v1097_v14 = vld [vmem:[%s1304_s1 + $0x18] sm:$0xff]   ;;  %v1100_v17 = vld [vmem:[%s1304_s1 + $0x10] sm:$0xff]  }
  0x12   : > { %986 = vmatpush3.bf16.msra.mxu0 %v1088_v4  ;;  %v1102_v18 = vld [vmem:[%s1304_s1 + $0x48] sm:$0xff]   ;;  %v1105_v21 = vld [vmem:[%s1304_s1 + $0x40] sm:$0xff]   ;;  %v1120_v32 = vld [vmem:[%s1258_s16 + $0x50] ss:$12 sps:$4 sm:$0xff]  }
  0x13   : > { %987 = vmatprep.subr.bf16.mxu0 %v1090_v6  ;;  %v1103_v19 = vld [vmem:[%s1304_s1 + $0x8] sm:$0xff]   ;;  %v1107_v22 = vld [vmem:[%s1304_s1 + $0x80] sm:$0xff]   ;;  %v1118_v33 = vld [vmem:[%s1258_s16 + $0x30] ss:$12 sps:$4 sm:$0xff]  }
  0x14   : > { %1038 = vmatpush3.bf16.msra.mxu1 %v1089_v5  ;;  %v1104_v20 = vld [vmem:[%s1304_s1 + $0x88] sm:$0xff]   ;;  %v1110_v23 = vld [vmem:[%s1258_s16 + $0x4] ss:$12 sps:$4 sm:$0xff]   ;;  %v1116_v31 = vld [vmem:[%s1258_s16 + $0x34] ss:$12 sps:$4 sm:$0xff]  }
  0x15   : > { %1039 = vmatprep.subr.bf16.mxu1 %v1092_v8  ;;  %v1111_v24 = vld [vmem:[%s1258_s16 + $0x8] ss:$12 sps:$4 sm:$0xff]   ;;  %v1106_v25 = vld [vmem:[%s1304_s1] sm:$0xff]   ;;  %592 = vmatprep.mubr.bf16.mxu0 %v1110_v23  ;;  %v1121_v34 = vld [vmem:[%s1258_s16 + $0x4c] ss:$12 sps:$4 sm:$0xff]  }
  0x16   : > { %988 = vmatpush3.bf16.msra.mxu0 %v1091_v7  ;;  %1051 = vmatprep.mubr.bf16.mxu1 %v1111_v24  ;;  %v1108_v26 = vld [vmem:[%s1258_s16] ss:$12 sps:$4 sm:$0xff]   ;;  %v1113_v27 = vld [vmem:[%s1258_s16 + $0x1c] ss:$12 sps:$4 sm:$0xff]   ;;  %v1119_v29 = vld [vmem:[%s1258_s16 + $0x38] ss:$12 sps:$4 sm:$0xff]  }
  0x17   : > { %989 = vmatprep.subr.bf16.mxu0 %v1093_v9  ;;  %v1112_v28 = vld [vmem:[%s1258_s16 + $0x20] ss:$12 sps:$4 sm:$0xff]   ;;  %v1115_v30 = vld [vmem:[%s1258_s16 + $0x18] ss:$12 sps:$4 sm:$0xff]   ;;  %v1123_v35 = vld [vmem:[%s1258_s16 + $0x48] ss:$12 sps:$4 sm:$0xff]  }
  0x18   : > { %1040 = vmatpush3.bf16.msra.mxu1 %v1092_v8  ;;  %v941_v43 = vld [vmem:[%s1305_s2] ss:$0 sm:$0xff] }
  0x19   : > { %1041 = vmatprep.subr.bf16.mxu1 %v1095_v11 }
  0x1a   : > { %990 = vmatpush3.bf16.msra.mxu0 %v1094_v10 }
  0x1b   : > { %991 = vmatprep.subr.bf16.mxu0 %v1096_v12 }
  0x1c   : > { %1042 = vmatpush3.bf16.msra.mxu1 %v1095_v11 }
  0x1d   : > { %1043 = vmatprep.subr.bf16.mxu1 %v1098_v13 }
  0x1e   : > { %992 = vmatpush3.bf16.msra.mxu0 %v1097_v14 }
  0x1f   : > { %993 = vmatprep.subr.bf16.mxu0 %v1099_v15 }
  0x20   : > { %1044 = vmatpush3.bf16.msra.mxu1 %v1098_v13 }
  0x21   : > { %1045 = vmatprep.subr.bf16.mxu1 %v1101_v16 }
  0x22   : > { %994 = vmatpush3.bf16.msra.mxu0 %v1100_v17 }
  0x23   : > { %995 = vmatprep.subr.bf16.mxu0 %v1102_v18 }
  0x24   : > { %1046 = vmatpush3.bf16.msra.mxu1 %v1101_v16 }
  0x25   : > { %1047 = vmatprep.subr.bf16.mxu1 %v1104_v20 }
  0x26   : > { %996 = vmatpush3.bf16.msra.mxu0 %v1103_v19 }
  0x27   : > { %997 = vmatprep.subr.bf16.mxu0 %v1105_v21 }
  0x28   : > { %1048 = vmatpush3.bf16.msra.mxu1 %v1104_v20 }
  0x29   : > { %1049 = vmatprep.subr.bf16.mxu1 %v1107_v22 }
  0x2a   : > { %998 = vmatpush3.bf16.msra.mxu0 %v1106_v25 }
  0x2c   : > { %1050 = vmatpush3.bf16.msra.mxu1 %v1107_v22 }
  0x2d   : > { %593 = vmatmul.mubr.bf16.vlgmr.msra.gmra.mxu0 %v1108_v26 }
  0x2e   : > { %600 = vmatprep.mubr.bf16.mxu0 %v1113_v27 }
  0x2f   : > { %1052 = vmatmul.mubr.bf16.vlgmr.msra.gmra.mxu1 %v1112_v28 }
  0x30   : > { %1055 = vmatprep.mubr.bf16.mxu1 %v1119_v29 }
  0x35   : > { %601 = vmatmul.mubr.bf16.gmra.mxu0 %v1115_v30 }
  0x36   : > { %608 = vmatprep.mubr.bf16.mxu0 %v1116_v31 }
  0x37   : > { %1056 = vmatmul.mubr.bf16.gmra.mxu1 %v1120_v32 }
  0x3d   : > { %609 = vmatmul.mubr.bf16.gmra.mxu0 %v1118_v33 }
  0x3e   : > { %616 = vmatprep.mubr.bf16.mxu0 %v1121_v34 }
  0x45   : > { %617 = vmatmul.mubr.bf16.gmra.mxu0 %v1123_v35 }
  0xed   : > { %v999_v36 = vpop.f32.mrf.mxu0 }
  0xef   : > { %v1000_v37 = vpop.f32.mrf.mxu0  ;;  %v1053_v38 = vpop.f32.mrf.mxu1 }
  0xf0   : > { %v1001_v39 = vadd.f32 %v1000_v37, %v999_v36 }
  0xf1   : > { %v1002_v40 = vpop.f32.mrf.mxu0  ;;  %v659_v41 = vpop.f32.mrf.mxu1 }
  0xf2   : > { %v660_v42 = vadd.f32 %v1001_v39, %v659_v41 }
  0xf3   : > { %v1003_v44 = vpop.f32.mrf.mxu0  ;;  %v1054_v45 = vpop.f32.mrf.mxu1 }
  0xf4   : > { %v1004_v46 = vadd.f32 %v1003_v44, %v1002_v40  ;;  %v724_v49 = vadd.f32 %v941_v43, %v660_v42 }
  0xf5   : > { %v1005_v47 = vpop.f32.mrf.mxu0  ;;  %v662_v48 = vpop.f32.mrf.mxu1 }
  0xf6   : > { %v663_v50 = vadd.f32 %v1004_v46, %v662_v48  ;;  %v732_v56 = vmax.f32 %v724_v49, 0.0 }
  0xf7   : > { %v1006_v51 = vpop.f32.mrf.mxu0  ;;  %v1057_v52 = vpop.f32.mrf.mxu1 }
  0xf8   : > { %v725_v53 = vadd.f32 %v941_v43, %v663_v50  ;;  %v1007_v54 = vadd.f32 %v1006_v51, %v1005_v47 }
  0xf9   : > { %v1008_v55 = vpop.f32.mrf.mxu0  ;;  %v675_v60 = vpop.f32.mrf.mxu1 }
  0xfa   : > { %v733_v57 = vmax.f32 %v725_v53, 0.0  ;;  %v668_v58 = vadd.f32 %v1053_v38, %v1007_v54 }
  0xfb   : > { %v1009_v59 = vpop.f32.mrf.mxu0  ;;  %v1058_v3 = vpop.f32.mrf.mxu1 }
  0xfc   : > { %v963_v61 = vpack.c.bf16 %v733_v57, %v732_v56  ;;  %v1010_v62 = vadd.f32 %v1009_v59, %v1008_v55  ;;  %v726_v0 = vadd.f32 %v941_v43, %v668_v58 }
  0xfd   : > { %v1011_v63 = vpop.f32.mrf.mxu0  ;;  %v678_v11 = vpop.f32.mrf.mxu1 }
  0xfe   : > { %964 = vst [vmem:[%s1288_s27] sm:$0xff] %v963_v61   ;;  %v671_v1 = vadd.f32 %v1054_v45, %v1010_v62  ;;  %v734_v7 = vmax.f32 %v726_v0, 0.0 }
  0xff   : > { %v1012_v2 = vpop.f32.mrf.mxu0 }
 0x100   : > { %v727_v4 = vadd.f32 %v941_v43, %v671_v1  ;;  %v1013_v5 = vadd.f32 %v1012_v2, %v1011_v63 }
 0x101   : > { %v1014_v6 = vpop.f32.mrf.mxu0 }
 0x102   : > { %v735_v8 = vmax.f32 %v727_v4, 0.0  ;;  %v676_v9 = vadd.f32 %v1013_v5, %v675_v60 }
 0x103   : > { %v1015_v10 = vpop.f32.mrf.mxu0 }
 0x104   : > { %v968_v12 = vpack.c.bf16 %v735_v8, %v734_v7  ;;  %v1016_v13 = vadd.f32 %v1015_v10, %v1014_v6  ;;  %v728_v15 = vadd.f32 %v941_v43, %v676_v9 }
 0x105   : > { %v1017_v14 = vpop.f32.mrf.mxu0 }
 0x106   : > { %980 = vst [vmem:[%s1288_s27 + $0x8] sm:$0xff] %v968_v12   ;;  %v679_v16 = vadd.f32 %v1016_v13, %v678_v11  ;;  %v736_v21 = vmax.f32 %v728_v15, 0.0 }
 0x107   : > { %v1018_v17 = vpop.f32.mrf.mxu0 }
 0x108   : > { %v729_v18 = vadd.f32 %v941_v43, %v679_v16  ;;  %v1019_v19 = vadd.f32 %v1018_v17, %v1017_v14 }
 0x109   : > { %v1020_v20 = vpop.f32.mrf.mxu0 }
 0x10a   : > { %v737_v22 = vmax.f32 %v729_v18, 0.0  ;;  %v684_v23 = vadd.f32 %v1057_v52, %v1019_v19 }
 0x10b   : > { %v1021_v24 = vpop.f32.mrf.mxu0 }
 0x10c   : > { %v973_v25 = vpack.c.bf16 %v737_v22, %v736_v21  ;;  %v1022_v26 = vadd.f32 %v1021_v24, %v1020_v20  ;;  %v730_v27 = vadd.f32 %v941_v43, %v684_v23 }
 0x10e   : > { %981 = vst [vmem:[%s1288_s27 + $0x10] sm:$0xff] %v973_v25   ;;  %v687_v28 = vadd.f32 %v1058_v3, %v1022_v26  ;;  %v738_v30 = vmax.f32 %v730_v27, 0.0 }
 0x110   : > { %v731_v29 = vadd.f32 %v941_v43, %v687_v28 }
 0x112   : > { %v739_v31 = vmax.f32 %v731_v29, 0.0 }
 0x114   : > { %v978_v32 = vpack.c.bf16 %v739_v31, %v738_v30 }
 0x116   : > { %982 = vst [vmem:[%s1288_s27 + $0x18] sm:$0xff] %v978_v32  }
 0x117 PF: > { %s13_s14 = sadd.s32 1, %s1146_s14   ;;  %s1307_s12 = smov %s1142_s13 }
 0x118   : > { %p10_p5 = scmp.ge.s32.totalorder %s13_s14, 4   ;;  %s1308_s13 = smov %s1310_s15 }
 0x11a   :  { %12 = sbr.rel (!%p10_p5) target bundleno = 2 (0x2), region = 76 }

// kernel: perceptual_forward.23
= control target key start
LH: loop header
LB: loop body
LE: loop exit
PB: predicated region body
PF: predicated region fallthrough
CT: control target
= control target key end

     0   :  { %s916_s12 = smov 0   ;;  %s918_s13 = smov 0   ;;  %s1031_s0 = inlined_call_operand.vmem [shape: bf16[32,384], index: 0, kind: input, shape index: {}]   ;;  %s1032_s1 = inlined_call_operand.vmem [shape: bf16[384,128], index: 1, kind: input, shape index: {}]   ;;  %s1033_s2 = inlined_call_operand.vmem [shape: f32[1,128], index: 2, kind: input, shape index: {}]   ;;  %s1034_s3 = inlined_call_operand.vmem [shape: bf16[32,128], index: 3, kind: output, shape index: {}]  }
   0x1   :  { %s920_s14 = smov 0  }
   0x2 LB: > { %s32_s15 = sadd.s32 1, %s888_s13  ;;  %p720_p0 = scmp.ge.s32.totalorder %s892_s14, 1  ;;  %s892_s14 = sphi %s920_s14, %s13_s14   ;;  %s888_s13 = sphi %s918_s13, %s1036_s13   ;;  %s884_s12 = sphi %s916_s12, %s1035_s12  }
   0x3   : > { %p34_p1 = scmp.ge.s32.totalorder %s32_s15, 2  ;;  %p191_p2 = scmp.lt.s32.totalorder %s892_s14, 3 }
   0x5   : > { %s1038_s15 = smov (%p34_p1, %s32_s15), 0  ;;  %p192_p3 = pnand %p720_p0, %p191_p2 }
   0x6   : > { %s721_s5 = sshll.u32 (!%p192_p3), %s884_s12, 1 }
   0x7   : > { %195 = sbr.rel (%p192_p3) target bundleno = 256 (0x100), region = 32  ;;  %p236_p4 = scmp.lt.s32.totalorder (!%p192_p3), %s721_s5, 3 }
   0xc   : > { %v842_v0 = vld [vmem:[%s1032_s1 + $0x78] sm:$0xff]   ;;  %v894_v1 = vmov 0.0   ;;  %vm895_vm0 = vmmov 0   ;;  %v845_v4 = vld [vmem:[%s1032_s1 + $0x70] sm:$0xff]   ;;  %v848_v7 = vld [vmem:[%s1032_s1 + $0x68] sm:$0xff]   ;;  %s1040_s5 = smov (!%p236_p4, %s721_s5), 3 }
   0xd   : > { %795 = vmatprep.subr.bf16.mxu1 %v894_v1  ;;  %v843_v2 = vld [vmem:[%s1032_s1 + $0xb8] sm:$0xff]   ;;  %764 = vmatprep.subr.bf16.mxu0 %v842_v0  ;;  %v846_v5 = vld [vmem:[%s1032_s1 + $0xb0] sm:$0xff]   ;;  %v849_v8 = vld [vmem:[%s1032_s1 + $0xa8] sm:$0xff]   ;;  %s815_s25 = smul.u32 12, %s1040_s5  ;;  %s724_s24 = sshll.u32 %s1040_s5, 2 }
   0xe   : > { %v844_v3 = vld [vmem:[%s1032_s1 + $0x38] sm:$0xff]   ;;  %811 = vmatprep.mubr.msk.bf16.mxu1 %vm895_vm0, %v894_v1  ;;  %796 = vmatpush3.bf16.msra.mxu1 %v843_v2  ;;  %v847_v6 = vld [vmem:[%s1032_s1 + $0x30] sm:$0xff]   ;;  %v850_v9 = vld [vmem:[%s1032_s1 + $0x28] sm:$0xff]   ;;  %s265_s27 = scalar_lea.vmem %s1034_s3, %s724_s24 }
   0xf   : > { %765 = vmatpush3.bf16.msra.mxu0 %v844_v3  ;;  %797 = vmatprep.subr.bf16.mxu1 %v894_v1  ;;  %v851_v10 = vld [vmem:[%s1032_s1 + $0x60] sm:$0xff]   ;;  %v854_v13 = vld [vmem:[%s1032_s1 + $0x58] sm:$0xff]   ;;  %v857_v16 = vld [vmem:[%s1032_s1 + $0x50] sm:$0xff]   ;;  %s243_s10 = scalar_lea.vmem %s1031_s0, %s815_s25 }
  0x10   : > { %766 = vmatprep.subr.bf16.mxu0 %v845_v4  ;;  %v852_v11 = vld [vmem:[%s1032_s1 + $0xa0] sm:$0xff]   ;;  %v855_v14 = vld [vmem:[%s1032_s1 + $0x98] sm:$0xff]   ;;  %v858_v17 = vld [vmem:[%s1032_s1 + $0x90] sm:$0xff]  }
  0x11   : > { %v853_v12 = vld [vmem:[%s1032_s1 + $0x20] sm:$0xff]   ;;  %v856_v15 = vld [vmem:[%s1032_s1 + $0x18] sm:$0xff]   ;;  %v859_v18 = vld [vmem:[%s1032_s1 + $0x10] sm:$0xff]  }
  0x12   : > { %798 = vmatpush3.bf16.msra.mxu1 %v846_v5  ;;  %v860_v19 = vld [vmem:[%s1032_s1 + $0x48] sm:$0xff]   ;;  %v863_v22 = vld [vmem:[%s1032_s1 + $0x40] sm:$0xff]  }
  0x13   : > { %767 = vmatpush3.bf16.msra.mxu0 %v847_v6  ;;  %799 = vmatprep.subr.bf16.mxu1 %v894_v1  ;;  %v861_v20 = vld [vmem:[%s1032_s1 + $0x88] sm:$0xff]   ;;  %v868_v23 = vld [vmem:[%s243_s10 + $0x4] ss:$12 sps:$4 sm:$0xff]   ;;  %v752_v37 = vld [vmem:[%s1033_s2] ss:$0 sm:$0xff] }
  0x14   : > { %768 = vmatprep.subr.bf16.mxu0 %v848_v7  ;;  %v862_v21 = vld [vmem:[%s1032_s1 + $0x8] sm:$0xff]   ;;  %v864_v24 = vld [vmem:[%s1032_s1 + $0x80] sm:$0xff]   ;;  %520 = vmatprep.mubr.bf16.mxu0 %v868_v23 }
  0x15   : > { %v865_v25 = vld [vmem:[%s1032_s1] sm:$0xff]   ;;  %v869_v26 = vld [vmem:[%s243_s10 + $0x8] ss:$12 sps:$4 sm:$0xff]  }
  0x16   : > { %800 = vmatpush3.bf16.msra.mxu1 %v849_v8  ;;  %v866_v27 = vld [vmem:[%s243_s10] ss:$12 sps:$4 sm:$0xff]  }
  0x17   : > { %769 = vmatpush3.bf16.msra.mxu0 %v850_v9  ;;  %801 = vmatprep.subr.bf16.mxu1 %v894_v1 }
  0x18   : > { %770 = vmatprep.subr.bf16.mxu0 %v851_v10 }
  0x1a   : > { %802 = vmatpush3.bf16.msra.mxu1 %v852_v11 }
  0x1b   : > { %771 = vmatpush3.bf16.msra.mxu0 %v853_v12  ;;  %803 = vmatprep.subr.bf16.mxu1 %v894_v1 }
  0x1c   : > { %772 = vmatprep.subr.bf16.mxu0 %v854_v13 }
  0x1e   : > { %804 = vmatpush3.bf16.msra.mxu1 %v855_v14 }
  0x1f   : > { %773 = vmatpush3.bf16.msra.mxu0 %v856_v15  ;;  %805 = vmatprep.subr.bf16.mxu1 %v894_v1 }
  0x20   : > { %774 = vmatprep.subr.bf16.mxu0 %v857_v16 }
  0x22   : > { %806 = vmatpush3.bf16.msra.mxu1 %v858_v17 }
  0x23   : > { %775 = vmatpush3.bf16.msra.mxu0 %v859_v18  ;;  %807 = vmatprep.subr.bf16.mxu1 %v894_v1 }
  0x24   : > { %776 = vmatprep.subr.bf16.mxu0 %v860_v19 }
  0x26   : > { %808 = vmatpush3.bf16.msra.mxu1 %v861_v20 }
  0x27   : > { %777 = vmatpush3.bf16.msra.mxu0 %v862_v21  ;;  %809 = vmatprep.subr.bf16.mxu1 %v894_v1 }
  0x28   : > { %778 = vmatprep.subr.bf16.mxu0 %v863_v22 }
  0x2a   : > { %810 = vmatpush3.bf16.msra.mxu1 %v864_v24 }
  0x2b   : > { %779 = vmatpush3.bf16.msra.mxu0 %v865_v25 }
  0x2d   : > { %812 = vmatmul.mubr.bf16.vlgmr.msra.gmra.mxu1 %v869_v26 }
  0x2e   : > { %521 = vmatmul.mubr.bf16.vlgmr.msra.gmra.mxu0 %v866_v27 }
  0xed   : > { %v563_v28 = vpop.f32.mrf.mxu1 }
  0xee   : > { %v780_v29 = vpop.f32.mrf.mxu0 }
  0xef   : > { %v813_v30 = vpop.f32.mrf.mxu1 }
  0xf0   : > { %v781_v31 = vpop.f32.mrf.mxu0 }
  0xf1   : > { %v782_v32 = vadd.f32 %v781_v31, %v780_v29  ;;  %v566_v33 = vpop.f32.mrf.mxu1 }
  0xf2   : > { %v783_v34 = vpop.f32.mrf.mxu0 }
  0xf3   : > { %v564_v35 = vadd.f32 %v782_v32, %v563_v28  ;;  %v814_v36 = vpop.f32.mrf.mxu1 }
  0xf4   : > { %v784_v38 = vpop.f32.mrf.mxu0 }
  0xf5   : > { %v785_v39 = vadd.f32 %v784_v38, %v783_v34  ;;  %v586_v40 = vadd.f32 %v752_v37, %v564_v35 }
  0xf7   : > { %v567_v41 = vadd.f32 %v785_v39, %v566_v33  ;;  %v588_v43 = vmax.f32 %v586_v40, 0.0 }
  0xf9   : > { %v587_v42 = vadd.f32 %v752_v37, %v567_v41 }
  0xfb   : > { %v589_v44 = vmax.f32 %v587_v42, 0.0 }
  0xfd   : > { %v762_v45 = vpack.c.bf16 %v589_v44, %v588_v43 }
  0xff   : > { %763 = vst [vmem:[%s265_s27] sm:$0xff] %v762_v45  }
 0x100 PF: > { %s13_s14 = sadd.s32 1, %s892_s14   ;;  %s1035_s12 = smov %s888_s13 }
 0x101   : > { %p10_p5 = scmp.ge.s32.totalorder %s13_s14, 4   ;;  %s1036_s13 = smov %s1038_s15 }
 0x103   :  { %12 = sbr.rel (!%p10_p5) target bundleno = 2 (0x2), region = 76 }

// kernel: perceptual_forward.24
= control target key start
LH: loop header
LB: loop body
LE: loop exit
PB: predicated region body
PF: predicated region fallthrough
CT: control target
= control target key end

     0   :  { %s1156_s12 = smov 0   ;;  %s1158_s13 = smov 0   ;;  %s1326_s0 = inlined_call_operand.vmem [shape: bf16[32,640], index: 0, kind: input, shape index: {}]   ;;  %s1327_s1 = inlined_call_operand.vmem [shape: bf16[640,128], index: 1, kind: input, shape index: {}]   ;;  %s1328_s2 = inlined_call_operand.vmem [shape: f32[1,128], index: 2, kind: input, shape index: {}]   ;;  %s1329_s3 = inlined_call_operand.vmem [shape: bf16[32,128], index: 3, kind: output, shape index: {}]  }
   0x1   :  { %s1160_s14 = smov 0  }
   0x2 LB: > { %s32_s15 = sadd.s32 1, %s1128_s13  ;;  %p901_p0 = scmp.ge.s32.totalorder %s1132_s14, 1  ;;  %s1132_s14 = sphi %s1160_s14, %s13_s14   ;;  %s1128_s13 = sphi %s1158_s13, %s1331_s13   ;;  %s1124_s12 = sphi %s1156_s12, %s1330_s12  }
   0x3   : > { %p34_p1 = scmp.ge.s32.totalorder %s32_s15, 2  ;;  %p191_p2 = scmp.lt.s32.totalorder %s1132_s14, 3 }
   0x5   : > { %s1333_s15 = smov (%p34_p1, %s32_s15), 0  ;;  %p192_p3 = pnand %p901_p0, %p191_p2 }
   0x6   : > { %s902_s23 = sshll.u32 (!%p192_p3), %s1124_s12, 1 }
   0x7   : > { %195 = sbr.rel (%p192_p3) target bundleno = 284 (0x11c), region = 32  ;;  %p236_p4 = scmp.lt.s32.totalorder (!%p192_p3), %s902_s23, 3 }
   0xc   : > { %v1063_v0 = vld [vmem:[%s1327_s1 + $0x78] sm:$0xff]   ;;  %v1067_v4 = vld [vmem:[%s1327_s1 + $0x70] sm:$0xff]   ;;  %v1071_v8 = vld [vmem:[%s1327_s1 + $0x68] sm:$0xff]   ;;  %s1335_s23 = smov (!%p236_p4, %s902_s23), 3  ;;  %v1134_v34 = vmov 0.0   ;;  %vm1135_vm0 = vmmov 0  }
   0xd   : > { %v1064_v1 = vld [vmem:[%s1327_s1 + $0xf8] sm:$0xff]   ;;  %963 = vmatprep.subr.bf16.mxu0 %v1063_v0  ;;  %v1068_v5 = vld [vmem:[%s1327_s1 + $0xf0] sm:$0xff]   ;;  %v1072_v9 = vld [vmem:[%s1327_s1 + $0xe8] sm:$0xff]   ;;  %s1036_s22 = smul.u32 20, %s1335_s23 }
   0xe   : > { %v1065_v2 = vld [vmem:[%s1327_s1 + $0x38] sm:$0xff]   ;;  %985 = vmatprep.subr.bf16.mxu1 %v1064_v1  ;;  %v1069_v6 = vld [vmem:[%s1327_s1 + $0x30] sm:$0xff]   ;;  %v1073_v10 = vld [vmem:[%s1327_s1 + $0x28] sm:$0xff]  }
   0xf   : > { %v1066_v3 = vld [vmem:[%s1327_s1 + $0xb8] sm:$0xff]   ;;  %964 = vmatpush3.bf16.msra.mxu0 %v1065_v2  ;;  %v1070_v7 = vld [vmem:[%s1327_s1 + $0xb0] sm:$0xff]   ;;  %v1074_v11 = vld [vmem:[%s1327_s1 + $0xa8] sm:$0xff]   ;;  %s1273_s6 = scalar_lea.vmem %s1326_s0, %s1036_s22 }
  0x10   : > { %986 = vmatpush3.bf16.msra.mxu1 %v1066_v3  ;;  %965 = vmatprep.subr.bf16.mxu0 %v1067_v4  ;;  %v1075_v12 = vld [vmem:[%s1327_s1 + $0x60] sm:$0xff]   ;;  %v1079_v16 = vld [vmem:[%s1327_s1 + $0x58] sm:$0xff]   ;;  %v1083_v20 = vld [vmem:[%s1327_s1 + $0x50] sm:$0xff]  }
  0x11   : > { %987 = vmatprep.subr.bf16.mxu1 %v1068_v5  ;;  %v1076_v13 = vld [vmem:[%s1327_s1 + $0xe0] sm:$0xff]   ;;  %v1080_v17 = vld [vmem:[%s1327_s1 + $0xd8] sm:$0xff]   ;;  %v1084_v21 = vld [vmem:[%s1327_s1 + $0xd0] sm:$0xff]  }
  0x12   : > { %v1077_v14 = vld [vmem:[%s1327_s1 + $0x20] sm:$0xff]   ;;  %v1081_v18 = vld [vmem:[%s1327_s1 + $0x18] sm:$0xff]   ;;  %v1085_v22 = vld [vmem:[%s1327_s1 + $0x10] sm:$0xff]  }
  0x13   : > { %966 = vmatpush3.bf16.msra.mxu0 %v1069_v6  ;;  %v1078_v15 = vld [vmem:[%s1327_s1 + $0xa0] sm:$0xff]   ;;  %v1082_v19 = vld [vmem:[%s1327_s1 + $0x98] sm:$0xff]   ;;  %v1086_v23 = vld [vmem:[%s1327_s1 + $0x90] sm:$0xff]  }
  0x14   : > { %988 = vmatpush3.bf16.msra.mxu1 %v1070_v7  ;;  %967 = vmatprep.subr.bf16.mxu0 %v1071_v8  ;;  %v1087_v24 = vld [vmem:[%s1327_s1 + $0x48] sm:$0xff]   ;;  %v1091_v28 = vld [vmem:[%s1327_s1 + $0x40] sm:$0xff]   ;;  %v1101_v37 = vld [vmem:[%s1327_s1 + $0x138] sm:$0xff]  }
  0x15   : > { %989 = vmatprep.subr.bf16.mxu1 %v1072_v9  ;;  %v1088_v25 = vld [vmem:[%s1327_s1 + $0xc8] sm:$0xff]   ;;  %v1092_v29 = vld [vmem:[%s1327_s1 + $0xc0] sm:$0xff]   ;;  %v1102_v38 = vld [vmem:[%s1327_s1 + $0x130] sm:$0xff]  }
  0x16   : > { %v1089_v26 = vld [vmem:[%s1327_s1 + $0x8] sm:$0xff]   ;;  %v1093_v30 = vld [vmem:[%s1327_s1] sm:$0xff]   ;;  %v1105_v41 = vld [vmem:[%s1327_s1 + $0x118] sm:$0xff]  }
  0x17   : > { %968 = vmatpush3.bf16.msra.mxu0 %v1073_v10  ;;  %v1090_v27 = vld [vmem:[%s1327_s1 + $0x88] sm:$0xff]   ;;  %v1094_v31 = vld [vmem:[%s1327_s1 + $0x80] sm:$0xff]   ;;  %v1106_v42 = vld [vmem:[%s1327_s1 + $0x110] sm:$0xff]  }
  0x18   : > { %990 = vmatpush3.bf16.msra.mxu1 %v1074_v11  ;;  %969 = vmatprep.subr.bf16.mxu0 %v1075_v12  ;;  %v1095_v32 = vld [vmem:[%s1273_s6] ss:$20 sps:$4 sm:$0xff]   ;;  %v1097_v33 = vld [vmem:[%s1273_s6 + $0x4] ss:$20 sps:$4 sm:$0xff]   ;;  %v1098_v35 = vld [vmem:[%s1273_s6 + $0x8] ss:$20 sps:$4 sm:$0xff]  }
  0x19   : > { %991 = vmatprep.subr.bf16.mxu1 %v1076_v13  ;;  %v1100_v36 = vld [vmem:[%s1273_s6 + $0xc] ss:$20 sps:$4 sm:$0xff]   ;;  %660 = vmatprep.mubr.bf16.mxu0 %v1097_v33  ;;  %v1109_v45 = vld [vmem:[%s1273_s6 + $0x10] ss:$20 sps:$4 sm:$0xff]   ;;  %s905_s6 = sshll.u32 %s1335_s23, 2 }
  0x1a   : > { %701 = vmatprep.mubr.bf16.mxu1 %v1100_v36  ;;  %v1103_v39 = vld [vmem:[%s1327_s1 + $0x128] sm:$0xff]   ;;  %v1104_v40 = vld [vmem:[%s1327_s1 + $0x120] sm:$0xff]   ;;  %s265_s9 = scalar_lea.vmem %s1329_s3, %s905_s6 }
  0x1b   : > { %970 = vmatpush3.bf16.msra.mxu0 %v1077_v14  ;;  %v1107_v43 = vld [vmem:[%s1327_s1 + $0x108] sm:$0xff]   ;;  %v1108_v44 = vld [vmem:[%s1327_s1 + $0x100] sm:$0xff]  }
  0x1c   : > { %992 = vmatpush3.bf16.msra.mxu1 %v1078_v15  ;;  %971 = vmatprep.subr.bf16.mxu0 %v1079_v16  ;;  %v951_v61 = vld [vmem:[%s1328_s2] ss:$0 sm:$0xff] }
  0x1d   : > { %993 = vmatprep.subr.bf16.mxu1 %v1080_v17 }
  0x1f   : > { %972 = vmatpush3.bf16.msra.mxu0 %v1081_v18 }
  0x20   : > { %994 = vmatpush3.bf16.msra.mxu1 %v1082_v19  ;;  %973 = vmatprep.subr.bf16.mxu0 %v1083_v20 }
  0x21   : > { %995 = vmatprep.subr.bf16.mxu1 %v1084_v21 }
  0x23   : > { %974 = vmatpush3.bf16.msra.mxu0 %v1085_v22 }
  0x24   : > { %996 = vmatpush3.bf16.msra.mxu1 %v1086_v23  ;;  %975 = vmatprep.subr.bf16.mxu0 %v1087_v24 }
  0x25   : > { %997 = vmatprep.subr.bf16.mxu1 %v1088_v25 }
  0x27   : > { %976 = vmatpush3.bf16.msra.mxu0 %v1089_v26 }
  0x28   : > { %998 = vmatpush3.bf16.msra.mxu1 %v1090_v27  ;;  %977 = vmatprep.subr.bf16.mxu0 %v1091_v28 }
  0x29   : > { %999 = vmatprep.subr.bf16.mxu1 %v1092_v29 }
  0x2b   : > { %978 = vmatpush3.bf16.msra.mxu0 %v1093_v30 }
  0x2c   : > { %1000 = vmatpush3.bf16.msra.mxu1 %v1094_v31  ;;  %1016 = vmatprep.subr.bf16.mxu0 %v1134_v34 }
  0x2e   : > { %661 = vmatmul.mubr.bf16.vlgmr.msra.gmra.mxu0 %v1095_v32 }
  0x2f   : > { %702 = vmatmul.mubr.bf16.vlgmr.msra.gmra.mxu1 %v1098_v35  ;;  %1017 = vmatpush3.bf16.msra.mxu0 %v1101_v37 }
  0x30   : > { %1018 = vmatprep.subr.bf16.mxu0 %v1134_v34  ;;  %1032 = vmatprep.mubr.msk.bf16.mxu0 %vm1135_vm0, %v1134_v34 }
  0x33   : > { %1019 = vmatpush3.bf16.msra.mxu0 %v1102_v38 }
  0x34   : > { %1020 = vmatprep.subr.bf16.mxu0 %v1134_v34 }
  0x37   : > { %1021 = vmatpush3.bf16.msra.mxu0 %v1103_v39 }
  0x38   : > { %1022 = vmatprep.subr.bf16.mxu0 %v1134_v34 }
  0x3b   : > { %1023 = vmatpush3.bf16.msra.mxu0 %v1104_v40 }
  0x3c   : > { %1024 = vmatprep.subr.bf16.mxu0 %v1134_v34 }
  0x3f   : > { %1025 = vmatpush3.bf16.msra.mxu0 %v1105_v41 }
  0x40   : > { %1026 = vmatprep.subr.bf16.mxu0 %v1134_v34 }
  0x43   : > { %1027 = vmatpush3.bf16.msra.mxu0 %v1106_v42 }
  0x44   : > { %1028 = vmatprep.subr.bf16.mxu0 %v1134_v34 }
  0x47   : > { %1029 = vmatpush3.bf16.msra.mxu0 %v1107_v43 }
  0x48   : > { %1030 = vmatprep.subr.bf16.mxu0 %v1134_v34 }
  0x4b   : > { %1031 = vmatpush3.bf16.msra.mxu0 %v1108_v44 }
  0x4e   : > { %1033 = vmatmul.mubr.bf16.vlgmr.msra.gmra.mxu0 %v1109_v45 }
  0xee   : > { %v979_v46 = vpop.f32.mrf.mxu0 }
  0xef   : > { %v1001_v47 = vpop.f32.mrf.mxu1 }
  0xf0   : > { %v980_v48 = vpop.f32.mrf.mxu0 }
  0xf1   : > { %v1002_v49 = vpop.f32.mrf.mxu1  ;;  %v981_v52 = vadd.f32 %v980_v48, %v979_v46 }
  0xf2   : > { %v982_v50 = vpop.f32.mrf.mxu0  ;;  %v1003_v53 = vadd.f32 %v1002_v49, %v1001_v47 }
  0xf3   : > { %v1004_v51 = vpop.f32.mrf.mxu1 }
  0xf4   : > { %v983_v54 = vpop.f32.mrf.mxu0  ;;  %v704_v58 = vadd.f32 %v1003_v53, %v981_v52 }
  0xf5   : > { %v1005_v55 = vpop.f32.mrf.mxu1  ;;  %v984_v56 = vadd.f32 %v983_v54, %v982_v50 }
  0xf6   : > { %v1006_v57 = vadd.f32 %v1005_v55, %v1004_v51 }
  0xf8   : > { %v707_v63 = vadd.f32 %v1006_v57, %v984_v56 }
 0x10e   : > { %v744_v59 = vpop.f32.mrf.mxu0 }
 0x10f   : > { %v745_v60 = vadd.f32 %v744_v59, %v704_v58 }
 0x110   : > { %v1034_v62 = vpop.f32.mrf.mxu0 }
 0x111   : > { %v767_v1 = vadd.f32 %v951_v61, %v745_v60 }
 0x112   : > { %v747_v0 = vpop.f32.mrf.mxu0 }
 0x113   : > { %v748_v2 = vadd.f32 %v747_v0, %v707_v63  ;;  %v769_v5 = vmax.f32 %v767_v1, 0.0 }
 0x114   : > { %v1035_v3 = vpop.f32.mrf.mxu0 }
 0x115   : > { %v768_v4 = vadd.f32 %v951_v61, %v748_v2 }
 0x117   : > { %v770_v6 = vmax.f32 %v768_v4, 0.0 }
 0x119   : > { %v961_v7 = vpack.c.bf16 %v770_v6, %v769_v5 }
 0x11b   : > { %962 = vst [vmem:[%s265_s9] sm:$0xff] %v961_v7  }
 0x11c PF: > { %s13_s14 = sadd.s32 1, %s1132_s14   ;;  %s1330_s12 = smov %s1128_s13 }
 0x11d   : > { %p10_p5 = scmp.ge.s32.totalorder %s13_s14, 4   ;;  %s1331_s13 = smov %s1333_s15 }
 0x11f   :  { %12 = sbr.rel (!%p10_p5) target bundleno = 2 (0x2), region = 76 }

// kernel: perceptual_forward.26
= control target key start
LH: loop header
LB: loop body
LE: loop exit
PB: predicated region body
PF: predicated region fallthrough
CT: control target
= control target key end

     0   :  { %v709_v34 = vmov 0.0   ;;  %vm710_vm0 = vmmov 0   ;;  %s872_s1 = inlined_call_operand.vmem [shape: bf16[640,128], index: 1, kind: input, shape index: {}]   ;;  %s873_s0 = inlined_call_operand.vmem [shape: bf16[16,640], index: 0, kind: input, shape index: {}]   ;;  %s874_s2 = inlined_call_operand.vmem [shape: f32[1,128], index: 2, kind: input, shape index: {}]   ;;  %s875_s3 = inlined_call_operand.vmem [shape: bf16[16,128], index: 3, kind: output, shape index: {}]  }
   0x1   :  { %v662_v0 = vld [vmem:[%s872_s1 + $0x78] sm:$0xff]   ;;  %v666_v4 = vld [vmem:[%s872_s1 + $0x70] sm:$0xff]   ;;  %v670_v8 = vld [vmem:[%s872_s1 + $0x68] sm:$0xff]  }
   0x2   :  { %v663_v1 = vld [vmem:[%s872_s1 + $0xf8] sm:$0xff]   ;;  %587 = vmatprep.subr.bf16.mxu0 %v662_v0  ;;  %v667_v5 = vld [vmem:[%s872_s1 + $0xf0] sm:$0xff]   ;;  %v671_v9 = vld [vmem:[%s872_s1 + $0xe8] sm:$0xff]  }
   0x3   :  { %v664_v2 = vld [vmem:[%s872_s1 + $0x38] sm:$0xff]   ;;  %609 = vmatprep.subr.bf16.mxu1 %v663_v1  ;;  %v668_v6 = vld [vmem:[%s872_s1 + $0x30] sm:$0xff]   ;;  %v672_v10 = vld [vmem:[%s872_s1 + $0x28] sm:$0xff]  }
   0x4   :  { %v665_v3 = vld [vmem:[%s872_s1 + $0xb8] sm:$0xff]   ;;  %588 = vmatpush3.bf16.msra.mxu0 %v664_v2  ;;  %v669_v7 = vld [vmem:[%s872_s1 + $0xb0] sm:$0xff]   ;;  %v673_v11 = vld [vmem:[%s872_s1 + $0xa8] sm:$0xff]  }
   0x5   :  { %610 = vmatpush3.bf16.msra.mxu1 %v665_v3  ;;  %589 = vmatprep.subr.bf16.mxu0 %v666_v4  ;;  %v674_v12 = vld [vmem:[%s872_s1 + $0x60] sm:$0xff]   ;;  %v678_v16 = vld [vmem:[%s872_s1 + $0x58] sm:$0xff]   ;;  %v682_v20 = vld [vmem:[%s872_s1 + $0x50] sm:$0xff]  }
   0x6   :  { %611 = vmatprep.subr.bf16.mxu1 %v667_v5  ;;  %v675_v13 = vld [vmem:[%s872_s1 + $0xe0] sm:$0xff]   ;;  %v679_v17 = vld [vmem:[%s872_s1 + $0xd8] sm:$0xff]   ;;  %v683_v21 = vld [vmem:[%s872_s1 + $0xd0] sm:$0xff]  }
   0x7   :  { %v676_v14 = vld [vmem:[%s872_s1 + $0x20] sm:$0xff]   ;;  %v680_v18 = vld [vmem:[%s872_s1 + $0x18] sm:$0xff]   ;;  %v684_v22 = vld [vmem:[%s872_s1 + $0x10] sm:$0xff]  }
   0x8   :  { %590 = vmatpush3.bf16.msra.mxu0 %v668_v6  ;;  %v677_v15 = vld [vmem:[%s872_s1 + $0xa0] sm:$0xff]   ;;  %v681_v19 = vld [vmem:[%s872_s1 + $0x98] sm:$0xff]   ;;  %v685_v23 = vld [vmem:[%s872_s1 + $0x90] sm:$0xff]  }
   0x9   :  { %612 = vmatpush3.bf16.msra.mxu1 %v669_v7  ;;  %591 = vmatprep.subr.bf16.mxu0 %v670_v8  ;;  %v686_v24 = vld [vmem:[%s872_s1 + $0x48] sm:$0xff]   ;;  %v690_v28 = vld [vmem:[%s872_s1 + $0x40] sm:$0xff]   ;;  %v700_v37 = vld [vmem:[%s872_s1 + $0x138] sm:$0xff]  }
   0xa   :  { %613 = vmatprep.subr.bf16.mxu1 %v671_v9  ;;  %v687_v25 = vld [vmem:[%s872_s1 + $0xc8] sm:$0xff]   ;;  %v691_v29 = vld [vmem:[%s872_s1 + $0xc0] sm:$0xff]   ;;  %v701_v38 = vld [vmem:[%s872_s1 + $0x130] sm:$0xff]  }
   0xb   :  { %v688_v26 = vld [vmem:[%s872_s1 + $0x8] sm:$0xff]   ;;  %v692_v30 = vld [vmem:[%s872_s1] sm:$0xff]   ;;  %v704_v41 = vld [vmem:[%s872_s1 + $0x118] sm:$0xff]  }
   0xc   :  { %592 = vmatpush3.bf16.msra.mxu0 %v672_v10  ;;  %v689_v27 = vld [vmem:[%s872_s1 + $0x88] sm:$0xff]   ;;  %v693_v31 = vld [vmem:[%s872_s1 + $0x80] sm:$0xff]   ;;  %v705_v42 = vld [vmem:[%s872_s1 + $0x110] sm:$0xff]  }
   0xd   :  { %614 = vmatpush3.bf16.msra.mxu1 %v673_v11  ;;  %593 = vmatprep.subr.bf16.mxu0 %v674_v12  ;;  %v694_v32 = vld [vmem:[%s873_s0] ss:$20 sps:$4 sm:$0xff]   ;;  %v696_v33 = vld [vmem:[%s873_s0 + $0x4] ss:$20 sps:$4 sm:$0xff]   ;;  %v697_v35 = vld [vmem:[%s873_s0 + $0x8] ss:$20 sps:$4 sm:$0xff]  }
   0xe   :  { %615 = vmatprep.subr.bf16.mxu1 %v675_v13  ;;  %v699_v36 = vld [vmem:[%s873_s0 + $0xc] ss:$20 sps:$4 sm:$0xff]   ;;  %407 = vmatprep.mubr.bf16.mxu0 %v696_v33  ;;  %v708_v45 = vld [vmem:[%s873_s0 + $0x10] ss:$20 sps:$4 sm:$0xff]  }
   0xf   :  { %448 = vmatprep.mubr.bf16.mxu1 %v699_v36  ;;  %v702_v39 = vld [vmem:[%s872_s1 + $0x128] sm:$0xff]   ;;  %v703_v40 = vld [vmem:[%s872_s1 + $0x120] sm:$0xff]  }
  0x10   :  { %594 = vmatpush3.bf16.msra.mxu0 %v676_v14  ;;  %v706_v43 = vld [vmem:[%s872_s1 + $0x108] sm:$0xff]   ;;  %v707_v44 = vld [vmem:[%s872_s1 + $0x100] sm:$0xff]  }
  0x11   :  { %616 = vmatpush3.bf16.msra.mxu1 %v677_v15  ;;  %595 = vmatprep.subr.bf16.mxu0 %v678_v16  ;;  %v577_v61 = vld [vmem:[%s874_s2] ss:$0 sm:$0xff] }
  0x12   :  { %617 = vmatprep.subr.bf16.mxu1 %v679_v17 }
  0x14   :  { %596 = vmatpush3.bf16.msra.mxu0 %v680_v18 }
  0x15   :  { %618 = vmatpush3.bf16.msra.mxu1 %v681_v19  ;;  %597 = vmatprep.subr.bf16.mxu0 %v682_v20 }
  0x16   :  { %619 = vmatprep.subr.bf16.mxu1 %v683_v21 }
  0x18   :  { %598 = vmatpush3.bf16.msra.mxu0 %v684_v22 }
  0x19   :  { %620 = vmatpush3.bf16.msra.mxu1 %v685_v23  ;;  %599 = vmatprep.subr.bf16.mxu0 %v686_v24 }
  0x1a   :  { %621 = vmatprep.subr.bf16.mxu1 %v687_v25 }
  0x1c   :  { %600 = vmatpush3.bf16.msra.mxu0 %v688_v26 }
  0x1d   :  { %622 = vmatpush3.bf16.msra.mxu1 %v689_v27  ;;  %601 = vmatprep.subr.bf16.mxu0 %v690_v28 }
  0x1e   :  { %623 = vmatprep.subr.bf16.mxu1 %v691_v29 }
  0x20   :  { %602 = vmatpush3.bf16.msra.mxu0 %v692_v30 }
  0x21   :  { %624 = vmatpush3.bf16.msra.mxu1 %v693_v31  ;;  %640 = vmatprep.subr.bf16.mxu0 %v709_v34 }
  0x23   :  { %408 = vmatmul.mubr.bf16.vlgmr.msra.gmra.mxu0 %v694_v32 }
  0x24   :  { %449 = vmatmul.mubr.bf16.vlgmr.msra.gmra.mxu1 %v697_v35  ;;  %641 = vmatpush3.bf16.msra.mxu0 %v700_v37 }
  0x25   :  { %642 = vmatprep.subr.bf16.mxu0 %v709_v34  ;;  %656 = vmatprep.mubr.msk.bf16.mxu0 %vm710_vm0, %v709_v34 }
  0x28   :  { %643 = vmatpush3.bf16.msra.mxu0 %v701_v38 }
  0x29   :  { %644 = vmatprep.subr.bf16.mxu0 %v709_v34 }
  0x2c   :  { %645 = vmatpush3.bf16.msra.mxu0 %v702_v39 }
  0x2d   :  { %646 = vmatprep.subr.bf16.mxu0 %v709_v34 }
  0x30   :  { %647 = vmatpush3.bf16.msra.mxu0 %v703_v40 }
  0x31   :  { %648 = vmatprep.subr.bf16.mxu0 %v709_v34 }
  0x34   :  { %649 = vmatpush3.bf16.msra.mxu0 %v704_v41 }
  0x35   :  { %650 = vmatprep.subr.bf16.mxu0 %v709_v34 }
  0x38   :  { %651 = vmatpush3.bf16.msra.mxu0 %v705_v42 }
  0x39   :  { %652 = vmatprep.subr.bf16.mxu0 %v709_v34 }
  0x3c   :  { %653 = vmatpush3.bf16.msra.mxu0 %v706_v43 }
  0x3d   :  { %654 = vmatprep.subr.bf16.mxu0 %v709_v34 }
  0x40   :  { %655 = vmatpush3.bf16.msra.mxu0 %v707_v44 }
  0x43   :  { %657 = vmatmul.mubr.bf16.vlgmr.msra.gmra.mxu0 %v708_v45 }
  0xe3   :  { %v603_v46 = vpop.f32.mrf.mxu0 }
  0xe4   :  { %v625_v47 = vpop.f32.mrf.mxu1 }
  0xe5   :  { %v604_v48 = vpop.f32.mrf.mxu0 }
  0xe6   :  { %v626_v49 = vpop.f32.mrf.mxu1  ;;  %v605_v52 = vadd.f32 %v604_v48, %v603_v46 }
  0xe7   :  { %v606_v50 = vpop.f32.mrf.mxu0  ;;  %v627_v53 = vadd.f32 %v626_v49, %v625_v47 }
  0xe8   :  { %v628_v51 = vpop.f32.mrf.mxu1 }
  0xe9   :  { %v607_v54 = vpop.f32.mrf.mxu0  ;;  %v451_v58 = vadd.f32 %v627_v53, %v605_v52 }
  0xea   :  { %v629_v55 = vpop.f32.mrf.mxu1  ;;  %v608_v56 = vadd.f32 %v607_v54, %v606_v50 }
  0xeb   :  { %v630_v57 = vadd.f32 %v629_v55, %v628_v51 }
  0xed   :  { %v454_v63 = vadd.f32 %v630_v57, %v608_v56 }
 0x103   :  { %v491_v59 = vpop.f32.mrf.mxu0 }
 0x104   :  { %v492_v60 = vadd.f32 %v491_v59, %v451_v58 }
 0x105   :  { %v658_v62 = vpop.f32.mrf.mxu0 }
 0x106   :  { %v514_v1 = vadd.f32 %v577_v61, %v492_v60 }
 0x107   :  { %v494_v0 = vpop.f32.mrf.mxu0 }
 0x108   :  { %v495_v2 = vadd.f32 %v494_v0, %v454_v63  ;;  %v516_v5 = vmax.f32 %v514_v1, 0.0 }
 0x109   :  { %v659_v3 = vpop.f32.mrf.mxu0 }
 0x10a   :  { %v515_v4 = vadd.f32 %v577_v61, %v495_v2 }
 0x10c   :  { %v517_v6 = vmax.f32 %v515_v4, 0.0 }
 0x10e   :  { %v585_v7 = vpack.c.bf16 %v517_v6, %v516_v5 }
 0x110   :  { %586 = vst [vmem:[%s875_s3] sm:$0xff] %v585_v7  }

// kernel: perceptual_forward.27
= control target key start
LH: loop header
LB: loop body
LE: loop exit
PB: predicated region body
PF: predicated region fallthrough
CT: control target
= control target key end

     0   :  { %s980_s12 = smov 0   ;;  %s982_s13 = smov 0   ;;  %s1084_s0 = inlined_call_operand.vmem [shape: bf16[16,1152], index: 0, kind: input, shape index: {}]   ;;  %s1085_s1 = inlined_call_operand.vmem [shape: bf16[1152,128], index: 1, kind: input, shape index: {}]   ;;  %s1086_s2 = inlined_call_operand.vmem [shape: f32[1,128], index: 2, kind: input, shape index: {}]   ;;  %s1087_s3 = inlined_call_operand.vmem [shape: bf16[16,128], index: 3, kind: output, shape index: {}]  }
   0x1   :  { %s984_s14 = smov 0   ;;  %s986_s15 = smov 0  }
   0x2   :  { %s988_s16 = smov 0  }
   0x3 LB: > { %s25_s17 = sadd.s32 1, %s951_s15  ;;  %p48_p1 = scmp.ne.s32.totalorder %s943_s13, %s939_s12  ;;  %s955_s16 = sphi %s988_s16, %s13_s16   ;;  %s951_s15 = sphi %s986_s15, %s1091_s15   ;;  %s947_s14 = sphi %s984_s14, %s1090_s14   ;;  %s943_s13 = sphi %s982_s13, %s1089_s13   ;;  %s939_s12 = sphi %s980_s12, %s1088_s12  }
   0x4   : > { %p26_p0 = scmp.ge.s32.totalorder %s25_s17, 3  ;;  %p49_p2 = scmp.eq.s32.totalorder %s955_s16, 0 }
   0x5   : > { %s41_s19 = sadd.s32 1, %s943_s13  ;;  %p741_p5 = scmp.ge.s32.totalorder %s955_s16, 3 }
   0x6   : > { %s1093_s17 = smov (%p26_p0, %s25_s17), 0  ;;  %p50_p3 = por %p49_p2, %p48_p1 }
   0x7   : > { %s37_s18 = ssub.s32 %s951_s15, %s1093_s17  ;;  %162 = sbr.rel (%p741_p5) target bundleno = 19 (0x13), region = 20 }
   0x8   : > { %p39_p4 = scmp.eq.s32.totalorder %s37_s18, 0 }
   0xa   : > { %s1015_s20 = scalar_select %p39_p4, %s943_s13, %s41_s19  }
   0xc   : > { %165 = sbr.rel (!%p50_p3) target bundleno = 19 (0x13), region = 24  ;;  %s167_s21 = sand.u32 (%p50_p3), 1, %s943_s13  }
   0xd   : > { %s785_s22 = smul.u32 (%p50_p3), 12, %s951_s15 }
   0xe   : > { %s844_s23 = smul.u32 (%p50_p3), 24, %s167_s21 }
   0xf   : > { %s175_s26 = scalar_lea.vmem (%p50_p3), %s1084_s0, %s785_s22 }
  0x10   : > { %v190_v0 = vld [vmem:[%s175_s26] sm:$0xff] (%p50_p3)  ;;  %v743_v2 = vld [vmem:[%s175_s26 + $0x8] sm:$0xf] (%p50_p3)  ;;  %s169_s27 = scalar_lea.vmem (%p50_p3), [#allocation3], %s844_s23  ;;  %v745_v3 = vld [vmem:[%s175_s26 + $0x2c] sm:$0xf] (%p50_p3) }
  0x11   : > { %v192_v1 = vld [vmem:[%s175_s26 + $0x24] sm:$0xff]  ;;  %191 = vst [vmem:[%s169_s27] sm:$0xff] %v190_v0  ;;  %744 = vst [vmem:[%s169_s27 + $0x8] sm:$0xf] %v743_v2 }
  0x12   : > { %193 = vst [vmem:[%s169_s27 + $0xc] sm:$0xff] %v192_v1  ;;  %746 = vst [vmem:[%s169_s27 + $0x14] sm:$0xf] %v745_v3 }
  0x13 PF: > { %p747_p6 = scmp.ge.s32.totalorder %s955_s16, 1  ;;  %p222_p7 = scmp.lt.s32.totalorder %s955_s16, 4 }
  0x15   : > { %p223_p8 = pnand %p747_p6, %p222_p7 }
  0x16   : > { %s229_s28 = sand.u32 (!%p223_p8), 1, %s939_s12   ;;  %s268_s29 = smul.u32 (!%p223_p8), 48, %s947_s14 }
  0x17   : > { %226 = sbr.rel (%p223_p8) target bundleno = 289 (0x121), region = 54  ;;  %p749_p10 = scmp.ne.s32.totalorder (!%p223_p8), %s947_s14, 0 }
  0x18   : > { %s845_s30 = smul.u32 (!%p223_p8), 24, %s229_s28  ;;  %p269_p9 = scmp.lt.s32.totalorder (!%p223_p8), %s268_s29, 143 }
  0x1a   : > { %s1032_s8 = scalar_lea.vmem (!%p223_p8), [#allocation3], %s845_s30 }
  0x1c   : > { %s1095_s29 = smov (!%p269_p9, %s268_s29), 143  ;;  %293 = sbr.rel (%p749_p10) target bundleno = 35 (0x23), region = 62 }
  0x1d   : > { %s748_s4 = sshll.u32 %s1095_s29, 2 }
  0x1e   : > { %s1030_s7 = scalar_lea.vmem %s1085_s1, %s748_s4 }
  0x21   : > { %v957_v4 = vmov 0.0  }
  0x22   : > { %294 = vst [vmem:[#allocation2] sm:$0xff] %v957_v4  ;;  %295 = vst [vmem:[#allocation2 + $0x8] sm:$0xff] %v957_v4 }
  0x23 PF: > { %v889_v5 = vld [vmem:[%s1030_s7 + $0x78] sm:$0xff]   ;;  %v958_v6 = vmov 0.0   ;;  %vm959_vm0 = vmmov 0   ;;  %v892_v9 = vld [vmem:[%s1030_s7 + $0x70] sm:$0xff]   ;;  %v895_v12 = vld [vmem:[%s1030_s7 + $0x68] sm:$0xff]   ;;  %p777_p11 = scmp.ne.s32.totalorder %s947_s14, 2 }
  0x24   : > { %824 = vmatprep.subr.bf16.mxu1 %v958_v6  ;;  %v890_v7 = vld [vmem:[%s1030_s7 + $0xb8] sm:$0xff]   ;;  %793 = vmatprep.subr.bf16.mxu0 %v889_v5  ;;  %v893_v10 = vld [vmem:[%s1030_s7 + $0xb0] sm:$0xff]   ;;  %v896_v13 = vld [vmem:[%s1030_s7 + $0xa8] sm:$0xff]  }
  0x25   : > { %v891_v8 = vld [vmem:[%s1030_s7 + $0x38] sm:$0xff]   ;;  %840 = vmatprep.mubr.msk.bf16.mxu1 %vm959_vm0, %v958_v6  ;;  %825 = vmatpush3.bf16.msra.mxu1 %v890_v7  ;;  %v894_v11 = vld [vmem:[%s1030_s7 + $0x30] sm:$0xff]   ;;  %v897_v14 = vld [vmem:[%s1030_s7 + $0x28] sm:$0xff]  }
  0x26   : > { %794 = vmatpush3.bf16.msra.mxu0 %v891_v8  ;;  %826 = vmatprep.subr.bf16.mxu1 %v958_v6  ;;  %v898_v15 = vld [vmem:[%s1030_s7 + $0x60] sm:$0xff]   ;;  %v901_v18 = vld [vmem:[%s1030_s7 + $0x58] sm:$0xff]   ;;  %v904_v21 = vld [vmem:[%s1030_s7 + $0x50] sm:$0xff]  }
  0x27   : > { %795 = vmatprep.subr.bf16.mxu0 %v892_v9  ;;  %v899_v16 = vld [vmem:[%s1030_s7 + $0xa0] sm:$0xff]   ;;  %v902_v19 = vld [vmem:[%s1030_s7 + $0x98] sm:$0xff]   ;;  %v905_v22 = vld [vmem:[%s1030_s7 + $0x90] sm:$0xff]  }
  0x28   : > { %v900_v17 = vld [vmem:[%s1030_s7 + $0x20] sm:$0xff]   ;;  %v903_v20 = vld [vmem:[%s1030_s7 + $0x18] sm:$0xff]   ;;  %v906_v23 = vld [vmem:[%s1030_s7 + $0x10] sm:$0xff]  }
  0x29   : > { %827 = vmatpush3.bf16.msra.mxu1 %v893_v10  ;;  %v907_v24 = vld [vmem:[%s1030_s7 + $0x48] sm:$0xff]   ;;  %v910_v27 = vld [vmem:[%s1030_s7 + $0x40] sm:$0xff]  }
  0x2a   : > { %796 = vmatpush3.bf16.msra.mxu0 %v894_v11  ;;  %828 = vmatprep.subr.bf16.mxu1 %v958_v6  ;;  %v908_v25 = vld [vmem:[%s1030_s7 + $0x88] sm:$0xff]   ;;  %v911_v29 = vld [vmem:[%s1030_s7 + $0x80] sm:$0xff]  }
  0x2b   : > { %797 = vmatprep.subr.bf16.mxu0 %v895_v12  ;;  %v909_v26 = vld [vmem:[%s1030_s7 + $0x8] sm:$0xff]   ;;  %v912_v30 = vld [vmem:[%s1030_s7] sm:$0xff]  }
  0x2c   : > { %v915_v28 = vld [vmem:[%s1032_s8 + $0x4] ss:$12 sps:$4 sm:$0xff]   ;;  %v916_v31 = vld [vmem:[%s1032_s8 + $0x8] ss:$12 sps:$4 sm:$0xff]   ;;  %v913_v32 = vld [vmem:[%s1032_s8] ss:$12 sps:$4 sm:$0xff]  }
  0x2d   : > { %829 = vmatpush3.bf16.msra.mxu1 %v896_v13  ;;  %542 = vmatprep.mubr.bf16.mxu0 %v915_v28  ;;  %v296_v39 = vld [vmem:[#allocation2] sm:$0xff]  ;;  %v297_v46 = vld [vmem:[#allocation2 + $0x8] sm:$0xff] }
  0x2e   : > { %798 = vmatpush3.bf16.msra.mxu0 %v897_v14  ;;  %830 = vmatprep.subr.bf16.mxu1 %v958_v6 }
  0x2f   : > { %799 = vmatprep.subr.bf16.mxu0 %v898_v15 }
  0x31   : > { %831 = vmatpush3.bf16.msra.mxu1 %v899_v16 }
  0x32   : > { %800 = vmatpush3.bf16.msra.mxu0 %v900_v17  ;;  %832 = vmatprep.subr.bf16.mxu1 %v958_v6 }
  0x33   : > { %801 = vmatprep.subr.bf16.mxu0 %v901_v18 }
  0x35   : > { %833 = vmatpush3.bf16.msra.mxu1 %v902_v19 }
  0x36   : > { %802 = vmatpush3.bf16.msra.mxu0 %v903_v20  ;;  %834 = vmatprep.subr.bf16.mxu1 %v958_v6 }
  0x37   : > { %803 = vmatprep.subr.bf16.mxu0 %v904_v21 }
  0x39   : > { %835 = vmatpush3.bf16.msra.mxu1 %v905_v22 }
  0x3a   : > { %804 = vmatpush3.bf16.msra.mxu0 %v906_v23  ;;  %836 = vmatprep.subr.bf16.mxu1 %v958_v6 }
  0x3b   : > { %805 = vmatprep.subr.bf16.mxu0 %v907_v24 }
  0x3d   : > { %837 = vmatpush3.bf16.msra.mxu1 %v908_v25 }
  0x3e   : > { %806 = vmatpush3.bf16.msra.mxu0 %v909_v26  ;;  %838 = vmatprep.subr.bf16.mxu1 %v958_v6 }
  0x3f   : > { %807 = vmatprep.subr.bf16.mxu0 %v910_v27 }
  0x41   : > { %839 = vmatpush3.bf16.msra.mxu1 %v911_v29 }
  0x42   : > { %808 = vmatpush3.bf16.msra.mxu0 %v912_v30 }
  0x44   : > { %841 = vmatmul.mubr.bf16.vlgmr.msra.gmra.mxu1 %v916_v31 }
  0x45   : > { %543 = vmatmul.mubr.bf16.vlgmr.msra.gmra.mxu0 %v913_v32 }
 0x104   : > { %v585_v33 = vpop.f32.mrf.mxu1 }
 0x105   : > { %v809_v34 = vpop.f32.mrf.mxu0 }
 0x106   : > { %v842_v35 = vpop.f32.mrf.mxu1 }
 0x107   : > { %v810_v36 = vpop.f32.mrf.mxu0 }
 0x108   : > { %v811_v37 = vadd.f32 %v810_v36, %v809_v34  ;;  %v588_v38 = vpop.f32.mrf.mxu1 }
 0x109   : > { %v812_v40 = vpop.f32.mrf.mxu0 }
 0x10a   : > { %v586_v41 = vadd.f32 %v811_v37, %v585_v33  ;;  %v843_v42 = vpop.f32.mrf.mxu1 }
 0x10b   : > { %v813_v43 = vpop.f32.mrf.mxu0 }
 0x10c   : > { %v592_v44 = vadd.f32 %v586_v41, %v296_v39  ;;  %v814_v45 = vadd.f32 %v813_v43, %v812_v40 }
 0x10e   : > { %594 = vst [vmem:[#allocation2] sm:$0xff] %v592_v44  ;;  %v589_v47 = vadd.f32 %v814_v45, %v588_v38  ;;  %599 = sbr.rel (%p777_p11) target bundleno = 289 (0x121), region = 66 }
 0x110   : > { %v593_v48 = vadd.f32 %v589_v47, %v297_v46 }
 0x112   : > { %595 = vst [vmem:[#allocation2 + $0x8] sm:$0xff] %v593_v48 }
 0x113   : > { %v778_v51 = vld [vmem:[%s1086_s2] ss:$0 sm:$0xff] }
 0x115   : > { %v600_v49 = vld [vmem:[#allocation2] sm:$0xff] }
 0x116   : > { %v609_v52 = vadd.f32 %v778_v51, %v600_v49 }
 0x118   : > { %v611_v54 = vmax.f32 %v609_v52, 0.0 }
 0x119   : > { %v601_v50 = vld [vmem:[#allocation2 + $0x8] sm:$0xff] }
 0x11a   : > { %v610_v53 = vadd.f32 %v778_v51, %v601_v50 }
 0x11c   : > { %v612_v55 = vmax.f32 %v610_v53, 0.0 }
 0x11e   : > { %v791_v56 = vpack.c.bf16 %v612_v55, %v611_v54 }
 0x120   : > { %792 = vst [vmem:[%s1087_s3] sm:$0xff] %v791_v56  }
 0x121 PF: > { %s13_s16 = sadd.s32 1, %s955_s16   ;;  %s1088_s12 = smov %s943_s13 }
 0x122   : > { %p10_p12 = scmp.ge.s32.totalorder %s13_s16, 5   ;;  %s1089_s13 = smov %s1015_s20 }
 0x123   : > { %s1090_s14 = smov %s951_s15  ;;  %s1091_s15 = smov %s1093_s17 }
 0x124   :  { %12 = sbr.rel (!%p10_p12) target bundleno = 3 (0x3), region = 113 }

// kernel: perceptual_forward.29
= control target key start
LH: loop header
LB: loop body
LE: loop exit
PB: predicated region body
PF: predicated region fallthrough
CT: control target
= control target key end

     0   :  { %s2107_s0 = inlined_call_operand.vmem [shape: bf16[16,3200], index: 0, kind: input, shape index: {}]   ;;  %s2108_s1 = inlined_call_operand.vmem [shape: bf16[3200,256], index: 1, kind: input, shape index: {}]   ;;  %s2109_s2 = inlined_call_operand.vmem [shape: f32[1,256], index: 2, kind: input, shape index: {}]   ;;  %s2110_s3 = inlined_call_operand.vmem [shape: bf16[16,256], index: 3, kind: output, shape index: {}]  }
   0x1   :  { %2112 = sst [smem:[#allocation7_spill]] %s2107_s0 }
   0x2   :  { %2113 = sst [smem:[#allocation8_spill]] %s2108_s1 }
   0x3   :  { %s1716_s12 = smov 0   ;;  %s1718_s13 = smov 0  }
   0x4   :  { %s1720_s14 = smov 0   ;;  %s1722_s15 = smov 0  }
   0x5   :  { %s1724_s16 = smov 0   ;;  %s1726_s17 = smov 0  }
   0x6   :  { %s1728_s18 = smov 0   ;;  %s1730_s19 = smov 0  }
   0x7   :  { %s1732_s20 = smov 0   ;;  %s1734_s21 = smov 0  }
   0x8   :  { %s1736_s22 = smov 0  }
   0x9 LB: > { %s1314_s23 = sadd.s32 4294967295, %s1691_s22   ;;  %s25_s24 = sadd.s32 1, %s1683_s20  ;;  %s1691_s22 = sphi %s1736_s22, %s13_s22   ;;  %s1687_s21 = sphi %s1734_s21, %s2130_s21   ;;  %s1683_s20 = sphi %s1732_s20, %s2129_s20   ;;  %s1679_s19 = sphi %s1730_s19, %s2128_s19   ;;  %s1675_s18 = sphi %s1728_s18, %s2127_s18   ;;  %s1671_s17 = sphi %s1726_s17, %s2126_s17   ;;  %s1667_s16 = sphi %s1724_s16, %s2125_s16   ;;  %s1663_s15 = sphi %s1722_s15, %s2124_s15   ;;  %s1659_s14 = sphi %s1720_s14, %s2123_s14   ;;  %s1655_s13 = sphi %s1718_s13, %s2122_s13   ;;  %s1651_s12 = sphi %s1716_s12, %s2121_s12  }
   0xa   : > { %p26_p0 = scmp.ge.s32.totalorder %s25_s24, 5  ;;  %s28_s25 = sadd.s32 1, %s1687_s21 }
   0xb   : > { %s41_s26 = sadd.s32 1, %s1671_s17  ;;  %p48_p1 = scmp.ne.s32.totalorder %s1671_s17, %s1667_s16 }
   0xc   : > { %s2132_s24 = smov (%p26_p0, %s25_s24), 0  ;;  %s2134_s25 = smov (!%p26_p0, %s28_s25), %s1687_s21 }
   0xd   : > { %s37_s27 = ssub.s32 %s1683_s20, %s2132_s24  ;;  %p49_p2 = scmp.eq.s32.totalorder %s1691_s22, 0 }
   0xe   : > { %p30_p3 = scmp.ge.s32.totalorder %s2134_s25, 2  ;;  %p39_p4 = scmp.eq.s32.totalorder %s37_s27, 0 }
   0xf   : > { %p1783_p5 = por %p49_p2, %p48_p1  ;;  %s69_s29 = sadd.s32 1, %s1663_s15 }
  0x10   : > { %s2136_s25 = smov (%p30_p3, %s2134_s25), 0  ;;  %p76_p6 = scmp.ne.s32.totalorder %s1663_s15, %s1659_s14 }
  0x11   : > { %2115 = sst [smem:[#allocation6_spill]] %s2136_s25  ;;  %s65_s4 = ssub.s32 %s1687_s21, %s2136_s25 }
  0x12   : > { %s1791_s30 = scalar_select %p39_p4, %s1671_s17, %s41_s26  }
  0x13   : > { %s66_s5 = sor.u32 %s65_s4, %s37_s27  ;;  %p121_p7 = scmp.eq.s32.totalorder %s65_s4, 0 }
  0x14   : > { %p67_p8 = scmp.eq.s32.totalorder %s66_s5, 0  ;;  %p1797_p9 = por %p76_p6, %p49_p2 }
  0x15   : > { %s123_s7 = sadd.s32 1, %s1655_s13  ;;  %p133_p10 = scmp.ne.s32.totalorder %s1655_s13, %s1651_s12 }
  0x16   : > { %s1805_s8 = scalar_select %p67_p8, %s1663_s15, %s69_s29  }
  0x17   : > { %s1808_s9 = scalar_select %p121_p7, %s1655_s13, %s123_s7  }
  0x18   : > { %p134_p11 = scmp.eq.s32.totalorder %s1314_s23, 9  ;;  %p1317_p13 = scmp.ge.s32.totalorder %s1691_s22, 10 }
  0x1a   : > { %p1810_p12 = por %p134_p11, %p133_p10  ;;  %156 = sbr.rel (%p1317_p13) target bundleno = 105 (0x69), region = 16 }
  0x1f   : > { %159 = sbr.rel (!%p1783_p5) target bundleno = 43 (0x2b), region = 20  ;;  %s161_s11 = sand.u32 (%p1783_p5), 1, %s1671_s17  }
  0x20   : > { %s1381_s26 = smul.u32 (%p1783_p5), 20, %s1683_s20  ;;  %s2118_s0 = sld [smem:[#allocation7_spill]] (%p1783_p5) }
  0x21   : > { %s1463_s27 = smul.u32 (%p1783_p5), 40, %s161_s11 }
  0x23   : > { %s163_s23 = scalar_lea.vmem (%p1783_p5), [#allocation3], %s1463_s27 }
  0x26   : > { %s169_s5 = scalar_lea.vmem %s2118_s0, %s1381_s26 }
  0x27   : > { %v184_v0 = vld [vmem:[%s169_s5] sm:$0xff]  ;;  %v186_v1 = vld [vmem:[%s169_s5 + $0x8] sm:$0xff]  ;;  %v1319_v4 = vld [vmem:[%s169_s5 + $0x10] sm:$0xf] }
  0x28   : > { %v188_v2 = vld [vmem:[%s169_s5 + $0x64] sm:$0xff]  ;;  %185 = vst [vmem:[%s163_s23] sm:$0xff] %v184_v0  ;;  %187 = vst [vmem:[%s163_s23 + $0x8] sm:$0xff] %v186_v1  ;;  %v190_v3 = vld [vmem:[%s169_s5 + $0x6c] sm:$0xff] }
  0x29   : > { %189 = vst [vmem:[%s163_s23 + $0x14] sm:$0xff] %v188_v2  ;;  %v1321_v5 = vld [vmem:[%s169_s5 + $0x74] sm:$0xf]  ;;  %191 = vst [vmem:[%s163_s23 + $0x1c] sm:$0xff] %v190_v3 }
  0x2a   : > { %1320 = vst [vmem:[%s163_s23 + $0x10] sm:$0xf] %v1319_v4  ;;  %1322 = vst [vmem:[%s163_s23 + $0x24] sm:$0xf] %v1321_v5 }
  0x2b PF: > { %209 = sbr.rel (!%p1797_p9) target bundleno = 105 (0x69), region = 46  ;;  %s211_s28 = sand.u32 (%p1797_p9), 1, %s1663_s15  }
  0x2c   : > { %s1382_s7 = smul.u32 (%p1797_p9), 160, %s1683_s20  ;;  %s2119_s1 = sld [smem:[#allocation8_spill]] (%p1797_p9) }
  0x2d   : > { %s1464_s11 = smul.u32 (%p1797_p9), 320, %s211_s28 }
  0x2e   : > { %s216_s26 = sadd.s32 (%p1797_p9), %s1687_s21, %s1382_s7 }
  0x2f   : > { %s1324_s27 = sshll.u32 (%p1797_p9), %s216_s26, 2  ;;  %s1835_s6 = scalar_lea.vmem (%p1797_p9), [#allocation4], %s1464_s11 }
  0x32   : > { %s1830_s0 = scalar_lea.vmem %s2119_s1, %s1324_s27 }
  0x33   : > { %v235_v6 = vld [vmem:[%s1830_s0] sm:$0xf]  ;;  %v237_v7 = vld [vmem:[%s1830_s0 + $0x8] sm:$0xf]  ;;  %v239_v8 = vld [vmem:[%s1830_s0 + $0x10] sm:$0xf] }
  0x34   : > { %236 = vst [vmem:[%s1835_s6] sm:$0xf] %v235_v6  ;;  %238 = vst [vmem:[%s1835_s6 + $0x4] sm:$0xf] %v237_v7  ;;  %v241_v9 = vld [vmem:[%s1830_s0 + $0x18] sm:$0xf] }
  0x35   : > { %240 = vst [vmem:[%s1835_s6 + $0x8] sm:$0xf] %v239_v8  ;;  %v243_v10 = vld [vmem:[%s1830_s0 + $0x20] sm:$0xf]  ;;  %v245_v11 = vld [vmem:[%s1830_s0 + $0x28] sm:$0xf] }
  0x36   : > { %242 = vst [vmem:[%s1835_s6 + $0xc] sm:$0xf] %v241_v9  ;;  %244 = vst [vmem:[%s1835_s6 + $0x10] sm:$0xf] %v243_v10  ;;  %v247_v12 = vld [vmem:[%s1830_s0 + $0x30] sm:$0xf] }
  0x37   : > { %246 = vst [vmem:[%s1835_s6 + $0x14] sm:$0xf] %v245_v11  ;;  %v249_v13 = vld [vmem:[%s1830_s0 + $0x38] sm:$0xf]  ;;  %v251_v14 = vld [vmem:[%s1830_s0 + $0x40] sm:$0xf] }
  0x38   : > { %248 = vst [vmem:[%s1835_s6 + $0x18] sm:$0xf] %v247_v12  ;;  %250 = vst [vmem:[%s1835_s6 + $0x1c] sm:$0xf] %v249_v13  ;;  %v253_v15 = vld [vmem:[%s1830_s0 + $0x48] sm:$0xf] }
  0x39   : > { %252 = vst [vmem:[%s1835_s6 + $0x20] sm:$0xf] %v251_v14  ;;  %v255_v16 = vld [vmem:[%s1830_s0 + $0x50] sm:$0xf]  ;;  %v257_v17 = vld [vmem:[%s1830_s0 + $0x58] sm:$0xf] }
  0x3a   : > { %254 = vst [vmem:[%s1835_s6 + $0x24] sm:$0xf] %v253_v15  ;;  %256 = vst [vmem:[%s1835_s6 + $0x28] sm:$0xf] %v255_v16  ;;  %v259_v18 = vld [vmem:[%s1830_s0 + $0x60] sm:$0xf] }
  0x3b   : > { %258 = vst [vmem:[%s1835_s6 + $0x2c] sm:$0xf] %v257_v17  ;;  %v261_v19 = vld [vmem:[%s1830_s0 + $0x68] sm:$0xf]  ;;  %v263_v20 = vld [vmem:[%s1830_s0 + $0x70] sm:$0xf] }
  0x3c   : > { %260 = vst [vmem:[%s1835_s6 + $0x30] sm:$0xf] %v259_v18  ;;  %262 = vst [vmem:[%s1835_s6 + $0x34] sm:$0xf] %v261_v19  ;;  %v265_v21 = vld [vmem:[%s1830_s0 + $0x78] sm:$0xf] }
  0x3d   : > { %264 = vst [vmem:[%s1835_s6 + $0x38] sm:$0xf] %v263_v20  ;;  %v267_v22 = vld [vmem:[%s1830_s0 + $0x80] sm:$0xf]  ;;  %v269_v23 = vld [vmem:[%s1830_s0 + $0x88] sm:$0xf] }
  0x3e   : > { %266 = vst [vmem:[%s1835_s6 + $0x3c] sm:$0xf] %v265_v21  ;;  %268 = vst [vmem:[%s1835_s6 + $0x40] sm:$0xf] %v267_v22  ;;  %v271_v24 = vld [vmem:[%s1830_s0 + $0x90] sm:$0xf] }
  0x3f   : > { %270 = vst [vmem:[%s1835_s6 + $0x44] sm:$0xf] %v269_v23  ;;  %v273_v25 = vld [vmem:[%s1830_s0 + $0x98] sm:$0xf]  ;;  %v275_v26 = vld [vmem:[%s1830_s0 + $0xa0] sm:$0xf] }
  0x40   : > { %272 = vst [vmem:[%s1835_s6 + $0x48] sm:$0xf] %v271_v24  ;;  %274 = vst [vmem:[%s1835_s6 + $0x4c] sm:$0xf] %v273_v25  ;;  %v277_v27 = vld [vmem:[%s1830_s0 + $0xa8] sm:$0xf] }
  0x41   : > { %276 = vst [vmem:[%s1835_s6 + $0x50] sm:$0xf] %v275_v26  ;;  %v279_v28 = vld [vmem:[%s1830_s0 + $0xb0] sm:$0xf]  ;;  %v281_v29 = vld [vmem:[%s1830_s0 + $0xb8] sm:$0xf] }
  0x42   : > { %278 = vst [vmem:[%s1835_s6 + $0x54] sm:$0xf] %v277_v27  ;;  %280 = vst [vmem:[%s1835_s6 + $0x58] sm:$0xf] %v279_v28  ;;  %v283_v30 = vld [vmem:[%s1830_s0 + $0xc0] sm:$0xf] }
  0x43   : > { %282 = vst [vmem:[%s1835_s6 + $0x5c] sm:$0xf] %v281_v29  ;;  %v285_v31 = vld [vmem:[%s1830_s0 + $0xc8] sm:$0xf]  ;;  %v287_v32 = vld [vmem:[%s1830_s0 + $0xd0] sm:$0xf] }
  0x44   : > { %284 = vst [vmem:[%s1835_s6 + $0x60] sm:$0xf] %v283_v30  ;;  %286 = vst [vmem:[%s1835_s6 + $0x64] sm:$0xf] %v285_v31  ;;  %v289_v33 = vld [vmem:[%s1830_s0 + $0xd8] sm:$0xf] }
  0x45   : > { %288 = vst [vmem:[%s1835_s6 + $0x68] sm:$0xf] %v287_v32  ;;  %v291_v34 = vld [vmem:[%s1830_s0 + $0xe0] sm:$0xf]  ;;  %v293_v35 = vld [vmem:[%s1830_s0 + $0xe8] sm:$0xf] }
  0x46   : > { %290 = vst [vmem:[%s1835_s6 + $0x6c] sm:$0xf] %v289_v33  ;;  %292 = vst [vmem:[%s1835_s6 + $0x70] sm:$0xf] %v291_v34  ;;  %v295_v36 = vld [vmem:[%s1830_s0 + $0xf0] sm:$0xf] }
  0x47   : > { %294 = vst [vmem:[%s1835_s6 + $0x74] sm:$0xf] %v293_v35  ;;  %v297_v37 = vld [vmem:[%s1830_s0 + $0xf8] sm:$0xf]  ;;  %v299_v38 = vld [vmem:[%s1830_s0 + $0x100] sm:$0xf] }
  0x48   : > { %296 = vst [vmem:[%s1835_s6 + $0x78] sm:$0xf] %v295_v36  ;;  %298 = vst [vmem:[%s1835_s6 + $0x7c] sm:$0xf] %v297_v37  ;;  %v301_v39 = vld [vmem:[%s1830_s0 + $0x108] sm:$0xf] }
  0x49   : > { %300 = vst [vmem:[%s1835_s6 + $0x80] sm:$0xf] %v299_v38  ;;  %v303_v40 = vld [vmem:[%s1830_s0 + $0x110] sm:$0xf]  ;;  %v305_v41 = vld [vmem:[%s1830_s0 + $0x118] sm:$0xf] }
  0x4a   : > { %302 = vst [vmem:[%s1835_s6 + $0x84] sm:$0xf] %v301_v39  ;;  %304 = vst [vmem:[%s1835_s6 + $0x88] sm:$0xf] %v303_v40  ;;  %v307_v42 = vld [vmem:[%s1830_s0 + $0x120] sm:$0xf] }
  0x4b   : > { %306 = vst [vmem:[%s1835_s6 + $0x8c] sm:$0xf] %v305_v41  ;;  %v309_v43 = vld [vmem:[%s1830_s0 + $0x128] sm:$0xf]  ;;  %v311_v44 = vld [vmem:[%s1830_s0 + $0x130] sm:$0xf] }
  0x4c   : > { %308 = vst [vmem:[%s1835_s6 + $0x90] sm:$0xf] %v307_v42  ;;  %310 = vst [vmem:[%s1835_s6 + $0x94] sm:$0xf] %v309_v43  ;;  %v313_v45 = vld [vmem:[%s1830_s0 + $0x138] sm:$0xf] }
  0x4d   : > { %312 = vst [vmem:[%s1835_s6 + $0x98] sm:$0xf] %v311_v44  ;;  %v315_v46 = vld [vmem:[%s1830_s0 + $0x140] sm:$0xf]  ;;  %v317_v47 = vld [vmem:[%s1830_s0 + $0x148] sm:$0xf] }
  0x4e   : > { %314 = vst [vmem:[%s1835_s6 + $0x9c] sm:$0xf] %v313_v45  ;;  %316 = vst [vmem:[%s1835_s6 + $0xa0] sm:$0xf] %v315_v46  ;;  %v319_v48 = vld [vmem:[%s1830_s0 + $0x150] sm:$0xf] }
  0x4f   : > { %318 = vst [vmem:[%s1835_s6 + $0xa4] sm:$0xf] %v317_v47  ;;  %v321_v49 = vld [vmem:[%s1830_s0 + $0x158] sm:$0xf]  ;;  %v323_v50 = vld [vmem:[%s1830_s0 + $0x160] sm:$0xf] }
  0x50   : > { %320 = vst [vmem:[%s1835_s6 + $0xa8] sm:$0xf] %v319_v48  ;;  %322 = vst [vmem:[%s1835_s6 + $0xac] sm:$0xf] %v321_v49  ;;  %v325_v51 = vld [vmem:[%s1830_s0 + $0x168] sm:$0xf] }
  0x51   : > { %324 = vst [vmem:[%s1835_s6 + $0xb0] sm:$0xf] %v323_v50  ;;  %v327_v52 = vld [vmem:[%s1830_s0 + $0x170] sm:$0xf]  ;;  %v329_v53 = vld [vmem:[%s1830_s0 + $0x178] sm:$0xf] }
  0x52   : > { %326 = vst [vmem:[%s1835_s6 + $0xb4] sm:$0xf] %v325_v51  ;;  %328 = vst [vmem:[%s1835_s6 + $0xb8] sm:$0xf] %v327_v52  ;;  %v331_v54 = vld [vmem:[%s1830_s0 + $0x180] sm:$0xf] }
  0x53   : > { %330 = vst [vmem:[%s1835_s6 + $0xbc] sm:$0xf] %v329_v53  ;;  %v333_v55 = vld [vmem:[%s1830_s0 + $0x188] sm:$0xf]  ;;  %v335_v56 = vld [vmem:[%s1830_s0 + $0x190] sm:$0xf] }
  0x54   : > { %332 = vst [vmem:[%s1835_s6 + $0xc0] sm:$0xf] %v331_v54  ;;  %334 = vst [vmem:[%s1835_s6 + $0xc4] sm:$0xf] %v333_v55  ;;  %v337_v57 = vld [vmem:[%s1830_s0 + $0x198] sm:$0xf] }
  0x55   : > { %336 = vst [vmem:[%s1835_s6 + $0xc8] sm:$0xf] %v335_v56  ;;  %v339_v58 = vld [vmem:[%s1830_s0 + $0x1a0] sm:$0xf]  ;;  %v341_v59 = vld [vmem:[%s1830_s0 + $0x1a8] sm:$0xf] }
  0x56   : > { %338 = vst [vmem:[%s1835_s6 + $0xcc] sm:$0xf] %v337_v57  ;;  %340 = vst [vmem:[%s1835_s6 + $0xd0] sm:$0xf] %v339_v58  ;;  %v343_v60 = vld [vmem:[%s1830_s0 + $0x1b0] sm:$0xf] }
  0x57   : > { %342 = vst [vmem:[%s1835_s6 + $0xd4] sm:$0xf] %v341_v59  ;;  %v345_v61 = vld [vmem:[%s1830_s0 + $0x1b8] sm:$0xf]  ;;  %v347_v62 = vld [vmem:[%s1830_s0 + $0x1c0] sm:$0xf] }
  0x58   : > { %344 = vst [vmem:[%s1835_s6 + $0xd8] sm:$0xf] %v343_v60  ;;  %346 = vst [vmem:[%s1835_s6 + $0xdc] sm:$0xf] %v345_v61  ;;  %v349_v63 = vld [vmem:[%s1830_s0 + $0x1c8] sm:$0xf] }
  0x59   : > { %348 = vst [vmem:[%s1835_s6 + $0xe0] sm:$0xf] %v347_v62  ;;  %v351_v0 = vld [vmem:[%s1830_s0 + $0x1d0] sm:$0xf]  ;;  %v353_v1 = vld [vmem:[%s1830_s0 + $0x1d8] sm:$0xf] }
  0x5a   : > { %350 = vst [vmem:[%s1835_s6 + $0xe4] sm:$0xf] %v349_v63  ;;  %352 = vst [vmem:[%s1835_s6 + $0xe8] sm:$0xf] %v351_v0  ;;  %v355_v2 = vld [vmem:[%s1830_s0 + $0x1e0] sm:$0xf] }
  0x5b   : > { %354 = vst [vmem:[%s1835_s6 + $0xec] sm:$0xf] %v353_v1  ;;  %v357_v3 = vld [vmem:[%s1830_s0 + $0x1e8] sm:$0xf]  ;;  %v359_v4 = vld [vmem:[%s1830_s0 + $0x1f0] sm:$0xf] }
  0x5c   : > { %356 = vst [vmem:[%s1835_s6 + $0xf0] sm:$0xf] %v355_v2  ;;  %358 = vst [vmem:[%s1835_s6 + $0xf4] sm:$0xf] %v357_v3  ;;  %v361_v5 = vld [vmem:[%s1830_s0 + $0x1f8] sm:$0xf] }
  0x5d   : > { %360 = vst [vmem:[%s1835_s6 + $0xf8] sm:$0xf] %v359_v4  ;;  %v363_v6 = vld [vmem:[%s1830_s0 + $0x200] sm:$0xf]  ;;  %v365_v7 = vld [vmem:[%s1830_s0 + $0x208] sm:$0xf] }
  0x5e   : > { %362 = vst [vmem:[%s1835_s6 + $0xfc] sm:$0xf] %v361_v5  ;;  %364 = vst [vmem:[%s1835_s6 + $0x100] sm:$0xf] %v363_v6  ;;  %v367_v8 = vld [vmem:[%s1830_s0 + $0x210] sm:$0xf] }
  0x5f   : > { %366 = vst [vmem:[%s1835_s6 + $0x104] sm:$0xf] %v365_v7  ;;  %v369_v9 = vld [vmem:[%s1830_s0 + $0x218] sm:$0xf]  ;;  %v371_v10 = vld [vmem:[%s1830_s0 + $0x220] sm:$0xf] }
  0x60   : > { %368 = vst [vmem:[%s1835_s6 + $0x108] sm:$0xf] %v367_v8  ;;  %370 = vst [vmem:[%s1835_s6 + $0x10c] sm:$0xf] %v369_v9  ;;  %v373_v11 = vld [vmem:[%s1830_s0 + $0x228] sm:$0xf] }
  0x61   : > { %372 = vst [vmem:[%s1835_s6 + $0x110] sm:$0xf] %v371_v10  ;;  %v375_v12 = vld [vmem:[%s1830_s0 + $0x230] sm:$0xf]  ;;  %v377_v13 = vld [vmem:[%s1830_s0 + $0x238] sm:$0xf] }
  0x62   : > { %374 = vst [vmem:[%s1835_s6 + $0x114] sm:$0xf] %v373_v11  ;;  %376 = vst [vmem:[%s1835_s6 + $0x118] sm:$0xf] %v375_v12  ;;  %v379_v14 = vld [vmem:[%s1830_s0 + $0x240] sm:$0xf] }
  0x63   : > { %378 = vst [vmem:[%s1835_s6 + $0x11c] sm:$0xf] %v377_v13  ;;  %v381_v15 = vld [vmem:[%s1830_s0 + $0x248] sm:$0xf]  ;;  %v383_v16 = vld [vmem:[%s1830_s0 + $0x250] sm:$0xf] }
  0x64   : > { %380 = vst [vmem:[%s1835_s6 + $0x120] sm:$0xf] %v379_v14  ;;  %382 = vst [vmem:[%s1835_s6 + $0x124] sm:$0xf] %v381_v15  ;;  %v385_v17 = vld [vmem:[%s1830_s0 + $0x258] sm:$0xf] }
  0x65   : > { %384 = vst [vmem:[%s1835_s6 + $0x128] sm:$0xf] %v383_v16  ;;  %v387_v18 = vld [vmem:[%s1830_s0 + $0x260] sm:$0xf]  ;;  %v389_v19 = vld [vmem:[%s1830_s0 + $0x268] sm:$0xf] }
  0x66   : > { %386 = vst [vmem:[%s1835_s6 + $0x12c] sm:$0xf] %v385_v17  ;;  %388 = vst [vmem:[%s1835_s6 + $0x130] sm:$0xf] %v387_v18  ;;  %v391_v20 = vld [vmem:[%s1830_s0 + $0x270] sm:$0xf] }
  0x67   : > { %390 = vst [vmem:[%s1835_s6 + $0x134] sm:$0xf] %v389_v19  ;;  %v393_v21 = vld [vmem:[%s1830_s0 + $0x278] sm:$0xf]  ;;  %392 = vst [vmem:[%s1835_s6 + $0x138] sm:$0xf] %v391_v20 }
  0x68   : > { %394 = vst [vmem:[%s1835_s6 + $0x13c] sm:$0xf] %v393_v21 }
  0x69 PF: > { %p1325_p0 = scmp.ge.s32.totalorder %s1691_s22, 1  ;;  %p583_p1 = scmp.lt.s32.totalorder %s1691_s22, 11 }
  0x6b   : > { %p584_p2 = pnand %p1325_p0, %p583_p1 }
  0x6c   : > { %s590_s5 = sand.u32 (!%p584_p2), 1, %s1667_s16   ;;  %s597_s23 = sand.u32 (!%p584_p2), 1, %s1659_s14  }
  0x6d   : > { %587 = sbr.rel (%p584_p2) target bundleno = 412 (0x19c), region = 91  ;;  %s623_s7 = sand.u32 (!%p584_p2), 1, %s1651_s12  }
  0x6e   : > { %s1465_s28 = smul.u32 (!%p584_p2), 40, %s590_s5  ;;  %s1326_s11 = sshll.u32 (!%p584_p2), %s623_s7, 3 }
  0x6f   : > { %s1466_s0 = smul.u32 (!%p584_p2), 320, %s597_s23  ;;  %p629_p3 = scmp.lt.s32.totalorder (!%p584_p2), %s1679_s19, 1 }
  0x70   : > { %s2007_s6 = scalar_lea.vmem (!%p584_p2), [#allocation3], %s1465_s28  ;;  %s2011_s25 = scalar_lea.vmem (!%p584_p2), [#allocation5], %s1326_s11 }
  0x71   : > { %s2009_s1 = scalar_lea.vmem (!%p584_p2), [#allocation4], %s1466_s0  ;;  %p1327_p4 = scmp.ne.s32.totalorder (!%p584_p2), %s1675_s18, 0 }
  0x72   : > { %s2001_s26 = scalar_select %p629_p3, %s1679_s19, 1 }
  0x73   : > { %637 = sbr.rel (%p1327_p4) target bundleno = 122 (0x7a), region = 103 }
  0x74   : > { %s631_s4 = scalar_lea.vmem %s2109_s2, %s2001_s26 }
  0x78   : > { %v1693_v22 = vmov 0.0  }
  0x79   : > { %638 = vst [vmem:[#allocation2] sm:$0xff] %v1693_v22  ;;  %639 = vst [vmem:[#allocation2 + $0x8] sm:$0xff] %v1693_v22 }
  0x7a PF: > { %v1558_v23 = vld [vmem:[%s2009_s1 + $0x78] sm:$0xff]   ;;  %v1562_v27 = vld [vmem:[%s2009_s1 + $0x70] sm:$0xff]   ;;  %v1566_v31 = vld [vmem:[%s2009_s1 + $0x68] sm:$0xff]   ;;  %v1694_v57 = vmov 0.0   ;;  %vm1695_vm0 = vmmov 0   ;;  %p1373_p5 = scmp.ne.s32.totalorder %s1675_s18, 4 }
  0x7b   : > { %v1559_v24 = vld [vmem:[%s2009_s1 + $0xf8] sm:$0xff]   ;;  %1390 = vmatprep.subr.bf16.mxu0 %v1558_v23  ;;  %v1563_v28 = vld [vmem:[%s2009_s1 + $0xf0] sm:$0xff]   ;;  %v1567_v32 = vld [vmem:[%s2009_s1 + $0xe8] sm:$0xff]  }
  0x7c   : > { %v1560_v25 = vld [vmem:[%s2009_s1 + $0x38] sm:$0xff]   ;;  %1412 = vmatprep.subr.bf16.mxu1 %v1559_v24  ;;  %v1564_v29 = vld [vmem:[%s2009_s1 + $0x30] sm:$0xff]   ;;  %v1568_v33 = vld [vmem:[%s2009_s1 + $0x28] sm:$0xff]  }
  0x7d   : > { %v1561_v26 = vld [vmem:[%s2009_s1 + $0xb8] sm:$0xff]   ;;  %1391 = vmatpush3.bf16.msra.mxu0 %v1560_v25  ;;  %v1565_v30 = vld [vmem:[%s2009_s1 + $0xb0] sm:$0xff]   ;;  %v1569_v34 = vld [vmem:[%s2009_s1 + $0xa8] sm:$0xff]  }
  0x7e   : > { %1413 = vmatpush3.bf16.msra.mxu1 %v1561_v26  ;;  %1392 = vmatprep.subr.bf16.mxu0 %v1562_v27  ;;  %v1570_v35 = vld [vmem:[%s2009_s1 + $0x60] sm:$0xff]   ;;  %v1574_v39 = vld [vmem:[%s2009_s1 + $0x58] sm:$0xff]   ;;  %v1578_v43 = vld [vmem:[%s2009_s1 + $0x50] sm:$0xff]  }
  0x7f   : > { %1414 = vmatprep.subr.bf16.mxu1 %v1563_v28  ;;  %v1571_v36 = vld [vmem:[%s2009_s1 + $0xe0] sm:$0xff]   ;;  %v1575_v40 = vld [vmem:[%s2009_s1 + $0xd8] sm:$0xff]   ;;  %v1579_v44 = vld [vmem:[%s2009_s1 + $0xd0] sm:$0xff]  }
  0x80   : > { %v1572_v37 = vld [vmem:[%s2009_s1 + $0x20] sm:$0xff]   ;;  %v1576_v41 = vld [vmem:[%s2009_s1 + $0x18] sm:$0xff]   ;;  %v1580_v45 = vld [vmem:[%s2009_s1 + $0x10] sm:$0xff]  }
  0x81   : > { %1393 = vmatpush3.bf16.msra.mxu0 %v1564_v29  ;;  %v1573_v38 = vld [vmem:[%s2009_s1 + $0xa0] sm:$0xff]   ;;  %v1577_v42 = vld [vmem:[%s2009_s1 + $0x98] sm:$0xff]   ;;  %v1581_v46 = vld [vmem:[%s2009_s1 + $0x90] sm:$0xff]  }
  0x82   : > { %1415 = vmatpush3.bf16.msra.mxu1 %v1565_v30  ;;  %1394 = vmatprep.subr.bf16.mxu0 %v1566_v31  ;;  %v1582_v47 = vld [vmem:[%s2009_s1 + $0x48] sm:$0xff]   ;;  %v1586_v51 = vld [vmem:[%s2009_s1 + $0x40] sm:$0xff]   ;;  %v1596_v60 = vld [vmem:[%s2009_s1 + $0x138] sm:$0xff]  }
  0x83   : > { %1416 = vmatprep.subr.bf16.mxu1 %v1567_v32  ;;  %v1583_v48 = vld [vmem:[%s2009_s1 + $0xc8] sm:$0xff]   ;;  %v1587_v52 = vld [vmem:[%s2009_s1 + $0xc0] sm:$0xff]   ;;  %v1597_v61 = vld [vmem:[%s2009_s1 + $0x130] sm:$0xff]  }
  0x84   : > { %v1584_v49 = vld [vmem:[%s2009_s1 + $0x8] sm:$0xff]   ;;  %v1588_v53 = vld [vmem:[%s2009_s1] sm:$0xff]   ;;  %v1600_v0 = vld [vmem:[%s2009_s1 + $0x118] sm:$0xff]  }
  0x85   : > { %1395 = vmatpush3.bf16.msra.mxu0 %v1568_v33  ;;  %v1585_v50 = vld [vmem:[%s2009_s1 + $0x88] sm:$0xff]   ;;  %v1589_v54 = vld [vmem:[%s2009_s1 + $0x80] sm:$0xff]   ;;  %v1601_v1 = vld [vmem:[%s2009_s1 + $0x110] sm:$0xff]  }
  0x86   : > { %1417 = vmatpush3.bf16.msra.mxu1 %v1569_v34  ;;  %1396 = vmatprep.subr.bf16.mxu0 %v1570_v35  ;;  %v1590_v55 = vld [vmem:[%s2007_s6] ss:$20 sps:$4 sm:$0xff]   ;;  %v1592_v56 = vld [vmem:[%s2007_s6 + $0x4] ss:$20 sps:$4 sm:$0xff]   ;;  %v1593_v58 = vld [vmem:[%s2007_s6 + $0x8] ss:$20 sps:$4 sm:$0xff]  }
  0x87   : > { %1418 = vmatprep.subr.bf16.mxu1 %v1571_v36  ;;  %v1595_v59 = vld [vmem:[%s2007_s6 + $0xc] ss:$20 sps:$4 sm:$0xff]   ;;  %1026 = vmatprep.mubr.bf16.mxu0 %v1592_v56  ;;  %v1598_v62 = vld [vmem:[%s2009_s1 + $0x128] sm:$0xff]  }
  0x88   : > { %1067 = vmatprep.mubr.bf16.mxu1 %v1595_v59  ;;  %v1599_v63 = vld [vmem:[%s2009_s1 + $0x120] sm:$0xff]   ;;  %v1602_v2 = vld [vmem:[%s2009_s1 + $0x108] sm:$0xff]  }
  0x89   : > { %1397 = vmatpush3.bf16.msra.mxu0 %v1572_v37  ;;  %v1603_v3 = vld [vmem:[%s2009_s1 + $0x100] sm:$0xff]   ;;  %v641_v24 = vld [vmem:[#allocation2 + $0x8] sm:$0xff] }
  0x8a   : > { %1419 = vmatpush3.bf16.msra.mxu1 %v1573_v38  ;;  %1398 = vmatprep.subr.bf16.mxu0 %v1574_v39  ;;  %v1604_v4 = vld [vmem:[%s2007_s6 + $0x10] ss:$20 sps:$4 sm:$0xff]  }
  0x8b   : > { %1420 = vmatprep.subr.bf16.mxu1 %v1575_v40  ;;  %v640_v18 = vld [vmem:[#allocation2] sm:$0xff] }
  0x8d   : > { %1399 = vmatpush3.bf16.msra.mxu0 %v1576_v41 }
  0x8e   : > { %1421 = vmatpush3.bf16.msra.mxu1 %v1577_v42  ;;  %1400 = vmatprep.subr.bf16.mxu0 %v1578_v43 }
  0x8f   : > { %1422 = vmatprep.subr.bf16.mxu1 %v1579_v44 }
  0x91   : > { %1401 = vmatpush3.bf16.msra.mxu0 %v1580_v45 }
  0x92   : > { %1423 = vmatpush3.bf16.msra.mxu1 %v1581_v46  ;;  %1402 = vmatprep.subr.bf16.mxu0 %v1582_v47 }
  0x93   : > { %1424 = vmatprep.subr.bf16.mxu1 %v1583_v48 }
  0x95   : > { %1403 = vmatpush3.bf16.msra.mxu0 %v1584_v49 }
  0x96   : > { %1425 = vmatpush3.bf16.msra.mxu1 %v1585_v50  ;;  %1404 = vmatprep.subr.bf16.mxu0 %v1586_v51 }
  0x97   : > { %1426 = vmatprep.subr.bf16.mxu1 %v1587_v52 }
  0x99   : > { %1405 = vmatpush3.bf16.msra.mxu0 %v1588_v53 }
  0x9a   : > { %1427 = vmatpush3.bf16.msra.mxu1 %v1589_v54  ;;  %1443 = vmatprep.subr.bf16.mxu0 %v1694_v57 }
  0x9c   : > { %1027 = vmatmul.mubr.bf16.vlgmr.msra.gmra.mxu0 %v1590_v55 }
  0x9d   : > { %1068 = vmatmul.mubr.bf16.vlgmr.msra.gmra.mxu1 %v1593_v58  ;;  %1444 = vmatpush3.bf16.msra.mxu0 %v1596_v60 }
  0x9e   : > { %1445 = vmatprep.subr.bf16.mxu0 %v1694_v57  ;;  %1459 = vmatprep.mubr.msk.bf16.mxu0 %vm1695_vm0, %v1694_v57 }
  0xa1   : > { %1446 = vmatpush3.bf16.msra.mxu0 %v1597_v61 }
  0xa2   : > { %1447 = vmatprep.subr.bf16.mxu0 %v1694_v57 }
  0xa5   : > { %1448 = vmatpush3.bf16.msra.mxu0 %v1598_v62 }
  0xa6   : > { %1449 = vmatprep.subr.bf16.mxu0 %v1694_v57 }
  0xa9   : > { %1450 = vmatpush3.bf16.msra.mxu0 %v1599_v63 }
  0xaa   : > { %1451 = vmatprep.subr.bf16.mxu0 %v1694_v57 }
  0xad   : > { %1452 = vmatpush3.bf16.msra.mxu0 %v1600_v0 }
  0xae   : > { %1453 = vmatprep.subr.bf16.mxu0 %v1694_v57 }
  0xb1   : > { %1454 = vmatpush3.bf16.msra.mxu0 %v1601_v1 }
  0xb2   : > { %1455 = vmatprep.subr.bf16.mxu0 %v1694_v57 }
  0xb5   : > { %1456 = vmatpush3.bf16.msra.mxu0 %v1602_v2 }
  0xb6   : > { %1457 = vmatprep.subr.bf16.mxu0 %v1694_v57 }
  0xb9   : > { %1458 = vmatpush3.bf16.msra.mxu0 %v1603_v3 }
  0xbc   : > { %1460 = vmatmul.mubr.bf16.vlgmr.msra.gmra.mxu0 %v1604_v4 }
 0x15c   : > { %v1406_v5 = vpop.f32.mrf.mxu0 }
 0x15d   : > { %v1428_v6 = vpop.f32.mrf.mxu1 }
 0x15e   : > { %v1407_v7 = vpop.f32.mrf.mxu0 }
 0x15f   : > { %v1429_v8 = vpop.f32.mrf.mxu1  ;;  %v1408_v11 = vadd.f32 %v1407_v7, %v1406_v5 }
 0x160   : > { %v1409_v9 = vpop.f32.mrf.mxu0  ;;  %v1430_v12 = vadd.f32 %v1429_v8, %v1428_v6 }
 0x161   : > { %v1431_v10 = vpop.f32.mrf.mxu1 }
 0x162   : > { %v1410_v13 = vpop.f32.mrf.mxu0  ;;  %v1070_v17 = vadd.f32 %v1430_v12, %v1408_v11 }
 0x163   : > { %v1432_v14 = vpop.f32.mrf.mxu1  ;;  %v1411_v15 = vadd.f32 %v1410_v13, %v1409_v9 }
 0x164   : > { %v1433_v16 = vadd.f32 %v1432_v14, %v1431_v10 }
 0x166   : > { %v1073_v23 = vadd.f32 %v1433_v16, %v1411_v15 }
 0x17c   : > { %v1110_v19 = vpop.f32.mrf.mxu0 }
 0x17d   : > { %v1111_v20 = vadd.f32 %v1110_v19, %v1070_v17 }
 0x17e   : > { %v1461_v21 = vpop.f32.mrf.mxu0 }
 0x17f   : > { %v1117_v22 = vadd.f32 %v1111_v20, %v640_v18 }
 0x180   : > { %v1113_v25 = vpop.f32.mrf.mxu0 }
 0x181   : > { %1119 = vst [vmem:[#allocation2] sm:$0xff] %v1117_v22  ;;  %v1114_v26 = vadd.f32 %v1113_v25, %v1073_v23  ;;  %1124 = sbr.rel (%p1373_p5) target bundleno = 404 (0x194), region = 107 }
 0x182   : > { %v1462_v27 = vpop.f32.mrf.mxu0 }
 0x183   : > { %v1118_v28 = vadd.f32 %v1114_v26, %v641_v24 }
 0x185   : > { %1120 = vst [vmem:[#allocation2 + $0x8] sm:$0xff] %v1118_v28 }
 0x186   : > { %v1374_v31 = vld [vmem:[%s631_s4] ss:$0 sm:$0xff] }
 0x188   : > { %v1125_v29 = vld [vmem:[#allocation2] sm:$0xff] }
 0x189   : > { %v1134_v32 = vadd.f32 %v1374_v31, %v1125_v29 }
 0x18b   : > { %v1136_v34 = vmax.f32 %v1134_v32, 0.0 }
 0x18c   : > { %v1126_v30 = vld [vmem:[#allocation2 + $0x8] sm:$0xff] }
 0x18d   : > { %v1135_v33 = vadd.f32 %v1374_v31, %v1126_v30 }
 0x18f   : > { %v1137_v35 = vmax.f32 %v1135_v33, 0.0 }
 0x191   : > { %v1388_v36 = vpack.c.bf16 %v1137_v35, %v1136_v34 }
 0x193   : > { %1389 = vst [vmem:[%s2011_s25] sm:$0xff] %v1388_v36  }
 0x194 PF: > { %1154 = sbr.rel (!%p1810_p12) target bundleno = 412 (0x19c), region = 111  ;;  %s1378_s14 = sshll.u32 (%p1810_p12), %s1679_s19, 2 }
 0x195   : > { %s1159_s5 = scalar_lea.vmem (%p1810_p12), %s2110_s3, %s1378_s14 }
 0x19a   : > { %v1176_v37 = vld [vmem:[%s2011_s25] sm:$0xf]  ;;  %v1178_v38 = vld [vmem:[%s2011_s25 + $0x4] sm:$0xf] }
 0x19b   : > { %1177 = vst [vmem:[%s1159_s5] sm:$0xf] %v1176_v37  ;;  %1179 = vst [vmem:[%s1159_s5 + $0x8] sm:$0xf] %v1178_v38 }
 0x19c PF: > { %s13_s22 = sadd.s32 1, %s1691_s22   ;;  %s2120_s25 = sld [smem:[#allocation6_spill]] }
 0x19d   : > { %p10_p6 = scmp.ge.s32.totalorder %s13_s22, 12   ;;  %s2121_s12 = smov %s1655_s13 }
 0x19e   : > { %s2122_s13 = smov %s1808_s9  ;;  %s2123_s14 = smov %s1663_s15 }
 0x19f   : > { %s2124_s15 = smov %s1805_s8  ;;  %s2125_s16 = smov %s1671_s17 }
 0x1a0   : > { %s2126_s17 = smov %s1791_s30  ;;  %s2127_s18 = smov %s1683_s20 }
 0x1a1   : > { %s2128_s19 = smov %s1687_s21  ;;  %s2129_s20 = smov %s2132_s24 }
 0x1a2   : > { %s2130_s21 = smov %s2120_s25  ;;  %12 = sbr.rel (!%p10_p6) target bundleno = 9 (0x9), region = 200 }

// kernel: perceptual_forward.30
= control target key start
LH: loop header
LB: loop body
LE: loop exit
PB: predicated region body
PF: predicated region fallthrough
CT: control target
= control target key end

     0   :  { %s2270_s0 = inlined_call_operand.vmem [shape: bf16[16,2304], index: 0, kind: input, shape index: {}]   ;;  %s2271_s1 = inlined_call_operand.vmem [shape: bf16[2304,256], index: 1, kind: input, shape index: {}]   ;;  %s2272_s2 = inlined_call_operand.vmem [shape: f32[1,256], index: 2, kind: input, shape index: {}]   ;;  %s2273_s3 = inlined_call_operand.vmem [shape: bf16[16,256], index: 3, kind: output, shape index: {}]  }
   0x1   :  { %2275 = sst [smem:[#allocation7_spill]] %s2270_s0 }
   0x2   :  { %2276 = sst [smem:[#allocation8_spill]] %s2271_s1 }
   0x3   :  { %s1838_s12 = smov 0   ;;  %s1840_s13 = smov 0  }
   0x4   :  { %s1842_s14 = smov 0   ;;  %s1844_s15 = smov 0  }
   0x5   :  { %s1846_s16 = smov 0   ;;  %s1848_s17 = smov 0  }
   0x6   :  { %s1850_s18 = smov 0   ;;  %s1852_s19 = smov 0  }
   0x7   :  { %s1854_s20 = smov 0   ;;  %s1856_s21 = smov 0  }
   0x8   :  { %s1858_s22 = smov 0  }
   0x9 LB: > { %s1432_s23 = sadd.s32 4294967295, %s1815_s22   ;;  %s25_s24 = sadd.s32 1, %s1807_s20  ;;  %s1815_s22 = sphi %s1858_s22, %s13_s22   ;;  %s1811_s21 = sphi %s1856_s21, %s2293_s21   ;;  %s1807_s20 = sphi %s1854_s20, %s2292_s20   ;;  %s1803_s19 = sphi %s1852_s19, %s2291_s19   ;;  %s1799_s18 = sphi %s1850_s18, %s2290_s18   ;;  %s1795_s17 = sphi %s1848_s17, %s2289_s17   ;;  %s1791_s16 = sphi %s1846_s16, %s2288_s16   ;;  %s1787_s15 = sphi %s1844_s15, %s2287_s15   ;;  %s1783_s14 = sphi %s1842_s14, %s2286_s14   ;;  %s1779_s13 = sphi %s1840_s13, %s2285_s13   ;;  %s1775_s12 = sphi %s1838_s12, %s2284_s12  }
   0xa   : > { %p26_p0 = scmp.ge.s32.totalorder %s25_s24, 3  ;;  %s28_s25 = sadd.s32 1, %s1811_s21 }
   0xb   : > { %s41_s26 = sadd.s32 1, %s1795_s17  ;;  %p48_p1 = scmp.ne.s32.totalorder %s1795_s17, %s1791_s16 }
   0xc   : > { %s2295_s24 = smov (%p26_p0, %s25_s24), 0  ;;  %s2297_s25 = smov (!%p26_p0, %s28_s25), %s1811_s21 }
   0xd   : > { %s37_s27 = ssub.s32 %s1807_s20, %s2295_s24  ;;  %p49_p2 = scmp.eq.s32.totalorder %s1815_s22, 0 }
   0xe   : > { %p30_p3 = scmp.ge.s32.totalorder %s2297_s25, 2  ;;  %p39_p4 = scmp.eq.s32.totalorder %s37_s27, 0 }
   0xf   : > { %p1905_p5 = por %p49_p2, %p48_p1  ;;  %s69_s29 = sadd.s32 1, %s1787_s15 }
  0x10   : > { %s2299_s25 = smov (%p30_p3, %s2297_s25), 0  ;;  %p76_p6 = scmp.ne.s32.totalorder %s1787_s15, %s1783_s14 }
  0x11   : > { %2278 = sst [smem:[#allocation6_spill]] %s2299_s25  ;;  %s65_s4 = ssub.s32 %s1811_s21, %s2299_s25 }
  0x12   : > { %s1913_s30 = scalar_select %p39_p4, %s1795_s17, %s41_s26  }
  0x13   : > { %s66_s5 = sor.u32 %s65_s4, %s37_s27  ;;  %p121_p7 = scmp.eq.s32.totalorder %s65_s4, 0 }
  0x14   : > { %p67_p8 = scmp.eq.s32.totalorder %s66_s5, 0  ;;  %p1919_p9 = por %p76_p6, %p49_p2 }
  0x15   : > { %s123_s7 = sadd.s32 1, %s1779_s13  ;;  %p133_p10 = scmp.ne.s32.totalorder %s1779_s13, %s1775_s12 }
  0x16   : > { %s1927_s8 = scalar_select %p67_p8, %s1787_s15, %s69_s29  }
  0x17   : > { %s1930_s9 = scalar_select %p121_p7, %s1779_s13, %s123_s7  }
  0x18   : > { %p134_p11 = scmp.eq.s32.totalorder %s1432_s23, 5  ;;  %p1435_p13 = scmp.ge.s32.totalorder %s1815_s22, 6 }
  0x1a   : > { %p1932_p12 = por %p134_p11, %p133_p10  ;;  %156 = sbr.rel (%p1435_p13) target bundleno = 116 (0x74), region = 16 }
  0x1f   : > { %159 = sbr.rel (!%p1905_p5) target bundleno = 43 (0x2b), region = 20  ;;  %s161_s11 = sand.u32 (%p1905_p5), 1, %s1795_s17  }
  0x20   : > { %s1504_s26 = smul.u32 (%p1905_p5), 24, %s1807_s20  ;;  %s2281_s0 = sld [smem:[#allocation7_spill]] (%p1905_p5) }
  0x21   : > { %s1579_s27 = smul.u32 (%p1905_p5), 48, %s161_s11 }
  0x23   : > { %s163_s23 = scalar_lea.vmem (%p1905_p5), [#allocation3], %s1579_s27 }
  0x26   : > { %s169_s5 = scalar_lea.vmem %s2281_s0, %s1504_s26 }
  0x27   : > { %v182_v0 = vld [vmem:[%s169_s5] sm:$0xff]  ;;  %v184_v1 = vld [vmem:[%s169_s5 + $0x8] sm:$0xff]  ;;  %v186_v2 = vld [vmem:[%s169_s5 + $0x10] sm:$0xff] }
  0x28   : > { %183 = vst [vmem:[%s163_s23] sm:$0xff] %v182_v0  ;;  %185 = vst [vmem:[%s163_s23 + $0x8] sm:$0xff] %v184_v1  ;;  %v188_v3 = vld [vmem:[%s169_s5 + $0x48] sm:$0xff]  ;;  %v190_v4 = vld [vmem:[%s169_s5 + $0x50] sm:$0xff] }
  0x29   : > { %187 = vst [vmem:[%s163_s23 + $0x10] sm:$0xff] %v186_v2  ;;  %v192_v5 = vld [vmem:[%s169_s5 + $0x58] sm:$0xff]  ;;  %189 = vst [vmem:[%s163_s23 + $0x18] sm:$0xff] %v188_v3 }
  0x2a   : > { %191 = vst [vmem:[%s163_s23 + $0x20] sm:$0xff] %v190_v4  ;;  %193 = vst [vmem:[%s163_s23 + $0x28] sm:$0xff] %v192_v5 }
  0x2b PF: > { %199 = sbr.rel (!%p1919_p9) target bundleno = 116 (0x74), region = 43  ;;  %s201_s28 = sand.u32 (%p1919_p9), 1, %s1787_s15  }
  0x2c   : > { %s1505_s7 = smul.u32 (%p1919_p9), 192, %s1807_s20  ;;  %s2282_s1 = sld [smem:[#allocation8_spill]] (%p1919_p9) }
  0x2d   : > { %s1580_s11 = smul.u32 (%p1919_p9), 384, %s201_s28 }
  0x2e   : > { %s206_s26 = sadd.s32 (%p1919_p9), %s1811_s21, %s1505_s7 }
  0x2f   : > { %s1438_s27 = sshll.u32 (%p1919_p9), %s206_s26, 2  ;;  %s1957_s6 = scalar_lea.vmem (%p1919_p9), [#allocation4], %s1580_s11 }
  0x32   : > { %s1952_s0 = scalar_lea.vmem %s2282_s1, %s1438_s27 }
  0x33   : > { %v225_v6 = vld [vmem:[%s1952_s0] sm:$0xf]  ;;  %v227_v7 = vld [vmem:[%s1952_s0 + $0x8] sm:$0xf]  ;;  %v229_v8 = vld [vmem:[%s1952_s0 + $0x10] sm:$0xf] }
  0x34   : > { %226 = vst [vmem:[%s1957_s6] sm:$0xf] %v225_v6  ;;  %228 = vst [vmem:[%s1957_s6 + $0x4] sm:$0xf] %v227_v7  ;;  %v231_v9 = vld [vmem:[%s1952_s0 + $0x18] sm:$0xf] }
  0x35   : > { %230 = vst [vmem:[%s1957_s6 + $0x8] sm:$0xf] %v229_v8  ;;  %v233_v10 = vld [vmem:[%s1952_s0 + $0x20] sm:$0xf]  ;;  %v235_v11 = vld [vmem:[%s1952_s0 + $0x28] sm:$0xf] }
  0x36   : > { %232 = vst [vmem:[%s1957_s6 + $0xc] sm:$0xf] %v231_v9  ;;  %234 = vst [vmem:[%s1957_s6 + $0x10] sm:$0xf] %v233_v10  ;;  %v237_v12 = vld [vmem:[%s1952_s0 + $0x30] sm:$0xf] }
  0x37   : > { %236 = vst [vmem:[%s1957_s6 + $0x14] sm:$0xf] %v235_v11  ;;  %v239_v13 = vld [vmem:[%s1952_s0 + $0x38] sm:$0xf]  ;;  %v241_v14 = vld [vmem:[%s1952_s0 + $0x40] sm:$0xf] }
  0x38   : > { %238 = vst [vmem:[%s1957_s6 + $0x18] sm:$0xf] %v237_v12  ;;  %240 = vst [vmem:[%s1957_s6 + $0x1c] sm:$0xf] %v239_v13  ;;  %v243_v15 = vld [vmem:[%s1952_s0 + $0x48] sm:$0xf] }
  0x39   : > { %242 = vst [vmem:[%s1957_s6 + $0x20] sm:$0xf] %v241_v14  ;;  %v245_v16 = vld [vmem:[%s1952_s0 + $0x50] sm:$0xf]  ;;  %v247_v17 = vld [vmem:[%s1952_s0 + $0x58] sm:$0xf] }
  0x3a   : > { %244 = vst [vmem:[%s1957_s6 + $0x24] sm:$0xf] %v243_v15  ;;  %246 = vst [vmem:[%s1957_s6 + $0x28] sm:$0xf] %v245_v16  ;;  %v249_v18 = vld [vmem:[%s1952_s0 + $0x60] sm:$0xf] }
  0x3b   : > { %248 = vst [vmem:[%s1957_s6 + $0x2c] sm:$0xf] %v247_v17  ;;  %v251_v19 = vld [vmem:[%s1952_s0 + $0x68] sm:$0xf]  ;;  %v253_v20 = vld [vmem:[%s1952_s0 + $0x70] sm:$0xf] }
  0x3c   : > { %250 = vst [vmem:[%s1957_s6 + $0x30] sm:$0xf] %v249_v18  ;;  %252 = vst [vmem:[%s1957_s6 + $0x34] sm:$0xf] %v251_v19  ;;  %v255_v21 = vld [vmem:[%s1952_s0 + $0x78] sm:$0xf] }
  0x3d   : > { %254 = vst [vmem:[%s1957_s6 + $0x38] sm:$0xf] %v253_v20  ;;  %v257_v22 = vld [vmem:[%s1952_s0 + $0x80] sm:$0xf]  ;;  %v259_v23 = vld [vmem:[%s1952_s0 + $0x88] sm:$0xf] }
  0x3e   : > { %256 = vst [vmem:[%s1957_s6 + $0x3c] sm:$0xf] %v255_v21  ;;  %258 = vst [vmem:[%s1957_s6 + $0x40] sm:$0xf] %v257_v22  ;;  %v261_v24 = vld [vmem:[%s1952_s0 + $0x90] sm:$0xf] }
  0x3f   : > { %260 = vst [vmem:[%s1957_s6 + $0x44] sm:$0xf] %v259_v23  ;;  %v263_v25 = vld [vmem:[%s1952_s0 + $0x98] sm:$0xf]  ;;  %v265_v26 = vld [vmem:[%s1952_s0 + $0xa0] sm:$0xf] }
  0x40   : > { %262 = vst [vmem:[%s1957_s6 + $0x48] sm:$0xf] %v261_v24  ;;  %264 = vst [vmem:[%s1957_s6 + $0x4c] sm:$0xf] %v263_v25  ;;  %v267_v27 = vld [vmem:[%s1952_s0 + $0xa8] sm:$0xf] }
  0x41   : > { %266 = vst [vmem:[%s1957_s6 + $0x50] sm:$0xf] %v265_v26  ;;  %v269_v28 = vld [vmem:[%s1952_s0 + $0xb0] sm:$0xf]  ;;  %v271_v29 = vld [vmem:[%s1952_s0 + $0xb8] sm:$0xf] }
  0x42   : > { %268 = vst [vmem:[%s1957_s6 + $0x54] sm:$0xf] %v267_v27  ;;  %270 = vst [vmem:[%s1957_s6 + $0x58] sm:$0xf] %v269_v28  ;;  %v273_v30 = vld [vmem:[%s1952_s0 + $0xc0] sm:$0xf] }
  0x43   : > { %272 = vst [vmem:[%s1957_s6 + $0x5c] sm:$0xf] %v271_v29  ;;  %v275_v31 = vld [vmem:[%s1952_s0 + $0xc8] sm:$0xf]  ;;  %v277_v32 = vld [vmem:[%s1952_s0 + $0xd0] sm:$0xf] }
  0x44   : > { %274 = vst [vmem:[%s1957_s6 + $0x60] sm:$0xf] %v273_v30  ;;  %276 = vst [vmem:[%s1957_s6 + $0x64] sm:$0xf] %v275_v31  ;;  %v279_v33 = vld [vmem:[%s1952_s0 + $0xd8] sm:$0xf] }
  0x45   : > { %278 = vst [vmem:[%s1957_s6 + $0x68] sm:$0xf] %v277_v32  ;;  %v281_v34 = vld [vmem:[%s1952_s0 + $0xe0] sm:$0xf]  ;;  %v283_v35 = vld [vmem:[%s1952_s0 + $0xe8] sm:$0xf] }
  0x46   : > { %280 = vst [vmem:[%s1957_s6 + $0x6c] sm:$0xf] %v279_v33  ;;  %282 = vst [vmem:[%s1957_s6 + $0x70] sm:$0xf] %v281_v34  ;;  %v285_v36 = vld [vmem:[%s1952_s0 + $0xf0] sm:$0xf] }
  0x47   : > { %284 = vst [vmem:[%s1957_s6 + $0x74] sm:$0xf] %v283_v35  ;;  %v287_v37 = vld [vmem:[%s1952_s0 + $0xf8] sm:$0xf]  ;;  %v289_v38 = vld [vmem:[%s1952_s0 + $0x100] sm:$0xf] }
  0x48   : > { %286 = vst [vmem:[%s1957_s6 + $0x78] sm:$0xf] %v285_v36  ;;  %288 = vst [vmem:[%s1957_s6 + $0x7c] sm:$0xf] %v287_v37  ;;  %v291_v39 = vld [vmem:[%s1952_s0 + $0x108] sm:$0xf] }
  0x49   : > { %290 = vst [vmem:[%s1957_s6 + $0x80] sm:$0xf] %v289_v38  ;;  %v293_v40 = vld [vmem:[%s1952_s0 + $0x110] sm:$0xf]  ;;  %v295_v41 = vld [vmem:[%s1952_s0 + $0x118] sm:$0xf] }
  0x4a   : > { %292 = vst [vmem:[%s1957_s6 + $0x84] sm:$0xf] %v291_v39  ;;  %294 = vst [vmem:[%s1957_s6 + $0x88] sm:$0xf] %v293_v40  ;;  %v297_v42 = vld [vmem:[%s1952_s0 + $0x120] sm:$0xf] }
  0x4b   : > { %296 = vst [vmem:[%s1957_s6 + $0x8c] sm:$0xf] %v295_v41  ;;  %v299_v43 = vld [vmem:[%s1952_s0 + $0x128] sm:$0xf]  ;;  %v301_v44 = vld [vmem:[%s1952_s0 + $0x130] sm:$0xf] }
  0x4c   : > { %298 = vst [vmem:[%s1957_s6 + $0x90] sm:$0xf] %v297_v42  ;;  %300 = vst [vmem:[%s1957_s6 + $0x94] sm:$0xf] %v299_v43  ;;  %v303_v45 = vld [vmem:[%s1952_s0 + $0x138] sm:$0xf] }
  0x4d   : > { %302 = vst [vmem:[%s1957_s6 + $0x98] sm:$0xf] %v301_v44  ;;  %v305_v46 = vld [vmem:[%s1952_s0 + $0x140] sm:$0xf]  ;;  %v307_v47 = vld [vmem:[%s1952_s0 + $0x148] sm:$0xf] }
  0x4e   : > { %304 = vst [vmem:[%s1957_s6 + $0x9c] sm:$0xf] %v303_v45  ;;  %306 = vst [vmem:[%s1957_s6 + $0xa0] sm:$0xf] %v305_v46  ;;  %v309_v48 = vld [vmem:[%s1952_s0 + $0x150] sm:$0xf] }
  0x4f   : > { %308 = vst [vmem:[%s1957_s6 + $0xa4] sm:$0xf] %v307_v47  ;;  %v311_v49 = vld [vmem:[%s1952_s0 + $0x158] sm:$0xf]  ;;  %v313_v50 = vld [vmem:[%s1952_s0 + $0x160] sm:$0xf] }
  0x50   : > { %310 = vst [vmem:[%s1957_s6 + $0xa8] sm:$0xf] %v309_v48  ;;  %312 = vst [vmem:[%s1957_s6 + $0xac] sm:$0xf] %v311_v49  ;;  %v315_v51 = vld [vmem:[%s1952_s0 + $0x168] sm:$0xf] }
  0x51   : > { %314 = vst [vmem:[%s1957_s6 + $0xb0] sm:$0xf] %v313_v50  ;;  %v317_v52 = vld [vmem:[%s1952_s0 + $0x170] sm:$0xf]  ;;  %v319_v53 = vld [vmem:[%s1952_s0 + $0x178] sm:$0xf] }
  0x52   : > { %316 = vst [vmem:[%s1957_s6 + $0xb4] sm:$0xf] %v315_v51  ;;  %318 = vst [vmem:[%s1957_s6 + $0xb8] sm:$0xf] %v317_v52  ;;  %v321_v54 = vld [vmem:[%s1952_s0 + $0x180] sm:$0xf] }
  0x53   : > { %320 = vst [vmem:[%s1957_s6 + $0xbc] sm:$0xf] %v319_v53  ;;  %v323_v55 = vld [vmem:[%s1952_s0 + $0x188] sm:$0xf]  ;;  %v325_v56 = vld [vmem:[%s1952_s0 + $0x190] sm:$0xf] }
  0x54   : > { %322 = vst [vmem:[%s1957_s6 + $0xc0] sm:$0xf] %v321_v54  ;;  %324 = vst [vmem:[%s1957_s6 + $0xc4] sm:$0xf] %v323_v55  ;;  %v327_v57 = vld [vmem:[%s1952_s0 + $0x198] sm:$0xf] }
  0x55   : > { %326 = vst [vmem:[%s1957_s6 + $0xc8] sm:$0xf] %v325_v56  ;;  %v329_v58 = vld [vmem:[%s1952_s0 + $0x1a0] sm:$0xf]  ;;  %v331_v59 = vld [vmem:[%s1952_s0 + $0x1a8] sm:$0xf] }
  0x56   : > { %328 = vst [vmem:[%s1957_s6 + $0xcc] sm:$0xf] %v327_v57  ;;  %330 = vst [vmem:[%s1957_s6 + $0xd0] sm:$0xf] %v329_v58  ;;  %v333_v60 = vld [vmem:[%s1952_s0 + $0x1b0] sm:$0xf] }
  0x57   : > { %332 = vst [vmem:[%s1957_s6 + $0xd4] sm:$0xf] %v331_v59  ;;  %v335_v61 = vld [vmem:[%s1952_s0 + $0x1b8] sm:$0xf]  ;;  %v337_v62 = vld [vmem:[%s1952_s0 + $0x1c0] sm:$0xf] }
  0x58   : > { %334 = vst [vmem:[%s1957_s6 + $0xd8] sm:$0xf] %v333_v60  ;;  %336 = vst [vmem:[%s1957_s6 + $0xdc] sm:$0xf] %v335_v61  ;;  %v339_v63 = vld [vmem:[%s1952_s0 + $0x1c8] sm:$0xf] }
  0x59   : > { %338 = vst [vmem:[%s1957_s6 + $0xe0] sm:$0xf] %v337_v62  ;;  %v341_v0 = vld [vmem:[%s1952_s0 + $0x1d0] sm:$0xf]  ;;  %v343_v1 = vld [vmem:[%s1952_s0 + $0x1d8] sm:$0xf] }
  0x5a   : > { %340 = vst [vmem:[%s1957_s6 + $0xe4] sm:$0xf] %v339_v63  ;;  %342 = vst [vmem:[%s1957_s6 + $0xe8] sm:$0xf] %v341_v0  ;;  %v345_v2 = vld [vmem:[%s1952_s0 + $0x1e0] sm:$0xf] }
  0x5b   : > { %344 = vst [vmem:[%s1957_s6 + $0xec] sm:$0xf] %v343_v1  ;;  %v347_v3 = vld [vmem:[%s1952_s0 + $0x1e8] sm:$0xf]  ;;  %v349_v4 = vld [vmem:[%s1952_s0 + $0x1f0] sm:$0xf] }
  0x5c   : > { %346 = vst [vmem:[%s1957_s6 + $0xf0] sm:$0xf] %v345_v2  ;;  %348 = vst [vmem:[%s1957_s6 + $0xf4] sm:$0xf] %v347_v3  ;;  %v351_v5 = vld [vmem:[%s1952_s0 + $0x1f8] sm:$0xf] }
  0x5d   : > { %350 = vst [vmem:[%s1957_s6 + $0xf8] sm:$0xf] %v349_v4  ;;  %v353_v6 = vld [vmem:[%s1952_s0 + $0x200] sm:$0xf]  ;;  %v355_v7 = vld [vmem:[%s1952_s0 + $0x208] sm:$0xf] }
  0x5e   : > { %352 = vst [vmem:[%s1957_s6 + $0xfc] sm:$0xf] %v351_v5  ;;  %354 = vst [vmem:[%s1957_s6 + $0x100] sm:$0xf] %v353_v6  ;;  %v357_v8 = vld [vmem:[%s1952_s0 + $0x210] sm:$0xf] }
  0x5f   : > { %356 = vst [vmem:[%s1957_s6 + $0x104] sm:$0xf] %v355_v7  ;;  %v359_v9 = vld [vmem:[%s1952_s0 + $0x218] sm:$0xf]  ;;  %v361_v10 = vld [vmem:[%s1952_s0 + $0x220] sm:$0xf] }
  0x60   : > { %358 = vst [vmem:[%s1957_s6 + $0x108] sm:$0xf] %v357_v8  ;;  %360 = vst [vmem:[%s1957_s6 + $0x10c] sm:$0xf] %v359_v9  ;;  %v363_v11 = vld [vmem:[%s1952_s0 + $0x228] sm:$0xf] }
  0x61   : > { %362 = vst [vmem:[%s1957_s6 + $0x110] sm:$0xf] %v361_v10  ;;  %v365_v12 = vld [vmem:[%s1952_s0 + $0x230] sm:$0xf]  ;;  %v367_v13 = vld [vmem:[%s1952_s0 + $0x238] sm:$0xf] }
  0x62   : > { %364 = vst [vmem:[%s1957_s6 + $0x114] sm:$0xf] %v363_v11  ;;  %366 = vst [vmem:[%s1957_s6 + $0x118] sm:$0xf] %v365_v12  ;;  %v369_v14 = vld [vmem:[%s1952_s0 + $0x240] sm:$0xf] }
  0x63   : > { %368 = vst [vmem:[%s1957_s6 + $0x11c] sm:$0xf] %v367_v13  ;;  %v371_v15 = vld [vmem:[%s1952_s0 + $0x248] sm:$0xf]  ;;  %v373_v16 = vld [vmem:[%s1952_s0 + $0x250] sm:$0xf] }
  0x64   : > { %370 = vst [vmem:[%s1957_s6 + $0x120] sm:$0xf] %v369_v14  ;;  %372 = vst [vmem:[%s1957_s6 + $0x124] sm:$0xf] %v371_v15  ;;  %v375_v17 = vld [vmem:[%s1952_s0 + $0x258] sm:$0xf] }
  0x65   : > { %374 = vst [vmem:[%s1957_s6 + $0x128] sm:$0xf] %v373_v16  ;;  %v377_v18 = vld [vmem:[%s1952_s0 + $0x260] sm:$0xf]  ;;  %v379_v19 = vld [vmem:[%s1952_s0 + $0x268] sm:$0xf] }
  0x66   : > { %376 = vst [vmem:[%s1957_s6 + $0x12c] sm:$0xf] %v375_v17  ;;  %378 = vst [vmem:[%s1957_s6 + $0x130] sm:$0xf] %v377_v18  ;;  %v381_v20 = vld [vmem:[%s1952_s0 + $0x270] sm:$0xf] }
  0x67   : > { %380 = vst [vmem:[%s1957_s6 + $0x134] sm:$0xf] %v379_v19  ;;  %v383_v21 = vld [vmem:[%s1952_s0 + $0x278] sm:$0xf]  ;;  %v385_v22 = vld [vmem:[%s1952_s0 + $0x280] sm:$0xf] }
  0x68   : > { %382 = vst [vmem:[%s1957_s6 + $0x138] sm:$0xf] %v381_v20  ;;  %384 = vst [vmem:[%s1957_s6 + $0x13c] sm:$0xf] %v383_v21  ;;  %v387_v23 = vld [vmem:[%s1952_s0 + $0x288] sm:$0xf] }
  0x69   : > { %386 = vst [vmem:[%s1957_s6 + $0x140] sm:$0xf] %v385_v22  ;;  %v389_v24 = vld [vmem:[%s1952_s0 + $0x290] sm:$0xf]  ;;  %v391_v25 = vld [vmem:[%s1952_s0 + $0x298] sm:$0xf] }
  0x6a   : > { %388 = vst [vmem:[%s1957_s6 + $0x144] sm:$0xf] %v387_v23  ;;  %390 = vst [vmem:[%s1957_s6 + $0x148] sm:$0xf] %v389_v24  ;;  %v393_v26 = vld [vmem:[%s1952_s0 + $0x2a0] sm:$0xf] }
  0x6b   : > { %392 = vst [vmem:[%s1957_s6 + $0x14c] sm:$0xf] %v391_v25  ;;  %v395_v27 = vld [vmem:[%s1952_s0 + $0x2a8] sm:$0xf]  ;;  %v397_v28 = vld [vmem:[%s1952_s0 + $0x2b0] sm:$0xf] }
  0x6c   : > { %394 = vst [vmem:[%s1957_s6 + $0x150] sm:$0xf] %v393_v26  ;;  %396 = vst [vmem:[%s1957_s6 + $0x154] sm:$0xf] %v395_v27  ;;  %v399_v29 = vld [vmem:[%s1952_s0 + $0x2b8] sm:$0xf] }
  0x6d   : > { %398 = vst [vmem:[%s1957_s6 + $0x158] sm:$0xf] %v397_v28  ;;  %v401_v30 = vld [vmem:[%s1952_s0 + $0x2c0] sm:$0xf]  ;;  %v403_v31 = vld [vmem:[%s1952_s0 + $0x2c8] sm:$0xf] }
  0x6e   : > { %400 = vst [vmem:[%s1957_s6 + $0x15c] sm:$0xf] %v399_v29  ;;  %402 = vst [vmem:[%s1957_s6 + $0x160] sm:$0xf] %v401_v30  ;;  %v405_v32 = vld [vmem:[%s1952_s0 + $0x2d0] sm:$0xf] }
  0x6f   : > { %404 = vst [vmem:[%s1957_s6 + $0x164] sm:$0xf] %v403_v31  ;;  %v407_v33 = vld [vmem:[%s1952_s0 + $0x2d8] sm:$0xf]  ;;  %v409_v34 = vld [vmem:[%s1952_s0 + $0x2e0] sm:$0xf] }
  0x70   : > { %406 = vst [vmem:[%s1957_s6 + $0x168] sm:$0xf] %v405_v32  ;;  %408 = vst [vmem:[%s1957_s6 + $0x16c] sm:$0xf] %v407_v33  ;;  %v411_v35 = vld [vmem:[%s1952_s0 + $0x2e8] sm:$0xf] }
  0x71   : > { %410 = vst [vmem:[%s1957_s6 + $0x170] sm:$0xf] %v409_v34  ;;  %v413_v36 = vld [vmem:[%s1952_s0 + $0x2f0] sm:$0xf]  ;;  %v415_v37 = vld [vmem:[%s1952_s0 + $0x2f8] sm:$0xf] }
  0x72   : > { %412 = vst [vmem:[%s1957_s6 + $0x174] sm:$0xf] %v411_v35  ;;  %414 = vst [vmem:[%s1957_s6 + $0x178] sm:$0xf] %v413_v36 }
  0x73   : > { %416 = vst [vmem:[%s1957_s6 + $0x17c] sm:$0xf] %v415_v37 }
  0x74 PF: > { %p1439_p0 = scmp.ge.s32.totalorder %s1815_s22, 1  ;;  %p637_p1 = scmp.lt.s32.totalorder %s1815_s22, 7 }
  0x76   : > { %p638_p2 = pnand %p1439_p0, %p637_p1 }
  0x77   : > { %s644_s5 = sand.u32 (!%p638_p2), 1, %s1791_s16   ;;  %s651_s23 = sand.u32 (!%p638_p2), 1, %s1783_s14  }
  0x78   : > { %641 = sbr.rel (%p638_p2) target bundleno = 427 (0x1ab), region = 88  ;;  %s677_s0 = sand.u32 (!%p638_p2), 1, %s1775_s12  }
  0x79   : > { %s1581_s28 = smul.u32 (!%p638_p2), 48, %s644_s5  ;;  %s1440_s11 = sshll.u32 (!%p638_p2), %s677_s0, 3 }
  0x7a   : > { %s1582_s7 = smul.u32 (!%p638_p2), 384, %s651_s23  ;;  %p683_p3 = scmp.lt.s32.totalorder (!%p638_p2), %s1803_s19, 1 }
  0x7b   : > { %s2161_s6 = scalar_lea.vmem (!%p638_p2), [#allocation3], %s1581_s28  ;;  %s2165_s25 = scalar_lea.vmem (!%p638_p2), [#allocation5], %s1440_s11 }
  0x7c   : > { %s2163_s1 = scalar_lea.vmem (!%p638_p2), [#allocation4], %s1582_s7  ;;  %p1441_p4 = scmp.ne.s32.totalorder (!%p638_p2), %s1799_s18, 0 }
  0x7d   : > { %s2155_s26 = scalar_select %p683_p3, %s1803_s19, 1 }
  0x7e   : > { %691 = sbr.rel (%p1441_p4) target bundleno = 133 (0x85), region = 100 }
  0x7f   : > { %s685_s4 = scalar_lea.vmem %s2272_s2, %s2155_s26 }
  0x83   : > { %v1817_v38 = vmov 0.0  }
  0x84   : > { %692 = vst [vmem:[#allocation2] sm:$0xff] %v1817_v38  ;;  %693 = vst [vmem:[#allocation2 + $0x8] sm:$0xff] %v1817_v38 }
  0x85 PF: > { %v1672_v39 = vld [vmem:[%s2163_s1 + $0x78] sm:$0xff]   ;;  %v1676_v43 = vld [vmem:[%s2163_s1 + $0x70] sm:$0xff]   ;;  %v1680_v47 = vld [vmem:[%s2163_s1 + $0x68] sm:$0xff]   ;;  %p1496_p5 = scmp.ne.s32.totalorder %s1799_s18, 2 }
  0x86   : > { %v1673_v40 = vld [vmem:[%s2163_s1 + $0xf8] sm:$0xff]   ;;  %1513 = vmatprep.subr.bf16.mxu0 %v1672_v39  ;;  %v1677_v44 = vld [vmem:[%s2163_s1 + $0xf0] sm:$0xff]   ;;  %v1681_v48 = vld [vmem:[%s2163_s1 + $0xe8] sm:$0xff]  }
  0x87   : > { %v1674_v41 = vld [vmem:[%s2163_s1 + $0x38] sm:$0xff]   ;;  %1535 = vmatprep.subr.bf16.mxu1 %v1673_v40  ;;  %v1678_v45 = vld [vmem:[%s2163_s1 + $0x30] sm:$0xff]   ;;  %v1682_v49 = vld [vmem:[%s2163_s1 + $0x28] sm:$0xff]  }
  0x88   : > { %v1675_v42 = vld [vmem:[%s2163_s1 + $0xb8] sm:$0xff]   ;;  %1514 = vmatpush3.bf16.msra.mxu0 %v1674_v41  ;;  %v1679_v46 = vld [vmem:[%s2163_s1 + $0xb0] sm:$0xff]   ;;  %v1683_v50 = vld [vmem:[%s2163_s1 + $0xa8] sm:$0xff]  }
  0x89   : > { %1536 = vmatpush3.bf16.msra.mxu1 %v1675_v42  ;;  %1515 = vmatprep.subr.bf16.mxu0 %v1676_v43  ;;  %v1684_v51 = vld [vmem:[%s2163_s1 + $0x60] sm:$0xff]   ;;  %v1688_v55 = vld [vmem:[%s2163_s1 + $0x58] sm:$0xff]   ;;  %v1692_v59 = vld [vmem:[%s2163_s1 + $0x50] sm:$0xff]  }
  0x8a   : > { %1537 = vmatprep.subr.bf16.mxu1 %v1677_v44  ;;  %v1685_v52 = vld [vmem:[%s2163_s1 + $0xe0] sm:$0xff]   ;;  %v1689_v56 = vld [vmem:[%s2163_s1 + $0xd8] sm:$0xff]   ;;  %v1693_v60 = vld [vmem:[%s2163_s1 + $0xd0] sm:$0xff]  }
  0x8b   : > { %v1686_v53 = vld [vmem:[%s2163_s1 + $0x20] sm:$0xff]   ;;  %v1690_v57 = vld [vmem:[%s2163_s1 + $0x18] sm:$0xff]   ;;  %v1694_v61 = vld [vmem:[%s2163_s1 + $0x10] sm:$0xff]  }
  0x8c   : > { %1516 = vmatpush3.bf16.msra.mxu0 %v1678_v45  ;;  %v1687_v54 = vld [vmem:[%s2163_s1 + $0xa0] sm:$0xff]   ;;  %v1691_v58 = vld [vmem:[%s2163_s1 + $0x98] sm:$0xff]   ;;  %v1695_v62 = vld [vmem:[%s2163_s1 + $0x90] sm:$0xff]  }
  0x8d   : > { %1538 = vmatpush3.bf16.msra.mxu1 %v1679_v46  ;;  %1517 = vmatprep.subr.bf16.mxu0 %v1680_v47  ;;  %v1696_v63 = vld [vmem:[%s2163_s1 + $0x48] sm:$0xff]   ;;  %v1700_v3 = vld [vmem:[%s2163_s1 + $0x40] sm:$0xff]   ;;  %v1710_v11 = vld [vmem:[%s2163_s1 + $0x178] sm:$0xff]  }
  0x8e   : > { %1539 = vmatprep.subr.bf16.mxu1 %v1681_v48  ;;  %v1697_v0 = vld [vmem:[%s2163_s1 + $0xc8] sm:$0xff]   ;;  %v1701_v4 = vld [vmem:[%s2163_s1 + $0xc0] sm:$0xff]   ;;  %v1711_v12 = vld [vmem:[%s2163_s1 + $0x138] sm:$0xff]  }
  0x8f   : > { %v1698_v1 = vld [vmem:[%s2163_s1 + $0x8] sm:$0xff]   ;;  %v1702_v5 = vld [vmem:[%s2163_s1] sm:$0xff]   ;;  %v1712_v13 = vld [vmem:[%s2163_s1 + $0x170] sm:$0xff]  }
  0x90   : > { %1518 = vmatpush3.bf16.msra.mxu0 %v1682_v49  ;;  %v1699_v2 = vld [vmem:[%s2163_s1 + $0x88] sm:$0xff]   ;;  %v1703_v6 = vld [vmem:[%s2163_s1 + $0x80] sm:$0xff]   ;;  %v1713_v14 = vld [vmem:[%s2163_s1 + $0x130] sm:$0xff]  }
  0x91   : > { %1540 = vmatpush3.bf16.msra.mxu1 %v1683_v50  ;;  %1519 = vmatprep.subr.bf16.mxu0 %v1684_v51  ;;  %v1704_v7 = vld [vmem:[%s2161_s6] ss:$24 sps:$4 sm:$0xff]   ;;  %v1706_v8 = vld [vmem:[%s2161_s6 + $0x4] ss:$24 sps:$4 sm:$0xff]   ;;  %v1728_v22 = vld [vmem:[%s2161_s6 + $0x14] ss:$24 sps:$4 sm:$0xff]  }
  0x92   : > { %1541 = vmatprep.subr.bf16.mxu1 %v1685_v52  ;;  %v1707_v9 = vld [vmem:[%s2161_s6 + $0x8] ss:$24 sps:$4 sm:$0xff]   ;;  %v1709_v10 = vld [vmem:[%s2161_s6 + $0xc] ss:$24 sps:$4 sm:$0xff]   ;;  %1148 = vmatprep.mubr.bf16.mxu0 %v1706_v8 }
  0x93   : > { %1189 = vmatprep.mubr.bf16.mxu1 %v1709_v10  ;;  %v1714_v15 = vld [vmem:[%s2163_s1 + $0x168] sm:$0xff]   ;;  %v1716_v17 = vld [vmem:[%s2163_s1 + $0x160] sm:$0xff]   ;;  %v1718_v19 = vld [vmem:[%s2163_s1 + $0x158] sm:$0xff]  }
  0x94   : > { %1520 = vmatpush3.bf16.msra.mxu0 %v1686_v53  ;;  %v1715_v16 = vld [vmem:[%s2163_s1 + $0x128] sm:$0xff]   ;;  %v1717_v18 = vld [vmem:[%s2163_s1 + $0x120] sm:$0xff]   ;;  %v1719_v20 = vld [vmem:[%s2163_s1 + $0x118] sm:$0xff]  }
  0x95   : > { %1542 = vmatpush3.bf16.msra.mxu1 %v1687_v54  ;;  %1521 = vmatprep.subr.bf16.mxu0 %v1688_v55  ;;  %v1720_v21 = vld [vmem:[%s2163_s1 + $0x150] sm:$0xff]   ;;  %v1722_v24 = vld [vmem:[%s2163_s1 + $0x148] sm:$0xff]   ;;  %v1724_v26 = vld [vmem:[%s2163_s1 + $0x140] sm:$0xff]  }
  0x96   : > { %1543 = vmatprep.subr.bf16.mxu1 %v1689_v56  ;;  %v1721_v23 = vld [vmem:[%s2163_s1 + $0x110] sm:$0xff]   ;;  %v1723_v25 = vld [vmem:[%s2163_s1 + $0x108] sm:$0xff]   ;;  %v1725_v27 = vld [vmem:[%s2163_s1 + $0x100] sm:$0xff]  }
  0x97   : > { %v1726_v28 = vld [vmem:[%s2161_s6 + $0x10] ss:$24 sps:$4 sm:$0xff]  }
  0x98   : > { %1522 = vmatpush3.bf16.msra.mxu0 %v1690_v57  ;;  %v694_v45 = vld [vmem:[#allocation2] sm:$0xff]  ;;  %v695_v52 = vld [vmem:[#allocation2 + $0x8] sm:$0xff] }
  0x99   : > { %1544 = vmatpush3.bf16.msra.mxu1 %v1691_v58  ;;  %1523 = vmatprep.subr.bf16.mxu0 %v1692_v59 }
  0x9a   : > { %1545 = vmatprep.subr.bf16.mxu1 %v1693_v60 }
  0x9c   : > { %1524 = vmatpush3.bf16.msra.mxu0 %v1694_v61 }
  0x9d   : > { %1546 = vmatpush3.bf16.msra.mxu1 %v1695_v62  ;;  %1525 = vmatprep.subr.bf16.mxu0 %v1696_v63 }
  0x9e   : > { %1547 = vmatprep.subr.bf16.mxu1 %v1697_v0 }
  0xa0   : > { %1526 = vmatpush3.bf16.msra.mxu0 %v1698_v1 }
  0xa1   : > { %1548 = vmatpush3.bf16.msra.mxu1 %v1699_v2  ;;  %1527 = vmatprep.subr.bf16.mxu0 %v1700_v3 }
  0xa2   : > { %1549 = vmatprep.subr.bf16.mxu1 %v1701_v4 }
  0xa4   : > { %1528 = vmatpush3.bf16.msra.mxu0 %v1702_v5 }
  0xa5   : > { %1550 = vmatpush3.bf16.msra.mxu1 %v1703_v6  ;;  %1557 = vmatprep.subr.bf16.mxu0 %v1710_v11 }
  0xa7   : > { %1149 = vmatmul.mubr.bf16.vlgmr.msra.gmra.mxu0 %v1704_v7 }
  0xa8   : > { %1190 = vmatmul.mubr.bf16.vlgmr.msra.gmra.mxu1 %v1707_v9  ;;  %1558 = vmatpush3.bf16.msra.mxu0 %v1711_v12 }
  0xa9   : > { %1559 = vmatprep.subr.bf16.mxu0 %v1712_v13  ;;  %1230 = vmatprep.mubr.bf16.mxu0 %v1728_v22 }
  0xac   : > { %1560 = vmatpush3.bf16.msra.mxu0 %v1713_v14 }
  0xad   : > { %1561 = vmatprep.subr.bf16.mxu0 %v1714_v15 }
  0xb0   : > { %1562 = vmatpush3.bf16.msra.mxu0 %v1715_v16 }
  0xb1   : > { %1563 = vmatprep.subr.bf16.mxu0 %v1716_v17 }
  0xb4   : > { %1564 = vmatpush3.bf16.msra.mxu0 %v1717_v18 }
  0xb5   : > { %1565 = vmatprep.subr.bf16.mxu0 %v1718_v19 }
  0xb8   : > { %1566 = vmatpush3.bf16.msra.mxu0 %v1719_v20 }
  0xb9   : > { %1567 = vmatprep.subr.bf16.mxu0 %v1720_v21 }
  0xbc   : > { %1568 = vmatpush3.bf16.msra.mxu0 %v1721_v23 }
  0xbd   : > { %1569 = vmatprep.subr.bf16.mxu0 %v1722_v24 }
  0xc0   : > { %1570 = vmatpush3.bf16.msra.mxu0 %v1723_v25 }
  0xc1   : > { %1571 = vmatprep.subr.bf16.mxu0 %v1724_v26 }
  0xc4   : > { %1572 = vmatpush3.bf16.msra.mxu0 %v1725_v27 }
  0xc7   : > { %1231 = vmatmul.mubr.bf16.vlgmr.msra.gmra.mxu0 %v1726_v28 }
 0x167   : > { %v1529_v29 = vpop.f32.mrf.mxu0 }
 0x168   : > { %v1551_v30 = vpop.f32.mrf.mxu1 }
 0x169   : > { %v1530_v31 = vpop.f32.mrf.mxu0 }
 0x16a   : > { %v1552_v32 = vpop.f32.mrf.mxu1  ;;  %v1531_v36 = vadd.f32 %v1530_v31, %v1529_v29 }
 0x16b   : > { %v1532_v33 = vpop.f32.mrf.mxu0  ;;  %v1553_v37 = vadd.f32 %v1552_v32, %v1551_v30 }
 0x16c   : > { %v1554_v34 = vpop.f32.mrf.mxu1 }
 0x16d   : > { %v1533_v35 = vpop.f32.mrf.mxu0  ;;  %v1192_v41 = vadd.f32 %v1553_v37, %v1531_v36 }
 0x16e   : > { %v1555_v38 = vpop.f32.mrf.mxu1  ;;  %v1534_v42 = vadd.f32 %v1533_v35, %v1532_v33 }
 0x16f   : > { %v1556_v43 = vadd.f32 %v1555_v38, %v1554_v34 }
 0x171   : > { %v1195_v49 = vadd.f32 %v1556_v43, %v1534_v42 }
 0x187   : > { %v1573_v39 = vpop.f32.mrf.mxu0 }
 0x189   : > { %v1574_v40 = vpop.f32.mrf.mxu0 }
 0x18a   : > { %v1575_v44 = vadd.f32 %v1574_v40, %v1573_v39 }
 0x18b   : > { %v1576_v46 = vpop.f32.mrf.mxu0 }
 0x18c   : > { %v1233_v47 = vadd.f32 %v1575_v44, %v1192_v41 }
 0x18d   : > { %v1577_v48 = vpop.f32.mrf.mxu0 }
 0x18e   : > { %v1239_v50 = vadd.f32 %v1233_v47, %v694_v45  ;;  %v1578_v51 = vadd.f32 %v1577_v48, %v1576_v46 }
 0x190   : > { %1241 = vst [vmem:[#allocation2] sm:$0xff] %v1239_v50  ;;  %v1236_v53 = vadd.f32 %v1578_v51, %v1195_v49  ;;  %1246 = sbr.rel (%p1496_p5) target bundleno = 419 (0x1a3), region = 104 }
 0x192   : > { %v1240_v54 = vadd.f32 %v1236_v53, %v695_v52 }
 0x194   : > { %1242 = vst [vmem:[#allocation2 + $0x8] sm:$0xff] %v1240_v54 }
 0x195   : > { %v1497_v57 = vld [vmem:[%s685_s4] ss:$0 sm:$0xff] }
 0x197   : > { %v1247_v55 = vld [vmem:[#allocation2] sm:$0xff] }
 0x198   : > { %v1256_v58 = vadd.f32 %v1497_v57, %v1247_v55 }
 0x19a   : > { %v1258_v60 = vmax.f32 %v1256_v58, 0.0 }
 0x19b   : > { %v1248_v56 = vld [vmem:[#allocation2 + $0x8] sm:$0xff] }
 0x19c   : > { %v1257_v59 = vadd.f32 %v1497_v57, %v1248_v56 }
 0x19e   : > { %v1259_v61 = vmax.f32 %v1257_v59, 0.0 }
 0x1a0   : > { %v1511_v62 = vpack.c.bf16 %v1259_v61, %v1258_v60 }
 0x1a2   : > { %1512 = vst [vmem:[%s2165_s25] sm:$0xff] %v1511_v62  }
 0x1a3 PF: > { %1276 = sbr.rel (!%p1932_p12) target bundleno = 427 (0x1ab), region = 108  ;;  %s1501_s14 = sshll.u32 (%p1932_p12), %s1803_s19, 2 }
 0x1a4   : > { %s1281_s5 = scalar_lea.vmem (%p1932_p12), %s2273_s3, %s1501_s14 }
 0x1a9   : > { %v1298_v63 = vld [vmem:[%s2165_s25] sm:$0xf]  ;;  %v1300_v0 = vld [vmem:[%s2165_s25 + $0x4] sm:$0xf] }
 0x1aa   : > { %1299 = vst [vmem:[%s1281_s5] sm:$0xf] %v1298_v63  ;;  %1301 = vst [vmem:[%s1281_s5 + $0x8] sm:$0xf] %v1300_v0 }
 0x1ab PF: > { %s13_s22 = sadd.s32 1, %s1815_s22   ;;  %s2283_s25 = sld [smem:[#allocation6_spill]] }
 0x1ac   : > { %p10_p6 = scmp.ge.s32.totalorder %s13_s22, 8   ;;  %s2284_s12 = smov %s1779_s13 }
 0x1ad   : > { %s2285_s13 = smov %s1930_s9  ;;  %s2286_s14 = smov %s1787_s15 }
 0x1ae   : > { %s2287_s15 = smov %s1927_s8  ;;  %s2288_s16 = smov %s1795_s17 }
 0x1af   : > { %s2289_s17 = smov %s1913_s30  ;;  %s2290_s18 = smov %s1807_s20 }
 0x1b0   : > { %s2291_s19 = smov %s1811_s21  ;;  %s2292_s20 = smov %s2295_s24 }
 0x1b1   : > { %s2293_s21 = smov %s2283_s25  ;;  %12 = sbr.rel (!%p10_p6) target bundleno = 9 (0x9), region = 191 }

// kernel: perceptual_forward.32
= control target key start
LH: loop header
LB: loop body
LE: loop exit
PB: predicated region body
PF: predicated region fallthrough
CT: control target
= control target key end

     0   :  { %s2374_s0 = inlined_call_operand.vmem [shape: bf16[16,6400], index: 0, kind: input, shape index: {}]   ;;  %s2375_s1 = inlined_call_operand.vmem [shape: bf16[6400,512], index: 1, kind: input, shape index: {}]   ;;  %s2376_s2 = inlined_call_operand.vmem [shape: f32[1,512], index: 2, kind: input, shape index: {}]   ;;  %s2377_s3 = inlined_call_operand.vmem [shape: bf16[16,512], index: 3, kind: output, shape index: {}]  }
   0x1   :  { %2379 = sst [smem:[#allocation7_spill]] %s2374_s0 }
   0x2   :  { %2380 = sst [smem:[#allocation8_spill]] %s2375_s1 }
   0x3   :  { %s1943_s12 = smov 0   ;;  %s1945_s13 = smov 0  }
   0x4   :  { %s1947_s14 = smov 0   ;;  %s1949_s15 = smov 0  }
   0x5   :  { %s1951_s16 = smov 0   ;;  %s1953_s17 = smov 0  }
   0x6   :  { %s1955_s18 = smov 0   ;;  %s1957_s19 = smov 0  }
   0x7   :  { %s1959_s20 = smov 0   ;;  %s1961_s21 = smov 0  }
   0x8   :  { %s1963_s22 = smov 0  }
   0x9 LB: > { %s1498_s23 = sadd.s32 4294967295, %s1919_s22   ;;  %s25_s24 = sadd.s32 1, %s1911_s20  ;;  %s1919_s22 = sphi %s1963_s22, %s13_s22   ;;  %s1915_s21 = sphi %s1961_s21, %s2397_s21   ;;  %s1911_s20 = sphi %s1959_s20, %s2396_s20   ;;  %s1907_s19 = sphi %s1957_s19, %s2395_s19   ;;  %s1903_s18 = sphi %s1955_s18, %s2394_s18   ;;  %s1899_s17 = sphi %s1953_s17, %s2393_s17   ;;  %s1895_s16 = sphi %s1951_s16, %s2392_s16   ;;  %s1891_s15 = sphi %s1949_s15, %s2391_s15   ;;  %s1887_s14 = sphi %s1947_s14, %s2390_s14   ;;  %s1883_s13 = sphi %s1945_s13, %s2389_s13   ;;  %s1879_s12 = sphi %s1943_s12, %s2388_s12  }
   0xa   : > { %p26_p0 = scmp.ge.s32.totalorder %s25_s24, 10  ;;  %s28_s25 = sadd.s32 1, %s1915_s21 }
   0xb   : > { %s41_s26 = sadd.s32 1, %s1899_s17  ;;  %p48_p1 = scmp.ne.s32.totalorder %s1899_s17, %s1895_s16 }
   0xc   : > { %s2399_s24 = smov (%p26_p0, %s25_s24), 0  ;;  %s2401_s25 = smov (!%p26_p0, %s28_s25), %s1915_s21 }
   0xd   : > { %s37_s27 = ssub.s32 %s1911_s20, %s2399_s24  ;;  %p49_p2 = scmp.eq.s32.totalorder %s1919_s22, 0 }
   0xe   : > { %p30_p3 = scmp.ge.s32.totalorder %s2401_s25, 2  ;;  %p39_p4 = scmp.eq.s32.totalorder %s37_s27, 0 }
   0xf   : > { %p2010_p5 = por %p49_p2, %p48_p1  ;;  %s69_s29 = sadd.s32 1, %s1891_s15 }
  0x10   : > { %s2403_s25 = smov (%p30_p3, %s2401_s25), 0  ;;  %p76_p6 = scmp.ne.s32.totalorder %s1891_s15, %s1887_s14 }
  0x11   : > { %2382 = sst [smem:[#allocation6_spill]] %s2403_s25  ;;  %s65_s4 = ssub.s32 %s1915_s21, %s2403_s25 }
  0x12   : > { %s2018_s30 = scalar_select %p39_p4, %s1899_s17, %s41_s26  }
  0x13   : > { %s66_s5 = sor.u32 %s65_s4, %s37_s27  ;;  %p121_p7 = scmp.eq.s32.totalorder %s65_s4, 0 }
  0x14   : > { %p67_p8 = scmp.eq.s32.totalorder %s66_s5, 0  ;;  %p2024_p9 = por %p76_p6, %p49_p2 }
  0x15   : > { %s123_s7 = sadd.s32 1, %s1883_s13  ;;  %p133_p10 = scmp.ne.s32.totalorder %s1883_s13, %s1879_s12 }
  0x16   : > { %s2032_s8 = scalar_select %p67_p8, %s1891_s15, %s69_s29  }
  0x17   : > { %s2035_s9 = scalar_select %p121_p7, %s1883_s13, %s123_s7  }
  0x18   : > { %p134_p11 = scmp.eq.s32.totalorder %s1498_s23, 19  ;;  %p1501_p13 = scmp.ge.s32.totalorder %s1919_s22, 20 }
  0x1a   : > { %p2037_p12 = por %p134_p11, %p133_p10  ;;  %156 = sbr.rel (%p1501_p13) target bundleno = 93 (0x5d), region = 16 }
  0x1f   : > { %159 = sbr.rel (!%p2010_p5) target bundleno = 43 (0x2b), region = 20  ;;  %s161_s11 = sand.u32 (%p2010_p5), 1, %s1899_s17  }
  0x20   : > { %s1607_s26 = smul.u32 (%p2010_p5), 20, %s1911_s20  ;;  %s2385_s0 = sld [smem:[#allocation7_spill]] (%p2010_p5) }
  0x21   : > { %s1612_s27 = smul.u32 (%p2010_p5), 40, %s161_s11 }
  0x23   : > { %s163_s23 = scalar_lea.vmem (%p2010_p5), [#allocation3], %s1612_s27 }
  0x26   : > { %s169_s5 = scalar_lea.vmem %s2385_s0, %s1607_s26 }
  0x27   : > { %v184_v0 = vld [vmem:[%s169_s5] sm:$0xff]  ;;  %v186_v1 = vld [vmem:[%s169_s5 + $0x8] sm:$0xff]  ;;  %v190_v3 = vld [vmem:[%s169_s5 + $0xd0] sm:$0xff] }
  0x28   : > { %v188_v2 = vld [vmem:[%s169_s5 + $0xc8] sm:$0xff]  ;;  %185 = vst [vmem:[%s163_s23] sm:$0xff] %v184_v0  ;;  %187 = vst [vmem:[%s163_s23 + $0x8] sm:$0xff] %v186_v1  ;;  %v1503_v4 = vld [vmem:[%s169_s5 + $0x10] sm:$0xf] }
  0x29   : > { %189 = vst [vmem:[%s163_s23 + $0x14] sm:$0xff] %v188_v2  ;;  %v1505_v5 = vld [vmem:[%s169_s5 + $0xd8] sm:$0xf]  ;;  %191 = vst [vmem:[%s163_s23 + $0x1c] sm:$0xff] %v190_v3 }
  0x2a   : > { %1504 = vst [vmem:[%s163_s23 + $0x10] sm:$0xf] %v1503_v4  ;;  %1506 = vst [vmem:[%s163_s23 + $0x24] sm:$0xf] %v1505_v5 }
  0x2b PF: > { %209 = sbr.rel (!%p2024_p9) target bundleno = 93 (0x5d), region = 46  ;;  %s211_s28 = sand.u32 (%p2024_p9), 1, %s1891_s15  }
  0x2c   : > { %s1613_s7 = smul.u32 (%p2024_p9), 640, %s211_s28  ;;  %s1507_s11 = sshll.u32 (%p2024_p9), %s1915_s21, 1 }
  0x2d   : > { %s1608_s26 = smul.u32 (%p2024_p9), 320, %s1911_s20  ;;  %s2386_s1 = sld [smem:[#allocation8_spill]] (%p2024_p9) }
  0x2e   : > { %s2062_s6 = scalar_lea.vmem (%p2024_p9), [#allocation4], %s1613_s7 }
  0x2f   : > { %s217_s27 = sadd.s32 (%p2024_p9), %s1608_s26, %s1507_s11 }
  0x30   : > { %s1509_s29 = sshll.u32 %s217_s27, 2 }
  0x33   : > { %s2057_s5 = scalar_lea.vmem %s2386_s1, %s1509_s29 }
  0x34   : > { %v406_v6 = vld [vmem:[%s2057_s5] sm:$0xff]  ;;  %v408_v7 = vld [vmem:[%s2057_s5 + $0x10] sm:$0xff] }
  0x35   : > { %v410_v8 = vld [vmem:[%s2057_s5 + $0x20] sm:$0xff]  ;;  %407 = vst [vmem:[%s2062_s6] sm:$0xff] %v406_v6  ;;  %409 = vst [vmem:[%s2062_s6 + $0x8] sm:$0xff] %v408_v7  ;;  %v412_v9 = vld [vmem:[%s2057_s5 + $0x30] sm:$0xff] }
  0x36   : > { %411 = vst [vmem:[%s2062_s6 + $0x10] sm:$0xff] %v410_v8  ;;  %v414_v10 = vld [vmem:[%s2057_s5 + $0x40] sm:$0xff]  ;;  %v416_v11 = vld [vmem:[%s2057_s5 + $0x50] sm:$0xff]  ;;  %413 = vst [vmem:[%s2062_s6 + $0x18] sm:$0xff] %v412_v9 }
  0x37   : > { %415 = vst [vmem:[%s2062_s6 + $0x20] sm:$0xff] %v414_v10  ;;  %417 = vst [vmem:[%s2062_s6 + $0x28] sm:$0xff] %v416_v11  ;;  %v418_v12 = vld [vmem:[%s2057_s5 + $0x60] sm:$0xff]  ;;  %v420_v13 = vld [vmem:[%s2057_s5 + $0x70] sm:$0xff] }
  0x38   : > { %v422_v14 = vld [vmem:[%s2057_s5 + $0x80] sm:$0xff]  ;;  %419 = vst [vmem:[%s2062_s6 + $0x30] sm:$0xff] %v418_v12  ;;  %421 = vst [vmem:[%s2062_s6 + $0x38] sm:$0xff] %v420_v13  ;;  %v424_v15 = vld [vmem:[%s2057_s5 + $0x90] sm:$0xff] }
  0x39   : > { %423 = vst [vmem:[%s2062_s6 + $0x40] sm:$0xff] %v422_v14  ;;  %v426_v16 = vld [vmem:[%s2057_s5 + $0xa0] sm:$0xff]  ;;  %v428_v17 = vld [vmem:[%s2057_s5 + $0xb0] sm:$0xff]  ;;  %425 = vst [vmem:[%s2062_s6 + $0x48] sm:$0xff] %v424_v15 }
  0x3a   : > { %427 = vst [vmem:[%s2062_s6 + $0x50] sm:$0xff] %v426_v16  ;;  %429 = vst [vmem:[%s2062_s6 + $0x58] sm:$0xff] %v428_v17  ;;  %v430_v18 = vld [vmem:[%s2057_s5 + $0xc0] sm:$0xff]  ;;  %v432_v19 = vld [vmem:[%s2057_s5 + $0xd0] sm:$0xff] }
  0x3b   : > { %v434_v20 = vld [vmem:[%s2057_s5 + $0xe0] sm:$0xff]  ;;  %431 = vst [vmem:[%s2062_s6 + $0x60] sm:$0xff] %v430_v18  ;;  %433 = vst [vmem:[%s2062_s6 + $0x68] sm:$0xff] %v432_v19  ;;  %v436_v21 = vld [vmem:[%s2057_s5 + $0xf0] sm:$0xff] }
  0x3c   : > { %435 = vst [vmem:[%s2062_s6 + $0x70] sm:$0xff] %v434_v20  ;;  %v438_v22 = vld [vmem:[%s2057_s5 + $0x100] sm:$0xff]  ;;  %v440_v23 = vld [vmem:[%s2057_s5 + $0x110] sm:$0xff]  ;;  %437 = vst [vmem:[%s2062_s6 + $0x78] sm:$0xff] %v436_v21 }
  0x3d   : > { %439 = vst [vmem:[%s2062_s6 + $0x80] sm:$0xff] %v438_v22  ;;  %441 = vst [vmem:[%s2062_s6 + $0x88] sm:$0xff] %v440_v23  ;;  %v442_v24 = vld [vmem:[%s2057_s5 + $0x120] sm:$0xff]  ;;  %v444_v25 = vld [vmem:[%s2057_s5 + $0x130] sm:$0xff] }
  0x3e   : > { %v446_v26 = vld [vmem:[%s2057_s5 + $0x140] sm:$0xff]  ;;  %443 = vst [vmem:[%s2062_s6 + $0x90] sm:$0xff] %v442_v24  ;;  %445 = vst [vmem:[%s2062_s6 + $0x98] sm:$0xff] %v444_v25  ;;  %v448_v27 = vld [vmem:[%s2057_s5 + $0x150] sm:$0xff] }
  0x3f   : > { %447 = vst [vmem:[%s2062_s6 + $0xa0] sm:$0xff] %v446_v26  ;;  %v450_v28 = vld [vmem:[%s2057_s5 + $0x160] sm:$0xff]  ;;  %v452_v29 = vld [vmem:[%s2057_s5 + $0x170] sm:$0xff]  ;;  %449 = vst [vmem:[%s2062_s6 + $0xa8] sm:$0xff] %v448_v27 }
  0x40   : > { %451 = vst [vmem:[%s2062_s6 + $0xb0] sm:$0xff] %v450_v28  ;;  %453 = vst [vmem:[%s2062_s6 + $0xb8] sm:$0xff] %v452_v29  ;;  %v454_v30 = vld [vmem:[%s2057_s5 + $0x180] sm:$0xff]  ;;  %v456_v31 = vld [vmem:[%s2057_s5 + $0x190] sm:$0xff] }
  0x41   : > { %v458_v32 = vld [vmem:[%s2057_s5 + $0x1a0] sm:$0xff]  ;;  %455 = vst [vmem:[%s2062_s6 + $0xc0] sm:$0xff] %v454_v30  ;;  %457 = vst [vmem:[%s2062_s6 + $0xc8] sm:$0xff] %v456_v31  ;;  %v460_v33 = vld [vmem:[%s2057_s5 + $0x1b0] sm:$0xff] }
  0x42   : > { %459 = vst [vmem:[%s2062_s6 + $0xd0] sm:$0xff] %v458_v32  ;;  %v462_v34 = vld [vmem:[%s2057_s5 + $0x1c0] sm:$0xff]  ;;  %v464_v35 = vld [vmem:[%s2057_s5 + $0x1d0] sm:$0xff]  ;;  %461 = vst [vmem:[%s2062_s6 + $0xd8] sm:$0xff] %v460_v33 }
  0x43   : > { %463 = vst [vmem:[%s2062_s6 + $0xe0] sm:$0xff] %v462_v34  ;;  %465 = vst [vmem:[%s2062_s6 + $0xe8] sm:$0xff] %v464_v35  ;;  %v466_v36 = vld [vmem:[%s2057_s5 + $0x1e0] sm:$0xff]  ;;  %v468_v37 = vld [vmem:[%s2057_s5 + $0x1f0] sm:$0xff] }
  0x44   : > { %v470_v38 = vld [vmem:[%s2057_s5 + $0x200] sm:$0xff]  ;;  %467 = vst [vmem:[%s2062_s6 + $0xf0] sm:$0xff] %v466_v36  ;;  %469 = vst [vmem:[%s2062_s6 + $0xf8] sm:$0xff] %v468_v37  ;;  %v472_v39 = vld [vmem:[%s2057_s5 + $0x210] sm:$0xff] }
  0x45   : > { %471 = vst [vmem:[%s2062_s6 + $0x100] sm:$0xff] %v470_v38  ;;  %v474_v40 = vld [vmem:[%s2057_s5 + $0x220] sm:$0xff]  ;;  %v476_v41 = vld [vmem:[%s2057_s5 + $0x230] sm:$0xff]  ;;  %473 = vst [vmem:[%s2062_s6 + $0x108] sm:$0xff] %v472_v39 }
  0x46   : > { %475 = vst [vmem:[%s2062_s6 + $0x110] sm:$0xff] %v474_v40  ;;  %477 = vst [vmem:[%s2062_s6 + $0x118] sm:$0xff] %v476_v41  ;;  %v478_v42 = vld [vmem:[%s2057_s5 + $0x240] sm:$0xff]  ;;  %v480_v43 = vld [vmem:[%s2057_s5 + $0x250] sm:$0xff] }
  0x47   : > { %v482_v44 = vld [vmem:[%s2057_s5 + $0x260] sm:$0xff]  ;;  %479 = vst [vmem:[%s2062_s6 + $0x120] sm:$0xff] %v478_v42  ;;  %481 = vst [vmem:[%s2062_s6 + $0x128] sm:$0xff] %v480_v43  ;;  %v484_v45 = vld [vmem:[%s2057_s5 + $0x270] sm:$0xff] }
  0x48   : > { %483 = vst [vmem:[%s2062_s6 + $0x130] sm:$0xff] %v482_v44  ;;  %v486_v46 = vld [vmem:[%s2057_s5 + $0x280] sm:$0xff]  ;;  %v488_v47 = vld [vmem:[%s2057_s5 + $0x290] sm:$0xff]  ;;  %485 = vst [vmem:[%s2062_s6 + $0x138] sm:$0xff] %v484_v45 }
  0x49   : > { %487 = vst [vmem:[%s2062_s6 + $0x140] sm:$0xff] %v486_v46  ;;  %489 = vst [vmem:[%s2062_s6 + $0x148] sm:$0xff] %v488_v47  ;;  %v490_v48 = vld [vmem:[%s2057_s5 + $0x2a0] sm:$0xff]  ;;  %v492_v49 = vld [vmem:[%s2057_s5 + $0x2b0] sm:$0xff] }
  0x4a   : > { %v494_v50 = vld [vmem:[%s2057_s5 + $0x2c0] sm:$0xff]  ;;  %491 = vst [vmem:[%s2062_s6 + $0x150] sm:$0xff] %v490_v48  ;;  %493 = vst [vmem:[%s2062_s6 + $0x158] sm:$0xff] %v492_v49  ;;  %v496_v51 = vld [vmem:[%s2057_s5 + $0x2d0] sm:$0xff] }
  0x4b   : > { %495 = vst [vmem:[%s2062_s6 + $0x160] sm:$0xff] %v494_v50  ;;  %v498_v52 = vld [vmem:[%s2057_s5 + $0x2e0] sm:$0xff]  ;;  %v500_v53 = vld [vmem:[%s2057_s5 + $0x2f0] sm:$0xff]  ;;  %497 = vst [vmem:[%s2062_s6 + $0x168] sm:$0xff] %v496_v51 }
  0x4c   : > { %499 = vst [vmem:[%s2062_s6 + $0x170] sm:$0xff] %v498_v52  ;;  %501 = vst [vmem:[%s2062_s6 + $0x178] sm:$0xff] %v500_v53  ;;  %v502_v54 = vld [vmem:[%s2057_s5 + $0x300] sm:$0xff]  ;;  %v504_v55 = vld [vmem:[%s2057_s5 + $0x310] sm:$0xff] }
  0x4d   : > { %v506_v56 = vld [vmem:[%s2057_s5 + $0x320] sm:$0xff]  ;;  %503 = vst [vmem:[%s2062_s6 + $0x180] sm:$0xff] %v502_v54  ;;  %505 = vst [vmem:[%s2062_s6 + $0x188] sm:$0xff] %v504_v55  ;;  %v508_v57 = vld [vmem:[%s2057_s5 + $0x330] sm:$0xff] }
  0x4e   : > { %507 = vst [vmem:[%s2062_s6 + $0x190] sm:$0xff] %v506_v56  ;;  %v510_v58 = vld [vmem:[%s2057_s5 + $0x340] sm:$0xff]  ;;  %v512_v59 = vld [vmem:[%s2057_s5 + $0x350] sm:$0xff]  ;;  %509 = vst [vmem:[%s2062_s6 + $0x198] sm:$0xff] %v508_v57 }
  0x4f   : > { %511 = vst [vmem:[%s2062_s6 + $0x1a0] sm:$0xff] %v510_v58  ;;  %513 = vst [vmem:[%s2062_s6 + $0x1a8] sm:$0xff] %v512_v59  ;;  %v514_v60 = vld [vmem:[%s2057_s5 + $0x360] sm:$0xff]  ;;  %v516_v61 = vld [vmem:[%s2057_s5 + $0x370] sm:$0xff] }
  0x50   : > { %v518_v62 = vld [vmem:[%s2057_s5 + $0x380] sm:$0xff]  ;;  %515 = vst [vmem:[%s2062_s6 + $0x1b0] sm:$0xff] %v514_v60  ;;  %517 = vst [vmem:[%s2062_s6 + $0x1b8] sm:$0xff] %v516_v61  ;;  %v520_v63 = vld [vmem:[%s2057_s5 + $0x390] sm:$0xff] }
  0x51   : > { %519 = vst [vmem:[%s2062_s6 + $0x1c0] sm:$0xff] %v518_v62  ;;  %v522_v0 = vld [vmem:[%s2057_s5 + $0x3a0] sm:$0xff]  ;;  %v524_v1 = vld [vmem:[%s2057_s5 + $0x3b0] sm:$0xff]  ;;  %521 = vst [vmem:[%s2062_s6 + $0x1c8] sm:$0xff] %v520_v63 }
  0x52   : > { %523 = vst [vmem:[%s2062_s6 + $0x1d0] sm:$0xff] %v522_v0  ;;  %525 = vst [vmem:[%s2062_s6 + $0x1d8] sm:$0xff] %v524_v1  ;;  %v526_v2 = vld [vmem:[%s2057_s5 + $0x3c0] sm:$0xff]  ;;  %v528_v3 = vld [vmem:[%s2057_s5 + $0x3d0] sm:$0xff] }
  0x53   : > { %v530_v4 = vld [vmem:[%s2057_s5 + $0x3e0] sm:$0xff]  ;;  %527 = vst [vmem:[%s2062_s6 + $0x1e0] sm:$0xff] %v526_v2  ;;  %529 = vst [vmem:[%s2062_s6 + $0x1e8] sm:$0xff] %v528_v3  ;;  %v532_v5 = vld [vmem:[%s2057_s5 + $0x3f0] sm:$0xff] }
  0x54   : > { %531 = vst [vmem:[%s2062_s6 + $0x1f0] sm:$0xff] %v530_v4  ;;  %v534_v6 = vld [vmem:[%s2057_s5 + $0x400] sm:$0xff]  ;;  %v536_v7 = vld [vmem:[%s2057_s5 + $0x410] sm:$0xff]  ;;  %533 = vst [vmem:[%s2062_s6 + $0x1f8] sm:$0xff] %v532_v5 }
  0x55   : > { %535 = vst [vmem:[%s2062_s6 + $0x200] sm:$0xff] %v534_v6  ;;  %537 = vst [vmem:[%s2062_s6 + $0x208] sm:$0xff] %v536_v7  ;;  %v538_v8 = vld [vmem:[%s2057_s5 + $0x420] sm:$0xff]  ;;  %v540_v9 = vld [vmem:[%s2057_s5 + $0x430] sm:$0xff] }
  0x56   : > { %v542_v10 = vld [vmem:[%s2057_s5 + $0x440] sm:$0xff]  ;;  %539 = vst [vmem:[%s2062_s6 + $0x210] sm:$0xff] %v538_v8  ;;  %541 = vst [vmem:[%s2062_s6 + $0x218] sm:$0xff] %v540_v9  ;;  %v544_v11 = vld [vmem:[%s2057_s5 + $0x450] sm:$0xff] }
  0x57   : > { %543 = vst [vmem:[%s2062_s6 + $0x220] sm:$0xff] %v542_v10  ;;  %v546_v12 = vld [vmem:[%s2057_s5 + $0x460] sm:$0xff]  ;;  %v548_v13 = vld [vmem:[%s2057_s5 + $0x470] sm:$0xff]  ;;  %545 = vst [vmem:[%s2062_s6 + $0x228] sm:$0xff] %v544_v11 }
  0x58   : > { %547 = vst [vmem:[%s2062_s6 + $0x230] sm:$0xff] %v546_v12  ;;  %549 = vst [vmem:[%s2062_s6 + $0x238] sm:$0xff] %v548_v13  ;;  %v550_v14 = vld [vmem:[%s2057_s5 + $0x480] sm:$0xff]  ;;  %v552_v15 = vld [vmem:[%s2057_s5 + $0x490] sm:$0xff] }
  0x59   : > { %v554_v16 = vld [vmem:[%s2057_s5 + $0x4a0] sm:$0xff]  ;;  %551 = vst [vmem:[%s2062_s6 + $0x240] sm:$0xff] %v550_v14  ;;  %553 = vst [vmem:[%s2062_s6 + $0x248] sm:$0xff] %v552_v15  ;;  %v556_v17 = vld [vmem:[%s2057_s5 + $0x4b0] sm:$0xff] }
  0x5a   : > { %555 = vst [vmem:[%s2062_s6 + $0x250] sm:$0xff] %v554_v16  ;;  %v558_v18 = vld [vmem:[%s2057_s5 + $0x4c0] sm:$0xff]  ;;  %v560_v19 = vld [vmem:[%s2057_s5 + $0x4d0] sm:$0xff]  ;;  %557 = vst [vmem:[%s2062_s6 + $0x258] sm:$0xff] %v556_v17 }
  0x5b   : > { %559 = vst [vmem:[%s2062_s6 + $0x260] sm:$0xff] %v558_v18  ;;  %561 = vst [vmem:[%s2062_s6 + $0x268] sm:$0xff] %v560_v19  ;;  %v562_v20 = vld [vmem:[%s2057_s5 + $0x4e0] sm:$0xff]  ;;  %v564_v21 = vld [vmem:[%s2057_s5 + $0x4f0] sm:$0xff] }
  0x5c   : > { %563 = vst [vmem:[%s2062_s6 + $0x270] sm:$0xff] %v562_v20  ;;  %565 = vst [vmem:[%s2062_s6 + $0x278] sm:$0xff] %v564_v21 }
  0x5d PF: > { %p1510_p0 = scmp.ge.s32.totalorder %s1919_s22, 1  ;;  %p578_p1 = scmp.lt.s32.totalorder %s1919_s22, 21 }
  0x5f   : > { %p579_p2 = pnand %p1510_p0, %p578_p1 }
  0x60   : > { %s585_s0 = sand.u32 (!%p579_p2), 1, %s1895_s16   ;;  %s592_s23 = sand.u32 (!%p579_p2), 1, %s1887_s14  }
  0x61   : > { %582 = sbr.rel (%p579_p2) target bundleno = 436 (0x1b4), region = 88  ;;  %s619_s7 = sand.u32 (!%p579_p2), 1, %s1879_s12  }
  0x62   : > { %s1614_s28 = smul.u32 (!%p579_p2), 40, %s585_s0  ;;  %s1511_s26 = sshll.u32 (!%p579_p2), %s619_s7, 4 }
  0x63   : > { %s1615_s11 = smul.u32 (!%p579_p2), 640, %s592_s23  ;;  %s1512_s27 = sshll.u32 (!%p579_p2), %s1907_s19, 1 }
  0x64   : > { %p627_p3 = scmp.lt.s32.totalorder (!%p579_p2), %s1512_s27, 3  ;;  %s2233_s6 = scalar_lea.vmem (!%p579_p2), [#allocation3], %s1614_s28 }
  0x65   : > { %s2235_s1 = scalar_lea.vmem (!%p579_p2), [#allocation4], %s1615_s11  ;;  %s2237_s25 = scalar_lea.vmem (!%p579_p2), [#allocation5], %s1511_s26 }
  0x66   : > { %s2405_s27 = smov (!%p627_p3, %s1512_s27), 3  ;;  %p1513_p4 = scmp.ne.s32.totalorder %s1903_s18, 0 }
  0x67   : > { %s629_s5 = scalar_lea.vmem %s2376_s2, %s2405_s27 }
  0x68   : > { %637 = sbr.rel (%p1513_p4) target bundleno = 112 (0x70), region = 100 }
  0x6d   : > { %v1921_v22 = vmov 0.0  }
  0x6e   : > { %638 = vst [vmem:[#allocation2 + $0x10] sm:$0xff] %v1921_v22  ;;  %639 = vst [vmem:[#allocation2] sm:$0xff] %v1921_v22 }
  0x6f   : > { %640 = vst [vmem:[#allocation2 + $0x18] sm:$0xff] %v1921_v22  ;;  %641 = vst [vmem:[#allocation2 + $0x8] sm:$0xff] %v1921_v22 }
  0x70 PF: > { %v1706_v23 = vld [vmem:[%s2235_s1 + $0x74] ss:$8 sps:$4 sm:$0xff]   ;;  %v1710_v25 = vld [vmem:[%s2235_s1 + $0x70] ss:$8 sps:$4 sm:$0xff]   ;;  %v1712_v27 = vld [vmem:[%s2235_s1 + $0x64] ss:$8 sps:$4 sm:$0xff]  }
  0x71   : > { %v1708_v24 = vld [vmem:[%s2235_s1 + $0x174] ss:$8 sps:$4 sm:$0xff]   ;;  %1158 = vmatprep.subr.bf16.mxu0 %v1706_v23  ;;  %v1711_v26 = vld [vmem:[%s2235_s1 + $0x170] ss:$8 sps:$4 sm:$0xff]   ;;  %v1714_v28 = vld [vmem:[%s2235_s1 + $0x164] ss:$8 sps:$4 sm:$0xff]  }
  0x72   : > { %1201 = vmatprep.subr.bf16.mxu1 %v1708_v24  ;;  %1159 = vmatpush1.bf16.msra.mxu0 %v1710_v25  ;;  %v1716_v29 = vld [vmem:[%s2235_s1 + $0x60] ss:$8 sps:$4 sm:$0xff]   ;;  %v1718_v31 = vld [vmem:[%s2235_s1 + $0x54] ss:$8 sps:$4 sm:$0xff]   ;;  %v1722_v33 = vld [vmem:[%s2235_s1 + $0x50] ss:$8 sps:$4 sm:$0xff]  }
  0x73   : > { %1202 = vmatpush1.bf16.msra.mxu1 %v1711_v26  ;;  %1160 = vmatprep.subr.bf16.mxu0 %v1712_v27  ;;  %v1717_v30 = vld [vmem:[%s2235_s1 + $0x160] ss:$8 sps:$4 sm:$0xff]   ;;  %v1720_v32 = vld [vmem:[%s2235_s1 + $0x154] ss:$8 sps:$4 sm:$0xff]   ;;  %v1723_v34 = vld [vmem:[%s2235_s1 + $0x150] ss:$8 sps:$4 sm:$0xff]  }
  0x74   : > { %1203 = vmatprep.subr.bf16.mxu1 %v1714_v28  ;;  %v1724_v35 = vld [vmem:[%s2235_s1 + $0x44] ss:$8 sps:$4 sm:$0xff]   ;;  %v1728_v37 = vld [vmem:[%s2235_s1 + $0x40] ss:$8 sps:$4 sm:$0xff]   ;;  %v1730_v39 = vld [vmem:[%s2235_s1 + $0x34] ss:$8 sps:$4 sm:$0xff]  }
  0x75   : > { %v1726_v36 = vld [vmem:[%s2235_s1 + $0x144] ss:$8 sps:$4 sm:$0xff]   ;;  %v1729_v38 = vld [vmem:[%s2235_s1 + $0x140] ss:$8 sps:$4 sm:$0xff]   ;;  %v1732_v40 = vld [vmem:[%s2235_s1 + $0x134] ss:$8 sps:$4 sm:$0xff]  }
  0x76   : > { %1161 = vmatpush1.bf16.msra.mxu0 %v1716_v29  ;;  %v1734_v41 = vld [vmem:[%s2235_s1 + $0x30] ss:$8 sps:$4 sm:$0xff]   ;;  %v1736_v43 = vld [vmem:[%s2235_s1 + $0x24] ss:$8 sps:$4 sm:$0xff]   ;;  %v1740_v45 = vld [vmem:[%s2235_s1 + $0x20] ss:$8 sps:$4 sm:$0xff]  }
  0x77   : > { %1204 = vmatpush1.bf16.msra.mxu1 %v1717_v30  ;;  %1162 = vmatprep.subr.bf16.mxu0 %v1718_v31  ;;  %v1735_v42 = vld [vmem:[%s2235_s1 + $0x130] ss:$8 sps:$4 sm:$0xff]   ;;  %v1738_v44 = vld [vmem:[%s2235_s1 + $0x124] ss:$8 sps:$4 sm:$0xff]   ;;  %v1741_v46 = vld [vmem:[%s2235_s1 + $0x120] ss:$8 sps:$4 sm:$0xff]  }
  0x78   : > { %1205 = vmatprep.subr.bf16.mxu1 %v1720_v32  ;;  %v1742_v47 = vld [vmem:[%s2235_s1 + $0x14] ss:$8 sps:$4 sm:$0xff]   ;;  %v1746_v49 = vld [vmem:[%s2235_s1 + $0x10] ss:$8 sps:$4 sm:$0xff]   ;;  %v1748_v51 = vld [vmem:[%s2235_s1 + $0x4] ss:$8 sps:$4 sm:$0xff]  }
  0x79   : > { %v1744_v48 = vld [vmem:[%s2235_s1 + $0x114] ss:$8 sps:$4 sm:$0xff]   ;;  %v1747_v50 = vld [vmem:[%s2235_s1 + $0x110] ss:$8 sps:$4 sm:$0xff]   ;;  %v1750_v52 = vld [vmem:[%s2235_s1 + $0x104] ss:$8 sps:$4 sm:$0xff]  }
  0x7a   : > { %1163 = vmatpush1.bf16.msra.mxu0 %v1722_v33  ;;  %v1752_v53 = vld [vmem:[%s2235_s1] ss:$8 sps:$4 sm:$0xff]   ;;  %v1754_v55 = vld [vmem:[%s2235_s1 + $0xf4] ss:$8 sps:$4 sm:$0xff]   ;;  %v1758_v57 = vld [vmem:[%s2235_s1 + $0xf0] ss:$8 sps:$4 sm:$0xff]  }
  0x7b   : > { %1206 = vmatpush1.bf16.msra.mxu1 %v1723_v34  ;;  %1164 = vmatprep.subr.bf16.mxu0 %v1724_v35  ;;  %v1753_v54 = vld [vmem:[%s2235_s1 + $0x100] ss:$8 sps:$4 sm:$0xff]   ;;  %v1756_v56 = vld [vmem:[%s2235_s1 + $0x1f4] ss:$8 sps:$4 sm:$0xff]   ;;  %v1759_v58 = vld [vmem:[%s2235_s1 + $0x1f0] ss:$8 sps:$4 sm:$0xff]  }
  0x7c   : > { %1207 = vmatprep.subr.bf16.mxu1 %v1726_v36  ;;  %v1760_v59 = vld [vmem:[%s2235_s1 + $0xe4] ss:$8 sps:$4 sm:$0xff]   ;;  %v1764_v61 = vld [vmem:[%s2235_s1 + $0xe0] ss:$8 sps:$4 sm:$0xff]   ;;  %v1766_v63 = vld [vmem:[%s2235_s1 + $0xd4] ss:$8 sps:$4 sm:$0xff]  }
  0x7d   : > { %v1762_v60 = vld [vmem:[%s2235_s1 + $0x1e4] ss:$8 sps:$4 sm:$0xff]   ;;  %v1765_v62 = vld [vmem:[%s2235_s1 + $0x1e0] ss:$8 sps:$4 sm:$0xff]   ;;  %v1768_v0 = vld [vmem:[%s2235_s1 + $0x1d4] ss:$8 sps:$4 sm:$0xff]  }
  0x7e   : > { %1165 = vmatpush1.bf16.msra.mxu0 %v1728_v37  ;;  %v1770_v1 = vld [vmem:[%s2235_s1 + $0xd0] ss:$8 sps:$4 sm:$0xff]   ;;  %v1772_v3 = vld [vmem:[%s2235_s1 + $0xc4] ss:$8 sps:$4 sm:$0xff]   ;;  %v1776_v5 = vld [vmem:[%s2235_s1 + $0xc0] ss:$8 sps:$4 sm:$0xff]  }
  0x7f   : > { %1208 = vmatpush1.bf16.msra.mxu1 %v1729_v38  ;;  %1166 = vmatprep.subr.bf16.mxu0 %v1730_v39  ;;  %v1771_v2 = vld [vmem:[%s2235_s1 + $0x1d0] ss:$8 sps:$4 sm:$0xff]   ;;  %v1774_v4 = vld [vmem:[%s2235_s1 + $0x1c4] ss:$8 sps:$4 sm:$0xff]   ;;  %v1777_v6 = vld [vmem:[%s2235_s1 + $0x1c0] ss:$8 sps:$4 sm:$0xff]  }
  0x80   : > { %1209 = vmatprep.subr.bf16.mxu1 %v1732_v40  ;;  %v1778_v7 = vld [vmem:[%s2235_s1 + $0xb4] ss:$8 sps:$4 sm:$0xff]   ;;  %v1782_v11 = vld [vmem:[%s2235_s1 + $0xb0] ss:$8 sps:$4 sm:$0xff]   ;;  %v1784_v13 = vld [vmem:[%s2235_s1 + $0xa4] ss:$8 sps:$4 sm:$0xff]  }
  0x81   : > { %v1804_v8 = vld [vmem:[%s2233_s6 + $0x4] ss:$20 sps:$4 sm:$0xff]   ;;  %v1807_v10 = vld [vmem:[%s2233_s6 + $0xc] ss:$20 sps:$4 sm:$0xff]   ;;  %v1805_v27 = vld [vmem:[%s2233_s6 + $0x8] ss:$20 sps:$4 sm:$0xff]  }
  0x82   : > { %1167 = vmatpush1.bf16.msra.mxu0 %v1734_v41  ;;  %v1780_v9 = vld [vmem:[%s2235_s1 + $0x1b4] ss:$8 sps:$4 sm:$0xff]   ;;  %1190 = vmatprep.mubr.bf16.mxu0 %v1804_v8  ;;  %v1783_v12 = vld [vmem:[%s2235_s1 + $0x1b0] ss:$8 sps:$4 sm:$0xff]   ;;  %v1786_v14 = vld [vmem:[%s2235_s1 + $0x1a4] ss:$8 sps:$4 sm:$0xff]  }
  0x83   : > { %1210 = vmatpush1.bf16.msra.mxu1 %v1735_v42  ;;  %1168 = vmatprep.subr.bf16.mxu0 %v1736_v43  ;;  %v1788_v15 = vld [vmem:[%s2235_s1 + $0xa0] ss:$8 sps:$4 sm:$0xff]   ;;  %v1790_v17 = vld [vmem:[%s2235_s1 + $0x94] ss:$8 sps:$4 sm:$0xff]   ;;  %v1794_v19 = vld [vmem:[%s2235_s1 + $0x90] ss:$8 sps:$4 sm:$0xff]  }
  0x84   : > { %1211 = vmatprep.subr.bf16.mxu1 %v1738_v44  ;;  %1233 = vmatprep.mubr.bf16.mxu1 %v1807_v10  ;;  %v1789_v16 = vld [vmem:[%s2235_s1 + $0x1a0] ss:$8 sps:$4 sm:$0xff]   ;;  %v1792_v18 = vld [vmem:[%s2235_s1 + $0x194] ss:$8 sps:$4 sm:$0xff]   ;;  %v1795_v20 = vld [vmem:[%s2235_s1 + $0x190] ss:$8 sps:$4 sm:$0xff]  }
  0x85   : > { %v1796_v21 = vld [vmem:[%s2235_s1 + $0x84] ss:$8 sps:$4 sm:$0xff]   ;;  %v1800_v23 = vld [vmem:[%s2235_s1 + $0x80] ss:$8 sps:$4 sm:$0xff]   ;;  %v1810_v25 = vld [vmem:[%s2235_s1 + $0x274] ss:$8 sps:$4 sm:$0xff]  }
  0x86   : > { %1169 = vmatpush1.bf16.msra.mxu0 %v1740_v45  ;;  %v1798_v22 = vld [vmem:[%s2235_s1 + $0x184] ss:$8 sps:$4 sm:$0xff]   ;;  %v1801_v24 = vld [vmem:[%s2235_s1 + $0x180] ss:$8 sps:$4 sm:$0xff]   ;;  %v1808_v28 = vld [vmem:[%s2235_s1 + $0x270] ss:$8 sps:$4 sm:$0xff]  }
  0x87   : > { %1212 = vmatpush1.bf16.msra.mxu1 %v1741_v46  ;;  %1170 = vmatprep.subr.bf16.mxu0 %v1742_v47  ;;  %v1802_v26 = vld [vmem:[%s2233_s6] ss:$20 sps:$4 sm:$0xff]   ;;  %v1811_v30 = vld [vmem:[%s2235_s1 + $0x260] ss:$8 sps:$4 sm:$0xff]   ;;  %v1922_v31 = vmov 0   ;;  %p1599_p5 = scmp.ne.s32.totalorder %s1903_s18, 9 }
  0x88   : > { %1213 = vmatprep.subr.bf16.mxu1 %v1744_v48  ;;  %v1813_v29 = vld [vmem:[%s2235_s1 + $0x264] ss:$8 sps:$4 sm:$0xff]   ;;  %v1816_v32 = vld [vmem:[%s2235_s1 + $0x254] ss:$8 sps:$4 sm:$0xff]   ;;  %v1814_v33 = vld [vmem:[%s2235_s1 + $0x250] ss:$8 sps:$4 sm:$0xff]  }
  0x89   : > { %v1819_v34 = vld [vmem:[%s2235_s1 + $0x244] ss:$8 sps:$4 sm:$0xff]   ;;  %v1817_v35 = vld [vmem:[%s2235_s1 + $0x240] ss:$8 sps:$4 sm:$0xff]   ;;  %v1822_v36 = vld [vmem:[%s2235_s1 + $0x234] ss:$8 sps:$4 sm:$0xff]  }
  0x8a   : > { %1171 = vmatpush1.bf16.msra.mxu0 %v1746_v49  ;;  %v1820_v37 = vld [vmem:[%s2235_s1 + $0x230] ss:$8 sps:$4 sm:$0xff]   ;;  %v1825_v38 = vld [vmem:[%s2235_s1 + $0x224] ss:$8 sps:$4 sm:$0xff]   ;;  %v1823_v39 = vld [vmem:[%s2235_s1 + $0x220] ss:$8 sps:$4 sm:$0xff]  }
  0x8b   : > { %1214 = vmatpush1.bf16.msra.mxu1 %v1747_v50  ;;  %1172 = vmatprep.subr.bf16.mxu0 %v1748_v51  ;;  %v1828_v40 = vld [vmem:[%s2235_s1 + $0x214] ss:$8 sps:$4 sm:$0xff]   ;;  %v1826_v41 = vld [vmem:[%s2235_s1 + $0x210] ss:$8 sps:$4 sm:$0xff]   ;;  %v1831_v42 = vld [vmem:[%s2235_s1 + $0x204] ss:$8 sps:$4 sm:$0xff]  }
  0x8c   : > { %1215 = vmatprep.subr.bf16.mxu1 %v1750_v52  ;;  %v1829_v43 = vld [vmem:[%s2235_s1 + $0x200] ss:$8 sps:$4 sm:$0xff]  }
  0x8d   : > { %v1832_v44 = vld [vmem:[%s2233_s6 + $0x10] ss:$20 sps:$4 sm:$0xff]  }
  0x8e   : > { %1173 = vmatpush1.bf16.msra.mxu0 %v1752_v53  ;;  %v642_v53 = vld [vmem:[#allocation2 + $0x10] sm:$0xff] }
  0x8f   : > { %1216 = vmatpush1.bf16.msra.mxu1 %v1753_v54  ;;  %1174 = vmatprep.subr.bf16.mxu0 %v1754_v55 }
  0x90   : > { %1217 = vmatprep.subr.bf16.mxu1 %v1756_v56 }
  0x92   : > { %1175 = vmatpush2.bf16.msra.mxu0 %v1758_v57 }
  0x93   : > { %1218 = vmatpush2.bf16.msra.mxu1 %v1759_v58  ;;  %1176 = vmatprep.subr.bf16.mxu0 %v1760_v59  ;;  %v643_v58 = vld [vmem:[#allocation2] sm:$0xff] }
  0x94   : > { %1219 = vmatprep.subr.bf16.mxu1 %v1762_v60 }
  0x96   : > { %1177 = vmatpush2.bf16.msra.mxu0 %v1764_v61 }
  0x97   : > { %1220 = vmatpush2.bf16.msra.mxu1 %v1765_v62  ;;  %1178 = vmatprep.subr.bf16.mxu0 %v1766_v63  ;;  %v644_v63 = vld [vmem:[#allocation2 + $0x18] sm:$0xff] }
  0x98   : > { %1221 = vmatprep.subr.bf16.mxu1 %v1768_v0 }
  0x9a   : > { %1179 = vmatpush2.bf16.msra.mxu0 %v1770_v1 }
  0x9b   : > { %1222 = vmatpush2.bf16.msra.mxu1 %v1771_v2  ;;  %1180 = vmatprep.subr.bf16.mxu0 %v1772_v3 }
  0x9c   : > { %1223 = vmatprep.subr.bf16.mxu1 %v1774_v4  ;;  %v645_v4 = vld [vmem:[#allocation2 + $0x8] sm:$0xff] }
  0x9e   : > { %1181 = vmatpush2.bf16.msra.mxu0 %v1776_v5 }
  0x9f   : > { %1224 = vmatpush2.bf16.msra.mxu1 %v1777_v6  ;;  %1182 = vmatprep.subr.bf16.mxu0 %v1778_v7 }
  0xa0   : > { %1225 = vmatprep.subr.bf16.mxu1 %v1780_v9 }
  0xa2   : > { %1183 = vmatpush2.bf16.msra.mxu0 %v1782_v11 }
  0xa3   : > { %1226 = vmatpush2.bf16.msra.mxu1 %v1783_v12  ;;  %1184 = vmatprep.subr.bf16.mxu0 %v1784_v13 }
  0xa4   : > { %1227 = vmatprep.subr.bf16.mxu1 %v1786_v14 }
  0xa6   : > { %1185 = vmatpush2.bf16.msra.mxu0 %v1788_v15 }
  0xa7   : > { %1228 = vmatpush2.bf16.msra.mxu1 %v1789_v16  ;;  %1186 = vmatprep.subr.bf16.mxu0 %v1790_v17 }
  0xa8   : > { %1229 = vmatprep.subr.bf16.mxu1 %v1792_v18 }
  0xaa   : > { %1187 = vmatpush2.bf16.msra.mxu0 %v1794_v19 }
  0xab   : > { %1230 = vmatpush2.bf16.msra.mxu1 %v1795_v20  ;;  %1188 = vmatprep.subr.bf16.mxu0 %v1796_v21 }
  0xac   : > { %1231 = vmatprep.subr.bf16.mxu1 %v1798_v22 }
  0xae   : > { %1189 = vmatpush2.bf16.msra.mxu0 %v1800_v23 }
  0xaf   : > { %1232 = vmatpush2.bf16.msra.mxu1 %v1801_v24  ;;  %1244 = vmatprep.subr.bf16.mxu0 %v1810_v25 }
  0xb1   : > { %1191 = vmatmul.mubr.bf16.vlgmr.msra.gmra.mxu0 %v1802_v26 }
  0xb2   : > { %1234 = vmatmul.mubr.bf16.vlgmr.msra.gmra.mxu1 %v1805_v27  ;;  %1245 = vmatpush1.bf16.msra.mxu0 %v1808_v28 }
  0xb3   : > { %1276 = vmatprep.mubr.bf16.mxu0 %v1922_v31  ;;  %1246 = vmatprep.subr.bf16.mxu0 %v1813_v29 }
  0xb6   : > { %1247 = vmatpush1.bf16.msra.mxu0 %v1811_v30 }
  0xb7   : > { %1248 = vmatprep.subr.bf16.mxu0 %v1816_v32 }
  0xba   : > { %1249 = vmatpush1.bf16.msra.mxu0 %v1814_v33 }
  0xbb   : > { %1250 = vmatprep.subr.bf16.mxu0 %v1819_v34 }
  0xbe   : > { %1251 = vmatpush1.bf16.msra.mxu0 %v1817_v35 }
  0xbf   : > { %1252 = vmatprep.subr.bf16.mxu0 %v1822_v36 }
  0xc2   : > { %1253 = vmatpush1.bf16.msra.mxu0 %v1820_v37 }
  0xc3   : > { %1254 = vmatprep.subr.bf16.mxu0 %v1825_v38 }
  0xc6   : > { %1255 = vmatpush1.bf16.msra.mxu0 %v1823_v39 }
  0xc7   : > { %1256 = vmatprep.subr.bf16.mxu0 %v1828_v40 }
  0xca   : > { %1257 = vmatpush1.bf16.msra.mxu0 %v1826_v41 }
  0xcb   : > { %1258 = vmatprep.subr.bf16.mxu0 %v1831_v42 }
  0xce   : > { %1259 = vmatpush1.bf16.msra.mxu0 %v1829_v43 }
  0xd1   : > { %1277 = vmatmul.mubr.bf16.vlgmr.msra.gmra.mxu0 %v1832_v44 }
 0x171   : > { %v1192_v45 = vpop.f32.mrf.mxu0 }
 0x172   : > { %v1235_v46 = vpop.f32.mrf.mxu1 }
 0x173   : > { %v1194_v47 = vpop.f32.mrf.mxu0  ;;  %v1236_v52 = vadd.f32 %v1235_v46, %v1192_v45 }
 0x174   : > { %v1237_v48 = vpop.f32.mrf.mxu1 }
 0x175   : > { %v1196_v49 = vpop.f32.mrf.mxu0  ;;  %v1238_v55 = vadd.f32 %v1237_v48, %v1194_v47 }
 0x176   : > { %v1239_v50 = vpop.f32.mrf.mxu1 }
 0x177   : > { %v1198_v51 = vpop.f32.mrf.mxu0  ;;  %v1240_v60 = vadd.f32 %v1239_v50, %v1196_v49 }
 0x178   : > { %v1241_v57 = vpop.f32.mrf.mxu1 }
 0x179   : > { %v1242_v1 = vadd.f32 %v1241_v57, %v1198_v51 }
 0x191   : > { %v1278_v54 = vpop.f32.mrf.mxu0 }
 0x192   : > { %v1279_v56 = vadd.f32 %v1278_v54, %v1236_v52 }
 0x193   : > { %v1280_v59 = vpop.f32.mrf.mxu0 }
 0x194   : > { %v1287_v61 = vadd.f32 %v1279_v56, %v642_v53  ;;  %v1281_v62 = vadd.f32 %v1280_v59, %v1238_v55 }
 0x195   : > { %v1282_v0 = vpop.f32.mrf.mxu0 }
 0x196   : > { %1291 = vst [vmem:[#allocation2 + $0x10] sm:$0xff] %v1287_v61  ;;  %v1288_v2 = vadd.f32 %v1281_v62, %v643_v58  ;;  %v1283_v3 = vadd.f32 %v1282_v0, %v1240_v60 }
 0x197   : > { %v1284_v5 = vpop.f32.mrf.mxu0 }
 0x198   : > { %1292 = vst [vmem:[#allocation2] sm:$0xff] %v1288_v2  ;;  %v1289_v6 = vadd.f32 %v1283_v3, %v644_v63  ;;  %v1285_v7 = vadd.f32 %v1284_v5, %v1242_v1  ;;  %1298 = sbr.rel (%p1599_p5) target bundleno = 428 (0x1ac), region = 104 }
 0x19a   : > { %1293 = vst [vmem:[#allocation2 + $0x18] sm:$0xff] %v1289_v6  ;;  %v1290_v8 = vadd.f32 %v1285_v7, %v645_v4 }
 0x19c   : > { %1294 = vst [vmem:[#allocation2 + $0x8] sm:$0xff] %v1290_v8 }
 0x19d   : > { %v1305_v9 = vlaneseq  ;;  %v1303_v11 = vld [vmem:[%s629_s5] sm:$0x3]  ;;  %v1299_v12 = vld [vmem:[#allocation2 + $0x10] sm:$0xff] }
 0x19f   : > { %v1306_v10 = vshrl.u32 %v1305_v9, 7  ;;  %v1300_v15 = vld [vmem:[#allocation2] sm:$0xff] }
 0x1a1   : > { %v1307_v13 = vsub.s32 0, %v1306_v10  ;;  %v1311_v14 = vsub.s32 1, %v1306_v10  ;;  %v1301_v16 = vld [vmem:[#allocation2 + $0x18] sm:$0xff] }
 0x1a3   : > { %v1302_v17 = vld [vmem:[#allocation2 + $0x8] sm:$0xff]  ;;  %v1308_v18 = vrot.slane %v1303_v11, %v1307_v13  ;;  %v1312_v19 = vrot.slane %v1303_v11, %v1311_v14 }
 0x1a5   : > { %v1315_v20 = vadd.f32 %v1308_v18, %v1299_v12  ;;  %v1316_v21 = vadd.f32 %v1312_v19, %v1300_v15  ;;  %v1317_v22 = vadd.f32 %v1308_v18, %v1301_v16  ;;  %v1318_v23 = vadd.f32 %v1312_v19, %v1302_v17 }
 0x1a7   : > { %v1319_v24 = vmax.f32 %v1315_v20, 0.0  ;;  %v1320_v25 = vmax.f32 %v1316_v21, 0.0  ;;  %v1321_v26 = vmax.f32 %v1317_v22, 0.0  ;;  %v1322_v27 = vmax.f32 %v1318_v23, 0.0 }
 0x1a9   : > { %v1609_v28 = vpack.c.bf16 %v1320_v25, %v1319_v24  ;;  %v1610_v29 = vpack.c.bf16 %v1322_v27, %v1321_v26 }
 0x1ab   : > { %1335 = vst [vmem:[%s2237_s25] sm:$0xff] %v1609_v28  ;;  %1336 = vst [vmem:[%s2237_s25 + $0x8] sm:$0xff] %v1610_v29 }
 0x1ac PF: > { %1343 = sbr.rel (!%p2037_p12) target bundleno = 436 (0x1b4), region = 108  ;;  %s1611_s14 = sshll.u32 (%p2037_p12), %s1907_s19, 3 }
 0x1ad   : > { %s1349_s0 = scalar_lea.vmem (%p2037_p12), %s2377_s3, %s1611_s14 }
 0x1b2   : > { %v1380_v30 = vld [vmem:[%s2237_s25] sm:$0xff]  ;;  %v1382_v31 = vld [vmem:[%s2237_s25 + $0x8] sm:$0xff] }
 0x1b3   : > { %1381 = vst [vmem:[%s1349_s0] sm:$0xff] %v1380_v30  ;;  %1383 = vst [vmem:[%s1349_s0 + $0x10] sm:$0xff] %v1382_v31 }
 0x1b4 PF: > { %s13_s22 = sadd.s32 1, %s1919_s22   ;;  %s2387_s25 = sld [smem:[#allocation6_spill]] }
 0x1b5   : > { %p10_p6 = scmp.ge.s32.totalorder %s13_s22, 22   ;;  %s2388_s12 = smov %s1883_s13 }
 0x1b6   : > { %s2389_s13 = smov %s2035_s9  ;;  %s2390_s14 = smov %s1891_s15 }
 0x1b7   : > { %s2391_s15 = smov %s2032_s8  ;;  %s2392_s16 = smov %s1899_s17 }
 0x1b8   : > { %s2393_s17 = smov %s2018_s30  ;;  %s2394_s18 = smov %s1911_s20 }
 0x1b9   : > { %s2395_s19 = smov %s1915_s21  ;;  %s2396_s20 = smov %s2399_s24 }
 0x1ba   : > { %s2397_s21 = smov %s2387_s25  ;;  %12 = sbr.rel (!%p10_p6) target bundleno = 9 (0x9), region = 194 }

// kernel: perceptual_forward.33
= control target key start
LH: loop header
LB: loop body
LE: loop exit
PB: predicated region body
PF: predicated region fallthrough
CT: control target
= control target key end

     0   :  { %s2609_s0 = inlined_call_operand.vmem [shape: bf16[16,4608], index: 0, kind: input, shape index: {}]   ;;  %s2610_s1 = inlined_call_operand.vmem [shape: bf16[4608,512], index: 1, kind: input, shape index: {}]   ;;  %s2611_s2 = inlined_call_operand.vmem [shape: f32[1,512], index: 2, kind: input, shape index: {}]   ;;  %s2612_s3 = inlined_call_operand.vmem [shape: bf16[16,512], index: 3, kind: output, shape index: {}]  }
   0x1   :  { %2614 = sst [smem:[#allocation7_spill]] %s2609_s0 }
   0x2   :  { %2615 = sst [smem:[#allocation8_spill]] %s2610_s1 }
   0x3   :  { %s2129_s12 = smov 0   ;;  %s2131_s13 = smov 0  }
   0x4   :  { %s2133_s14 = smov 0   ;;  %s2135_s15 = smov 0  }
   0x5   :  { %s2137_s16 = smov 0   ;;  %s2139_s17 = smov 0  }
   0x6   :  { %s2141_s18 = smov 0   ;;  %s2143_s19 = smov 0  }
   0x7   :  { %s2145_s20 = smov 0   ;;  %s2147_s21 = smov 0  }
   0x8   :  { %s2149_s22 = smov 0  }
   0x9 LB: > { %s1647_s23 = sadd.s32 4294967295, %s2106_s22   ;;  %s25_s24 = sadd.s32 1, %s2098_s20  ;;  %s2106_s22 = sphi %s2149_s22, %s13_s22   ;;  %s2102_s21 = sphi %s2147_s21, %s2632_s21   ;;  %s2098_s20 = sphi %s2145_s20, %s2631_s20   ;;  %s2094_s19 = sphi %s2143_s19, %s2630_s19   ;;  %s2090_s18 = sphi %s2141_s18, %s2629_s18   ;;  %s2086_s17 = sphi %s2139_s17, %s2628_s17   ;;  %s2082_s16 = sphi %s2137_s16, %s2627_s16   ;;  %s2078_s15 = sphi %s2135_s15, %s2626_s15   ;;  %s2074_s14 = sphi %s2133_s14, %s2625_s14   ;;  %s2070_s13 = sphi %s2131_s13, %s2624_s13   ;;  %s2066_s12 = sphi %s2129_s12, %s2623_s12  }
   0xa   : > { %p26_p0 = scmp.ge.s32.totalorder %s25_s24, 6  ;;  %s28_s25 = sadd.s32 1, %s2102_s21 }
   0xb   : > { %s41_s26 = sadd.s32 1, %s2086_s17  ;;  %p48_p1 = scmp.ne.s32.totalorder %s2086_s17, %s2082_s16 }
   0xc   : > { %s2634_s24 = smov (%p26_p0, %s25_s24), 0  ;;  %s2636_s25 = smov (!%p26_p0, %s28_s25), %s2102_s21 }
   0xd   : > { %s37_s27 = ssub.s32 %s2098_s20, %s2634_s24  ;;  %p49_p2 = scmp.eq.s32.totalorder %s2106_s22, 0 }
   0xe   : > { %p30_p3 = scmp.ge.s32.totalorder %s2636_s25, 2  ;;  %p39_p4 = scmp.eq.s32.totalorder %s37_s27, 0 }
   0xf   : > { %p2196_p5 = por %p49_p2, %p48_p1  ;;  %s69_s29 = sadd.s32 1, %s2078_s15 }
  0x10   : > { %s2638_s25 = smov (%p30_p3, %s2636_s25), 0  ;;  %p76_p6 = scmp.ne.s32.totalorder %s2078_s15, %s2074_s14 }
  0x11   : > { %2617 = sst [smem:[#allocation6_spill]] %s2638_s25  ;;  %s65_s4 = ssub.s32 %s2102_s21, %s2638_s25 }
  0x12   : > { %s2204_s30 = scalar_select %p39_p4, %s2086_s17, %s41_s26  }
  0x13   : > { %s66_s5 = sor.u32 %s65_s4, %s37_s27  ;;  %p121_p7 = scmp.eq.s32.totalorder %s65_s4, 0 }
  0x14   : > { %p67_p8 = scmp.eq.s32.totalorder %s66_s5, 0  ;;  %p2210_p9 = por %p76_p6, %p49_p2 }
  0x15   : > { %s123_s7 = sadd.s32 1, %s2070_s13  ;;  %p133_p10 = scmp.ne.s32.totalorder %s2070_s13, %s2066_s12 }
  0x16   : > { %s2218_s8 = scalar_select %p67_p8, %s2078_s15, %s69_s29  }
  0x17   : > { %s2221_s9 = scalar_select %p121_p7, %s2070_s13, %s123_s7  }
  0x18   : > { %p134_p11 = scmp.eq.s32.totalorder %s1647_s23, 11  ;;  %p1650_p13 = scmp.ge.s32.totalorder %s2106_s22, 12 }
  0x1a   : > { %p2223_p12 = por %p134_p11, %p133_p10  ;;  %156 = sbr.rel (%p1650_p13) target bundleno = 101 (0x65), region = 16 }
  0x1f   : > { %159 = sbr.rel (!%p2196_p5) target bundleno = 43 (0x2b), region = 20  ;;  %s161_s11 = sand.u32 (%p2196_p5), 1, %s2086_s17  }
  0x20   : > { %s1769_s26 = smul.u32 (%p2196_p5), 24, %s2098_s20  ;;  %s2620_s0 = sld [smem:[#allocation7_spill]] (%p2196_p5) }
  0x21   : > { %s1774_s27 = smul.u32 (%p2196_p5), 48, %s161_s11 }
  0x23   : > { %s163_s23 = scalar_lea.vmem (%p2196_p5), [#allocation3], %s1774_s27 }
  0x26   : > { %s169_s5 = scalar_lea.vmem %s2620_s0, %s1769_s26 }
  0x27   : > { %v182_v0 = vld [vmem:[%s169_s5] sm:$0xff]  ;;  %v184_v1 = vld [vmem:[%s169_s5 + $0x8] sm:$0xff]  ;;  %v186_v2 = vld [vmem:[%s169_s5 + $0x10] sm:$0xff] }
  0x28   : > { %183 = vst [vmem:[%s163_s23] sm:$0xff] %v182_v0  ;;  %185 = vst [vmem:[%s163_s23 + $0x8] sm:$0xff] %v184_v1  ;;  %v188_v3 = vld [vmem:[%s169_s5 + $0x90] sm:$0xff]  ;;  %v190_v4 = vld [vmem:[%s169_s5 + $0x98] sm:$0xff] }
  0x29   : > { %187 = vst [vmem:[%s163_s23 + $0x10] sm:$0xff] %v186_v2  ;;  %v192_v5 = vld [vmem:[%s169_s5 + $0xa0] sm:$0xff]  ;;  %189 = vst [vmem:[%s163_s23 + $0x18] sm:$0xff] %v188_v3 }
  0x2a   : > { %191 = vst [vmem:[%s163_s23 + $0x20] sm:$0xff] %v190_v4  ;;  %193 = vst [vmem:[%s163_s23 + $0x28] sm:$0xff] %v192_v5 }
  0x2b PF: > { %199 = sbr.rel (!%p2210_p9) target bundleno = 101 (0x65), region = 43  ;;  %s201_s28 = sand.u32 (%p2210_p9), 1, %s2078_s15  }
  0x2c   : > { %s1775_s7 = smul.u32 (%p2210_p9), 768, %s201_s28  ;;  %s1652_s11 = sshll.u32 (%p2210_p9), %s2102_s21, 1 }
  0x2d   : > { %s1770_s26 = smul.u32 (%p2210_p9), 384, %s2098_s20  ;;  %s2621_s1 = sld [smem:[#allocation8_spill]] (%p2210_p9) }
  0x2e   : > { %s2248_s6 = scalar_lea.vmem (%p2210_p9), [#allocation4], %s1775_s7 }
  0x2f   : > { %s207_s27 = sadd.s32 (%p2210_p9), %s1770_s26, %s1652_s11 }
  0x30   : > { %s1654_s29 = sshll.u32 %s207_s27, 2 }
  0x33   : > { %s2243_s5 = scalar_lea.vmem %s2621_s1, %s1654_s29 }
  0x34   : > { %v428_v6 = vld [vmem:[%s2243_s5] sm:$0xff]  ;;  %v430_v7 = vld [vmem:[%s2243_s5 + $0x10] sm:$0xff] }
  0x35   : > { %v432_v8 = vld [vmem:[%s2243_s5 + $0x20] sm:$0xff]  ;;  %429 = vst [vmem:[%s2248_s6] sm:$0xff] %v428_v6  ;;  %431 = vst [vmem:[%s2248_s6 + $0x8] sm:$0xff] %v430_v7  ;;  %v434_v9 = vld [vmem:[%s2243_s5 + $0x30] sm:$0xff] }
  0x36   : > { %433 = vst [vmem:[%s2248_s6 + $0x10] sm:$0xff] %v432_v8  ;;  %v436_v10 = vld [vmem:[%s2243_s5 + $0x40] sm:$0xff]  ;;  %v438_v11 = vld [vmem:[%s2243_s5 + $0x50] sm:$0xff]  ;;  %435 = vst [vmem:[%s2248_s6 + $0x18] sm:$0xff] %v434_v9 }
  0x37   : > { %437 = vst [vmem:[%s2248_s6 + $0x20] sm:$0xff] %v436_v10  ;;  %439 = vst [vmem:[%s2248_s6 + $0x28] sm:$0xff] %v438_v11  ;;  %v440_v12 = vld [vmem:[%s2243_s5 + $0x60] sm:$0xff]  ;;  %v442_v13 = vld [vmem:[%s2243_s5 + $0x70] sm:$0xff] }
  0x38   : > { %v444_v14 = vld [vmem:[%s2243_s5 + $0x80] sm:$0xff]  ;;  %441 = vst [vmem:[%s2248_s6 + $0x30] sm:$0xff] %v440_v12  ;;  %443 = vst [vmem:[%s2248_s6 + $0x38] sm:$0xff] %v442_v13  ;;  %v446_v15 = vld [vmem:[%s2243_s5 + $0x90] sm:$0xff] }
  0x39   : > { %445 = vst [vmem:[%s2248_s6 + $0x40] sm:$0xff] %v444_v14  ;;  %v448_v16 = vld [vmem:[%s2243_s5 + $0xa0] sm:$0xff]  ;;  %v450_v17 = vld [vmem:[%s2243_s5 + $0xb0] sm:$0xff]  ;;  %447 = vst [vmem:[%s2248_s6 + $0x48] sm:$0xff] %v446_v15 }
  0x3a   : > { %449 = vst [vmem:[%s2248_s6 + $0x50] sm:$0xff] %v448_v16  ;;  %451 = vst [vmem:[%s2248_s6 + $0x58] sm:$0xff] %v450_v17  ;;  %v452_v18 = vld [vmem:[%s2243_s5 + $0xc0] sm:$0xff]  ;;  %v454_v19 = vld [vmem:[%s2243_s5 + $0xd0] sm:$0xff] }
  0x3b   : > { %v456_v20 = vld [vmem:[%s2243_s5 + $0xe0] sm:$0xff]  ;;  %453 = vst [vmem:[%s2248_s6 + $0x60] sm:$0xff] %v452_v18  ;;  %455 = vst [vmem:[%s2248_s6 + $0x68] sm:$0xff] %v454_v19  ;;  %v458_v21 = vld [vmem:[%s2243_s5 + $0xf0] sm:$0xff] }
  0x3c   : > { %457 = vst [vmem:[%s2248_s6 + $0x70] sm:$0xff] %v456_v20  ;;  %v460_v22 = vld [vmem:[%s2243_s5 + $0x100] sm:$0xff]  ;;  %v462_v23 = vld [vmem:[%s2243_s5 + $0x110] sm:$0xff]  ;;  %459 = vst [vmem:[%s2248_s6 + $0x78] sm:$0xff] %v458_v21 }
  0x3d   : > { %461 = vst [vmem:[%s2248_s6 + $0x80] sm:$0xff] %v460_v22  ;;  %463 = vst [vmem:[%s2248_s6 + $0x88] sm:$0xff] %v462_v23  ;;  %v464_v24 = vld [vmem:[%s2243_s5 + $0x120] sm:$0xff]  ;;  %v466_v25 = vld [vmem:[%s2243_s5 + $0x130] sm:$0xff] }
  0x3e   : > { %v468_v26 = vld [vmem:[%s2243_s5 + $0x140] sm:$0xff]  ;;  %465 = vst [vmem:[%s2248_s6 + $0x90] sm:$0xff] %v464_v24  ;;  %467 = vst [vmem:[%s2248_s6 + $0x98] sm:$0xff] %v466_v25  ;;  %v470_v27 = vld [vmem:[%s2243_s5 + $0x150] sm:$0xff] }
  0x3f   : > { %469 = vst [vmem:[%s2248_s6 + $0xa0] sm:$0xff] %v468_v26  ;;  %v472_v28 = vld [vmem:[%s2243_s5 + $0x160] sm:$0xff]  ;;  %v474_v29 = vld [vmem:[%s2243_s5 + $0x170] sm:$0xff]  ;;  %471 = vst [vmem:[%s2248_s6 + $0xa8] sm:$0xff] %v470_v27 }
  0x40   : > { %473 = vst [vmem:[%s2248_s6 + $0xb0] sm:$0xff] %v472_v28  ;;  %475 = vst [vmem:[%s2248_s6 + $0xb8] sm:$0xff] %v474_v29  ;;  %v476_v30 = vld [vmem:[%s2243_s5 + $0x180] sm:$0xff]  ;;  %v478_v31 = vld [vmem:[%s2243_s5 + $0x190] sm:$0xff] }
  0x41   : > { %v480_v32 = vld [vmem:[%s2243_s5 + $0x1a0] sm:$0xff]  ;;  %477 = vst [vmem:[%s2248_s6 + $0xc0] sm:$0xff] %v476_v30  ;;  %479 = vst [vmem:[%s2248_s6 + $0xc8] sm:$0xff] %v478_v31  ;;  %v482_v33 = vld [vmem:[%s2243_s5 + $0x1b0] sm:$0xff] }
  0x42   : > { %481 = vst [vmem:[%s2248_s6 + $0xd0] sm:$0xff] %v480_v32  ;;  %v484_v34 = vld [vmem:[%s2243_s5 + $0x1c0] sm:$0xff]  ;;  %v486_v35 = vld [vmem:[%s2243_s5 + $0x1d0] sm:$0xff]  ;;  %483 = vst [vmem:[%s2248_s6 + $0xd8] sm:$0xff] %v482_v33 }
  0x43   : > { %485 = vst [vmem:[%s2248_s6 + $0xe0] sm:$0xff] %v484_v34  ;;  %487 = vst [vmem:[%s2248_s6 + $0xe8] sm:$0xff] %v486_v35  ;;  %v488_v36 = vld [vmem:[%s2243_s5 + $0x1e0] sm:$0xff]  ;;  %v490_v37 = vld [vmem:[%s2243_s5 + $0x1f0] sm:$0xff] }
  0x44   : > { %v492_v38 = vld [vmem:[%s2243_s5 + $0x200] sm:$0xff]  ;;  %489 = vst [vmem:[%s2248_s6 + $0xf0] sm:$0xff] %v488_v36  ;;  %491 = vst [vmem:[%s2248_s6 + $0xf8] sm:$0xff] %v490_v37  ;;  %v494_v39 = vld [vmem:[%s2243_s5 + $0x210] sm:$0xff] }
  0x45   : > { %493 = vst [vmem:[%s2248_s6 + $0x100] sm:$0xff] %v492_v38  ;;  %v496_v40 = vld [vmem:[%s2243_s5 + $0x220] sm:$0xff]  ;;  %v498_v41 = vld [vmem:[%s2243_s5 + $0x230] sm:$0xff]  ;;  %495 = vst [vmem:[%s2248_s6 + $0x108] sm:$0xff] %v494_v39 }
  0x46   : > { %497 = vst [vmem:[%s2248_s6 + $0x110] sm:$0xff] %v496_v40  ;;  %499 = vst [vmem:[%s2248_s6 + $0x118] sm:$0xff] %v498_v41  ;;  %v500_v42 = vld [vmem:[%s2243_s5 + $0x240] sm:$0xff]  ;;  %v502_v43 = vld [vmem:[%s2243_s5 + $0x250] sm:$0xff] }
  0x47   : > { %v504_v44 = vld [vmem:[%s2243_s5 + $0x260] sm:$0xff]  ;;  %501 = vst [vmem:[%s2248_s6 + $0x120] sm:$0xff] %v500_v42  ;;  %503 = vst [vmem:[%s2248_s6 + $0x128] sm:$0xff] %v502_v43  ;;  %v506_v45 = vld [vmem:[%s2243_s5 + $0x270] sm:$0xff] }
  0x48   : > { %505 = vst [vmem:[%s2248_s6 + $0x130] sm:$0xff] %v504_v44  ;;  %v508_v46 = vld [vmem:[%s2243_s5 + $0x280] sm:$0xff]  ;;  %v510_v47 = vld [vmem:[%s2243_s5 + $0x290] sm:$0xff]  ;;  %507 = vst [vmem:[%s2248_s6 + $0x138] sm:$0xff] %v506_v45 }
  0x49   : > { %509 = vst [vmem:[%s2248_s6 + $0x140] sm:$0xff] %v508_v46  ;;  %511 = vst [vmem:[%s2248_s6 + $0x148] sm:$0xff] %v510_v47  ;;  %v512_v48 = vld [vmem:[%s2243_s5 + $0x2a0] sm:$0xff]  ;;  %v514_v49 = vld [vmem:[%s2243_s5 + $0x2b0] sm:$0xff] }
  0x4a   : > { %v516_v50 = vld [vmem:[%s2243_s5 + $0x2c0] sm:$0xff]  ;;  %513 = vst [vmem:[%s2248_s6 + $0x150] sm:$0xff] %v512_v48  ;;  %515 = vst [vmem:[%s2248_s6 + $0x158] sm:$0xff] %v514_v49  ;;  %v518_v51 = vld [vmem:[%s2243_s5 + $0x2d0] sm:$0xff] }
  0x4b   : > { %517 = vst [vmem:[%s2248_s6 + $0x160] sm:$0xff] %v516_v50  ;;  %v520_v52 = vld [vmem:[%s2243_s5 + $0x2e0] sm:$0xff]  ;;  %v522_v53 = vld [vmem:[%s2243_s5 + $0x2f0] sm:$0xff]  ;;  %519 = vst [vmem:[%s2248_s6 + $0x168] sm:$0xff] %v518_v51 }
  0x4c   : > { %521 = vst [vmem:[%s2248_s6 + $0x170] sm:$0xff] %v520_v52  ;;  %523 = vst [vmem:[%s2248_s6 + $0x178] sm:$0xff] %v522_v53  ;;  %v524_v54 = vld [vmem:[%s2243_s5 + $0x300] sm:$0xff]  ;;  %v526_v55 = vld [vmem:[%s2243_s5 + $0x310] sm:$0xff] }
  0x4d   : > { %v528_v56 = vld [vmem:[%s2243_s5 + $0x320] sm:$0xff]  ;;  %525 = vst [vmem:[%s2248_s6 + $0x180] sm:$0xff] %v524_v54  ;;  %527 = vst [vmem:[%s2248_s6 + $0x188] sm:$0xff] %v526_v55  ;;  %v530_v57 = vld [vmem:[%s2243_s5 + $0x330] sm:$0xff] }
  0x4e   : > { %529 = vst [vmem:[%s2248_s6 + $0x190] sm:$0xff] %v528_v56  ;;  %v532_v58 = vld [vmem:[%s2243_s5 + $0x340] sm:$0xff]  ;;  %v534_v59 = vld [vmem:[%s2243_s5 + $0x350] sm:$0xff]  ;;  %531 = vst [vmem:[%s2248_s6 + $0x198] sm:$0xff] %v530_v57 }
  0x4f   : > { %533 = vst [vmem:[%s2248_s6 + $0x1a0] sm:$0xff] %v532_v58  ;;  %535 = vst [vmem:[%s2248_s6 + $0x1a8] sm:$0xff] %v534_v59  ;;  %v536_v60 = vld [vmem:[%s2243_s5 + $0x360] sm:$0xff]  ;;  %v538_v61 = vld [vmem:[%s2243_s5 + $0x370] sm:$0xff] }
  0x50   : > { %v540_v62 = vld [vmem:[%s2243_s5 + $0x380] sm:$0xff]  ;;  %537 = vst [vmem:[%s2248_s6 + $0x1b0] sm:$0xff] %v536_v60  ;;  %539 = vst [vmem:[%s2248_s6 + $0x1b8] sm:$0xff] %v538_v61  ;;  %v542_v63 = vld [vmem:[%s2243_s5 + $0x390] sm:$0xff] }
  0x51   : > { %541 = vst [vmem:[%s2248_s6 + $0x1c0] sm:$0xff] %v540_v62  ;;  %v544_v0 = vld [vmem:[%s2243_s5 + $0x3a0] sm:$0xff]  ;;  %v546_v1 = vld [vmem:[%s2243_s5 + $0x3b0] sm:$0xff]  ;;  %543 = vst [vmem:[%s2248_s6 + $0x1c8] sm:$0xff] %v542_v63 }
  0x52   : > { %545 = vst [vmem:[%s2248_s6 + $0x1d0] sm:$0xff] %v544_v0  ;;  %547 = vst [vmem:[%s2248_s6 + $0x1d8] sm:$0xff] %v546_v1  ;;  %v548_v2 = vld [vmem:[%s2243_s5 + $0x3c0] sm:$0xff]  ;;  %v550_v3 = vld [vmem:[%s2243_s5 + $0x3d0] sm:$0xff] }
  0x53   : > { %v552_v4 = vld [vmem:[%s2243_s5 + $0x3e0] sm:$0xff]  ;;  %549 = vst [vmem:[%s2248_s6 + $0x1e0] sm:$0xff] %v548_v2  ;;  %551 = vst [vmem:[%s2248_s6 + $0x1e8] sm:$0xff] %v550_v3  ;;  %v554_v5 = vld [vmem:[%s2243_s5 + $0x3f0] sm:$0xff] }
  0x54   : > { %553 = vst [vmem:[%s2248_s6 + $0x1f0] sm:$0xff] %v552_v4  ;;  %v556_v6 = vld [vmem:[%s2243_s5 + $0x400] sm:$0xff]  ;;  %v558_v7 = vld [vmem:[%s2243_s5 + $0x410] sm:$0xff]  ;;  %555 = vst [vmem:[%s2248_s6 + $0x1f8] sm:$0xff] %v554_v5 }
  0x55   : > { %557 = vst [vmem:[%s2248_s6 + $0x200] sm:$0xff] %v556_v6  ;;  %559 = vst [vmem:[%s2248_s6 + $0x208] sm:$0xff] %v558_v7  ;;  %v560_v8 = vld [vmem:[%s2243_s5 + $0x420] sm:$0xff]  ;;  %v562_v9 = vld [vmem:[%s2243_s5 + $0x430] sm:$0xff] }
  0x56   : > { %v564_v10 = vld [vmem:[%s2243_s5 + $0x440] sm:$0xff]  ;;  %561 = vst [vmem:[%s2248_s6 + $0x210] sm:$0xff] %v560_v8  ;;  %563 = vst [vmem:[%s2248_s6 + $0x218] sm:$0xff] %v562_v9  ;;  %v566_v11 = vld [vmem:[%s2243_s5 + $0x450] sm:$0xff] }
  0x57   : > { %565 = vst [vmem:[%s2248_s6 + $0x220] sm:$0xff] %v564_v10  ;;  %v568_v12 = vld [vmem:[%s2243_s5 + $0x460] sm:$0xff]  ;;  %v570_v13 = vld [vmem:[%s2243_s5 + $0x470] sm:$0xff]  ;;  %567 = vst [vmem:[%s2248_s6 + $0x228] sm:$0xff] %v566_v11 }
  0x58   : > { %569 = vst [vmem:[%s2248_s6 + $0x230] sm:$0xff] %v568_v12  ;;  %571 = vst [vmem:[%s2248_s6 + $0x238] sm:$0xff] %v570_v13  ;;  %v572_v14 = vld [vmem:[%s2243_s5 + $0x480] sm:$0xff]  ;;  %v574_v15 = vld [vmem:[%s2243_s5 + $0x490] sm:$0xff] }
  0x59   : > { %v576_v16 = vld [vmem:[%s2243_s5 + $0x4a0] sm:$0xff]  ;;  %573 = vst [vmem:[%s2248_s6 + $0x240] sm:$0xff] %v572_v14  ;;  %575 = vst [vmem:[%s2248_s6 + $0x248] sm:$0xff] %v574_v15  ;;  %v578_v17 = vld [vmem:[%s2243_s5 + $0x4b0] sm:$0xff] }
  0x5a   : > { %577 = vst [vmem:[%s2248_s6 + $0x250] sm:$0xff] %v576_v16  ;;  %v580_v18 = vld [vmem:[%s2243_s5 + $0x4c0] sm:$0xff]  ;;  %v582_v19 = vld [vmem:[%s2243_s5 + $0x4d0] sm:$0xff]  ;;  %579 = vst [vmem:[%s2248_s6 + $0x258] sm:$0xff] %v578_v17 }
  0x5b   : > { %581 = vst [vmem:[%s2248_s6 + $0x260] sm:$0xff] %v580_v18  ;;  %583 = vst [vmem:[%s2248_s6 + $0x268] sm:$0xff] %v582_v19  ;;  %v584_v20 = vld [vmem:[%s2243_s5 + $0x4e0] sm:$0xff]  ;;  %v586_v21 = vld [vmem:[%s2243_s5 + $0x4f0] sm:$0xff] }
  0x5c   : > { %v588_v22 = vld [vmem:[%s2243_s5 + $0x500] sm:$0xff]  ;;  %585 = vst [vmem:[%s2248_s6 + $0x270] sm:$0xff] %v584_v20  ;;  %587 = vst [vmem:[%s2248_s6 + $0x278] sm:$0xff] %v586_v21  ;;  %v590_v23 = vld [vmem:[%s2243_s5 + $0x510] sm:$0xff] }
  0x5d   : > { %589 = vst [vmem:[%s2248_s6 + $0x280] sm:$0xff] %v588_v22  ;;  %v592_v24 = vld [vmem:[%s2243_s5 + $0x520] sm:$0xff]  ;;  %v594_v25 = vld [vmem:[%s2243_s5 + $0x530] sm:$0xff]  ;;  %591 = vst [vmem:[%s2248_s6 + $0x288] sm:$0xff] %v590_v23 }
  0x5e   : > { %593 = vst [vmem:[%s2248_s6 + $0x290] sm:$0xff] %v592_v24  ;;  %595 = vst [vmem:[%s2248_s6 + $0x298] sm:$0xff] %v594_v25  ;;  %v596_v26 = vld [vmem:[%s2243_s5 + $0x540] sm:$0xff]  ;;  %v598_v27 = vld [vmem:[%s2243_s5 + $0x550] sm:$0xff] }
  0x5f   : > { %v600_v28 = vld [vmem:[%s2243_s5 + $0x560] sm:$0xff]  ;;  %597 = vst [vmem:[%s2248_s6 + $0x2a0] sm:$0xff] %v596_v26  ;;  %599 = vst [vmem:[%s2248_s6 + $0x2a8] sm:$0xff] %v598_v27  ;;  %v602_v29 = vld [vmem:[%s2243_s5 + $0x570] sm:$0xff] }
  0x60   : > { %601 = vst [vmem:[%s2248_s6 + $0x2b0] sm:$0xff] %v600_v28  ;;  %v604_v30 = vld [vmem:[%s2243_s5 + $0x580] sm:$0xff]  ;;  %v606_v31 = vld [vmem:[%s2243_s5 + $0x590] sm:$0xff]  ;;  %603 = vst [vmem:[%s2248_s6 + $0x2b8] sm:$0xff] %v602_v29 }
  0x61   : > { %605 = vst [vmem:[%s2248_s6 + $0x2c0] sm:$0xff] %v604_v30  ;;  %607 = vst [vmem:[%s2248_s6 + $0x2c8] sm:$0xff] %v606_v31  ;;  %v608_v32 = vld [vmem:[%s2243_s5 + $0x5a0] sm:$0xff]  ;;  %v610_v33 = vld [vmem:[%s2243_s5 + $0x5b0] sm:$0xff] }
  0x62   : > { %v612_v34 = vld [vmem:[%s2243_s5 + $0x5c0] sm:$0xff]  ;;  %609 = vst [vmem:[%s2248_s6 + $0x2d0] sm:$0xff] %v608_v32  ;;  %611 = vst [vmem:[%s2248_s6 + $0x2d8] sm:$0xff] %v610_v33  ;;  %v614_v35 = vld [vmem:[%s2243_s5 + $0x5d0] sm:$0xff] }
  0x63   : > { %613 = vst [vmem:[%s2248_s6 + $0x2e0] sm:$0xff] %v612_v34  ;;  %v616_v36 = vld [vmem:[%s2243_s5 + $0x5e0] sm:$0xff]  ;;  %v618_v37 = vld [vmem:[%s2243_s5 + $0x5f0] sm:$0xff]  ;;  %615 = vst [vmem:[%s2248_s6 + $0x2e8] sm:$0xff] %v614_v35 }
  0x64   : > { %617 = vst [vmem:[%s2248_s6 + $0x2f0] sm:$0xff] %v616_v36  ;;  %619 = vst [vmem:[%s2248_s6 + $0x2f8] sm:$0xff] %v618_v37 }
  0x65 PF: > { %p1655_p0 = scmp.ge.s32.totalorder %s2106_s22, 1  ;;  %p632_p1 = scmp.lt.s32.totalorder %s2106_s22, 13 }
  0x67   : > { %p633_p2 = pnand %p1655_p0, %p632_p1 }
  0x68   : > { %s639_s0 = sand.u32 (!%p633_p2), 1, %s2082_s16   ;;  %s646_s23 = sand.u32 (!%p633_p2), 1, %s2074_s14  }
  0x69   : > { %636 = sbr.rel (%p633_p2) target bundleno = 476 (0x1dc), region = 85  ;;  %s673_s7 = sand.u32 (!%p633_p2), 1, %s2066_s12  }
  0x6a   : > { %s1776_s28 = smul.u32 (!%p633_p2), 48, %s639_s0  ;;  %s1656_s26 = sshll.u32 (!%p633_p2), %s673_s7, 4 }
  0x6b   : > { %s1777_s11 = smul.u32 (!%p633_p2), 768, %s646_s23  ;;  %s1657_s27 = sshll.u32 (!%p633_p2), %s2094_s19, 1 }
  0x6c   : > { %p681_p3 = scmp.lt.s32.totalorder (!%p633_p2), %s1657_s27, 3  ;;  %s2451_s6 = scalar_lea.vmem (!%p633_p2), [#allocation3], %s1776_s28 }
  0x6d   : > { %s2453_s1 = scalar_lea.vmem (!%p633_p2), [#allocation4], %s1777_s11  ;;  %s2455_s25 = scalar_lea.vmem (!%p633_p2), [#allocation5], %s1656_s26 }
  0x6e   : > { %s2640_s27 = smov (!%p681_p3, %s1657_s27), 3  ;;  %p1658_p4 = scmp.ne.s32.totalorder %s2090_s18, 0 }
  0x6f   : > { %s683_s5 = scalar_lea.vmem %s2611_s2, %s2640_s27 }
  0x70   : > { %690 = sbr.rel (%p1658_p4) target bundleno = 120 (0x78), region = 97 }
  0x75   : > { %v2108_v38 = vmov 0.0  }
  0x76   : > { %691 = vst [vmem:[#allocation2 + $0x10] sm:$0xff] %v2108_v38  ;;  %692 = vst [vmem:[#allocation2] sm:$0xff] %v2108_v38 }
  0x77   : > { %693 = vst [vmem:[#allocation2 + $0x18] sm:$0xff] %v2108_v38  ;;  %694 = vst [vmem:[#allocation2 + $0x8] sm:$0xff] %v2108_v38 }
  0x78 PF: > { %v1867_v39 = vld [vmem:[%s2453_s1 + $0x74] ss:$8 sps:$4 sm:$0xff]   ;;  %v1871_v41 = vld [vmem:[%s2453_s1 + $0x70] ss:$8 sps:$4 sm:$0xff]   ;;  %v1873_v43 = vld [vmem:[%s2453_s1 + $0x64] ss:$8 sps:$4 sm:$0xff]  }
  0x79   : > { %v1869_v40 = vld [vmem:[%s2453_s1 + $0x174] ss:$8 sps:$4 sm:$0xff]   ;;  %1311 = vmatprep.subr.bf16.mxu0 %v1867_v39  ;;  %v1872_v42 = vld [vmem:[%s2453_s1 + $0x170] ss:$8 sps:$4 sm:$0xff]   ;;  %v1875_v44 = vld [vmem:[%s2453_s1 + $0x164] ss:$8 sps:$4 sm:$0xff]  }
  0x7a   : > { %1354 = vmatprep.subr.bf16.mxu1 %v1869_v40  ;;  %1312 = vmatpush1.bf16.msra.mxu0 %v1871_v41  ;;  %v1877_v45 = vld [vmem:[%s2453_s1 + $0x60] ss:$8 sps:$4 sm:$0xff]   ;;  %v1879_v47 = vld [vmem:[%s2453_s1 + $0x54] ss:$8 sps:$4 sm:$0xff]   ;;  %v1883_v49 = vld [vmem:[%s2453_s1 + $0x50] ss:$8 sps:$4 sm:$0xff]  }
  0x7b   : > { %1355 = vmatpush1.bf16.msra.mxu1 %v1872_v42  ;;  %1313 = vmatprep.subr.bf16.mxu0 %v1873_v43  ;;  %v1878_v46 = vld [vmem:[%s2453_s1 + $0x160] ss:$8 sps:$4 sm:$0xff]   ;;  %v1881_v48 = vld [vmem:[%s2453_s1 + $0x154] ss:$8 sps:$4 sm:$0xff]   ;;  %v1884_v50 = vld [vmem:[%s2453_s1 + $0x150] ss:$8 sps:$4 sm:$0xff]  }
  0x7c   : > { %1356 = vmatprep.subr.bf16.mxu1 %v1875_v44  ;;  %v1885_v51 = vld [vmem:[%s2453_s1 + $0x44] ss:$8 sps:$4 sm:$0xff]   ;;  %v1889_v53 = vld [vmem:[%s2453_s1 + $0x40] ss:$8 sps:$4 sm:$0xff]   ;;  %v1891_v55 = vld [vmem:[%s2453_s1 + $0x34] ss:$8 sps:$4 sm:$0xff]  }
  0x7d   : > { %v1887_v52 = vld [vmem:[%s2453_s1 + $0x144] ss:$8 sps:$4 sm:$0xff]   ;;  %v1890_v54 = vld [vmem:[%s2453_s1 + $0x140] ss:$8 sps:$4 sm:$0xff]   ;;  %v1893_v56 = vld [vmem:[%s2453_s1 + $0x134] ss:$8 sps:$4 sm:$0xff]  }
  0x7e   : > { %1314 = vmatpush1.bf16.msra.mxu0 %v1877_v45  ;;  %v1895_v57 = vld [vmem:[%s2453_s1 + $0x30] ss:$8 sps:$4 sm:$0xff]   ;;  %v1897_v59 = vld [vmem:[%s2453_s1 + $0x24] ss:$8 sps:$4 sm:$0xff]   ;;  %v1901_v61 = vld [vmem:[%s2453_s1 + $0x20] ss:$8 sps:$4 sm:$0xff]  }
  0x7f   : > { %1357 = vmatpush1.bf16.msra.mxu1 %v1878_v46  ;;  %1315 = vmatprep.subr.bf16.mxu0 %v1879_v47  ;;  %v1896_v58 = vld [vmem:[%s2453_s1 + $0x130] ss:$8 sps:$4 sm:$0xff]   ;;  %v1899_v60 = vld [vmem:[%s2453_s1 + $0x124] ss:$8 sps:$4 sm:$0xff]   ;;  %v1902_v62 = vld [vmem:[%s2453_s1 + $0x120] ss:$8 sps:$4 sm:$0xff]  }
  0x80   : > { %1358 = vmatprep.subr.bf16.mxu1 %v1881_v48  ;;  %v1903_v63 = vld [vmem:[%s2453_s1 + $0x14] ss:$8 sps:$4 sm:$0xff]   ;;  %v1907_v1 = vld [vmem:[%s2453_s1 + $0x10] ss:$8 sps:$4 sm:$0xff]   ;;  %v1909_v3 = vld [vmem:[%s2453_s1 + $0x4] ss:$8 sps:$4 sm:$0xff]  }
  0x81   : > { %v1905_v0 = vld [vmem:[%s2453_s1 + $0x114] ss:$8 sps:$4 sm:$0xff]   ;;  %v1908_v2 = vld [vmem:[%s2453_s1 + $0x110] ss:$8 sps:$4 sm:$0xff]   ;;  %v1911_v4 = vld [vmem:[%s2453_s1 + $0x104] ss:$8 sps:$4 sm:$0xff]  }
  0x82   : > { %1316 = vmatpush1.bf16.msra.mxu0 %v1883_v49  ;;  %v1913_v5 = vld [vmem:[%s2453_s1] ss:$8 sps:$4 sm:$0xff]   ;;  %v1915_v7 = vld [vmem:[%s2453_s1 + $0xf4] ss:$8 sps:$4 sm:$0xff]   ;;  %v1919_v9 = vld [vmem:[%s2453_s1 + $0xf0] ss:$8 sps:$4 sm:$0xff]  }
  0x83   : > { %1359 = vmatpush1.bf16.msra.mxu1 %v1884_v50  ;;  %1317 = vmatprep.subr.bf16.mxu0 %v1885_v51  ;;  %v1914_v6 = vld [vmem:[%s2453_s1 + $0x100] ss:$8 sps:$4 sm:$0xff]   ;;  %v1917_v8 = vld [vmem:[%s2453_s1 + $0x1f4] ss:$8 sps:$4 sm:$0xff]   ;;  %v1920_v10 = vld [vmem:[%s2453_s1 + $0x1f0] ss:$8 sps:$4 sm:$0xff]  }
  0x84   : > { %1360 = vmatprep.subr.bf16.mxu1 %v1887_v52  ;;  %v1921_v11 = vld [vmem:[%s2453_s1 + $0xe4] ss:$8 sps:$4 sm:$0xff]   ;;  %v1925_v13 = vld [vmem:[%s2453_s1 + $0xe0] ss:$8 sps:$4 sm:$0xff]   ;;  %v1927_v15 = vld [vmem:[%s2453_s1 + $0xd4] ss:$8 sps:$4 sm:$0xff]  }
  0x85   : > { %v1923_v12 = vld [vmem:[%s2453_s1 + $0x1e4] ss:$8 sps:$4 sm:$0xff]   ;;  %v1926_v14 = vld [vmem:[%s2453_s1 + $0x1e0] ss:$8 sps:$4 sm:$0xff]   ;;  %v1929_v16 = vld [vmem:[%s2453_s1 + $0x1d4] ss:$8 sps:$4 sm:$0xff]  }
  0x86   : > { %1318 = vmatpush1.bf16.msra.mxu0 %v1889_v53  ;;  %v1931_v17 = vld [vmem:[%s2453_s1 + $0xd0] ss:$8 sps:$4 sm:$0xff]   ;;  %v1933_v19 = vld [vmem:[%s2453_s1 + $0xc4] ss:$8 sps:$4 sm:$0xff]   ;;  %v1937_v21 = vld [vmem:[%s2453_s1 + $0xc0] ss:$8 sps:$4 sm:$0xff]  }
  0x87   : > { %1361 = vmatpush1.bf16.msra.mxu1 %v1890_v54  ;;  %1319 = vmatprep.subr.bf16.mxu0 %v1891_v55  ;;  %v1932_v18 = vld [vmem:[%s2453_s1 + $0x1d0] ss:$8 sps:$4 sm:$0xff]   ;;  %v1935_v20 = vld [vmem:[%s2453_s1 + $0x1c4] ss:$8 sps:$4 sm:$0xff]   ;;  %v1938_v22 = vld [vmem:[%s2453_s1 + $0x1c0] ss:$8 sps:$4 sm:$0xff]  }
  0x88   : > { %1362 = vmatprep.subr.bf16.mxu1 %v1893_v56  ;;  %v1939_v23 = vld [vmem:[%s2453_s1 + $0xb4] ss:$8 sps:$4 sm:$0xff]   ;;  %v1943_v27 = vld [vmem:[%s2453_s1 + $0xb0] ss:$8 sps:$4 sm:$0xff]   ;;  %v1945_v29 = vld [vmem:[%s2453_s1 + $0xa4] ss:$8 sps:$4 sm:$0xff]  }
  0x89   : > { %v1965_v24 = vld [vmem:[%s2451_s6 + $0x4] ss:$24 sps:$4 sm:$0xff]   ;;  %v1944_v28 = vld [vmem:[%s2453_s1 + $0x1b0] ss:$8 sps:$4 sm:$0xff]   ;;  %v1949_v31 = vld [vmem:[%s2453_s1 + $0xa0] ss:$8 sps:$4 sm:$0xff]  }
  0x8a   : > { %1320 = vmatpush1.bf16.msra.mxu0 %v1895_v57  ;;  %v1941_v25 = vld [vmem:[%s2453_s1 + $0x1b4] ss:$8 sps:$4 sm:$0xff]   ;;  %1343 = vmatprep.mubr.bf16.mxu0 %v1965_v24  ;;  %v1947_v30 = vld [vmem:[%s2453_s1 + $0x1a4] ss:$8 sps:$4 sm:$0xff]   ;;  %v1950_v32 = vld [vmem:[%s2453_s1 + $0x1a0] ss:$8 sps:$4 sm:$0xff]  }
  0x8b   : > { %1363 = vmatpush1.bf16.msra.mxu1 %v1896_v58  ;;  %1321 = vmatprep.subr.bf16.mxu0 %v1897_v59  ;;  %v1968_v26 = vld [vmem:[%s2451_s6 + $0xc] ss:$24 sps:$4 sm:$0xff]   ;;  %v1955_v35 = vld [vmem:[%s2453_s1 + $0x90] ss:$8 sps:$4 sm:$0xff]   ;;  %v1961_v39 = vld [vmem:[%s2453_s1 + $0x80] ss:$8 sps:$4 sm:$0xff]  }
  0x8c   : > { %1364 = vmatprep.subr.bf16.mxu1 %v1899_v60  ;;  %1386 = vmatprep.mubr.bf16.mxu1 %v1968_v26  ;;  %v1951_v33 = vld [vmem:[%s2453_s1 + $0x94] ss:$8 sps:$4 sm:$0xff]   ;;  %v1956_v36 = vld [vmem:[%s2453_s1 + $0x190] ss:$8 sps:$4 sm:$0xff]   ;;  %v1957_v37 = vld [vmem:[%s2453_s1 + $0x84] ss:$8 sps:$4 sm:$0xff]  }
  0x8d   : > { %v1953_v34 = vld [vmem:[%s2453_s1 + $0x194] ss:$8 sps:$4 sm:$0xff]   ;;  %v1959_v38 = vld [vmem:[%s2453_s1 + $0x184] ss:$8 sps:$4 sm:$0xff]   ;;  %v1962_v40 = vld [vmem:[%s2453_s1 + $0x180] ss:$8 sps:$4 sm:$0xff]  }
  0x8e   : > { %1322 = vmatpush1.bf16.msra.mxu0 %v1901_v61  ;;  %v1971_v41 = vld [vmem:[%s2453_s1 + $0x274] ss:$8 sps:$4 sm:$0xff]   ;;  %v1963_v42 = vld [vmem:[%s2451_s6] ss:$24 sps:$4 sm:$0xff]   ;;  %v1974_v45 = vld [vmem:[%s2453_s1 + $0x264] ss:$8 sps:$4 sm:$0xff]  }
  0x8f   : > { %1365 = vmatpush1.bf16.msra.mxu1 %v1902_v62  ;;  %1323 = vmatprep.subr.bf16.mxu0 %v1903_v63  ;;  %v1966_v43 = vld [vmem:[%s2451_s6 + $0x8] ss:$24 sps:$4 sm:$0xff]   ;;  %v2019_v46 = vld [vmem:[%s2451_s6 + $0x14] ss:$24 sps:$4 sm:$0xff]   ;;  %p1761_p5 = scmp.ne.s32.totalorder %s2090_s18, 5 }
  0x90   : > { %1366 = vmatprep.subr.bf16.mxu1 %v1905_v0  ;;  %v1969_v44 = vld [vmem:[%s2453_s1 + $0x270] ss:$8 sps:$4 sm:$0xff]   ;;  %v1972_v47 = vld [vmem:[%s2453_s1 + $0x260] ss:$8 sps:$4 sm:$0xff]   ;;  %v1977_v48 = vld [vmem:[%s2453_s1 + $0x254] ss:$8 sps:$4 sm:$0xff]  }
  0x91   : > { %v1975_v49 = vld [vmem:[%s2453_s1 + $0x250] ss:$8 sps:$4 sm:$0xff]   ;;  %v1980_v50 = vld [vmem:[%s2453_s1 + $0x244] ss:$8 sps:$4 sm:$0xff]   ;;  %v1978_v51 = vld [vmem:[%s2453_s1 + $0x240] ss:$8 sps:$4 sm:$0xff]  }
  0x92   : > { %1324 = vmatpush1.bf16.msra.mxu0 %v1907_v1  ;;  %v1983_v52 = vld [vmem:[%s2453_s1 + $0x234] ss:$8 sps:$4 sm:$0xff]   ;;  %v1981_v53 = vld [vmem:[%s2453_s1 + $0x230] ss:$8 sps:$4 sm:$0xff]   ;;  %v1986_v54 = vld [vmem:[%s2453_s1 + $0x224] ss:$8 sps:$4 sm:$0xff]  }
  0x93   : > { %1367 = vmatpush1.bf16.msra.mxu1 %v1908_v2  ;;  %1325 = vmatprep.subr.bf16.mxu0 %v1909_v3  ;;  %v1984_v55 = vld [vmem:[%s2453_s1 + $0x220] ss:$8 sps:$4 sm:$0xff]   ;;  %v1989_v56 = vld [vmem:[%s2453_s1 + $0x214] ss:$8 sps:$4 sm:$0xff]   ;;  %v1987_v57 = vld [vmem:[%s2453_s1 + $0x210] ss:$8 sps:$4 sm:$0xff]  }
  0x94   : > { %1368 = vmatprep.subr.bf16.mxu1 %v1911_v4  ;;  %v1992_v58 = vld [vmem:[%s2453_s1 + $0x204] ss:$8 sps:$4 sm:$0xff]   ;;  %v1990_v59 = vld [vmem:[%s2453_s1 + $0x200] ss:$8 sps:$4 sm:$0xff]   ;;  %v1995_v60 = vld [vmem:[%s2453_s1 + $0x2f4] ss:$8 sps:$4 sm:$0xff]  }
  0x95   : > { %v1993_v61 = vld [vmem:[%s2453_s1 + $0x2f0] ss:$8 sps:$4 sm:$0xff]   ;;  %v1998_v62 = vld [vmem:[%s2453_s1 + $0x2e4] ss:$8 sps:$4 sm:$0xff]   ;;  %v1996_v63 = vld [vmem:[%s2453_s1 + $0x2e0] ss:$8 sps:$4 sm:$0xff]  }
  0x96   : > { %1326 = vmatpush1.bf16.msra.mxu0 %v1913_v5  ;;  %v2001_v0 = vld [vmem:[%s2453_s1 + $0x2d4] ss:$8 sps:$4 sm:$0xff]   ;;  %v1999_v1 = vld [vmem:[%s2453_s1 + $0x2d0] ss:$8 sps:$4 sm:$0xff]   ;;  %v2004_v2 = vld [vmem:[%s2453_s1 + $0x2c4] ss:$8 sps:$4 sm:$0xff]  }
  0x97   : > { %1369 = vmatpush1.bf16.msra.mxu1 %v1914_v6  ;;  %1327 = vmatprep.subr.bf16.mxu0 %v1915_v7  ;;  %v2002_v3 = vld [vmem:[%s2453_s1 + $0x2c0] ss:$8 sps:$4 sm:$0xff]   ;;  %v2007_v4 = vld [vmem:[%s2453_s1 + $0x2b4] ss:$8 sps:$4 sm:$0xff]   ;;  %v2005_v5 = vld [vmem:[%s2453_s1 + $0x2b0] ss:$8 sps:$4 sm:$0xff]  }
  0x98   : > { %1370 = vmatprep.subr.bf16.mxu1 %v1917_v8  ;;  %v2010_v6 = vld [vmem:[%s2453_s1 + $0x2a4] ss:$8 sps:$4 sm:$0xff]   ;;  %v2008_v7 = vld [vmem:[%s2453_s1 + $0x2a0] ss:$8 sps:$4 sm:$0xff]   ;;  %v2013_v8 = vld [vmem:[%s2453_s1 + $0x294] ss:$8 sps:$4 sm:$0xff]  }
  0x99   : > { %v696_v26 = vld [vmem:[#allocation2] sm:$0xff] }
  0x9a   : > { %1328 = vmatpush2.bf16.msra.mxu0 %v1919_v9  ;;  %v2011_v9 = vld [vmem:[%s2453_s1 + $0x290] ss:$8 sps:$4 sm:$0xff]  }
  0x9b   : > { %1371 = vmatpush2.bf16.msra.mxu1 %v1920_v10  ;;  %1329 = vmatprep.subr.bf16.mxu0 %v1921_v11  ;;  %v2016_v10 = vld [vmem:[%s2453_s1 + $0x284] ss:$8 sps:$4 sm:$0xff]   ;;  %v2014_v11 = vld [vmem:[%s2453_s1 + $0x280] ss:$8 sps:$4 sm:$0xff]  }
  0x9c   : > { %1372 = vmatprep.subr.bf16.mxu1 %v1923_v12  ;;  %v2017_v12 = vld [vmem:[%s2451_s6 + $0x10] ss:$24 sps:$4 sm:$0xff]  }
  0x9e   : > { %1330 = vmatpush2.bf16.msra.mxu0 %v1925_v13 }
  0x9f   : > { %1373 = vmatpush2.bf16.msra.mxu1 %v1926_v14  ;;  %1331 = vmatprep.subr.bf16.mxu0 %v1927_v15 }
  0xa0   : > { %1374 = vmatprep.subr.bf16.mxu1 %v1929_v16 }
  0xa2   : > { %1332 = vmatpush2.bf16.msra.mxu0 %v1931_v17 }
  0xa3   : > { %1375 = vmatpush2.bf16.msra.mxu1 %v1932_v18  ;;  %1333 = vmatprep.subr.bf16.mxu0 %v1933_v19 }
  0xa4   : > { %1376 = vmatprep.subr.bf16.mxu1 %v1935_v20 }
  0xa6   : > { %1334 = vmatpush2.bf16.msra.mxu0 %v1937_v21  ;;  %v695_v21 = vld [vmem:[#allocation2 + $0x10] sm:$0xff] }
  0xa7   : > { %1377 = vmatpush2.bf16.msra.mxu1 %v1938_v22  ;;  %1335 = vmatprep.subr.bf16.mxu0 %v1939_v23 }
  0xa8   : > { %1378 = vmatprep.subr.bf16.mxu1 %v1941_v25 }
  0xaa   : > { %1336 = vmatpush2.bf16.msra.mxu0 %v1943_v27 }
  0xab   : > { %1379 = vmatpush2.bf16.msra.mxu1 %v1944_v28  ;;  %1337 = vmatprep.subr.bf16.mxu0 %v1945_v29 }
  0xac   : > { %1380 = vmatprep.subr.bf16.mxu1 %v1947_v30 }
  0xae   : > { %1338 = vmatpush2.bf16.msra.mxu0 %v1949_v31  ;;  %v697_v31 = vld [vmem:[#allocation2 + $0x18] sm:$0xff] }
  0xaf   : > { %1381 = vmatpush2.bf16.msra.mxu1 %v1950_v32  ;;  %1339 = vmatprep.subr.bf16.mxu0 %v1951_v33 }
  0xb0   : > { %1382 = vmatprep.subr.bf16.mxu1 %v1953_v34 }
  0xb2   : > { %1340 = vmatpush2.bf16.msra.mxu0 %v1955_v35 }
  0xb3   : > { %1383 = vmatpush2.bf16.msra.mxu1 %v1956_v36  ;;  %1341 = vmatprep.subr.bf16.mxu0 %v1957_v37  ;;  %v698_v36 = vld [vmem:[#allocation2 + $0x8] sm:$0xff] }
  0xb4   : > { %1384 = vmatprep.subr.bf16.mxu1 %v1959_v38 }
  0xb6   : > { %1342 = vmatpush2.bf16.msra.mxu0 %v1961_v39 }
  0xb7   : > { %1385 = vmatpush2.bf16.msra.mxu1 %v1962_v40  ;;  %1397 = vmatprep.subr.bf16.mxu0 %v1971_v41 }
  0xb9   : > { %1344 = vmatmul.mubr.bf16.vlgmr.msra.gmra.mxu0 %v1963_v42 }
  0xba   : > { %1387 = vmatmul.mubr.bf16.vlgmr.msra.gmra.mxu1 %v1966_v43  ;;  %1398 = vmatpush1.bf16.msra.mxu0 %v1969_v44 }
  0xbb   : > { %1399 = vmatprep.subr.bf16.mxu0 %v1974_v45  ;;  %1429 = vmatprep.mubr.bf16.mxu0 %v2019_v46 }
  0xbe   : > { %1400 = vmatpush1.bf16.msra.mxu0 %v1972_v47 }
  0xbf   : > { %1401 = vmatprep.subr.bf16.mxu0 %v1977_v48 }
  0xc2   : > { %1402 = vmatpush1.bf16.msra.mxu0 %v1975_v49 }
  0xc3   : > { %1403 = vmatprep.subr.bf16.mxu0 %v1980_v50 }
  0xc6   : > { %1404 = vmatpush1.bf16.msra.mxu0 %v1978_v51 }
  0xc7   : > { %1405 = vmatprep.subr.bf16.mxu0 %v1983_v52 }
  0xca   : > { %1406 = vmatpush1.bf16.msra.mxu0 %v1981_v53 }
  0xcb   : > { %1407 = vmatprep.subr.bf16.mxu0 %v1986_v54 }
  0xce   : > { %1408 = vmatpush1.bf16.msra.mxu0 %v1984_v55 }
  0xcf   : > { %1409 = vmatprep.subr.bf16.mxu0 %v1989_v56 }
  0xd2   : > { %1410 = vmatpush1.bf16.msra.mxu0 %v1987_v57 }
  0xd3   : > { %1411 = vmatprep.subr.bf16.mxu0 %v1992_v58 }
  0xd6   : > { %1412 = vmatpush1.bf16.msra.mxu0 %v1990_v59 }
  0xd7   : > { %1413 = vmatprep.subr.bf16.mxu0 %v1995_v60 }
  0xda   : > { %1414 = vmatpush2.bf16.msra.mxu0 %v1993_v61 }
  0xdb   : > { %1415 = vmatprep.subr.bf16.mxu0 %v1998_v62 }
  0xde   : > { %1416 = vmatpush2.bf16.msra.mxu0 %v1996_v63 }
  0xdf   : > { %1417 = vmatprep.subr.bf16.mxu0 %v2001_v0 }
  0xe2   : > { %1418 = vmatpush2.bf16.msra.mxu0 %v1999_v1 }
  0xe3   : > { %1419 = vmatprep.subr.bf16.mxu0 %v2004_v2 }
  0xe6   : > { %1420 = vmatpush2.bf16.msra.mxu0 %v2002_v3 }
  0xe7   : > { %1421 = vmatprep.subr.bf16.mxu0 %v2007_v4 }
  0xea   : > { %1422 = vmatpush2.bf16.msra.mxu0 %v2005_v5 }
  0xeb   : > { %1423 = vmatprep.subr.bf16.mxu0 %v2010_v6 }
  0xee   : > { %1424 = vmatpush2.bf16.msra.mxu0 %v2008_v7 }
  0xef   : > { %1425 = vmatprep.subr.bf16.mxu0 %v2013_v8 }
  0xf2   : > { %1426 = vmatpush2.bf16.msra.mxu0 %v2011_v9 }
  0xf3   : > { %1427 = vmatprep.subr.bf16.mxu0 %v2016_v10 }
  0xf6   : > { %1428 = vmatpush2.bf16.msra.mxu0 %v2014_v11 }
  0xf9   : > { %1430 = vmatmul.mubr.bf16.vlgmr.msra.gmra.mxu0 %v2017_v12 }
 0x179   : > { %v1345_v13 = vpop.f32.mrf.mxu0 }
 0x17a   : > { %v1388_v14 = vpop.f32.mrf.mxu1 }
 0x17b   : > { %v1347_v15 = vpop.f32.mrf.mxu0  ;;  %v1389_v20 = vadd.f32 %v1388_v14, %v1345_v13 }
 0x17c   : > { %v1390_v16 = vpop.f32.mrf.mxu1 }
 0x17d   : > { %v1349_v17 = vpop.f32.mrf.mxu0  ;;  %v1391_v23 = vadd.f32 %v1390_v16, %v1347_v15 }
 0x17e   : > { %v1392_v18 = vpop.f32.mrf.mxu1 }
 0x17f   : > { %v1351_v19 = vpop.f32.mrf.mxu0  ;;  %v1393_v28 = vadd.f32 %v1392_v18, %v1349_v17 }
 0x180   : > { %v1394_v25 = vpop.f32.mrf.mxu1 }
 0x181   : > { %v1395_v33 = vadd.f32 %v1394_v25, %v1351_v19 }
 0x1b9   : > { %v1431_v22 = vpop.f32.mrf.mxu0 }
 0x1ba   : > { %v1432_v24 = vadd.f32 %v1431_v22, %v1389_v20 }
 0x1bb   : > { %v1433_v27 = vpop.f32.mrf.mxu0 }
 0x1bc   : > { %v1440_v29 = vadd.f32 %v1432_v24, %v695_v21  ;;  %v1434_v30 = vadd.f32 %v1433_v27, %v1391_v23 }
 0x1bd   : > { %v1435_v32 = vpop.f32.mrf.mxu0 }
 0x1be   : > { %1444 = vst [vmem:[#allocation2 + $0x10] sm:$0xff] %v1440_v29  ;;  %v1441_v34 = vadd.f32 %v1434_v30, %v696_v26  ;;  %v1436_v35 = vadd.f32 %v1435_v32, %v1393_v28 }
 0x1bf   : > { %v1437_v37 = vpop.f32.mrf.mxu0 }
 0x1c0   : > { %1445 = vst [vmem:[#allocation2] sm:$0xff] %v1441_v34  ;;  %v1442_v38 = vadd.f32 %v1436_v35, %v697_v31  ;;  %v1438_v39 = vadd.f32 %v1437_v37, %v1395_v33  ;;  %1451 = sbr.rel (%p1761_p5) target bundleno = 468 (0x1d4), region = 101 }
 0x1c2   : > { %1446 = vst [vmem:[#allocation2 + $0x18] sm:$0xff] %v1442_v38  ;;  %v1443_v40 = vadd.f32 %v1438_v39, %v698_v36 }
 0x1c4   : > { %1447 = vst [vmem:[#allocation2 + $0x8] sm:$0xff] %v1443_v40 }
 0x1c5   : > { %v1458_v41 = vlaneseq  ;;  %v1456_v43 = vld [vmem:[%s683_s5] sm:$0x3]  ;;  %v1452_v44 = vld [vmem:[#allocation2 + $0x10] sm:$0xff] }
 0x1c7   : > { %v1459_v42 = vshrl.u32 %v1458_v41, 7  ;;  %v1453_v47 = vld [vmem:[#allocation2] sm:$0xff] }
 0x1c9   : > { %v1460_v45 = vsub.s32 0, %v1459_v42  ;;  %v1464_v46 = vsub.s32 1, %v1459_v42  ;;  %v1454_v48 = vld [vmem:[#allocation2 + $0x18] sm:$0xff] }
 0x1cb   : > { %v1455_v49 = vld [vmem:[#allocation2 + $0x8] sm:$0xff]  ;;  %v1461_v50 = vrot.slane %v1456_v43, %v1460_v45  ;;  %v1465_v51 = vrot.slane %v1456_v43, %v1464_v46 }
 0x1cd   : > { %v1468_v52 = vadd.f32 %v1461_v50, %v1452_v44  ;;  %v1469_v53 = vadd.f32 %v1465_v51, %v1453_v47  ;;  %v1470_v54 = vadd.f32 %v1461_v50, %v1454_v48  ;;  %v1471_v55 = vadd.f32 %v1465_v51, %v1455_v49 }
 0x1cf   : > { %v1472_v56 = vmax.f32 %v1468_v52, 0.0  ;;  %v1473_v57 = vmax.f32 %v1469_v53, 0.0  ;;  %v1474_v58 = vmax.f32 %v1470_v54, 0.0  ;;  %v1475_v59 = vmax.f32 %v1471_v55, 0.0 }
 0x1d1   : > { %v1771_v60 = vpack.c.bf16 %v1473_v57, %v1472_v56  ;;  %v1772_v61 = vpack.c.bf16 %v1475_v59, %v1474_v58 }
 0x1d3   : > { %1488 = vst [vmem:[%s2455_s25] sm:$0xff] %v1771_v60  ;;  %1489 = vst [vmem:[%s2455_s25 + $0x8] sm:$0xff] %v1772_v61 }
 0x1d4 PF: > { %1496 = sbr.rel (!%p2223_p12) target bundleno = 476 (0x1dc), region = 105  ;;  %s1773_s14 = sshll.u32 (%p2223_p12), %s2094_s19, 3 }
 0x1d5   : > { %s1502_s0 = scalar_lea.vmem (%p2223_p12), %s2612_s3, %s1773_s14 }
 0x1da   : > { %v1533_v62 = vld [vmem:[%s2455_s25] sm:$0xff]  ;;  %v1535_v63 = vld [vmem:[%s2455_s25 + $0x8] sm:$0xff] }
 0x1db   : > { %1534 = vst [vmem:[%s1502_s0] sm:$0xff] %v1533_v62  ;;  %1536 = vst [vmem:[%s1502_s0 + $0x10] sm:$0xff] %v1535_v63 }
 0x1dc PF: > { %s13_s22 = sadd.s32 1, %s2106_s22   ;;  %s2622_s25 = sld [smem:[#allocation6_spill]] }
 0x1dd   : > { %p10_p6 = scmp.ge.s32.totalorder %s13_s22, 14   ;;  %s2623_s12 = smov %s2070_s13 }
 0x1de   : > { %s2624_s13 = smov %s2221_s9  ;;  %s2625_s14 = smov %s2078_s15 }
 0x1df   : > { %s2626_s15 = smov %s2218_s8  ;;  %s2627_s16 = smov %s2086_s17 }
 0x1e0   : > { %s2628_s17 = smov %s2204_s30  ;;  %s2629_s18 = smov %s2098_s20 }
 0x1e1   : > { %s2630_s19 = smov %s2102_s21  ;;  %s2631_s20 = smov %s2634_s24 }
 0x1e2   : > { %s2632_s21 = smov %s2622_s25  ;;  %12 = sbr.rel (!%p10_p6) target bundleno = 9 (0x9), region = 185 }

</bundles_post_ra>
